<compile_context>
chip_gen: v7x
topology: tpu7x:2x2x1
jax: 0.10.0
libtpu: 0.0.40
codegen_flags: <defaults>
</compile_context>

<pallas_src>
import functools

import numpy as np
import jax
import jax.numpy as jnp
from jax import lax
from jax.experimental import pallas as pl
from jax.experimental.pallas import tpu as pltpu


# SSIM constants for data range [0, 1].  The torch reference scales images to
# [0, 255] and uses (0.01*255)^2 / (0.03*255)^2; the 255^2 factors cancel
# exactly, so working in [0, 1] is algebraically identical and cheaper.
_K1 = 0.01 ** 2
_K2 = 0.03 ** 2

# Constants for the [0, 255]-range XLA reference (mirrors the torch code).
_C1_255 = (0.01 * 255.0) ** 2
_C2_255 = (0.03 * 255.0) ** 2


def _gaussian_kernel_1d(window_size, sigma):
    """Reproduces cv2.getGaussianKernel(window_size, sigma) (f64, sums to 1)."""
    if sigma <= 0:
        sigma = 0.3 * ((window_size - 1) * 0.5 - 1) + 0.8
    coords = np.arange(window_size, dtype=np.float64) - (window_size - 1) / 2.0
    g = np.exp(-(coords ** 2) / (2.0 * sigma ** 2))
    return g / g.sum()


def _rgb2y_nchw(x):
    """Y channel of BT.601 YCbCr for NCHW RGB input in [0, 1] (for the ref).

    TODO(synk): rgb2ycbcr_torch source was not provided with the module;
    standard BT.601 coefficients (as in basicsr) are assumed.
    """
    r, g, b = x[:, 0:1], x[:, 1:2], x[:, 2:3]
    return (65.481 * r + 128.553 * g + 24.966 * b + 16.0) / 255.0


def _ssim_strip_kernel(raw_ref, dst_ref, out_ref, acc_ref, carry_ref, comb_ref,
                       *, g, strip_h, h_total, w_total, cb, ws, only_y,
                       inv_count):
    """One (batch, H-strip) step of the fused SSIM computation.

    raw_ref / dst_ref : (1, C, strip_h, W) VMEM input blocks.
    out_ref           : (1, 8, 128) lane-dense output tile for this batch elem.
    acc_ref           : (1, 1) f32 running SSIM-map sum for this batch elem.
    carry_ref         : (5, C_eff, ws-1, w_out) column-convolved tail rows of
                        the previous strip (one slot per moment x, y, xx, yy, xy).
    comb_ref          : (C_eff, strip_h + pad, w_out) staging buffer gluing the
                        carried halo onto the current strip for the row pass.
    """
    s = pl.program_id(1)
    S = strip_h
    w_out = w_total - 2 * cb - ws + 1
    pad = -(-(ws - 1) // 8) * 8          # carried rows rounded up to 8
    head = pad - (ws - 1)                # so the big colc store stays aligned

    @pl.when(s == 0)
    def _():
        acc_ref[...] = jnp.zeros_like(acc_ref)

    x = raw_ref[0].astype(jnp.float32)   # (C, S, W)
    y = dst_ref[0].astype(jnp.float32)
    if only_y:
        # BT.601 Y in [0, 1]; fused here so the wrapper never materializes a
        # Y image in HBM.
        def to_y(t):
            return (65.481 * t[0:1] + 128.553 * t[1:2] + 24.966 * t[2:3]
                    + 16.0) * (1.0 / 255.0)
        x = to_y(x)
        y = to_y(y)
    c_eff = x.shape[0]

    def col_pass(img):
        # VALID Gaussian conv along W (lane axis).  The crop border is folded
        # into the tap offsets so no cropped copy of the image is ever made.
        # TODO(synk): if the bundle dump shows these shifted slices
        # materializing VMEM copies, switch the taps to pltpu.roll + FMA.
        acc = g[0] * img[:, :, cb:cb + w_out]
        for q in range(1, ws):
            acc = acc + g[q] * img[:, :, cb + q:cb + q + w_out]
        return acc                                   # (C_eff, S, w_out)

    def gconv(img, slot):
        # Column pass on this strip, then a row pass over
        # [previous-strip carry ; this strip], so the inter-strip halo never
        # re-reads HBM.
        colc = col_pass(img)
        comb_ref[:, head:head + ws - 1, :] = carry_ref[slot, :, :, :]
        comb_ref[:, pad:pad + S, :] = colc
        carry_ref[slot, :, :, :] = colc[:, S - (ws - 1):S, :]
        out = g[0] * comb_ref[:, head:head + S, :]
        for p in range(1, ws):
            out = out + g[p] * comb_ref[:, head + p:head + p + S, :]
        return out                                   # (C_eff, S, w_out)

    mu_x = gconv(x, 0)
    mu_y = gconv(y, 1)
    mu_x2 = mu_x * mu_x
    mu_y2 = mu_y * mu_y
    mu_xy = mu_x * mu_y
    var_x = gconv(x * x, 2) - mu_x2                  # E[x^2] dies immediately
    var_y = gconv(y * y, 3) - mu_y2
    cov_xy = gconv(x * y, 4) - mu_xy                 # x and y die after this

    num = (2.0 * mu_xy + _K1) * (2.0 * cov_xy + _K2)
    den = (mu_x2 + mu_y2 + _K1) * (var_x + var_y + _K2)
    r = pl.reciprocal(den, approx=True)              # EUP slot
    r = r * (2.0 - den * r)                          # one Newton step (f32 acc.)
    ssim_map = num * r                               # (C_eff, S, w_out)

    # Channel reduction (tiny static loop), then mask off rows that fall
    # outside the cropped output range (top crop / first-strip warm-up rows
    # and the ragged bottom of the last strip), then sum into the accumulator.
    plane = ssim_map[0]
    for ci in range(1, c_eff):
        plane = plane + ssim_map[ci]
    # Output row r of this strip corresponds to global row  s*S - (ws-1) + r.
    lo = cb + (ws - 1) - s * S
    hi = h_total - cb - s * S
    rows = lax.broadcasted_iota(jnp.int32, (S, w_out), 0)
    plane = jnp.where((rows >= lo) & (rows < hi), plane, 0.0)

    total = jnp.sum(jnp.sum(plane, axis=1, keepdims=True), axis=0, keepdims=True)
    acc_ref[...] = acc_ref[...] + total

    # Lane-dense (8, 128) store; the wrapper slices out [:, 0, 0].
    out_ref[0] = jnp.broadcast_to(acc_ref[...] * inv_count, (8, 128)).astype(
        out_ref.dtype)


def _pick_strip_h(h, w, c, c_eff, in_itemsize, window_size,
                  target_rows=128, vmem_budget_bytes=40 << 20):
    """Largest strip height (multiple of 8) keeping the working set within a
    conservative VMEM budget (sized so it also fits v7x's 64 MiB parts)."""
    min_rows = max(window_size - 1, 8)
    # ~4 pipelined input buffers + ~14 live strip-sized f32 intermediates.
    bytes_per_row = (4 * c * in_itemsize + 14 * c_eff * 4) * w
    s = int(vmem_budget_bytes // max(bytes_per_row, 1))
    s = max(min(s, target_rows), min_rows)
    s = ((s + 7) // 8) * 8
    return h if s >= h else s


def ssim_pallas(raw, dst, crop_border=0, only_test_y_channel=False,
                window_size=11, gaussian_sigma=1.5, strip_h=None):
    """Pallas equivalent of SSIM.forward for NCHW inputs in [0, 1]."""
    assert raw.shape == dst.shape, (
        f"Supplied images have different sizes {raw.shape} and {dst.shape}")
    assert raw.ndim == 4, f"Only support 4D tensor input, but got {raw.shape}"

    b, c, h, w = raw.shape
    cb = int(crop_border)
    ws = int(window_size)
    h_out = h - 2 * cb - ws + 1
    w_out = w - 2 * cb - ws + 1
    assert h_out > 0 and w_out > 0, "Image smaller than crop + Gaussian window."
    if only_test_y_channel:
        assert c == 3, "only_test_y_channel=True requires RGB (C=3) input."
    c_eff = 1 if only_test_y_channel else c
    in_itemsize = raw.dtype.itemsize

    S = (int(strip_h) if strip_h is not None
         else _pick_strip_h(h, w, c, c_eff, in_itemsize, ws))
    assert S == h or (S % 8 == 0 and S >= ws - 1), (
        "strip_h must equal H or be a multiple of 8 that is >= window_size-1")
    n_strips = -(-h // S)
    pad = -(-(ws - 1) // 8) * 8

    g = tuple(float(v) for v in _gaussian_kernel_1d(ws, gaussian_sigma))
    inv_count = 1.0 / float(c_eff * h_out * w_out)

    kernel = functools.partial(
        _ssim_strip_kernel, g=g, strip_h=S, h_total=h, w_total=w, cb=cb,
        ws=ws, only_y=only_test_y_channel, inv_count=inv_count)

    # Explicit scoped-VMEM limit (defaults: 16 MiB v5e / 32 MiB v6e,v7x are
    # smaller than the strips this kernel wants at production image sizes) and
    # a cost estimate so XLA can schedule neighbouring ops around the call.
    bytes_per_row = (4 * c * in_itemsize + 14 * c_eff * 4) * w
    vmem_limit = int(min(max(int(bytes_per_row * S * 1.3) + (2 << 20),
                             16 << 20), 56 << 20))
    flops_per_px = 5 * 4 * ws + 40            # 5 separable convs + SSIM algebra
    cost = pl.CostEstimate(
        flops=int(b * c_eff * h_out * w_out * flops_per_px),
        transcendentals=int(b * c_eff * h_out * w_out),
        bytes_accessed=int(2 * b * c * h * w * in_itemsize + b * 4))

    out = pl.pallas_call(
        kernel,
        out_shape=jax.ShapeDtypeStruct((b, 8, 128), jnp.float32),
        grid_spec=pltpu.PrefetchScalarGridSpec(
            num_scalar_prefetch=0,
            grid=(b, n_strips),
            in_specs=[
                pl.BlockSpec((1, c, S, w), lambda i, s: (i, 0, s, 0)),
                pl.BlockSpec((1, c, S, w), lambda i, s: (i, 0, s, 0)),
            ],
            out_specs=pl.BlockSpec((1, 8, 128), lambda i, s: (i, 0, 0)),
            scratch_shapes=[
                pltpu.VMEM((1, 1), jnp.float32),                      # running sum
                pltpu.VMEM((5, c_eff, ws - 1, w_out), jnp.float32),   # halo carry
                pltpu.VMEM((c_eff, S + pad, w_out), jnp.float32),     # row-pass staging
            ]),
        compiler_params=pltpu.CompilerParams(
            dimension_semantics=("parallel", "arbitrary"),
            vmem_limit_bytes=vmem_limit),
        cost_estimate=cost,
    )(raw, dst)

    return out[:, 0, 0]


def _ssim_reference(raw, dst, crop_border=0, only_test_y_channel=False,
                    window_size=11, gaussian_sigma=1.5):
    """Pure-JAX (XLA) reference mirroring the torch implementation (f32)."""
    if crop_border > 0:
        raw = raw[:, :, crop_border:-crop_border, crop_border:-crop_border]
        dst = dst[:, :, crop_border:-crop_border, crop_border:-crop_border]
    if only_test_y_channel:
        raw = _rgb2y_nchw(raw)
        dst = _rgb2y_nchw(dst)
    _, c, _, _ = raw.shape

    g1 = _gaussian_kernel_1d(window_size, gaussian_sigma)
    win = np.outer(g1, g1)
    k = jnp.asarray(win, jnp.float32).reshape(1, 1, window_size, window_size)
    k = jnp.tile(k, (c, 1, 1, 1))

    def conv(t):
        return lax.conv_general_dilated(
            t, k, window_strides=(1, 1), padding="VALID",
            dimension_numbers=("NCHW", "OIHW", "NCHW"),
            feature_group_count=c)

    x = raw.astype(jnp.float32) * 255.0
    y = dst.astype(jnp.float32) * 255.0
    mu_x, mu_y = conv(x), conv(y)
    mu_x2, mu_y2, mu_xy = mu_x ** 2, mu_y ** 2, mu_x * mu_y
    var_x = conv(x * x) - mu_x2
    var_y = conv(y * y) - mu_y2
    cov = conv(x * y) - mu_xy
    num = (2.0 * mu_xy + _C1_255) * (2.0 * cov + _C2_255)
    den = (mu_x2 + mu_y2 + _C1_255) * (var_x + var_y + _C2_255)
    return jnp.mean(num / den, axis=(1, 2, 3))


if __name__ == "__main__":
    key = jax.random.PRNGKey(0)
    k1, k2, k3, k4 = jax.random.split(key, 4)

    ok = True

    def _close(a, b):
        return a.shape == b.shape and np.allclose(a, b, atol=5e-4, rtol=1e-3)

    # --- small images, single strip ---------------------------------------
    raw = jax.random.uniform(k1, (2, 4, 16, 16), dtype=jnp.float32)
    dst = jnp.clip(raw + 0.05 * jax.random.normal(k2, raw.shape, jnp.float32),
                   0.0, 1.0)
    for cfg in (dict(crop_border=0, only_test_y_channel=False),
                dict(crop_border=2, only_test_y_channel=False)):
        out = np.asarray(jax.block_until_ready(ssim_pallas(raw, dst, **cfg)))
        ref = np.asarray(_ssim_reference(raw, dst, **cfg))
        if not _close(out, ref):
            ok = False
            print(f"MISMATCH cfg={cfg}: pallas={out} ref={ref}")

    # --- taller images: multi-strip path (halo carry + ragged last strip) --
    raw3 = jax.random.uniform(k3, (2, 3, 40, 20), dtype=jnp.float32)
    dst3 = jnp.clip(raw3 + 0.05 * jax.random.normal(k4, raw3.shape, jnp.float32),
                    0.0, 1.0)
    for cfg in (dict(crop_border=0, only_test_y_channel=False),
                dict(crop_border=3, only_test_y_channel=False),
                dict(crop_border=0, only_test_y_channel=True),
                dict(crop_border=2, only_test_y_channel=True)):
        out = np.asarray(jax.block_until_ready(
            ssim_pallas(raw3, dst3, strip_h=16, **cfg)))
        ref = np.asarray(_ssim_reference(raw3, dst3, **cfg))
        if not _close(out, ref):
            ok = False
            print(f"MISMATCH multi-strip cfg={cfg}: pallas={out} ref={ref}")

    # --- identity sanity check: SSIM(x, x) == 1 ----------------------------
    out_id = np.asarray(jax.block_until_ready(
        ssim_pallas(raw, raw, crop_border=0, only_test_y_channel=False)))
    if not np.allclose(out_id, 1.0, atol=1e-4):
        ok = False
        print(f"MISMATCH identity: {out_id}")

    if ok:
        print("KERNEL_OK")
</pallas_src>

<mosaic_0001>
module attributes {stable_mosaic.version = 11 : i64} {
  func.func @_ssim_strip_kernel(%arg0: i32, %arg1: i32, %arg2: memref<1x4x16x16xf32, #tpu.memory_space<vmem>>, %arg3: memref<1x4x16x16xf32, #tpu.memory_space<vmem>>, %arg4: memref<1x8x128xf32, #tpu.memory_space<vmem>>, %arg5: memref<1x1xf32, #tpu.memory_space<vmem>>, %arg6: memref<5x4x10x6xf32, #tpu.memory_space<vmem>>, %arg7: memref<4x32x6xf32, #tpu.memory_space<vmem>>) attributes {dimension_semantics = [#tpu.dimension_semantics<parallel>, #tpu.dimension_semantics<arbitrary>], iteration_bounds = array<i64: 2, 1>, scalar_prefetch = 0 : i64, scratch_operands = 3 : i64, tpu.core_type = #tpu.core_type<tc>, window_params = [{transform_indices = @transform_0, window_bounds = array<i64: 1, 4, 16, 16>}, {transform_indices = @transform_1, window_bounds = array<i64: 1, 4, 16, 16>}, {transform_indices = @transform_2, window_bounds = array<i64: 1, 8, 128>}]} {
    %c0_i32 = arith.constant 0 : i32
    %0 = arith.cmpi eq, %arg1, %c0_i32 : i32
    %1 = arith.extui %0 : i1 to i32
    %c0_i32_0 = arith.constant 0 : i32
    %2 = arith.cmpi ne, %1, %c0_i32_0 : i32
    scf.if %2 {
      %cst_359 = arith.constant 0.000000e+00 : f32
      %546 = vector.broadcast %cst_359 : f32 to vector<1x1xf32>
      %c0_360 = arith.constant 0 : index
      %c0_361 = arith.constant 0 : index
      %547 = vector.load %arg5[%c0_360, %c0_361] : memref<1x1xf32, #tpu.memory_space<vmem>>, vector<1x1xf32>
      tpu.vector_store %arg5[%c0_360, %c0_361], %546 {strides = array<i32>} : memref<1x1xf32, #tpu.memory_space<vmem>>, vector<1x1xf32>,
    } else {
    }
    %c0 = arith.constant 0 : index
    %c0_1 = arith.constant 0 : index
    %c0_2 = arith.constant 0 : index
    %c0_3 = arith.constant 0 : index
    %3 = vector.load %arg2[%c0, %c0_1, %c0_2, %c0_3] : memref<1x4x16x16xf32, #tpu.memory_space<vmem>>, vector<1x4x16x16xf32>
    %4 = vector.shape_cast %3 : vector<1x4x16x16xf32> to vector<4x16x16xf32>
    %c0_4 = arith.constant 0 : index
    %c0_5 = arith.constant 0 : index
    %c0_6 = arith.constant 0 : index
    %c0_7 = arith.constant 0 : index
    %5 = vector.load %arg3[%c0_4, %c0_5, %c0_6, %c0_7] : memref<1x4x16x16xf32, #tpu.memory_space<vmem>>, vector<1x4x16x16xf32>
    %6 = vector.shape_cast %5 : vector<1x4x16x16xf32> to vector<4x16x16xf32>
    %7 = vector.extract_strided_slice %4 {offsets = [0, 0, 0], sizes = [4, 16, 6], strides = [1, 1, 1]} : vector<4x16x16xf32> to vector<4x16x6xf32>
    %cst = arith.constant 0.00102838012 : f32
    %8 = vector.broadcast %cst : f32 to vector<4x16x6xf32>
    %9 = arith.mulf %8, %7 : vector<4x16x6xf32>
    %10 = vector.extract_strided_slice %4 {offsets = [0, 0, 1], sizes = [4, 16, 6], strides = [1, 1, 1]} : vector<4x16x16xf32> to vector<4x16x6xf32>
    %cst_8 = arith.constant 0.00759875821 : f32
    %11 = vector.broadcast %cst_8 : f32 to vector<4x16x6xf32>
    %12 = arith.mulf %11, %10 : vector<4x16x6xf32>
    %13 = arith.addf %9, %12 : vector<4x16x6xf32>
    %14 = vector.extract_strided_slice %4 {offsets = [0, 0, 2], sizes = [4, 16, 6], strides = [1, 1, 1]} : vector<4x16x16xf32> to vector<4x16x6xf32>
    %cst_9 = arith.constant 0.0360007733 : f32
    %15 = vector.broadcast %cst_9 : f32 to vector<4x16x6xf32>
    %16 = arith.mulf %15, %14 : vector<4x16x6xf32>
    %17 = arith.addf %13, %16 : vector<4x16x6xf32>
    %18 = vector.extract_strided_slice %4 {offsets = [0, 0, 3], sizes = [4, 16, 6], strides = [1, 1, 1]} : vector<4x16x16xf32> to vector<4x16x6xf32>
    %cst_10 = arith.constant 0.109360687 : f32
    %19 = vector.broadcast %cst_10 : f32 to vector<4x16x6xf32>
    %20 = arith.mulf %19, %18 : vector<4x16x6xf32>
    %21 = arith.addf %17, %20 : vector<4x16x6xf32>
    %22 = vector.extract_strided_slice %4 {offsets = [0, 0, 4], sizes = [4, 16, 6], strides = [1, 1, 1]} : vector<4x16x16xf32> to vector<4x16x6xf32>
    %cst_11 = arith.constant 0.213005543 : f32
    %23 = vector.broadcast %cst_11 : f32 to vector<4x16x6xf32>
    %24 = arith.mulf %23, %22 : vector<4x16x6xf32>
    %25 = arith.addf %21, %24 : vector<4x16x6xf32>
    %26 = vector.extract_strided_slice %4 {offsets = [0, 0, 5], sizes = [4, 16, 6], strides = [1, 1, 1]} : vector<4x16x16xf32> to vector<4x16x6xf32>
    %cst_12 = arith.constant 0.266011715 : f32
    %27 = vector.broadcast %cst_12 : f32 to vector<4x16x6xf32>
    %28 = arith.mulf %27, %26 : vector<4x16x6xf32>
    %29 = arith.addf %25, %28 : vector<4x16x6xf32>
    %30 = vector.extract_strided_slice %4 {offsets = [0, 0, 6], sizes = [4, 16, 6], strides = [1, 1, 1]} : vector<4x16x16xf32> to vector<4x16x6xf32>
    %cst_13 = arith.constant 0.213005543 : f32
    %31 = vector.broadcast %cst_13 : f32 to vector<4x16x6xf32>
    %32 = arith.mulf %31, %30 : vector<4x16x6xf32>
    %33 = arith.addf %29, %32 : vector<4x16x6xf32>
    %34 = vector.extract_strided_slice %4 {offsets = [0, 0, 7], sizes = [4, 16, 6], strides = [1, 1, 1]} : vector<4x16x16xf32> to vector<4x16x6xf32>
    %cst_14 = arith.constant 0.109360687 : f32
    %35 = vector.broadcast %cst_14 : f32 to vector<4x16x6xf32>
    %36 = arith.mulf %35, %34 : vector<4x16x6xf32>
    %37 = arith.addf %33, %36 : vector<4x16x6xf32>
    %38 = vector.extract_strided_slice %4 {offsets = [0, 0, 8], sizes = [4, 16, 6], strides = [1, 1, 1]} : vector<4x16x16xf32> to vector<4x16x6xf32>
    %cst_15 = arith.constant 0.0360007733 : f32
    %39 = vector.broadcast %cst_15 : f32 to vector<4x16x6xf32>
    %40 = arith.mulf %39, %38 : vector<4x16x6xf32>
    %41 = arith.addf %37, %40 : vector<4x16x6xf32>
    %42 = vector.extract_strided_slice %4 {offsets = [0, 0, 9], sizes = [4, 16, 6], strides = [1, 1, 1]} : vector<4x16x16xf32> to vector<4x16x6xf32>
    %cst_16 = arith.constant 0.00759875821 : f32
    %43 = vector.broadcast %cst_16 : f32 to vector<4x16x6xf32>
    %44 = arith.mulf %43, %42 : vector<4x16x6xf32>
    %45 = arith.addf %41, %44 : vector<4x16x6xf32>
    %46 = vector.extract_strided_slice %4 {offsets = [0, 0, 10], sizes = [4, 16, 6], strides = [1, 1, 1]} : vector<4x16x16xf32> to vector<4x16x6xf32>
    %cst_17 = arith.constant 0.00102838012 : f32
    %47 = vector.broadcast %cst_17 : f32 to vector<4x16x6xf32>
    %48 = arith.mulf %47, %46 : vector<4x16x6xf32>
    %49 = arith.addf %45, %48 : vector<4x16x6xf32>
    %c0_18 = arith.constant 0 : index
    %c0_19 = arith.constant 0 : index
    %c0_20 = arith.constant 0 : index
    %c0_21 = arith.constant 0 : index
    %50 = vector.load %arg6[%c0_18, %c0_19, %c0_20, %c0_21] : memref<5x4x10x6xf32, #tpu.memory_space<vmem>>, vector<1x4x10x6xf32>
    %51 = vector.shape_cast %50 : vector<1x4x10x6xf32> to vector<4x10x6xf32>
    %c0_22 = arith.constant 0 : index
    %c6 = arith.constant 6 : index
    %c0_23 = arith.constant 0 : index
    %52 = vector.load %arg7[%c0_22, %c6, %c0_23] : memref<4x32x6xf32, #tpu.memory_space<vmem>>, vector<4x10x6xf32>
    tpu.vector_store %arg7[%c0_22, %c6, %c0_23], %51 {strides = array<i32>} : memref<4x32x6xf32, #tpu.memory_space<vmem>>, vector<4x10x6xf32>,
    %c0_24 = arith.constant 0 : index
    %c16 = arith.constant 16 : index
    %c0_25 = arith.constant 0 : index
    %53 = vector.load %arg7[%c0_24, %c16, %c0_25] : memref<4x32x6xf32, #tpu.memory_space<vmem>>, vector<4x16x6xf32>
    tpu.vector_store %arg7[%c0_24, %c16, %c0_25], %49 {strides = array<i32>} : memref<4x32x6xf32, #tpu.memory_space<vmem>>, vector<4x16x6xf32>,
    %54 = vector.extract_strided_slice %49 {offsets = [0, 6, 0], sizes = [4, 10, 6], strides = [1, 1, 1]} : vector<4x16x6xf32> to vector<4x10x6xf32>
    %c0_26 = arith.constant 0 : index
    %c0_27 = arith.constant 0 : index
    %c0_28 = arith.constant 0 : index
    %c0_29 = arith.constant 0 : index
    %55 = vector.load %arg6[%c0_26, %c0_27, %c0_28, %c0_29] : memref<5x4x10x6xf32, #tpu.memory_space<vmem>>, vector<1x4x10x6xf32>
    %56 = vector.shape_cast %55 : vector<1x4x10x6xf32> to vector<4x10x6xf32>
    %57 = vector.shape_cast %54 : vector<4x10x6xf32> to vector<1x4x10x6xf32>
    tpu.vector_store %arg6[%c0_26, %c0_27, %c0_28, %c0_29], %57 {strides = array<i32>} : memref<5x4x10x6xf32, #tpu.memory_space<vmem>>, vector<1x4x10x6xf32>,
    %c0_30 = arith.constant 0 : index
    %c6_31 = arith.constant 6 : index
    %c0_32 = arith.constant 0 : index
    %58 = vector.load %arg7[%c0_30, %c6_31, %c0_32] : memref<4x32x6xf32, #tpu.memory_space<vmem>>, vector<4x16x6xf32>
    %cst_33 = arith.constant 0.00102838012 : f32
    %59 = vector.broadcast %cst_33 : f32 to vector<4x16x6xf32>
    %60 = arith.mulf %59, %58 : vector<4x16x6xf32>
    %c0_34 = arith.constant 0 : index
    %c7 = arith.constant 7 : index
    %c0_35 = arith.constant 0 : index
    %61 = vector.load %arg7[%c0_34, %c7, %c0_35] : memref<4x32x6xf32, #tpu.memory_space<vmem>>, vector<4x16x6xf32>
    %cst_36 = arith.constant 0.00759875821 : f32
    %62 = vector.broadcast %cst_36 : f32 to vector<4x16x6xf32>
    %63 = arith.mulf %62, %61 : vector<4x16x6xf32>
    %64 = arith.addf %60, %63 : vector<4x16x6xf32>
    %c0_37 = arith.constant 0 : index
    %c8 = arith.constant 8 : index
    %c0_38 = arith.constant 0 : index
    %65 = vector.load %arg7[%c0_37, %c8, %c0_38] : memref<4x32x6xf32, #tpu.memory_space<vmem>>, vector<4x16x6xf32>
    %cst_39 = arith.constant 0.0360007733 : f32
    %66 = vector.broadcast %cst_39 : f32 to vector<4x16x6xf32>
    %67 = arith.mulf %66, %65 : vector<4x16x6xf32>
    %68 = arith.addf %64, %67 : vector<4x16x6xf32>
    %c0_40 = arith.constant 0 : index
    %c9 = arith.constant 9 : index
    %c0_41 = arith.constant 0 : index
    %69 = vector.load %arg7[%c0_40, %c9, %c0_41] : memref<4x32x6xf32, #tpu.memory_space<vmem>>, vector<4x16x6xf32>
    %cst_42 = arith.constant 0.109360687 : f32
    %70 = vector.broadcast %cst_42 : f32 to vector<4x16x6xf32>
    %71 = arith.mulf %70, %69 : vector<4x16x6xf32>
    %72 = arith.addf %68, %71 : vector<4x16x6xf32>
    %c0_43 = arith.constant 0 : index
    %c10 = arith.constant 10 : index
    %c0_44 = arith.constant 0 : index
    %73 = vector.load %arg7[%c0_43, %c10, %c0_44] : memref<4x32x6xf32, #tpu.memory_space<vmem>>, vector<4x16x6xf32>
    %cst_45 = arith.constant 0.213005543 : f32
    %74 = vector.broadcast %cst_45 : f32 to vector<4x16x6xf32>
    %75 = arith.mulf %74, %73 : vector<4x16x6xf32>
    %76 = arith.addf %72, %75 : vector<4x16x6xf32>
    %c0_46 = arith.constant 0 : index
    %c11 = arith.constant 11 : index
    %c0_47 = arith.constant 0 : index
    %77 = vector.load %arg7[%c0_46, %c11, %c0_47] : memref<4x32x6xf32, #tpu.memory_space<vmem>>, vector<4x16x6xf32>
    %cst_48 = arith.constant 0.266011715 : f32
    %78 = vector.broadcast %cst_48 : f32 to vector<4x16x6xf32>
    %79 = arith.mulf %78, %77 : vector<4x16x6xf32>
    %80 = arith.addf %76, %79 : vector<4x16x6xf32>
    %c0_49 = arith.constant 0 : index
    %c12 = arith.constant 12 : index
    %c0_50 = arith.constant 0 : index
    %81 = vector.load %arg7[%c0_49, %c12, %c0_50] : memref<4x32x6xf32, #tpu.memory_space<vmem>>, vector<4x16x6xf32>
    %cst_51 = arith.constant 0.213005543 : f32
    %82 = vector.broadcast %cst_51 : f32 to vector<4x16x6xf32>
    %83 = arith.mulf %82, %81 : vector<4x16x6xf32>
    %84 = arith.addf %80, %83 : vector<4x16x6xf32>
    %c0_52 = arith.constant 0 : index
    %c13 = arith.constant 13 : index
    %c0_53 = arith.constant 0 : index
    %85 = vector.load %arg7[%c0_52, %c13, %c0_53] : memref<4x32x6xf32, #tpu.memory_space<vmem>>, vector<4x16x6xf32>
    %cst_54 = arith.constant 0.109360687 : f32
    %86 = vector.broadcast %cst_54 : f32 to vector<4x16x6xf32>
    %87 = arith.mulf %86, %85 : vector<4x16x6xf32>
    %88 = arith.addf %84, %87 : vector<4x16x6xf32>
    %c0_55 = arith.constant 0 : index
    %c14 = arith.constant 14 : index
    %c0_56 = arith.constant 0 : index
    %89 = vector.load %arg7[%c0_55, %c14, %c0_56] : memref<4x32x6xf32, #tpu.memory_space<vmem>>, vector<4x16x6xf32>
    %cst_57 = arith.constant 0.0360007733 : f32
    %90 = vector.broadcast %cst_57 : f32 to vector<4x16x6xf32>
    %91 = arith.mulf %90, %89 : vector<4x16x6xf32>
    %92 = arith.addf %88, %91 : vector<4x16x6xf32>
    %c0_58 = arith.constant 0 : index
    %c15 = arith.constant 15 : index
    %c0_59 = arith.constant 0 : index
    %93 = vector.load %arg7[%c0_58, %c15, %c0_59] : memref<4x32x6xf32, #tpu.memory_space<vmem>>, vector<4x16x6xf32>
    %cst_60 = arith.constant 0.00759875821 : f32
    %94 = vector.broadcast %cst_60 : f32 to vector<4x16x6xf32>
    %95 = arith.mulf %94, %93 : vector<4x16x6xf32>
    %96 = arith.addf %92, %95 : vector<4x16x6xf32>
    %c0_61 = arith.constant 0 : index
    %c16_62 = arith.constant 16 : index
    %c0_63 = arith.constant 0 : index
    %97 = vector.load %arg7[%c0_61, %c16_62, %c0_63] : memref<4x32x6xf32, #tpu.memory_space<vmem>>, vector<4x16x6xf32>
    %cst_64 = arith.constant 0.00102838012 : f32
    %98 = vector.broadcast %cst_64 : f32 to vector<4x16x6xf32>
    %99 = arith.mulf %98, %97 : vector<4x16x6xf32>
    %100 = arith.addf %96, %99 : vector<4x16x6xf32>
    %101 = vector.extract_strided_slice %6 {offsets = [0, 0, 0], sizes = [4, 16, 6], strides = [1, 1, 1]} : vector<4x16x16xf32> to vector<4x16x6xf32>
    %cst_65 = arith.constant 0.00102838012 : f32
    %102 = vector.broadcast %cst_65 : f32 to vector<4x16x6xf32>
    %103 = arith.mulf %102, %101 : vector<4x16x6xf32>
    %104 = vector.extract_strided_slice %6 {offsets = [0, 0, 1], sizes = [4, 16, 6], strides = [1, 1, 1]} : vector<4x16x16xf32> to vector<4x16x6xf32>
    %cst_66 = arith.constant 0.00759875821 : f32
    %105 = vector.broadcast %cst_66 : f32 to vector<4x16x6xf32>
    %106 = arith.mulf %105, %104 : vector<4x16x6xf32>
    %107 = arith.addf %103, %106 : vector<4x16x6xf32>
    %108 = vector.extract_strided_slice %6 {offsets = [0, 0, 2], sizes = [4, 16, 6], strides = [1, 1, 1]} : vector<4x16x16xf32> to vector<4x16x6xf32>
    %cst_67 = arith.constant 0.0360007733 : f32
    %109 = vector.broadcast %cst_67 : f32 to vector<4x16x6xf32>
    %110 = arith.mulf %109, %108 : vector<4x16x6xf32>
    %111 = arith.addf %107, %110 : vector<4x16x6xf32>
    %112 = vector.extract_strided_slice %6 {offsets = [0, 0, 3], sizes = [4, 16, 6], strides = [1, 1, 1]} : vector<4x16x16xf32> to vector<4x16x6xf32>
    %cst_68 = arith.constant 0.109360687 : f32
    %113 = vector.broadcast %cst_68 : f32 to vector<4x16x6xf32>
    %114 = arith.mulf %113, %112 : vector<4x16x6xf32>
    %115 = arith.addf %111, %114 : vector<4x16x6xf32>
    %116 = vector.extract_strided_slice %6 {offsets = [0, 0, 4], sizes = [4, 16, 6], strides = [1, 1, 1]} : vector<4x16x16xf32> to vector<4x16x6xf32>
    %cst_69 = arith.constant 0.213005543 : f32
    %117 = vector.broadcast %cst_69 : f32 to vector<4x16x6xf32>
    %118 = arith.mulf %117, %116 : vector<4x16x6xf32>
    %119 = arith.addf %115, %118 : vector<4x16x6xf32>
    %120 = vector.extract_strided_slice %6 {offsets = [0, 0, 5], sizes = [4, 16, 6], strides = [1, 1, 1]} : vector<4x16x16xf32> to vector<4x16x6xf32>
    %cst_70 = arith.constant 0.266011715 : f32
    %121 = vector.broadcast %cst_70 : f32 to vector<4x16x6xf32>
    %122 = arith.mulf %121, %120 : vector<4x16x6xf32>
    %123 = arith.addf %119, %122 : vector<4x16x6xf32>
    %124 = vector.extract_strided_slice %6 {offsets = [0, 0, 6], sizes = [4, 16, 6], strides = [1, 1, 1]} : vector<4x16x16xf32> to vector<4x16x6xf32>
    %cst_71 = arith.constant 0.213005543 : f32
    %125 = vector.broadcast %cst_71 : f32 to vector<4x16x6xf32>
    %126 = arith.mulf %125, %124 : vector<4x16x6xf32>
    %127 = arith.addf %123, %126 : vector<4x16x6xf32>
    %128 = vector.extract_strided_slice %6 {offsets = [0, 0, 7], sizes = [4, 16, 6], strides = [1, 1, 1]} : vector<4x16x16xf32> to vector<4x16x6xf32>
    %cst_72 = arith.constant 0.109360687 : f32
    %129 = vector.broadcast %cst_72 : f32 to vector<4x16x6xf32>
    %130 = arith.mulf %129, %128 : vector<4x16x6xf32>
    %131 = arith.addf %127, %130 : vector<4x16x6xf32>
    %132 = vector.extract_strided_slice %6 {offsets = [0, 0, 8], sizes = [4, 16, 6], strides = [1, 1, 1]} : vector<4x16x16xf32> to vector<4x16x6xf32>
    %cst_73 = arith.constant 0.0360007733 : f32
    %133 = vector.broadcast %cst_73 : f32 to vector<4x16x6xf32>
    %134 = arith.mulf %133, %132 : vector<4x16x6xf32>
    %135 = arith.addf %131, %134 : vector<4x16x6xf32>
    %136 = vector.extract_strided_slice %6 {offsets = [0, 0, 9], sizes = [4, 16, 6], strides = [1, 1, 1]} : vector<4x16x16xf32> to vector<4x16x6xf32>
    %cst_74 = arith.constant 0.00759875821 : f32
    %137 = vector.broadcast %cst_74 : f32 to vector<4x16x6xf32>
    %138 = arith.mulf %137, %136 : vector<4x16x6xf32>
    %139 = arith.addf %135, %138 : vector<4x16x6xf32>
    %140 = vector.extract_strided_slice %6 {offsets = [0, 0, 10], sizes = [4, 16, 6], strides = [1, 1, 1]} : vector<4x16x16xf32> to vector<4x16x6xf32>
    %cst_75 = arith.constant 0.00102838012 : f32
    %141 = vector.broadcast %cst_75 : f32 to vector<4x16x6xf32>
    %142 = arith.mulf %141, %140 : vector<4x16x6xf32>
    %143 = arith.addf %139, %142 : vector<4x16x6xf32>
    %c1 = arith.constant 1 : index
    %c0_76 = arith.constant 0 : index
    %c0_77 = arith.constant 0 : index
    %c0_78 = arith.constant 0 : index
    %144 = vector.load %arg6[%c1, %c0_76, %c0_77, %c0_78] : memref<5x4x10x6xf32, #tpu.memory_space<vmem>>, vector<1x4x10x6xf32>
    %145 = vector.shape_cast %144 : vector<1x4x10x6xf32> to vector<4x10x6xf32>
    %c0_79 = arith.constant 0 : index
    %c6_80 = arith.constant 6 : index
    %c0_81 = arith.constant 0 : index
    %146 = vector.load %arg7[%c0_79, %c6_80, %c0_81] : memref<4x32x6xf32, #tpu.memory_space<vmem>>, vector<4x10x6xf32>
    tpu.vector_store %arg7[%c0_79, %c6_80, %c0_81], %145 {strides = array<i32>} : memref<4x32x6xf32, #tpu.memory_space<vmem>>, vector<4x10x6xf32>,
    %c0_82 = arith.constant 0 : index
    %c16_83 = arith.constant 16 : index
    %c0_84 = arith.constant 0 : index
    %147 = vector.load %arg7[%c0_82, %c16_83, %c0_84] : memref<4x32x6xf32, #tpu.memory_space<vmem>>, vector<4x16x6xf32>
    tpu.vector_store %arg7[%c0_82, %c16_83, %c0_84], %143 {strides = array<i32>} : memref<4x32x6xf32, #tpu.memory_space<vmem>>, vector<4x16x6xf32>,
    %148 = vector.extract_strided_slice %143 {offsets = [0, 6, 0], sizes = [4, 10, 6], strides = [1, 1, 1]} : vector<4x16x6xf32> to vector<4x10x6xf32>
    %c1_85 = arith.constant 1 : index
    %c0_86 = arith.constant 0 : index
    %c0_87 = arith.constant 0 : index
    %c0_88 = arith.constant 0 : index
    %149 = vector.load %arg6[%c1_85, %c0_86, %c0_87, %c0_88] : memref<5x4x10x6xf32, #tpu.memory_space<vmem>>, vector<1x4x10x6xf32>
    %150 = vector.shape_cast %149 : vector<1x4x10x6xf32> to vector<4x10x6xf32>
    %151 = vector.shape_cast %148 : vector<4x10x6xf32> to vector<1x4x10x6xf32>
    tpu.vector_store %arg6[%c1_85, %c0_86, %c0_87, %c0_88], %151 {strides = array<i32>} : memref<5x4x10x6xf32, #tpu.memory_space<vmem>>, vector<1x4x10x6xf32>,
    %c0_89 = arith.constant 0 : index
    %c6_90 = arith.constant 6 : index
    %c0_91 = arith.constant 0 : index
    %152 = vector.load %arg7[%c0_89, %c6_90, %c0_91] : memref<4x32x6xf32, #tpu.memory_space<vmem>>, vector<4x16x6xf32>
    %cst_92 = arith.constant 0.00102838012 : f32
    %153 = vector.broadcast %cst_92 : f32 to vector<4x16x6xf32>
    %154 = arith.mulf %153, %152 : vector<4x16x6xf32>
    %c0_93 = arith.constant 0 : index
    %c7_94 = arith.constant 7 : index
    %c0_95 = arith.constant 0 : index
    %155 = vector.load %arg7[%c0_93, %c7_94, %c0_95] : memref<4x32x6xf32, #tpu.memory_space<vmem>>, vector<4x16x6xf32>
    %cst_96 = arith.constant 0.00759875821 : f32
    %156 = vector.broadcast %cst_96 : f32 to vector<4x16x6xf32>
    %157 = arith.mulf %156, %155 : vector<4x16x6xf32>
    %158 = arith.addf %154, %157 : vector<4x16x6xf32>
    %c0_97 = arith.constant 0 : index
    %c8_98 = arith.constant 8 : index
    %c0_99 = arith.constant 0 : index
    %159 = vector.load %arg7[%c0_97, %c8_98, %c0_99] : memref<4x32x6xf32, #tpu.memory_space<vmem>>, vector<4x16x6xf32>
    %cst_100 = arith.constant 0.0360007733 : f32
    %160 = vector.broadcast %cst_100 : f32 to vector<4x16x6xf32>
    %161 = arith.mulf %160, %159 : vector<4x16x6xf32>
    %162 = arith.addf %158, %161 : vector<4x16x6xf32>
    %c0_101 = arith.constant 0 : index
    %c9_102 = arith.constant 9 : index
    %c0_103 = arith.constant 0 : index
    %163 = vector.load %arg7[%c0_101, %c9_102, %c0_103] : memref<4x32x6xf32, #tpu.memory_space<vmem>>, vector<4x16x6xf32>
    %cst_104 = arith.constant 0.109360687 : f32
    %164 = vector.broadcast %cst_104 : f32 to vector<4x16x6xf32>
    %165 = arith.mulf %164, %163 : vector<4x16x6xf32>
    %166 = arith.addf %162, %165 : vector<4x16x6xf32>
    %c0_105 = arith.constant 0 : index
    %c10_106 = arith.constant 10 : index
    %c0_107 = arith.constant 0 : index
    %167 = vector.load %arg7[%c0_105, %c10_106, %c0_107] : memref<4x32x6xf32, #tpu.memory_space<vmem>>, vector<4x16x6xf32>
    %cst_108 = arith.constant 0.213005543 : f32
    %168 = vector.broadcast %cst_108 : f32 to vector<4x16x6xf32>
    %169 = arith.mulf %168, %167 : vector<4x16x6xf32>
    %170 = arith.addf %166, %169 : vector<4x16x6xf32>
    %c0_109 = arith.constant 0 : index
    %c11_110 = arith.constant 11 : index
    %c0_111 = arith.constant 0 : index
    %171 = vector.load %arg7[%c0_109, %c11_110, %c0_111] : memref<4x32x6xf32, #tpu.memory_space<vmem>>, vector<4x16x6xf32>
    %cst_112 = arith.constant 0.266011715 : f32
    %172 = vector.broadcast %cst_112 : f32 to vector<4x16x6xf32>
    %173 = arith.mulf %172, %171 : vector<4x16x6xf32>
    %174 = arith.addf %170, %173 : vector<4x16x6xf32>
    %c0_113 = arith.constant 0 : index
    %c12_114 = arith.constant 12 : index
    %c0_115 = arith.constant 0 : index
    %175 = vector.load %arg7[%c0_113, %c12_114, %c0_115] : memref<4x32x6xf32, #tpu.memory_space<vmem>>, vector<4x16x6xf32>
    %cst_116 = arith.constant 0.213005543 : f32
    %176 = vector.broadcast %cst_116 : f32 to vector<4x16x6xf32>
    %177 = arith.mulf %176, %175 : vector<4x16x6xf32>
    %178 = arith.addf %174, %177 : vector<4x16x6xf32>
    %c0_117 = arith.constant 0 : index
    %c13_118 = arith.constant 13 : index
    %c0_119 = arith.constant 0 : index
    %179 = vector.load %arg7[%c0_117, %c13_118, %c0_119] : memref<4x32x6xf32, #tpu.memory_space<vmem>>, vector<4x16x6xf32>
    %cst_120 = arith.constant 0.109360687 : f32
    %180 = vector.broadcast %cst_120 : f32 to vector<4x16x6xf32>
    %181 = arith.mulf %180, %179 : vector<4x16x6xf32>
    %182 = arith.addf %178, %181 : vector<4x16x6xf32>
    %c0_121 = arith.constant 0 : index
    %c14_122 = arith.constant 14 : index
    %c0_123 = arith.constant 0 : index
    %183 = vector.load %arg7[%c0_121, %c14_122, %c0_123] : memref<4x32x6xf32, #tpu.memory_space<vmem>>, vector<4x16x6xf32>
    %cst_124 = arith.constant 0.0360007733 : f32
    %184 = vector.broadcast %cst_124 : f32 to vector<4x16x6xf32>
    %185 = arith.mulf %184, %183 : vector<4x16x6xf32>
    %186 = arith.addf %182, %185 : vector<4x16x6xf32>
    %c0_125 = arith.constant 0 : index
    %c15_126 = arith.constant 15 : index
    %c0_127 = arith.constant 0 : index
    %187 = vector.load %arg7[%c0_125, %c15_126, %c0_127] : memref<4x32x6xf32, #tpu.memory_space<vmem>>, vector<4x16x6xf32>
    %cst_128 = arith.constant 0.00759875821 : f32
    %188 = vector.broadcast %cst_128 : f32 to vector<4x16x6xf32>
    %189 = arith.mulf %188, %187 : vector<4x16x6xf32>
    %190 = arith.addf %186, %189 : vector<4x16x6xf32>
    %c0_129 = arith.constant 0 : index
    %c16_130 = arith.constant 16 : index
    %c0_131 = arith.constant 0 : index
    %191 = vector.load %arg7[%c0_129, %c16_130, %c0_131] : memref<4x32x6xf32, #tpu.memory_space<vmem>>, vector<4x16x6xf32>
    %cst_132 = arith.constant 0.00102838012 : f32
    %192 = vector.broadcast %cst_132 : f32 to vector<4x16x6xf32>
    %193 = arith.mulf %192, %191 : vector<4x16x6xf32>
    %194 = arith.addf %190, %193 : vector<4x16x6xf32>
    %195 = arith.mulf %100, %100 : vector<4x16x6xf32>
    %196 = arith.mulf %194, %194 : vector<4x16x6xf32>
    %197 = arith.mulf %100, %194 : vector<4x16x6xf32>
    %198 = arith.mulf %4, %4 : vector<4x16x16xf32>
    %199 = vector.extract_strided_slice %198 {offsets = [0, 0, 0], sizes = [4, 16, 6], strides = [1, 1, 1]} : vector<4x16x16xf32> to vector<4x16x6xf32>
    %cst_133 = arith.constant 0.00102838012 : f32
    %200 = vector.broadcast %cst_133 : f32 to vector<4x16x6xf32>
    %201 = arith.mulf %200, %199 : vector<4x16x6xf32>
    %202 = vector.extract_strided_slice %198 {offsets = [0, 0, 1], sizes = [4, 16, 6], strides = [1, 1, 1]} : vector<4x16x16xf32> to vector<4x16x6xf32>
    %cst_134 = arith.constant 0.00759875821 : f32
    %203 = vector.broadcast %cst_134 : f32 to vector<4x16x6xf32>
    %204 = arith.mulf %203, %202 : vector<4x16x6xf32>
    %205 = arith.addf %201, %204 : vector<4x16x6xf32>
    %206 = vector.extract_strided_slice %198 {offsets = [0, 0, 2], sizes = [4, 16, 6], strides = [1, 1, 1]} : vector<4x16x16xf32> to vector<4x16x6xf32>
    %cst_135 = arith.constant 0.0360007733 : f32
    %207 = vector.broadcast %cst_135 : f32 to vector<4x16x6xf32>
    %208 = arith.mulf %207, %206 : vector<4x16x6xf32>
    %209 = arith.addf %205, %208 : vector<4x16x6xf32>
    %210 = vector.extract_strided_slice %198 {offsets = [0, 0, 3], sizes = [4, 16, 6], strides = [1, 1, 1]} : vector<4x16x16xf32> to vector<4x16x6xf32>
    %cst_136 = arith.constant 0.109360687 : f32
    %211 = vector.broadcast %cst_136 : f32 to vector<4x16x6xf32>
    %212 = arith.mulf %211, %210 : vector<4x16x6xf32>
    %213 = arith.addf %209, %212 : vector<4x16x6xf32>
    %214 = vector.extract_strided_slice %198 {offsets = [0, 0, 4], sizes = [4, 16, 6], strides = [1, 1, 1]} : vector<4x16x16xf32> to vector<4x16x6xf32>
    %cst_137 = arith.constant 0.213005543 : f32
    %215 = vector.broadcast %cst_137 : f32 to vector<4x16x6xf32>
    %216 = arith.mulf %215, %214 : vector<4x16x6xf32>
    %217 = arith.addf %213, %216 : vector<4x16x6xf32>
    %218 = vector.extract_strided_slice %198 {offsets = [0, 0, 5], sizes = [4, 16, 6], strides = [1, 1, 1]} : vector<4x16x16xf32> to vector<4x16x6xf32>
    %cst_138 = arith.constant 0.266011715 : f32
    %219 = vector.broadcast %cst_138 : f32 to vector<4x16x6xf32>
    %220 = arith.mulf %219, %218 : vector<4x16x6xf32>
    %221 = arith.addf %217, %220 : vector<4x16x6xf32>
    %222 = vector.extract_strided_slice %198 {offsets = [0, 0, 6], sizes = [4, 16, 6], strides = [1, 1, 1]} : vector<4x16x16xf32> to vector<4x16x6xf32>
    %cst_139 = arith.constant 0.213005543 : f32
    %223 = vector.broadcast %cst_139 : f32 to vector<4x16x6xf32>
    %224 = arith.mulf %223, %222 : vector<4x16x6xf32>
    %225 = arith.addf %221, %224 : vector<4x16x6xf32>
    %226 = vector.extract_strided_slice %198 {offsets = [0, 0, 7], sizes = [4, 16, 6], strides = [1, 1, 1]} : vector<4x16x16xf32> to vector<4x16x6xf32>
    %cst_140 = arith.constant 0.109360687 : f32
    %227 = vector.broadcast %cst_140 : f32 to vector<4x16x6xf32>
    %228 = arith.mulf %227, %226 : vector<4x16x6xf32>
    %229 = arith.addf %225, %228 : vector<4x16x6xf32>
    %230 = vector.extract_strided_slice %198 {offsets = [0, 0, 8], sizes = [4, 16, 6], strides = [1, 1, 1]} : vector<4x16x16xf32> to vector<4x16x6xf32>
    %cst_141 = arith.constant 0.0360007733 : f32
    %231 = vector.broadcast %cst_141 : f32 to vector<4x16x6xf32>
    %232 = arith.mulf %231, %230 : vector<4x16x6xf32>
    %233 = arith.addf %229, %232 : vector<4x16x6xf32>
    %234 = vector.extract_strided_slice %198 {offsets = [0, 0, 9], sizes = [4, 16, 6], strides = [1, 1, 1]} : vector<4x16x16xf32> to vector<4x16x6xf32>
    %cst_142 = arith.constant 0.00759875821 : f32
    %235 = vector.broadcast %cst_142 : f32 to vector<4x16x6xf32>
    %236 = arith.mulf %235, %234 : vector<4x16x6xf32>
    %237 = arith.addf %233, %236 : vector<4x16x6xf32>
    %238 = vector.extract_strided_slice %198 {offsets = [0, 0, 10], sizes = [4, 16, 6], strides = [1, 1, 1]} : vector<4x16x16xf32> to vector<4x16x6xf32>
    %cst_143 = arith.constant 0.00102838012 : f32
    %239 = vector.broadcast %cst_143 : f32 to vector<4x16x6xf32>
    %240 = arith.mulf %239, %238 : vector<4x16x6xf32>
    %241 = arith.addf %237, %240 : vector<4x16x6xf32>
    %c2 = arith.constant 2 : index
    %c0_144 = arith.constant 0 : index
    %c0_145 = arith.constant 0 : index
    %c0_146 = arith.constant 0 : index
    %242 = vector.load %arg6[%c2, %c0_144, %c0_145, %c0_146] : memref<5x4x10x6xf32, #tpu.memory_space<vmem>>, vector<1x4x10x6xf32>
    %243 = vector.shape_cast %242 : vector<1x4x10x6xf32> to vector<4x10x6xf32>
    %c0_147 = arith.constant 0 : index
    %c6_148 = arith.constant 6 : index
    %c0_149 = arith.constant 0 : index
    %244 = vector.load %arg7[%c0_147, %c6_148, %c0_149] : memref<4x32x6xf32, #tpu.memory_space<vmem>>, vector<4x10x6xf32>
    tpu.vector_store %arg7[%c0_147, %c6_148, %c0_149], %243 {strides = array<i32>} : memref<4x32x6xf32, #tpu.memory_space<vmem>>, vector<4x10x6xf32>,
    %c0_150 = arith.constant 0 : index
    %c16_151 = arith.constant 16 : index
    %c0_152 = arith.constant 0 : index
    %245 = vector.load %arg7[%c0_150, %c16_151, %c0_152] : memref<4x32x6xf32, #tpu.memory_space<vmem>>, vector<4x16x6xf32>
    tpu.vector_store %arg7[%c0_150, %c16_151, %c0_152], %241 {strides = array<i32>} : memref<4x32x6xf32, #tpu.memory_space<vmem>>, vector<4x16x6xf32>,
    %246 = vector.extract_strided_slice %241 {offsets = [0, 6, 0], sizes = [4, 10, 6], strides = [1, 1, 1]} : vector<4x16x6xf32> to vector<4x10x6xf32>
    %c2_153 = arith.constant 2 : index
    %c0_154 = arith.constant 0 : index
    %c0_155 = arith.constant 0 : index
    %c0_156 = arith.constant 0 : index
    %247 = vector.load %arg6[%c2_153, %c0_154, %c0_155, %c0_156] : memref<5x4x10x6xf32, #tpu.memory_space<vmem>>, vector<1x4x10x6xf32>
    %248 = vector.shape_cast %247 : vector<1x4x10x6xf32> to vector<4x10x6xf32>
    %249 = vector.shape_cast %246 : vector<4x10x6xf32> to vector<1x4x10x6xf32>
    tpu.vector_store %arg6[%c2_153, %c0_154, %c0_155, %c0_156], %249 {strides = array<i32>} : memref<5x4x10x6xf32, #tpu.memory_space<vmem>>, vector<1x4x10x6xf32>,
    %c0_157 = arith.constant 0 : index
    %c6_158 = arith.constant 6 : index
    %c0_159 = arith.constant 0 : index
    %250 = vector.load %arg7[%c0_157, %c6_158, %c0_159] : memref<4x32x6xf32, #tpu.memory_space<vmem>>, vector<4x16x6xf32>
    %cst_160 = arith.constant 0.00102838012 : f32
    %251 = vector.broadcast %cst_160 : f32 to vector<4x16x6xf32>
    %252 = arith.mulf %251, %250 : vector<4x16x6xf32>
    %c0_161 = arith.constant 0 : index
    %c7_162 = arith.constant 7 : index
    %c0_163 = arith.constant 0 : index
    %253 = vector.load %arg7[%c0_161, %c7_162, %c0_163] : memref<4x32x6xf32, #tpu.memory_space<vmem>>, vector<4x16x6xf32>
    %cst_164 = arith.constant 0.00759875821 : f32
    %254 = vector.broadcast %cst_164 : f32 to vector<4x16x6xf32>
    %255 = arith.mulf %254, %253 : vector<4x16x6xf32>
    %256 = arith.addf %252, %255 : vector<4x16x6xf32>
    %c0_165 = arith.constant 0 : index
    %c8_166 = arith.constant 8 : index
    %c0_167 = arith.constant 0 : index
    %257 = vector.load %arg7[%c0_165, %c8_166, %c0_167] : memref<4x32x6xf32, #tpu.memory_space<vmem>>, vector<4x16x6xf32>
    %cst_168 = arith.constant 0.0360007733 : f32
    %258 = vector.broadcast %cst_168 : f32 to vector<4x16x6xf32>
    %259 = arith.mulf %258, %257 : vector<4x16x6xf32>
    %260 = arith.addf %256, %259 : vector<4x16x6xf32>
    %c0_169 = arith.constant 0 : index
    %c9_170 = arith.constant 9 : index
    %c0_171 = arith.constant 0 : index
    %261 = vector.load %arg7[%c0_169, %c9_170, %c0_171] : memref<4x32x6xf32, #tpu.memory_space<vmem>>, vector<4x16x6xf32>
    %cst_172 = arith.constant 0.109360687 : f32
    %262 = vector.broadcast %cst_172 : f32 to vector<4x16x6xf32>
    %263 = arith.mulf %262, %261 : vector<4x16x6xf32>
    %264 = arith.addf %260, %263 : vector<4x16x6xf32>
    %c0_173 = arith.constant 0 : index
    %c10_174 = arith.constant 10 : index
    %c0_175 = arith.constant 0 : index
    %265 = vector.load %arg7[%c0_173, %c10_174, %c0_175] : memref<4x32x6xf32, #tpu.memory_space<vmem>>, vector<4x16x6xf32>
    %cst_176 = arith.constant 0.213005543 : f32
    %266 = vector.broadcast %cst_176 : f32 to vector<4x16x6xf32>
    %267 = arith.mulf %266, %265 : vector<4x16x6xf32>
    %268 = arith.addf %264, %267 : vector<4x16x6xf32>
    %c0_177 = arith.constant 0 : index
    %c11_178 = arith.constant 11 : index
    %c0_179 = arith.constant 0 : index
    %269 = vector.load %arg7[%c0_177, %c11_178, %c0_179] : memref<4x32x6xf32, #tpu.memory_space<vmem>>, vector<4x16x6xf32>
    %cst_180 = arith.constant 0.266011715 : f32
    %270 = vector.broadcast %cst_180 : f32 to vector<4x16x6xf32>
    %271 = arith.mulf %270, %269 : vector<4x16x6xf32>
    %272 = arith.addf %268, %271 : vector<4x16x6xf32>
    %c0_181 = arith.constant 0 : index
    %c12_182 = arith.constant 12 : index
    %c0_183 = arith.constant 0 : index
    %273 = vector.load %arg7[%c0_181, %c12_182, %c0_183] : memref<4x32x6xf32, #tpu.memory_space<vmem>>, vector<4x16x6xf32>
    %cst_184 = arith.constant 0.213005543 : f32
    %274 = vector.broadcast %cst_184 : f32 to vector<4x16x6xf32>
    %275 = arith.mulf %274, %273 : vector<4x16x6xf32>
    %276 = arith.addf %272, %275 : vector<4x16x6xf32>
    %c0_185 = arith.constant 0 : index
    %c13_186 = arith.constant 13 : index
    %c0_187 = arith.constant 0 : index
    %277 = vector.load %arg7[%c0_185, %c13_186, %c0_187] : memref<4x32x6xf32, #tpu.memory_space<vmem>>, vector<4x16x6xf32>
    %cst_188 = arith.constant 0.109360687 : f32
    %278 = vector.broadcast %cst_188 : f32 to vector<4x16x6xf32>
    %279 = arith.mulf %278, %277 : vector<4x16x6xf32>
    %280 = arith.addf %276, %279 : vector<4x16x6xf32>
    %c0_189 = arith.constant 0 : index
    %c14_190 = arith.constant 14 : index
    %c0_191 = arith.constant 0 : index
    %281 = vector.load %arg7[%c0_189, %c14_190, %c0_191] : memref<4x32x6xf32, #tpu.memory_space<vmem>>, vector<4x16x6xf32>
    %cst_192 = arith.constant 0.0360007733 : f32
    %282 = vector.broadcast %cst_192 : f32 to vector<4x16x6xf32>
    %283 = arith.mulf %282, %281 : vector<4x16x6xf32>
    %284 = arith.addf %280, %283 : vector<4x16x6xf32>
    %c0_193 = arith.constant 0 : index
    %c15_194 = arith.constant 15 : index
    %c0_195 = arith.constant 0 : index
    %285 = vector.load %arg7[%c0_193, %c15_194, %c0_195] : memref<4x32x6xf32, #tpu.memory_space<vmem>>, vector<4x16x6xf32>
    %cst_196 = arith.constant 0.00759875821 : f32
    %286 = vector.broadcast %cst_196 : f32 to vector<4x16x6xf32>
    %287 = arith.mulf %286, %285 : vector<4x16x6xf32>
    %288 = arith.addf %284, %287 : vector<4x16x6xf32>
    %c0_197 = arith.constant 0 : index
    %c16_198 = arith.constant 16 : index
    %c0_199 = arith.constant 0 : index
    %289 = vector.load %arg7[%c0_197, %c16_198, %c0_199] : memref<4x32x6xf32, #tpu.memory_space<vmem>>, vector<4x16x6xf32>
    %cst_200 = arith.constant 0.00102838012 : f32
    %290 = vector.broadcast %cst_200 : f32 to vector<4x16x6xf32>
    %291 = arith.mulf %290, %289 : vector<4x16x6xf32>
    %292 = arith.addf %288, %291 : vector<4x16x6xf32>
    %293 = arith.subf %292, %195 : vector<4x16x6xf32>
    %294 = arith.mulf %6, %6 : vector<4x16x16xf32>
    %295 = vector.extract_strided_slice %294 {offsets = [0, 0, 0], sizes = [4, 16, 6], strides = [1, 1, 1]} : vector<4x16x16xf32> to vector<4x16x6xf32>
    %cst_201 = arith.constant 0.00102838012 : f32
    %296 = vector.broadcast %cst_201 : f32 to vector<4x16x6xf32>
    %297 = arith.mulf %296, %295 : vector<4x16x6xf32>
    %298 = vector.extract_strided_slice %294 {offsets = [0, 0, 1], sizes = [4, 16, 6], strides = [1, 1, 1]} : vector<4x16x16xf32> to vector<4x16x6xf32>
    %cst_202 = arith.constant 0.00759875821 : f32
    %299 = vector.broadcast %cst_202 : f32 to vector<4x16x6xf32>
    %300 = arith.mulf %299, %298 : vector<4x16x6xf32>
    %301 = arith.addf %297, %300 : vector<4x16x6xf32>
    %302 = vector.extract_strided_slice %294 {offsets = [0, 0, 2], sizes = [4, 16, 6], strides = [1, 1, 1]} : vector<4x16x16xf32> to vector<4x16x6xf32>
    %cst_203 = arith.constant 0.0360007733 : f32
    %303 = vector.broadcast %cst_203 : f32 to vector<4x16x6xf32>
    %304 = arith.mulf %303, %302 : vector<4x16x6xf32>
    %305 = arith.addf %301, %304 : vector<4x16x6xf32>
    %306 = vector.extract_strided_slice %294 {offsets = [0, 0, 3], sizes = [4, 16, 6], strides = [1, 1, 1]} : vector<4x16x16xf32> to vector<4x16x6xf32>
    %cst_204 = arith.constant 0.109360687 : f32
    %307 = vector.broadcast %cst_204 : f32 to vector<4x16x6xf32>
    %308 = arith.mulf %307, %306 : vector<4x16x6xf32>
    %309 = arith.addf %305, %308 : vector<4x16x6xf32>
    %310 = vector.extract_strided_slice %294 {offsets = [0, 0, 4], sizes = [4, 16, 6], strides = [1, 1, 1]} : vector<4x16x16xf32> to vector<4x16x6xf32>
    %cst_205 = arith.constant 0.213005543 : f32
    %311 = vector.broadcast %cst_205 : f32 to vector<4x16x6xf32>
    %312 = arith.mulf %311, %310 : vector<4x16x6xf32>
    %313 = arith.addf %309, %312 : vector<4x16x6xf32>
    %314 = vector.extract_strided_slice %294 {offsets = [0, 0, 5], sizes = [4, 16, 6], strides = [1, 1, 1]} : vector<4x16x16xf32> to vector<4x16x6xf32>
    %cst_206 = arith.constant 0.266011715 : f32
    %315 = vector.broadcast %cst_206 : f32 to vector<4x16x6xf32>
    %316 = arith.mulf %315, %314 : vector<4x16x6xf32>
    %317 = arith.addf %313, %316 : vector<4x16x6xf32>
    %318 = vector.extract_strided_slice %294 {offsets = [0, 0, 6], sizes = [4, 16, 6], strides = [1, 1, 1]} : vector<4x16x16xf32> to vector<4x16x6xf32>
    %cst_207 = arith.constant 0.213005543 : f32
    %319 = vector.broadcast %cst_207 : f32 to vector<4x16x6xf32>
    %320 = arith.mulf %319, %318 : vector<4x16x6xf32>
    %321 = arith.addf %317, %320 : vector<4x16x6xf32>
    %322 = vector.extract_strided_slice %294 {offsets = [0, 0, 7], sizes = [4, 16, 6], strides = [1, 1, 1]} : vector<4x16x16xf32> to vector<4x16x6xf32>
    %cst_208 = arith.constant 0.109360687 : f32
    %323 = vector.broadcast %cst_208 : f32 to vector<4x16x6xf32>
    %324 = arith.mulf %323, %322 : vector<4x16x6xf32>
    %325 = arith.addf %321, %324 : vector<4x16x6xf32>
    %326 = vector.extract_strided_slice %294 {offsets = [0, 0, 8], sizes = [4, 16, 6], strides = [1, 1, 1]} : vector<4x16x16xf32> to vector<4x16x6xf32>
    %cst_209 = arith.constant 0.0360007733 : f32
    %327 = vector.broadcast %cst_209 : f32 to vector<4x16x6xf32>
    %328 = arith.mulf %327, %326 : vector<4x16x6xf32>
    %329 = arith.addf %325, %328 : vector<4x16x6xf32>
    %330 = vector.extract_strided_slice %294 {offsets = [0, 0, 9], sizes = [4, 16, 6], strides = [1, 1, 1]} : vector<4x16x16xf32> to vector<4x16x6xf32>
    %cst_210 = arith.constant 0.00759875821 : f32
    %331 = vector.broadcast %cst_210 : f32 to vector<4x16x6xf32>
    %332 = arith.mulf %331, %330 : vector<4x16x6xf32>
    %333 = arith.addf %329, %332 : vector<4x16x6xf32>
    %334 = vector.extract_strided_slice %294 {offsets = [0, 0, 10], sizes = [4, 16, 6], strides = [1, 1, 1]} : vector<4x16x16xf32> to vector<4x16x6xf32>
    %cst_211 = arith.constant 0.00102838012 : f32
    %335 = vector.broadcast %cst_211 : f32 to vector<4x16x6xf32>
    %336 = arith.mulf %335, %334 : vector<4x16x6xf32>
    %337 = arith.addf %333, %336 : vector<4x16x6xf32>
    %c3 = arith.constant 3 : index
    %c0_212 = arith.constant 0 : index
    %c0_213 = arith.constant 0 : index
    %c0_214 = arith.constant 0 : index
    %338 = vector.load %arg6[%c3, %c0_212, %c0_213, %c0_214] : memref<5x4x10x6xf32, #tpu.memory_space<vmem>>, vector<1x4x10x6xf32>
    %339 = vector.shape_cast %338 : vector<1x4x10x6xf32> to vector<4x10x6xf32>
    %c0_215 = arith.constant 0 : index
    %c6_216 = arith.constant 6 : index
    %c0_217 = arith.constant 0 : index
    %340 = vector.load %arg7[%c0_215, %c6_216, %c0_217] : memref<4x32x6xf32, #tpu.memory_space<vmem>>, vector<4x10x6xf32>
    tpu.vector_store %arg7[%c0_215, %c6_216, %c0_217], %339 {strides = array<i32>} : memref<4x32x6xf32, #tpu.memory_space<vmem>>, vector<4x10x6xf32>,
    %c0_218 = arith.constant 0 : index
    %c16_219 = arith.constant 16 : index
    %c0_220 = arith.constant 0 : index
    %341 = vector.load %arg7[%c0_218, %c16_219, %c0_220] : memref<4x32x6xf32, #tpu.memory_space<vmem>>, vector<4x16x6xf32>
    tpu.vector_store %arg7[%c0_218, %c16_219, %c0_220], %337 {strides = array<i32>} : memref<4x32x6xf32, #tpu.memory_space<vmem>>, vector<4x16x6xf32>,
    %342 = vector.extract_strided_slice %337 {offsets = [0, 6, 0], sizes = [4, 10, 6], strides = [1, 1, 1]} : vector<4x16x6xf32> to vector<4x10x6xf32>
    %c3_221 = arith.constant 3 : index
    %c0_222 = arith.constant 0 : index
    %c0_223 = arith.constant 0 : index
    %c0_224 = arith.constant 0 : index
    %343 = vector.load %arg6[%c3_221, %c0_222, %c0_223, %c0_224] : memref<5x4x10x6xf32, #tpu.memory_space<vmem>>, vector<1x4x10x6xf32>
    %344 = vector.shape_cast %343 : vector<1x4x10x6xf32> to vector<4x10x6xf32>
    %345 = vector.shape_cast %342 : vector<4x10x6xf32> to vector<1x4x10x6xf32>
    tpu.vector_store %arg6[%c3_221, %c0_222, %c0_223, %c0_224], %345 {strides = array<i32>} : memref<5x4x10x6xf32, #tpu.memory_space<vmem>>, vector<1x4x10x6xf32>,
    %c0_225 = arith.constant 0 : index
    %c6_226 = arith.constant 6 : index
    %c0_227 = arith.constant 0 : index
    %346 = vector.load %arg7[%c0_225, %c6_226, %c0_227] : memref<4x32x6xf32, #tpu.memory_space<vmem>>, vector<4x16x6xf32>
    %cst_228 = arith.constant 0.00102838012 : f32
    %347 = vector.broadcast %cst_228 : f32 to vector<4x16x6xf32>
    %348 = arith.mulf %347, %346 : vector<4x16x6xf32>
    %c0_229 = arith.constant 0 : index
    %c7_230 = arith.constant 7 : index
    %c0_231 = arith.constant 0 : index
    %349 = vector.load %arg7[%c0_229, %c7_230, %c0_231] : memref<4x32x6xf32, #tpu.memory_space<vmem>>, vector<4x16x6xf32>
    %cst_232 = arith.constant 0.00759875821 : f32
    %350 = vector.broadcast %cst_232 : f32 to vector<4x16x6xf32>
    %351 = arith.mulf %350, %349 : vector<4x16x6xf32>
    %352 = arith.addf %348, %351 : vector<4x16x6xf32>
    %c0_233 = arith.constant 0 : index
    %c8_234 = arith.constant 8 : index
    %c0_235 = arith.constant 0 : index
    %353 = vector.load %arg7[%c0_233, %c8_234, %c0_235] : memref<4x32x6xf32, #tpu.memory_space<vmem>>, vector<4x16x6xf32>
    %cst_236 = arith.constant 0.0360007733 : f32
    %354 = vector.broadcast %cst_236 : f32 to vector<4x16x6xf32>
    %355 = arith.mulf %354, %353 : vector<4x16x6xf32>
    %356 = arith.addf %352, %355 : vector<4x16x6xf32>
    %c0_237 = arith.constant 0 : index
    %c9_238 = arith.constant 9 : index
    %c0_239 = arith.constant 0 : index
    %357 = vector.load %arg7[%c0_237, %c9_238, %c0_239] : memref<4x32x6xf32, #tpu.memory_space<vmem>>, vector<4x16x6xf32>
    %cst_240 = arith.constant 0.109360687 : f32
    %358 = vector.broadcast %cst_240 : f32 to vector<4x16x6xf32>
    %359 = arith.mulf %358, %357 : vector<4x16x6xf32>
    %360 = arith.addf %356, %359 : vector<4x16x6xf32>
    %c0_241 = arith.constant 0 : index
    %c10_242 = arith.constant 10 : index
    %c0_243 = arith.constant 0 : index
    %361 = vector.load %arg7[%c0_241, %c10_242, %c0_243] : memref<4x32x6xf32, #tpu.memory_space<vmem>>, vector<4x16x6xf32>
    %cst_244 = arith.constant 0.213005543 : f32
    %362 = vector.broadcast %cst_244 : f32 to vector<4x16x6xf32>
    %363 = arith.mulf %362, %361 : vector<4x16x6xf32>
    %364 = arith.addf %360, %363 : vector<4x16x6xf32>
    %c0_245 = arith.constant 0 : index
    %c11_246 = arith.constant 11 : index
    %c0_247 = arith.constant 0 : index
    %365 = vector.load %arg7[%c0_245, %c11_246, %c0_247] : memref<4x32x6xf32, #tpu.memory_space<vmem>>, vector<4x16x6xf32>
    %cst_248 = arith.constant 0.266011715 : f32
    %366 = vector.broadcast %cst_248 : f32 to vector<4x16x6xf32>
    %367 = arith.mulf %366, %365 : vector<4x16x6xf32>
    %368 = arith.addf %364, %367 : vector<4x16x6xf32>
    %c0_249 = arith.constant 0 : index
    %c12_250 = arith.constant 12 : index
    %c0_251 = arith.constant 0 : index
    %369 = vector.load %arg7[%c0_249, %c12_250, %c0_251] : memref<4x32x6xf32, #tpu.memory_space<vmem>>, vector<4x16x6xf32>
    %cst_252 = arith.constant 0.213005543 : f32
    %370 = vector.broadcast %cst_252 : f32 to vector<4x16x6xf32>
    %371 = arith.mulf %370, %369 : vector<4x16x6xf32>
    %372 = arith.addf %368, %371 : vector<4x16x6xf32>
    %c0_253 = arith.constant 0 : index
    %c13_254 = arith.constant 13 : index
    %c0_255 = arith.constant 0 : index
    %373 = vector.load %arg7[%c0_253, %c13_254, %c0_255] : memref<4x32x6xf32, #tpu.memory_space<vmem>>, vector<4x16x6xf32>
    %cst_256 = arith.constant 0.109360687 : f32
    %374 = vector.broadcast %cst_256 : f32 to vector<4x16x6xf32>
    %375 = arith.mulf %374, %373 : vector<4x16x6xf32>
    %376 = arith.addf %372, %375 : vector<4x16x6xf32>
    %c0_257 = arith.constant 0 : index
    %c14_258 = arith.constant 14 : index
    %c0_259 = arith.constant 0 : index
    %377 = vector.load %arg7[%c0_257, %c14_258, %c0_259] : memref<4x32x6xf32, #tpu.memory_space<vmem>>, vector<4x16x6xf32>
    %cst_260 = arith.constant 0.0360007733 : f32
    %378 = vector.broadcast %cst_260 : f32 to vector<4x16x6xf32>
    %379 = arith.mulf %378, %377 : vector<4x16x6xf32>
    %380 = arith.addf %376, %379 : vector<4x16x6xf32>
    %c0_261 = arith.constant 0 : index
    %c15_262 = arith.constant 15 : index
    %c0_263 = arith.constant 0 : index
    %381 = vector.load %arg7[%c0_261, %c15_262, %c0_263] : memref<4x32x6xf32, #tpu.memory_space<vmem>>, vector<4x16x6xf32>
    %cst_264 = arith.constant 0.00759875821 : f32
    %382 = vector.broadcast %cst_264 : f32 to vector<4x16x6xf32>
    %383 = arith.mulf %382, %381 : vector<4x16x6xf32>
    %384 = arith.addf %380, %383 : vector<4x16x6xf32>
    %c0_265 = arith.constant 0 : index
    %c16_266 = arith.constant 16 : index
    %c0_267 = arith.constant 0 : index
    %385 = vector.load %arg7[%c0_265, %c16_266, %c0_267] : memref<4x32x6xf32, #tpu.memory_space<vmem>>, vector<4x16x6xf32>
    %cst_268 = arith.constant 0.00102838012 : f32
    %386 = vector.broadcast %cst_268 : f32 to vector<4x16x6xf32>
    %387 = arith.mulf %386, %385 : vector<4x16x6xf32>
    %388 = arith.addf %384, %387 : vector<4x16x6xf32>
    %389 = arith.subf %388, %196 : vector<4x16x6xf32>
    %390 = arith.mulf %4, %6 : vector<4x16x16xf32>
    %391 = vector.extract_strided_slice %390 {offsets = [0, 0, 0], sizes = [4, 16, 6], strides = [1, 1, 1]} : vector<4x16x16xf32> to vector<4x16x6xf32>
    %cst_269 = arith.constant 0.00102838012 : f32
    %392 = vector.broadcast %cst_269 : f32 to vector<4x16x6xf32>
    %393 = arith.mulf %392, %391 : vector<4x16x6xf32>
    %394 = vector.extract_strided_slice %390 {offsets = [0, 0, 1], sizes = [4, 16, 6], strides = [1, 1, 1]} : vector<4x16x16xf32> to vector<4x16x6xf32>
    %cst_270 = arith.constant 0.00759875821 : f32
    %395 = vector.broadcast %cst_270 : f32 to vector<4x16x6xf32>
    %396 = arith.mulf %395, %394 : vector<4x16x6xf32>
    %397 = arith.addf %393, %396 : vector<4x16x6xf32>
    %398 = vector.extract_strided_slice %390 {offsets = [0, 0, 2], sizes = [4, 16, 6], strides = [1, 1, 1]} : vector<4x16x16xf32> to vector<4x16x6xf32>
    %cst_271 = arith.constant 0.0360007733 : f32
    %399 = vector.broadcast %cst_271 : f32 to vector<4x16x6xf32>
    %400 = arith.mulf %399, %398 : vector<4x16x6xf32>
    %401 = arith.addf %397, %400 : vector<4x16x6xf32>
    %402 = vector.extract_strided_slice %390 {offsets = [0, 0, 3], sizes = [4, 16, 6], strides = [1, 1, 1]} : vector<4x16x16xf32> to vector<4x16x6xf32>
    %cst_272 = arith.constant 0.109360687 : f32
    %403 = vector.broadcast %cst_272 : f32 to vector<4x16x6xf32>
    %404 = arith.mulf %403, %402 : vector<4x16x6xf32>
    %405 = arith.addf %401, %404 : vector<4x16x6xf32>
    %406 = vector.extract_strided_slice %390 {offsets = [0, 0, 4], sizes = [4, 16, 6], strides = [1, 1, 1]} : vector<4x16x16xf32> to vector<4x16x6xf32>
    %cst_273 = arith.constant 0.213005543 : f32
    %407 = vector.broadcast %cst_273 : f32 to vector<4x16x6xf32>
    %408 = arith.mulf %407, %406 : vector<4x16x6xf32>
    %409 = arith.addf %405, %408 : vector<4x16x6xf32>
    %410 = vector.extract_strided_slice %390 {offsets = [0, 0, 5], sizes = [4, 16, 6], strides = [1, 1, 1]} : vector<4x16x16xf32> to vector<4x16x6xf32>
    %cst_274 = arith.constant 0.266011715 : f32
    %411 = vector.broadcast %cst_274 : f32 to vector<4x16x6xf32>
    %412 = arith.mulf %411, %410 : vector<4x16x6xf32>
    %413 = arith.addf %409, %412 : vector<4x16x6xf32>
    %414 = vector.extract_strided_slice %390 {offsets = [0, 0, 6], sizes = [4, 16, 6], strides = [1, 1, 1]} : vector<4x16x16xf32> to vector<4x16x6xf32>
    %cst_275 = arith.constant 0.213005543 : f32
    %415 = vector.broadcast %cst_275 : f32 to vector<4x16x6xf32>
    %416 = arith.mulf %415, %414 : vector<4x16x6xf32>
    %417 = arith.addf %413, %416 : vector<4x16x6xf32>
    %418 = vector.extract_strided_slice %390 {offsets = [0, 0, 7], sizes = [4, 16, 6], strides = [1, 1, 1]} : vector<4x16x16xf32> to vector<4x16x6xf32>
    %cst_276 = arith.constant 0.109360687 : f32
    %419 = vector.broadcast %cst_276 : f32 to vector<4x16x6xf32>
    %420 = arith.mulf %419, %418 : vector<4x16x6xf32>
    %421 = arith.addf %417, %420 : vector<4x16x6xf32>
    %422 = vector.extract_strided_slice %390 {offsets = [0, 0, 8], sizes = [4, 16, 6], strides = [1, 1, 1]} : vector<4x16x16xf32> to vector<4x16x6xf32>
    %cst_277 = arith.constant 0.0360007733 : f32
    %423 = vector.broadcast %cst_277 : f32 to vector<4x16x6xf32>
    %424 = arith.mulf %423, %422 : vector<4x16x6xf32>
    %425 = arith.addf %421, %424 : vector<4x16x6xf32>
    %426 = vector.extract_strided_slice %390 {offsets = [0, 0, 9], sizes = [4, 16, 6], strides = [1, 1, 1]} : vector<4x16x16xf32> to vector<4x16x6xf32>
    %cst_278 = arith.constant 0.00759875821 : f32
    %427 = vector.broadcast %cst_278 : f32 to vector<4x16x6xf32>
    %428 = arith.mulf %427, %426 : vector<4x16x6xf32>
    %429 = arith.addf %425, %428 : vector<4x16x6xf32>
    %430 = vector.extract_strided_slice %390 {offsets = [0, 0, 10], sizes = [4, 16, 6], strides = [1, 1, 1]} : vector<4x16x16xf32> to vector<4x16x6xf32>
    %cst_279 = arith.constant 0.00102838012 : f32
    %431 = vector.broadcast %cst_279 : f32 to vector<4x16x6xf32>
    %432 = arith.mulf %431, %430 : vector<4x16x6xf32>
    %433 = arith.addf %429, %432 : vector<4x16x6xf32>
    %c4 = arith.constant 4 : index
    %c0_280 = arith.constant 0 : index
    %c0_281 = arith.constant 0 : index
    %c0_282 = arith.constant 0 : index
    %434 = vector.load %arg6[%c4, %c0_280, %c0_281, %c0_282] : memref<5x4x10x6xf32, #tpu.memory_space<vmem>>, vector<1x4x10x6xf32>
    %435 = vector.shape_cast %434 : vector<1x4x10x6xf32> to vector<4x10x6xf32>
    %c0_283 = arith.constant 0 : index
    %c6_284 = arith.constant 6 : index
    %c0_285 = arith.constant 0 : index
    %436 = vector.load %arg7[%c0_283, %c6_284, %c0_285] : memref<4x32x6xf32, #tpu.memory_space<vmem>>, vector<4x10x6xf32>
    tpu.vector_store %arg7[%c0_283, %c6_284, %c0_285], %435 {strides = array<i32>} : memref<4x32x6xf32, #tpu.memory_space<vmem>>, vector<4x10x6xf32>,
    %c0_286 = arith.constant 0 : index
    %c16_287 = arith.constant 16 : index
    %c0_288 = arith.constant 0 : index
    %437 = vector.load %arg7[%c0_286, %c16_287, %c0_288] : memref<4x32x6xf32, #tpu.memory_space<vmem>>, vector<4x16x6xf32>
    tpu.vector_store %arg7[%c0_286, %c16_287, %c0_288], %433 {strides = array<i32>} : memref<4x32x6xf32, #tpu.memory_space<vmem>>, vector<4x16x6xf32>,
    %438 = vector.extract_strided_slice %433 {offsets = [0, 6, 0], sizes = [4, 10, 6], strides = [1, 1, 1]} : vector<4x16x6xf32> to vector<4x10x6xf32>
    %c4_289 = arith.constant 4 : index
    %c0_290 = arith.constant 0 : index
    %c0_291 = arith.constant 0 : index
    %c0_292 = arith.constant 0 : index
    %439 = vector.load %arg6[%c4_289, %c0_290, %c0_291, %c0_292] : memref<5x4x10x6xf32, #tpu.memory_space<vmem>>, vector<1x4x10x6xf32>
    %440 = vector.shape_cast %439 : vector<1x4x10x6xf32> to vector<4x10x6xf32>
    %441 = vector.shape_cast %438 : vector<4x10x6xf32> to vector<1x4x10x6xf32>
    tpu.vector_store %arg6[%c4_289, %c0_290, %c0_291, %c0_292], %441 {strides = array<i32>} : memref<5x4x10x6xf32, #tpu.memory_space<vmem>>, vector<1x4x10x6xf32>,
    %c0_293 = arith.constant 0 : index
    %c6_294 = arith.constant 6 : index
    %c0_295 = arith.constant 0 : index
    %442 = vector.load %arg7[%c0_293, %c6_294, %c0_295] : memref<4x32x6xf32, #tpu.memory_space<vmem>>, vector<4x16x6xf32>
    %cst_296 = arith.constant 0.00102838012 : f32
    %443 = vector.broadcast %cst_296 : f32 to vector<4x16x6xf32>
    %444 = arith.mulf %443, %442 : vector<4x16x6xf32>
    %c0_297 = arith.constant 0 : index
    %c7_298 = arith.constant 7 : index
    %c0_299 = arith.constant 0 : index
    %445 = vector.load %arg7[%c0_297, %c7_298, %c0_299] : memref<4x32x6xf32, #tpu.memory_space<vmem>>, vector<4x16x6xf32>
    %cst_300 = arith.constant 0.00759875821 : f32
    %446 = vector.broadcast %cst_300 : f32 to vector<4x16x6xf32>
    %447 = arith.mulf %446, %445 : vector<4x16x6xf32>
    %448 = arith.addf %444, %447 : vector<4x16x6xf32>
    %c0_301 = arith.constant 0 : index
    %c8_302 = arith.constant 8 : index
    %c0_303 = arith.constant 0 : index
    %449 = vector.load %arg7[%c0_301, %c8_302, %c0_303] : memref<4x32x6xf32, #tpu.memory_space<vmem>>, vector<4x16x6xf32>
    %cst_304 = arith.constant 0.0360007733 : f32
    %450 = vector.broadcast %cst_304 : f32 to vector<4x16x6xf32>
    %451 = arith.mulf %450, %449 : vector<4x16x6xf32>
    %452 = arith.addf %448, %451 : vector<4x16x6xf32>
    %c0_305 = arith.constant 0 : index
    %c9_306 = arith.constant 9 : index
    %c0_307 = arith.constant 0 : index
    %453 = vector.load %arg7[%c0_305, %c9_306, %c0_307] : memref<4x32x6xf32, #tpu.memory_space<vmem>>, vector<4x16x6xf32>
    %cst_308 = arith.constant 0.109360687 : f32
    %454 = vector.broadcast %cst_308 : f32 to vector<4x16x6xf32>
    %455 = arith.mulf %454, %453 : vector<4x16x6xf32>
    %456 = arith.addf %452, %455 : vector<4x16x6xf32>
    %c0_309 = arith.constant 0 : index
    %c10_310 = arith.constant 10 : index
    %c0_311 = arith.constant 0 : index
    %457 = vector.load %arg7[%c0_309, %c10_310, %c0_311] : memref<4x32x6xf32, #tpu.memory_space<vmem>>, vector<4x16x6xf32>
    %cst_312 = arith.constant 0.213005543 : f32
    %458 = vector.broadcast %cst_312 : f32 to vector<4x16x6xf32>
    %459 = arith.mulf %458, %457 : vector<4x16x6xf32>
    %460 = arith.addf %456, %459 : vector<4x16x6xf32>
    %c0_313 = arith.constant 0 : index
    %c11_314 = arith.constant 11 : index
    %c0_315 = arith.constant 0 : index
    %461 = vector.load %arg7[%c0_313, %c11_314, %c0_315] : memref<4x32x6xf32, #tpu.memory_space<vmem>>, vector<4x16x6xf32>
    %cst_316 = arith.constant 0.266011715 : f32
    %462 = vector.broadcast %cst_316 : f32 to vector<4x16x6xf32>
    %463 = arith.mulf %462, %461 : vector<4x16x6xf32>
    %464 = arith.addf %460, %463 : vector<4x16x6xf32>
    %c0_317 = arith.constant 0 : index
    %c12_318 = arith.constant 12 : index
    %c0_319 = arith.constant 0 : index
    %465 = vector.load %arg7[%c0_317, %c12_318, %c0_319] : memref<4x32x6xf32, #tpu.memory_space<vmem>>, vector<4x16x6xf32>
    %cst_320 = arith.constant 0.213005543 : f32
    %466 = vector.broadcast %cst_320 : f32 to vector<4x16x6xf32>
    %467 = arith.mulf %466, %465 : vector<4x16x6xf32>
    %468 = arith.addf %464, %467 : vector<4x16x6xf32>
    %c0_321 = arith.constant 0 : index
    %c13_322 = arith.constant 13 : index
    %c0_323 = arith.constant 0 : index
    %469 = vector.load %arg7[%c0_321, %c13_322, %c0_323] : memref<4x32x6xf32, #tpu.memory_space<vmem>>, vector<4x16x6xf32>
    %cst_324 = arith.constant 0.109360687 : f32
    %470 = vector.broadcast %cst_324 : f32 to vector<4x16x6xf32>
    %471 = arith.mulf %470, %469 : vector<4x16x6xf32>
    %472 = arith.addf %468, %471 : vector<4x16x6xf32>
    %c0_325 = arith.constant 0 : index
    %c14_326 = arith.constant 14 : index
    %c0_327 = arith.constant 0 : index
    %473 = vector.load %arg7[%c0_325, %c14_326, %c0_327] : memref<4x32x6xf32, #tpu.memory_space<vmem>>, vector<4x16x6xf32>
    %cst_328 = arith.constant 0.0360007733 : f32
    %474 = vector.broadcast %cst_328 : f32 to vector<4x16x6xf32>
    %475 = arith.mulf %474, %473 : vector<4x16x6xf32>
    %476 = arith.addf %472, %475 : vector<4x16x6xf32>
    %c0_329 = arith.constant 0 : index
    %c15_330 = arith.constant 15 : index
    %c0_331 = arith.constant 0 : index
    %477 = vector.load %arg7[%c0_329, %c15_330, %c0_331] : memref<4x32x6xf32, #tpu.memory_space<vmem>>, vector<4x16x6xf32>
    %cst_332 = arith.constant 0.00759875821 : f32
    %478 = vector.broadcast %cst_332 : f32 to vector<4x16x6xf32>
    %479 = arith.mulf %478, %477 : vector<4x16x6xf32>
    %480 = arith.addf %476, %479 : vector<4x16x6xf32>
    %c0_333 = arith.constant 0 : index
    %c16_334 = arith.constant 16 : index
    %c0_335 = arith.constant 0 : index
    %481 = vector.load %arg7[%c0_333, %c16_334, %c0_335] : memref<4x32x6xf32, #tpu.memory_space<vmem>>, vector<4x16x6xf32>
    %cst_336 = arith.constant 0.00102838012 : f32
    %482 = vector.broadcast %cst_336 : f32 to vector<4x16x6xf32>
    %483 = arith.mulf %482, %481 : vector<4x16x6xf32>
    %484 = arith.addf %480, %483 : vector<4x16x6xf32>
    %485 = arith.subf %484, %197 : vector<4x16x6xf32>
    %cst_337 = arith.constant 2.000000e+00 : f32
    %486 = vector.broadcast %cst_337 : f32 to vector<4x16x6xf32>
    %487 = arith.mulf %486, %197 : vector<4x16x6xf32>
    %cst_338 = arith.constant 9.99999974E-5 : f32
    %488 = vector.broadcast %cst_338 : f32 to vector<4x16x6xf32>
    %489 = arith.addf %487, %488 : vector<4x16x6xf32>
    %cst_339 = arith.constant 2.000000e+00 : f32
    %490 = vector.broadcast %cst_339 : f32 to vector<4x16x6xf32>
    %491 = arith.mulf %490, %485 : vector<4x16x6xf32>
    %cst_340 = arith.constant 8.99999984E-4 : f32
    %492 = vector.broadcast %cst_340 : f32 to vector<4x16x6xf32>
    %493 = arith.addf %491, %492 : vector<4x16x6xf32>
    %494 = arith.mulf %489, %493 : vector<4x16x6xf32>
    %495 = arith.addf %195, %196 : vector<4x16x6xf32>
    %cst_341 = arith.constant 9.99999974E-5 : f32
    %496 = vector.broadcast %cst_341 : f32 to vector<4x16x6xf32>
    %497 = arith.addf %495, %496 : vector<4x16x6xf32>
    %498 = arith.addf %293, %389 : vector<4x16x6xf32>
    %cst_342 = arith.constant 8.99999984E-4 : f32
    %499 = vector.broadcast %cst_342 : f32 to vector<4x16x6xf32>
    %500 = arith.addf %498, %499 : vector<4x16x6xf32>
    %501 = arith.mulf %497, %500 : vector<4x16x6xf32>
    %502 = tpu.reciprocal %501 {approx = true} : vector<4x16x6xf32> -> vector<4x16x6xf32>
    %503 = arith.mulf %501, %502 : vector<4x16x6xf32>
    %cst_343 = arith.constant 2.000000e+00 : f32
    %504 = vector.broadcast %cst_343 : f32 to vector<4x16x6xf32>
    %505 = arith.subf %504, %503 : vector<4x16x6xf32>
    %506 = arith.mulf %502, %505 : vector<4x16x6xf32>
    %507 = arith.mulf %494, %506 : vector<4x16x6xf32>
    %508 = vector.extract_strided_slice %507 {offsets = [0, 0, 0], sizes = [1, 16, 6], strides = [1, 1, 1]} : vector<4x16x6xf32> to vector<1x16x6xf32>
    %509 = vector.shape_cast %508 : vector<1x16x6xf32> to vector<16x6xf32>
    %510 = vector.extract_strided_slice %507 {offsets = [1, 0, 0], sizes = [1, 16, 6], strides = [1, 1, 1]} : vector<4x16x6xf32> to vector<1x16x6xf32>
    %511 = vector.shape_cast %510 : vector<1x16x6xf32> to vector<16x6xf32>
    %512 = arith.addf %509, %511 : vector<16x6xf32>
    %513 = vector.extract_strided_slice %507 {offsets = [2, 0, 0], sizes = [1, 16, 6], strides = [1, 1, 1]} : vector<4x16x6xf32> to vector<1x16x6xf32>
    %514 = vector.shape_cast %513 : vector<1x16x6xf32> to vector<16x6xf32>
    %515 = arith.addf %512, %514 : vector<16x6xf32>
    %516 = vector.extract_strided_slice %507 {offsets = [3, 0, 0], sizes = [1, 16, 6], strides = [1, 1, 1]} : vector<4x16x6xf32> to vector<1x16x6xf32>
    %517 = vector.shape_cast %516 : vector<1x16x6xf32> to vector<16x6xf32>
    %518 = arith.addf %515, %517 : vector<16x6xf32>
    %c16_i32 = arith.constant 16 : i32
    %519 = arith.muli %arg1, %c16_i32 : i32
    %c10_i32 = arith.constant 10 : i32
    %520 = arith.subi %c10_i32, %519 : i32
    %c16_i32_344 = arith.constant 16 : i32
    %521 = arith.muli %arg1, %c16_i32_344 : i32
    %c16_i32_345 = arith.constant 16 : i32
    %522 = arith.subi %c16_i32_345, %521 : i32
    %523 = tpu.iota {dimensions = array<i32: 0>} : vector<16x6xi32>
    %524 = vector.broadcast %520 : i32 to vector<16x6xi32>
    %525 = arith.cmpi sge, %523, %524 : vector<16x6xi32>
    %526 = vector.broadcast %522 : i32 to vector<16x6xi32>
    %527 = arith.cmpi slt, %523, %526 : vector<16x6xi32>
    %528 = arith.andi %525, %527 : vector<16x6xi1>
    %cst_346 = arith.constant 0.000000e+00 : f32
    %529 = vector.broadcast %cst_346 : f32 to vector<16x6xf32>
    %530 = arith.select %528, %518, %529 : vector<16x6xi1>, vector<16x6xf32>
    %cst_347 = arith.constant dense<0.000000e+00> : vector<16xf32>
    %531 = vector.multi_reduction <add>, %530, %cst_347 [1] : vector<16x6xf32> to vector<16xf32>
    %532 = vector.shape_cast %531 : vector<16xf32> to vector<16x1xf32>
    %cst_348 = arith.constant dense<0.000000e+00> : vector<1xf32>
    %533 = vector.multi_reduction <add>, %532, %cst_348 [0] : vector<16x1xf32> to vector<1xf32>
    %534 = vector.shape_cast %533 : vector<1xf32> to vector<1x1xf32>
    %c0_349 = arith.constant 0 : index
    %c0_350 = arith.constant 0 : index
    %535 = vector.load %arg5[%c0_349, %c0_350] : memref<1x1xf32, #tpu.memory_space<vmem>>, vector<1x1xf32>
    %536 = arith.addf %535, %534 : vector<1x1xf32>
    %c0_351 = arith.constant 0 : index
    %c0_352 = arith.constant 0 : index
    %537 = vector.load %arg5[%c0_351, %c0_352] : memref<1x1xf32, #tpu.memory_space<vmem>>, vector<1x1xf32>
    tpu.vector_store %arg5[%c0_351, %c0_352], %536 {strides = array<i32>} : memref<1x1xf32, #tpu.memory_space<vmem>>, vector<1x1xf32>,
    %c0_353 = arith.constant 0 : index
    %c0_354 = arith.constant 0 : index
    %538 = vector.load %arg5[%c0_353, %c0_354] : memref<1x1xf32, #tpu.memory_space<vmem>>, vector<1x1xf32>
    %cst_355 = arith.constant 0.0069444445 : f32
    %539 = vector.broadcast %cst_355 : f32 to vector<1x1xf32>
    %540 = arith.mulf %538, %539 : vector<1x1xf32>
    %541 = vector.shape_cast %540 : vector<1x1xf32> to vector<1x1xf32>
    %542 = vector.broadcast %541 : vector<1x1xf32> to vector<8x128xf32>
    %c0_356 = arith.constant 0 : index
    %c0_357 = arith.constant 0 : index
    %c0_358 = arith.constant 0 : index
    %543 = vector.load %arg4[%c0_356, %c0_357, %c0_358] : memref<1x8x128xf32, #tpu.memory_space<vmem>>, vector<1x8x128xf32>
    %544 = vector.shape_cast %543 : vector<1x8x128xf32> to vector<8x128xf32>
    %545 = vector.shape_cast %542 : vector<8x128xf32> to vector<1x8x128xf32>
    tpu.vector_store %arg4[%c0_356, %c0_357, %c0_358], %545 {strides = array<i32>} : memref<1x8x128xf32, #tpu.memory_space<vmem>>, vector<1x8x128xf32>,
    return
  }
  func.func @transform_0(%arg0: i32, %arg1: i32) -> (i32, i32, i32, i32) {
    %c0_i32 = arith.constant 0 : i32
    %c0_i32_0 = arith.constant 0 : i32
    %c0_i32_1 = arith.constant 0 : i32
    return %arg0, %c0_i32, %arg1, %c0_i32_0 : i32, i32, i32, i32
  }
  func.func @transform_1(%arg0: i32, %arg1: i32) -> (i32, i32, i32, i32) {
    %c0_i32 = arith.constant 0 : i32
    %c0_i32_0 = arith.constant 0 : i32
    %c0_i32_1 = arith.constant 0 : i32
    return %arg0, %c0_i32, %arg1, %c0_i32_0 : i32, i32, i32, i32
  }
  func.func @transform_2(%arg0: i32, %arg1: i32) -> (i32, i32, i32) {
    %c0_i32 = arith.constant 0 : i32
    %c0_i32_0 = arith.constant 0 : i32
    %c0_i32_1 = arith.constant 0 : i32
    return %arg0, %c0_i32, %c0_i32_0 : i32, i32, i32
  }
}

</mosaic_0001>

<bundles_post_ra>
// kernel: tpu_custom_call.1
= control target key start
LH: loop header
LB: loop body
LE: loop exit
PB: predicated region body
PF: predicated region fallthrough
CT: control target
= control target key end

     0   :  { %7 = vsyncpa [#allocation6], 0  ;;  %s7725_s0 = inlined_call_operand.hbm [shape: f32[2,4,16,16], index: 0, kind: input, shape index: {}]   ;;  %s7726_s1 = inlined_call_operand.hbm [shape: f32[2,4,16,16], index: 1, kind: input, shape index: {}]   ;;  %s7727_s2 = inlined_call_operand.hbm [shape: f32[2,8,128], index: 2, kind: output, shape index: {}]  }
   0x1   :  { %9 = vsyncpa [#allocation6 + $0x1], 0 }
   0x2   :  { %10 = vsyncpa [#allocation9], 0 }
   0x3   :  { %12 = vsyncpa [#allocation9 + $0x1], 0 }
   0x4   :  { %13 = vsyncpa [#allocation7], 0 }
   0x5   :  { %15 = vsyncpa [#allocation7 + $0x1], 0  ;;  %s4370_s9 = smov 0   ;;  %s4372_s10 = smov 0  }
   0x6   :  { %s4374_s11 = smov 0   ;;  %s4376_s12 = smov 0  }
   0x7   :  { %s4378_s13 = smov 0   ;;  %s4380_s14 = smov 0  }
   0x8 LB: > { %s4057_s15 = sadd.s32 4294967295, %s4336_s14   ;;  %s4058_s16 = sadd.s32 4294967294, %s4336_s14   ;;  %s4336_s14 = sphi %s4380_s14, %s21_s14   ;;  %s4332_s13 = sphi %s4378_s13, %s8595_s13   ;;  %s4328_s12 = sphi %s4376_s12, %s8594_s12   ;;  %s4324_s11 = sphi %s4374_s11, %s8593_s11   ;;  %s4320_s10 = sphi %s4372_s10, %s8592_s10   ;;  %s4316_s9 = sphi %s4370_s9, %s8591_s9  }
   0x9   : > { %s33_s17 = sadd.s32 1, %s4332_s13  ;;  %s42_s18 = sadd.s32 1, %s4324_s11 }
   0xa   : > { %p35_p0 = scmp.ge.s32.totalorder %s33_s17, 2  ;;  %p49_p1 = scmp.ne.s32.totalorder %s4324_s11, %s4320_s10 }
   0xb   : > { %p50_p2 = scmp.eq.s32.totalorder %s4336_s14, 0  ;;  %p55_p3 = scmp.ne.s32.totalorder %s4320_s10, %s4316_s9 }
   0xc   : > { %s8597_s17 = smov (%p35_p0, %s33_s17), 0  ;;  %p56_p5 = scmp.eq.s32.totalorder %s4057_s15, 0 }
   0xd   : > { %p4411_p4 = por %p50_p2, %p49_p1  ;;  %s37_s20 = ssub.s32 %s4332_s13, %s8597_s17 }
   0xe   : > { %p107_p6 = scmp.eq.s32.totalorder %s4057_s15, 1  ;;  %p40_p7 = scmp.eq.s32.totalorder %s37_s20, 0 }
   0xf   : > { %p4417_p8 = por %p56_p5, %p55_p3  ;;  %p113_p10 = scmp.eq.s32.totalorder %s4058_s16, 1 }
  0x10   : > { %p4421_p9 = por %p107_p6, %p49_p1  ;;  %p4094_p13 = scmp.lt.s32.totalorder %s4336_s14, 2 }
  0x11   : > { %s7860_s21 = scalar_select %p4417_p8, 1, 0 }
  0x12   : > { %s7861_s22 = scalar_select %p4421_p9, 1, 0 }
  0x13   : > { %s4426_s23 = scalar_select %p40_p7, %s4324_s11, %s42_s18  }
  0x14   : > { %p4428_p11 = por %p113_p10, %p55_p3  ;;  %s4435_s25 = sand.u32 1, %s4324_s11  }
  0x15   : > { %s4061_s26 = sshll.u32 %s4435_s25, 6  ;;  %s4075_s27 = sshll.u32 %s4332_s13, 10 }
  0x16   : > { %s7862_s24 = scalar_select %p4428_p11, 1, 0 }
  0x17   : > { %s4444_s30 = scalar_lea.hbm %s7725_s0, %s4075_s27  ;;  %s137_s3 = scalar_lea.vmem [#allocation5], %s4061_s26 }
  0x18   : > { %s146_s4 = sshll.u32 %s137_s3, 4  ;;  %p4452_p0 = pnand %p4094_p13, %p4411_p4  ;;  %s4448_s4 = int_to_ptr.vmem [resolvable:$true] %s146_s4 }
  0x19   : > { %s134_s6 = scalar_lea.sflag [#allocation6], %s4435_s25  ;;  %s4190_s7 = scalar_lea.hbm %s4444_s30, 1024 }
  0x1a   : > { %p4191_p2 = scmp.ne.s32.totalorder %s4444_s30, %s4190_s7  ;;  %p4192_p3 = pneg %p4452_p0 }
  0x1b   : > { %s4195_s16 = scalar_lea.hbm %s7725_s0, 2048  ;;  %p4196_p4 = scmp.lt.u32.totalorder %s4444_s30, %s7725_s0 }
  0x1c   : > { %p4193_p5 = pnand %p4192_p3, %p4191_p2  ;;  %p4197_p7 = scmp.lt.u32.totalorder %s4195_s16, %s4190_s7 }
  0x1d   : > { %p4199_p13 = scmp.lt.u32.totalorder %s4190_s7, %s4444_s30 }
  0x1e   : > { %p4194_p6 = pneg %p4193_p5  ;;  %p4198_p10 = por %p4197_p7, %p4196_p4 }
  0x20   : > { %p4200_p12 = por %p4199_p13, %p4198_p10 }
  0x22   : > { %p4201_p1 = pnand %p4200_p12, %p4194_p6 }
  0x24   : > { %4204 = shalt.err (!%p4201_p1)
}
  0x25   : > { %s4205_s20 = scalar_lea.vmem %s4448_s4, 1024  ;;  %s4338_s28 = smov [#allocation5]  }
  0x26   : > { %p4206_p2 = scmp.ne.s32.totalorder %s4448_s4, %s4205_s20  ;;  %s4210_s29 = sshll.u32 %s4338_s28, 4  ;;  %s4211_s29 = int_to_ptr.vmem [resolvable:$false] %s4210_s29 }
  0x27   : > { %s4212_s3 = scalar_lea.vmem %s4211_s29, 2048  ;;  %p4213_p9 = scmp.lt.s32.totalorder %s4448_s4, %s4211_s29 }
  0x28   : > { %p4208_p5 = pnand %p4206_p2, %p4192_p3  ;;  %p4214_p4 = scmp.lt.s32.totalorder %s4212_s3, %s4205_s20 }
  0x2a   : > { %p4209_p11 = pneg %p4208_p5  ;;  %p4215_p7 = por %p4214_p4, %p4213_p9 }
  0x2c   : > { %p4216_p10 = pnand %p4215_p7, %p4209_p11 }
  0x2e   : > { %4219 = shalt.err (!%p4216_p10)
}
  0x2f   : > { %s4339_s7 = smov 128   ;;  %s4340_s8 = smov 8  }
  0x30   : > { %4086 = dma.hbm_to_vmem [thread:$0]  (!%p4452_p0), %s4444_s30, 1024, %s4448_s4, %s134_s6, %s4339_s7, %s4339_s7, %s4340_s8  }
  0x31   : > { %p177_p9 = scmp.lt.s32.totalorder %s4336_s14, 3  ;;  %s4494_s18 = scalar_lea.hbm %s7726_s1, %s4075_s27 }
  0x32   : > { %p7864_p11 = scmp.ge.s32.totalorder %s4336_s14, 1  ;;  %s160_s20 = scalar_lea.vmem [#allocation8], %s4061_s26 }
  0x33   : > { %s169_s28 = sshll.u32 %s160_s20, 4  ;;  %s157_s30 = scalar_lea.sflag [#allocation9], %s4435_s25  ;;  %s4504_s28 = int_to_ptr.vmem [resolvable:$true] %s169_s28 }
  0x34   : > { %p4498_p12 = pnand %p7864_p11, %p177_p9  ;;  %s4220_s4 = scalar_lea.hbm %s4494_s18, 1024 }
  0x35   : > { %p4221_p1 = scmp.ne.s32.totalorder %s4494_s18, %s4220_s4  ;;  %s4225_s29 = scalar_lea.hbm %s7726_s1, 2048 }
  0x36   : > { %p4226_p2 = scmp.lt.u32.totalorder %s4494_s18, %s7726_s1  ;;  %p4227_p5 = scmp.lt.u32.totalorder %s4225_s29, %s4220_s4 }
  0x37   : > { %p4223_p6 = pnand %p4221_p1, %p4192_p3  ;;  %p4229_p7 = scmp.lt.u32.totalorder %s4220_s4, %s4494_s18 }
  0x38   : > { %p4228_p4 = por %p4227_p5, %p4226_p2 }
  0x39   : > { %p4224_p13 = pneg %p4223_p6 }
  0x3a   : > { %p4230_p10 = por %p4229_p7, %p4228_p4 }
  0x3c   : > { %p4231_p9 = pnand %p4230_p10, %p4224_p13 }
  0x3e   : > { %4234 = shalt.err (!%p4231_p9)
}
  0x3f   : > { %s4235_s26 = scalar_lea.vmem %s4504_s28, 1024  ;;  %s4341_s16 = smov [#allocation8]  }
  0x40   : > { %p4236_p11 = scmp.ne.s32.totalorder %s4504_s28, %s4235_s26  ;;  %s4240_s20 = sshll.u32 %s4341_s16, 4  ;;  %s4241_s20 = int_to_ptr.vmem [resolvable:$false] %s4240_s20 }
  0x41   : > { %s4242_s27 = scalar_lea.vmem %s4241_s20, 2048  ;;  %p4243_p8 = scmp.lt.s32.totalorder %s4504_s28, %s4241_s20 }
  0x42   : > { %p4238_p1 = pnand %p4236_p11, %p4192_p3  ;;  %p4244_p2 = scmp.lt.s32.totalorder %s4242_s27, %s4235_s26 }
  0x44   : > { %p4239_p6 = pneg %p4238_p1  ;;  %p4245_p5 = por %p4244_p2, %p4243_p8 }
  0x46   : > { %p4246_p4 = pnand %p4245_p5, %p4239_p6 }
  0x48   : > { %4249 = shalt.err (!%p4246_p4)
}
  0x49   : > { %4089 = dma.hbm_to_vmem [thread:$0]  (!%p4452_p0), %s4494_s18, 1024, %s4504_s28, %s157_s30, %s4339_s7, %s4339_s7, %s4340_s8  }
  0x4a   : > { %181 = sbr.rel (%p4498_p12) target bundleno = 1386 (0x56a), region = 28 }
  0x51   : > { %s4538_s4 = sand.u32 1, %s4320_s10   ;;  %p7866_p8 = scmp.ne.s32.totalorder %s7860_s21, 0 }
  0x52   : > { %s4068_s6 = sshll.u32 %s4538_s4, 6  ;;  %s184_s29 = scalar_lea.sflag [#allocation6], %s4538_s4 }
  0x53   : > { %s4542_s5 = scalar_lea.vmem [#allocation5], %s4068_s6 }
  0x54   : > { %4303 = dma.done.wait (%p7866_p8), %s184_s29, 1024  }
  0x55   : > { %4305 = vsyncadd (%p7866_p8), %s184_s29, 4294966272  ;;  %s193_s25 = scalar_lea.sflag [#allocation9], %s4538_s4  ;;  %s4549_s7 = scalar_lea.vmem [#allocation8], %s4068_s6 }
  0x56   : > { %4307 = dma.done.wait (%p7866_p8), %s193_s25, 1024  }
  0x57   : > { %4309 = vsyncadd (%p7866_p8), %s193_s25, 4294966272  ;;  %v4556_v0 = vld [vmem:[%s4542_s5 + $0x10] sm:$0xff]  ;;  %v4559_v1 = vld [vmem:[%s4542_s5] sm:$0xff]  ;;  %s4342_s21 = smov 127   ;;  %s4343_s8 = smov 126   ;;  %vm670_vm0 = vcmask 48128  }
  0x58   : > { %v4562_v2 = vld [vmem:[%s4542_s5 + $0x18] sm:$0xff]  ;;  %v4565_v3 = vmul.f32 0.007598758, %v4556_v0  ;;  %v4568_v4 = vmul.f32 0.007598758, %v4559_v1  ;;  %v4571_v5 = vld [vmem:[%s4542_s5 + $0x8] sm:$0xff] }
  0x59   : > { %7867 = vst [vmem:[#allocation14_spill] sm:$0xff] %v4571_v5  ;;  %v4578_v6 = vmul.f32 0.007598758, %v4562_v2  ;;  %v4581_v7 = vmul.f32 0.007598758, %v4571_v5  ;;  %v4584_v8 = vld [vmem:[%s4542_s5 + $0x28] sm:$0xff] }
  0x5a   : > { %274 = vrot.lane.b32.xlu1 %v4565_v3, %s4342_s21  ;;  %270 = vrot.lane.b32.xlu0 %v4568_v4, %s4342_s21  ;;  %v4587_v9 = vld [vmem:[%s4542_s5 + $0x20] sm:$0xff]  ;;  %v4594_v10 = vmul.f32 0.007598758, %v4584_v8  ;;  %v4600_v12 = vld [vmem:[%s4542_s5 + $0x38] sm:$0xff]  ;;  %v4620_v16 = vmul.f32 0.036000773, %v4571_v5 }
  0x5b   : > { %v4597_v11 = vmul.f32 0.007598758, %v4587_v9  ;;  %v4603_v13 = vld [vmem:[%s4542_s5 + $0x30] sm:$0xff]  ;;  %v4610_v14 = vmul.f32 0.007598758, %v4600_v12  ;;  %s4344_s18 = smov 125  }
  0x5c   : > { %v4613_v15 = vmul.f32 0.007598758, %v4603_v13  ;;  %v4623_v17 = vmul.f32 0.036000773, %v4559_v1  ;;  %v4630_v18 = vmul.f32 0.036000773, %v4562_v2 }
  0x5d   : > { %v4633_v19 = vmul.f32 0.036000773, %v4556_v0  ;;  %v4640_v20 = vmul.f32 0.036000773, %v4584_v8  ;;  %v4643_v21 = vmul.f32 0.036000773, %v4587_v9 }
  0x5e   : > { %276 = vrot.lane.b32.xlu1 %v4578_v6, %s4342_s21  ;;  %272 = vrot.lane.b32.xlu0 %v4581_v7, %s4342_s21  ;;  %v4650_v22 = vmul.f32 0.036000773, %v4600_v12  ;;  %v4653_v23 = vmul.f32 0.036000773, %v4603_v13  ;;  %v351_v24 = vmul.f32 0.10936069, %v4571_v5 }
  0x5f   : > { %v350_v25 = vmul.f32 0.10936069, %v4559_v1  ;;  %v353_v26 = vmul.f32 0.10936069, %v4562_v2  ;;  %v352_v27 = vmul.f32 0.10936069, %v4556_v0 }
  0x60   : > { %v355_v28 = vmul.f32 0.10936069, %v4584_v8  ;;  %v354_v29 = vmul.f32 0.10936069, %v4587_v9  ;;  %v357_v30 = vmul.f32 0.10936069, %v4600_v12 }
  0x61   : > { %v356_v31 = vmul.f32 0.10936069, %v4603_v13  ;;  %v399_v32 = vmul.f32 0.21300554, %v4571_v5  ;;  %v398_v33 = vmul.f32 0.21300554, %v4559_v1 }
  0x62   : > { %280 = vrot.lane.b32.xlu1 %v4594_v10, %s4342_s21  ;;  %278 = vrot.lane.b32.xlu0 %v4597_v11, %s4342_s21  ;;  %s4345_s19 = smov 124   ;;  %v401_v34 = vmul.f32 0.21300554, %v4562_v2  ;;  %v400_v35 = vmul.f32 0.21300554, %v4556_v0  ;;  %s4346_s28 = smov 123  }
  0x63   : > { %v403_v36 = vmul.f32 0.21300554, %v4584_v8  ;;  %v402_v37 = vmul.f32 0.21300554, %v4587_v9  ;;  %v405_v38 = vmul.f32 0.21300554, %v4600_v12 }
  0x64   : > { %v404_v39 = vmul.f32 0.21300554, %v4603_v13  ;;  %v447_v40 = vmul.f32 0.26601171, %v4571_v5  ;;  %v446_v41 = vmul.f32 0.26601171, %v4559_v1 }
  0x65   : > { %v449_v42 = vmul.f32 0.26601171, %v4562_v2  ;;  %v448_v43 = vmul.f32 0.26601171, %v4556_v0  ;;  %v451_v44 = vmul.f32 0.26601171, %v4584_v8 }
  0x66   : > { %284 = vrot.lane.b32.xlu1 %v4610_v14, %s4342_s21  ;;  %282 = vrot.lane.b32.xlu0 %v4613_v15, %s4342_s21  ;;  %v450_v45 = vmul.f32 0.26601171, %v4587_v9  ;;  %v453_v46 = vmul.f32 0.26601171, %v4600_v12  ;;  %v452_v47 = vmul.f32 0.26601171, %v4603_v13 }
  0x67   : > { %s4347_s30 = smov 122   ;;  %s4348_s3 = smov 121   ;;  %v663_v58 = vld [vmem:[#allocation3 + $0x8] sm:$0x3]  ;;  %vm672_vm1 = vcmask 41984   ;;  %vm688_vm2 = vcmask 48134  }
  0x68   : > { %s4349_s15 = smov 120   ;;  %s4350_s26 = smov 119   ;;  %673 = vst.msk [vmem:[#allocation4 + $0xe] sm:$0x3] %vm672_vm1, %v663_v58  ;;  %v665_v63 = vld [vmem:[#allocation3 + $0x18] sm:$0x3] }
  0x69   : > { %675 = vst.msk [vmem:[#allocation4 + $0x2e] sm:$0x3] %vm672_vm1, %v665_v63  ;;  %s4351_s16 = smov 118   ;;  %vm228_vm3 = vcmask 0   ;;  %s4070_s20 = sshll.u32 %s4538_s4, 3 }
  0x6a   : > { %320 = vrot.lane.b32.xlu1 %v4620_v16, %s4343_s8  ;;  %318 = vrot.lane.b32.xlu0 %v4623_v17, %s4343_s8  ;;  %s221_s27 = scalar_lea.vmem [#allocation10], %s4070_s20  ;;  %s4072_s29 = sshll.u32 %s4328_s12, 7 }
  0x6b   : > { %s3950_s6 = sshll.u32 %s221_s27, 4  ;;  %p8588_p3 = scmp.ne.s32.totalorder %s7861_s22, 0  ;;  %s7673_s6 = int_to_ptr.vmem [resolvable:$true] %s3950_s6 }
  0x6e   : > { %324 = vrot.lane.b32.xlu1 %v4630_v18, %s4343_s8  ;;  %322 = vrot.lane.b32.xlu0 %v4633_v19, %s4343_s8 }
  0x72   : > { %328 = vrot.lane.b32.xlu1 %v4640_v20, %s4343_s8  ;;  %326 = vrot.lane.b32.xlu0 %v4643_v21, %s4343_s8 }
  0x76   : > { %332 = vrot.lane.b32.xlu1 %v4650_v22, %s4343_s8  ;;  %330 = vrot.lane.b32.xlu0 %v4653_v23, %s4343_s8 }
  0x7a   : > { %368 = vrot.lane.b32.xlu1 %v351_v24, %s4344_s18  ;;  %366 = vrot.lane.b32.xlu0 %v350_v25, %s4344_s18 }
  0x7e   : > { %372 = vrot.lane.b32.xlu1 %v353_v26, %s4344_s18  ;;  %370 = vrot.lane.b32.xlu0 %v352_v27, %s4344_s18 }
  0x82   : > { %376 = vrot.lane.b32.xlu1 %v355_v28, %s4344_s18  ;;  %374 = vrot.lane.b32.xlu0 %v354_v29, %s4344_s18 }
  0x86   : > { %380 = vrot.lane.b32.xlu1 %v357_v30, %s4344_s18  ;;  %378 = vrot.lane.b32.xlu0 %v356_v31, %s4344_s18 }
  0x8a   : > { %416 = vrot.lane.b32.xlu1 %v399_v32, %s4345_s19  ;;  %414 = vrot.lane.b32.xlu0 %v398_v33, %s4345_s19 }
  0x8e   : > { %420 = vrot.lane.b32.xlu1 %v401_v34, %s4345_s19  ;;  %418 = vrot.lane.b32.xlu0 %v400_v35, %s4345_s19 }
  0x92   : > { %424 = vrot.lane.b32.xlu1 %v403_v36, %s4345_s19  ;;  %422 = vrot.lane.b32.xlu0 %v402_v37, %s4345_s19 }
  0x96   : > { %428 = vrot.lane.b32.xlu1 %v405_v38, %s4345_s19  ;;  %426 = vrot.lane.b32.xlu0 %v404_v39, %s4345_s19 }
  0x9a   : > { %464 = vrot.lane.b32.xlu1 %v447_v40, %s4346_s28  ;;  %462 = vrot.lane.b32.xlu0 %v446_v41, %s4346_s28 }
  0x9e   : > { %468 = vrot.lane.b32.xlu1 %v449_v42, %s4346_s28  ;;  %466 = vrot.lane.b32.xlu0 %v448_v43, %s4346_s28 }
  0xa2   : > { %472 = vrot.lane.b32.xlu1 %v451_v44, %s4346_s28  ;;  %470 = vrot.lane.b32.xlu0 %v450_v45, %s4346_s28 }
  0xa6   : > { %476 = vrot.lane.b32.xlu1 %v453_v46, %s4346_s28  ;;  %474 = vrot.lane.b32.xlu0 %v452_v47, %s4346_s28 }
  0xaa   : > { %496 = vrot.lane.b32.xlu1 %v399_v32, %s4347_s30  ;;  %494 = vrot.lane.b32.xlu0 %v398_v33, %s4347_s30 }
  0xae   : > { %500 = vrot.lane.b32.xlu1 %v401_v34, %s4347_s30  ;;  %498 = vrot.lane.b32.xlu0 %v400_v35, %s4347_s30  ;;  %v4896_v35 = vld [vmem:[%s4549_s7 + $0x38] sm:$0xff] }
  0xaf   : > { %7882 = vst [vmem:[#allocation29_spill] sm:$0xff] %v4896_v35 }
  0xb2   : > { %504 = vrot.lane.b32.xlu1 %v403_v36, %s4347_s30  ;;  %502 = vrot.lane.b32.xlu0 %v402_v37, %s4347_s30  ;;  %v4899_v36 = vld [vmem:[%s4549_s7 + $0x30] sm:$0xff] }
  0xb3   : > { %7883 = vst [vmem:[#allocation30_spill] sm:$0xff] %v4899_v36  ;;  %v4913_v40 = vmul.f32 0.007598758, %v4899_v36 }
  0xb5   : > { %7885 = vst [vmem:[#allocation32_spill] sm:$0xff] %v4913_v40 }
  0xb6   : > { %508 = vrot.lane.b32.xlu1 %v405_v38, %s4347_s30  ;;  %506 = vrot.lane.b32.xlu0 %v404_v39, %s4347_s30  ;;  %v4910_v39 = vmul.f32 0.007598758, %v4896_v35 }
  0xb8   : > { %7884 = vst [vmem:[#allocation31_spill] sm:$0xff] %v4910_v39 }
  0xba   : > { %528 = vrot.lane.b32.xlu1 %v351_v24, %s4348_s3  ;;  %526 = vrot.lane.b32.xlu0 %v350_v25, %s4348_s3  ;;  %v4856_v24 = vld [vmem:[%s4549_s7 + $0x18] sm:$0xff] }
  0xbb   : > { %7873 = vst [vmem:[#allocation20_spill] sm:$0xff] %v4856_v24  ;;  %v4938_v47 = vmul.f32 0.036000773, %v4856_v24 }
  0xbd   : > { %7892 = vst [vmem:[#allocation39_spill] sm:$0xff] %v4938_v47 }
  0xbe   : > { %532 = vrot.lane.b32.xlu1 %v353_v26, %s4348_s3  ;;  %530 = vrot.lane.b32.xlu0 %v352_v27, %s4348_s3  ;;  %v4870_v27 = vmul.f32 0.007598758, %v4856_v24 }
  0xc0   : > { %7877 = vst [vmem:[#allocation24_spill] sm:$0xff] %v4870_v27 }
  0xc2   : > { %536 = vrot.lane.b32.xlu1 %v355_v28, %s4348_s3  ;;  %534 = vrot.lane.b32.xlu0 %v354_v29, %s4348_s3  ;;  %v4876_v29 = vld [vmem:[%s4549_s7 + $0x28] sm:$0xff] }
  0xc3   : > { %v4890_v33 = vmul.f32 0.007598758, %v4876_v29 }
  0xc5   : > { %7880 = vst [vmem:[#allocation27_spill] sm:$0xff] %v4890_v33 }
  0xc6   : > { %540 = vrot.lane.b32.xlu1 %v357_v30, %s4348_s3  ;;  %538 = vrot.lane.b32.xlu0 %v356_v31, %s4348_s3  ;;  %v4879_v30 = vld [vmem:[%s4549_s7 + $0x20] sm:$0xff] }
  0xc7   : > { %7879 = vst [vmem:[#allocation26_spill] sm:$0xff] %v4879_v30  ;;  %v4893_v34 = vmul.f32 0.007598758, %v4879_v30 }
  0xc9   : > { %7881 = vst [vmem:[#allocation28_spill] sm:$0xff] %v4893_v34 }
  0xca   : > { %560 = vrot.lane.b32.xlu1 %v4620_v16, %s4349_s15  ;;  %558 = vrot.lane.b32.xlu0 %v4623_v17, %s4349_s15  ;;  %v669_v16 = vld [vmem:[#allocation3 + $0x38] sm:$0x3]  ;;  %v4816_v17 = vmul.f32 0.0010283801, %v4584_v8  ;;  %v4836_v8 = vmul.f32 0.0010283801, %v4600_v12 }
  0xcb   : > { %679 = vst.msk [vmem:[#allocation4 + $0x6e] sm:$0x3] %vm672_vm1, %v669_v16  ;;  %v4952_v16 = vmul.f32 0.036000773, %v4876_v29 }
  0xcc   : > { %v4727_v48 = vpop.permute.xlu1 %274  ;;  %v4729_v49 = vpop.permute.xlu0 %270 }
  0xcd   : > { %7894 = vst [vmem:[#allocation41_spill] sm:$0xff] %v4952_v16 }
  0xce   : > { %564 = vrot.lane.b32.xlu1 %v4630_v18, %s4349_s15  ;;  %562 = vrot.lane.b32.xlu0 %v4633_v19, %s4349_s15  ;;  %v4830_v19 = vld [vmem:[%s4549_s7 + $0x8] sm:$0xff] }
  0xcf   : > { %7869 = vst [vmem:[#allocation16_spill] sm:$0xff] %v4830_v19  ;;  %v4924_v43 = vmul.f32 0.036000773, %v4830_v19 }
  0xd0   : > { %v4735_v50 = vpop.permute.xlu1 %276  ;;  %v4737_v51 = vpop.permute.xlu0 %272 }
  0xd1   : > { %7888 = vst [vmem:[#allocation35_spill] sm:$0xff] %v4924_v43 }
  0xd2   : > { %568 = vrot.lane.b32.xlu1 %v4640_v20, %s4349_s15  ;;  %566 = vrot.lane.b32.xlu0 %v4643_v21, %s4349_s15  ;;  %v4833_v20 = vld [vmem:[%s4549_s7] sm:$0xff] }
  0xd3   : > { %7870 = vst [vmem:[#allocation17_spill] sm:$0xff] %v4833_v20  ;;  %v4853_v12 = vmul.f32 0.007598758, %v4833_v20  ;;  %v4927_v44 = vmul.f32 0.036000773, %v4833_v20 }
  0xd4   : > { %v4743_v52 = vpop.permute.xlu1 %280  ;;  %v4745_v53 = vpop.permute.xlu0 %278 }
  0xd5   : > { %7872 = vst [vmem:[#allocation19_spill] sm:$0xff] %v4853_v12  ;;  %7889 = vst [vmem:[#allocation36_spill] sm:$0xff] %v4927_v44 }
  0xd6   : > { %572 = vrot.lane.b32.xlu1 %v4650_v22, %s4349_s15  ;;  %570 = vrot.lane.b32.xlu0 %v4653_v23, %s4349_s15  ;;  %v4850_v23 = vmul.f32 0.007598758, %v4830_v19 }
  0xd8   : > { %v4751_v54 = vpop.permute.xlu1 %284  ;;  %v4753_v55 = vpop.permute.xlu0 %282  ;;  %7871 = vst [vmem:[#allocation18_spill] sm:$0xff] %v4850_v23 }
  0xda   : > { %592 = vrot.lane.b32.xlu1 %v4581_v7, %s4350_s26  ;;  %590 = vrot.lane.b32.xlu0 %v4568_v4, %s4350_s26  ;;  %v4789_v4 = vmul.f32 0.0010283801, %v4571_v5  ;;  %v4955_v5 = vmul.f32 0.036000773, %v4879_v30 }
  0xdc   : > { %v4759_v56 = vpop.permute.xlu1 %320  ;;  %v4761_v57 = vpop.permute.xlu0 %318  ;;  %7895 = vst [vmem:[#allocation42_spill] sm:$0xff] %v4955_v5 }
  0xde   : > { %596 = vrot.lane.b32.xlu1 %v4578_v6, %s4350_s26  ;;  %594 = vrot.lane.b32.xlu0 %v4565_v3, %s4350_s26  ;;  %v4786_v3 = vmul.f32 0.0010283801, %v4559_v1  ;;  %v4801_v1 = vmul.f32 0.0010283801, %v4556_v0  ;;  %v4819_v0 = vmul.f32 0.0010283801, %v4587_v9 }
  0xdf   : > { %v4839_v9 = vmul.f32 0.0010283801, %v4603_v13  ;;  %v4859_v13 = vld [vmem:[%s4549_s7 + $0x10] sm:$0xff] }
  0xe0   : > { %v4768_v59 = vpop.permute.xlu1 %324  ;;  %v4770_v60 = vpop.permute.xlu0 %322  ;;  %7874 = vst [vmem:[#allocation21_spill] sm:$0xff] %v4859_v13  ;;  %v4873_v28 = vmul.f32 0.007598758, %v4859_v13  ;;  %v4941_v58 = vmul.f32 0.036000773, %v4859_v13 }
  0xe2   : > { %600 = vrot.lane.b32.xlu1 %v4594_v10, %s4350_s26  ;;  %598 = vrot.lane.b32.xlu0 %v4597_v11, %s4350_s26  ;;  %v667_v10 = vld [vmem:[#allocation3 + $0x28] sm:$0x3]  ;;  %v4804_v11 = vmul.f32 0.0010283801, %v4562_v2  ;;  %7878 = vst [vmem:[#allocation25_spill] sm:$0xff] %v4873_v28  ;;  %7893 = vst [vmem:[#allocation40_spill] sm:$0xff] %v4941_v58 }
  0xe3   : > { %677 = vst.msk [vmem:[#allocation4 + $0x4e] sm:$0x3] %vm672_vm1, %v667_v10 }
  0xe4   : > { %v4776_v61 = vpop.permute.xlu1 %328  ;;  %v4778_v62 = vpop.permute.xlu0 %326 }
  0xe6   : > { %604 = vrot.lane.b32.xlu1 %v4610_v14, %s4350_s26  ;;  %602 = vrot.lane.b32.xlu0 %v4613_v15, %s4350_s26 }
  0xe8   : > { %v4791_v6 = vpop.permute.xlu1 %332  ;;  %v4793_v7 = vpop.permute.xlu0 %330 }
  0xe9   : > { %7868 = vst [vmem:[#allocation15_spill] sm:$0xff] %v4793_v7 }
  0xea   : > { %632 = vrot.lane.b32.xlu1 %v4789_v4, %s4351_s16  ;;  %630 = vrot.lane.b32.xlu0 %v4786_v3, %s4351_s16 }
  0xec   : > { %v4806_v14 = vpop.permute.xlu1 %368  ;;  %v4808_v15 = vpop.permute.xlu0 %366 }
  0xee   : > { %636 = vrot.lane.b32.xlu1 %v4804_v11, %s4351_s16  ;;  %634 = vrot.lane.b32.xlu0 %v4801_v1, %s4351_s16 }
  0xf0   : > { %v4821_v2 = vpop.permute.xlu1 %372  ;;  %v4823_v18 = vpop.permute.xlu0 %370 }
  0xf2   : > { %640 = vrot.lane.b32.xlu1 %v4816_v17, %s4351_s16  ;;  %638 = vrot.lane.b32.xlu0 %v4819_v0, %s4351_s16 }
  0xf4   : > { %v4841_v21 = vpop.permute.xlu1 %376  ;;  %v4843_v22 = vpop.permute.xlu0 %374 }
  0xf6   : > { %644 = vrot.lane.b32.xlu1 %v4836_v8, %s4351_s16  ;;  %642 = vrot.lane.b32.xlu0 %v4839_v9, %s4351_s16 }
  0xf8   : > { %v4861_v25 = vpop.permute.xlu1 %380  ;;  %v4863_v26 = vpop.permute.xlu0 %378 }
  0xf9   : > { %7875 = vst [vmem:[#allocation22_spill] sm:$0xff] %v4861_v25  ;;  %7876 = vst [vmem:[#allocation23_spill] sm:$0xff] %v4863_v26  ;;  %v5060_v26 = vmul.f32 0.21300554, %v4896_v35 }
  0xfa   : > { %963 = vrot.lane.b32.xlu1 %v4850_v23, %s4342_s21  ;;  %961 = vrot.lane.b32.xlu0 %v4853_v12, %s4342_s21  ;;  %v4980_v12 = vmul.f32 0.10936069, %v4830_v19  ;;  %v4983_v23 = vmul.f32 0.10936069, %v4833_v20 }
  0xfc   : > { %v4881_v31 = vpop.permute.xlu1 %416  ;;  %v4883_v32 = vpop.permute.xlu0 %414  ;;  %7900 = vst [vmem:[#allocation47_spill] sm:$0xff] %v4980_v12  ;;  %7901 = vst [vmem:[#allocation48_spill] sm:$0xff] %v4983_v23 }
  0xfe   : > { %967 = vrot.lane.b32.xlu1 %v4870_v27, %s4342_s21  ;;  %965 = vrot.lane.b32.xlu0 %v4873_v28, %s4342_s21 }
 0x100   : > { %v4901_v37 = vpop.permute.xlu1 %420  ;;  %v4903_v38 = vpop.permute.xlu0 %418 }
 0x102   : > { %971 = vrot.lane.b32.xlu1 %v4890_v33, %s4342_s21  ;;  %969 = vrot.lane.b32.xlu0 %v4893_v34, %s4342_s21  ;;  %v4966_v34 = vmul.f32 0.036000773, %v4896_v35  ;;  %v4969_v33 = vmul.f32 0.036000773, %v4899_v36 }
 0x104   : > { %v4915_v41 = vpop.permute.xlu1 %424  ;;  %v4917_v42 = vpop.permute.xlu0 %422  ;;  %7896 = vst [vmem:[#allocation43_spill] sm:$0xff] %v4966_v34  ;;  %7897 = vst [vmem:[#allocation44_spill] sm:$0xff] %v4969_v33 }
 0x105   : > { %7886 = vst [vmem:[#allocation33_spill] sm:$0xff] %v4915_v41  ;;  %7887 = vst [vmem:[#allocation34_spill] sm:$0xff] %v4917_v42 }
 0x106   : > { %975 = vrot.lane.b32.xlu1 %v4910_v39, %s4342_s21  ;;  %973 = vrot.lane.b32.xlu0 %v4913_v40, %s4342_s21 }
 0x108   : > { %v4929_v45 = vpop.permute.xlu1 %428  ;;  %v4931_v46 = vpop.permute.xlu0 %426 }
 0x109   : > { %7890 = vst [vmem:[#allocation37_spill] sm:$0xff] %v4929_v45  ;;  %7891 = vst [vmem:[#allocation38_spill] sm:$0xff] %v4931_v46 }
 0x10a   : > { %1011 = vrot.lane.b32.xlu1 %v4924_v43, %s4343_s8  ;;  %1009 = vrot.lane.b32.xlu0 %v4927_v44, %s4343_s8  ;;  %v5008_v44 = vmul.f32 0.10936069, %v4876_v29  ;;  %v5011_v43 = vmul.f32 0.10936069, %v4879_v30 }
 0x10c   : > { %v4943_v63 = vpop.permute.xlu1 %464  ;;  %v4945_v10 = vpop.permute.xlu0 %462  ;;  %7906 = vst [vmem:[#allocation53_spill] sm:$0xff] %v5008_v44  ;;  %7907 = vst [vmem:[#allocation54_spill] sm:$0xff] %v5011_v43 }
 0x10e   : > { %1015 = vrot.lane.b32.xlu1 %v4938_v47, %s4343_s8  ;;  %1013 = vrot.lane.b32.xlu0 %v4941_v58, %s4343_s8 }
 0x110   : > { %v4957_v40 = vpop.permute.xlu1 %468  ;;  %v4959_v39 = vpop.permute.xlu0 %466 }
 0x112   : > { %1019 = vrot.lane.b32.xlu1 %v4952_v16, %s4343_s8  ;;  %1017 = vrot.lane.b32.xlu0 %v4955_v5, %s4343_s8 }
 0x114   : > { %v4971_v28 = vpop.permute.xlu1 %472  ;;  %v4973_v27 = vpop.permute.xlu0 %470 }
 0x115   : > { %7898 = vst [vmem:[#allocation45_spill] sm:$0xff] %v4971_v28  ;;  %7899 = vst [vmem:[#allocation46_spill] sm:$0xff] %v4973_v27 }
 0x116   : > { %1023 = vrot.lane.b32.xlu1 %v4966_v34, %s4343_s8  ;;  %1021 = vrot.lane.b32.xlu0 %v4969_v33, %s4343_s8  ;;  %v4994_v34 = vmul.f32 0.10936069, %v4856_v24  ;;  %v4997_v33 = vmul.f32 0.10936069, %v4859_v13 }
 0x118   : > { %v4985_v5 = vpop.permute.xlu1 %476  ;;  %v4987_v16 = vpop.permute.xlu0 %474  ;;  %7904 = vst [vmem:[#allocation51_spill] sm:$0xff] %v4994_v34  ;;  %7905 = vst [vmem:[#allocation52_spill] sm:$0xff] %v4997_v33 }
 0x119   : > { %7902 = vst [vmem:[#allocation49_spill] sm:$0xff] %v4985_v5  ;;  %7903 = vst [vmem:[#allocation50_spill] sm:$0xff] %v4987_v16 }
 0x11a   : > { %1059 = vrot.lane.b32.xlu1 %v4980_v12, %s4344_s18  ;;  %1057 = vrot.lane.b32.xlu0 %v4983_v23, %s4344_s18 }
 0x11c   : > { %v4999_v58 = vpop.permute.xlu1 %496  ;;  %v5001_v47 = vpop.permute.xlu0 %494 }
 0x11e   : > { %1063 = vrot.lane.b32.xlu1 %v4994_v34, %s4344_s18  ;;  %1061 = vrot.lane.b32.xlu0 %v4997_v33, %s4344_s18  ;;  %v5022_v34 = vmul.f32 0.10936069, %v4896_v35  ;;  %v5025_v33 = vmul.f32 0.10936069, %v4899_v36 }
 0x120   : > { %v5013_v16 = vpop.permute.xlu1 %500  ;;  %v5015_v5 = vpop.permute.xlu0 %498  ;;  %7910 = vst [vmem:[#allocation57_spill] sm:$0xff] %v5022_v34  ;;  %7911 = vst [vmem:[#allocation58_spill] sm:$0xff] %v5025_v33 }
 0x121   : > { %7908 = vst [vmem:[#allocation55_spill] sm:$0xff] %v5013_v16  ;;  %7909 = vst [vmem:[#allocation56_spill] sm:$0xff] %v5015_v5  ;;  %v5063_v5 = vmul.f32 0.21300554, %v4899_v36 }
 0x122   : > { %1067 = vrot.lane.b32.xlu1 %v5008_v44, %s4344_s18  ;;  %1065 = vrot.lane.b32.xlu0 %v5011_v43, %s4344_s18  ;;  %v1090_v44 = vmul.f32 0.21300554, %v4830_v19  ;;  %v1089_v43 = vmul.f32 0.21300554, %v4833_v20 }
 0x124   : > { %v5027_v46 = vpop.permute.xlu1 %504  ;;  %v5029_v45 = vpop.permute.xlu0 %502 }
 0x125   : > { %7912 = vst [vmem:[#allocation59_spill] sm:$0xff] %v5027_v46  ;;  %7913 = vst [vmem:[#allocation60_spill] sm:$0xff] %v5029_v45  ;;  %v1092_v45 = vmul.f32 0.21300554, %v4856_v24  ;;  %v1091_v46 = vmul.f32 0.21300554, %v4859_v13 }
 0x126   : > { %1071 = vrot.lane.b32.xlu1 %v5022_v34, %s4344_s18  ;;  %1069 = vrot.lane.b32.xlu0 %v5025_v33, %s4344_s18  ;;  %v1094_v33 = vmul.f32 0.21300554, %v4876_v29 }
 0x128   : > { %v5037_v23 = vpop.permute.xlu1 %508  ;;  %v5039_v12 = vpop.permute.xlu0 %506 }
 0x129   : > { %7914 = vst [vmem:[#allocation61_spill] sm:$0xff] %v5037_v23  ;;  %7915 = vst [vmem:[#allocation62_spill] sm:$0xff] %v5039_v12  ;;  %v1093_v12 = vmul.f32 0.21300554, %v4879_v30 }
 0x12a   : > { %1107 = vrot.lane.b32.xlu1 %v1090_v44, %s4345_s19  ;;  %1105 = vrot.lane.b32.xlu0 %v1089_v43, %s4345_s19 }
 0x12c   : > { %v5045_v34 = vpop.permute.xlu1 %528  ;;  %v5047_v27 = vpop.permute.xlu0 %526 }
 0x12d   : > { %7916 = vst [vmem:[#allocation63_spill] sm:$0xff] %v5047_v27 }
 0x12e   : > { %1111 = vrot.lane.b32.xlu1 %v1092_v45, %s4345_s19  ;;  %1109 = vrot.lane.b32.xlu0 %v1091_v46, %s4345_s19 }
 0x130   : > { %v5053_v23 = vpop.permute.xlu1 %532  ;;  %v5055_v28 = vpop.permute.xlu0 %530 }
 0x131   : > { %7917 = vst [vmem:[#allocation64_spill] sm:$0xff] %v5053_v23  ;;  %7918 = vst [vmem:[#allocation65_spill] sm:$0xff] %v5055_v28  ;;  %v1138_v28 = vmul.f32 0.26601171, %v4830_v19  ;;  %v1137_v23 = vmul.f32 0.26601171, %v4833_v20 }
 0x132   : > { %1115 = vrot.lane.b32.xlu1 %v1094_v33, %s4345_s19  ;;  %1113 = vrot.lane.b32.xlu0 %v1093_v12, %s4345_s19  ;;  %v1142_v20 = vmul.f32 0.26601171, %v4876_v29  ;;  %v1141_v19 = vmul.f32 0.26601171, %v4879_v30 }
 0x134   : > { %v5065_v16 = vpop.permute.xlu1 %536  ;;  %v5067_v42 = vpop.permute.xlu0 %534 }
 0x135   : > { %7919 = vst [vmem:[#allocation66_spill] sm:$0xff] %v5065_v16  ;;  %7920 = vst [vmem:[#allocation67_spill] sm:$0xff] %v5067_v42  ;;  %v1140_v42 = vmul.f32 0.26601171, %v4856_v24  ;;  %v1139_v16 = vmul.f32 0.26601171, %v4859_v13 }
 0x136   : > { %1119 = vrot.lane.b32.xlu1 %v5060_v26, %s4345_s19  ;;  %1117 = vrot.lane.b32.xlu0 %v5063_v5, %s4345_s19  ;;  %v1143_v13 = vmul.f32 0.26601171, %v4899_v36 }
 0x138   : > { %v5075_v41 = vpop.permute.xlu1 %540  ;;  %v5077_v25 = vpop.permute.xlu0 %538 }
 0x139   : > { %7921 = vst [vmem:[#allocation68_spill] sm:$0xff] %v5077_v25 }
 0x13a   : > { %1155 = vrot.lane.b32.xlu1 %v1138_v28, %s4346_s28  ;;  %1153 = vrot.lane.b32.xlu0 %v1137_v23, %s4346_s28  ;;  %v1144_v23 = vmul.f32 0.26601171, %v4896_v35 }
 0x13c   : > { %v5083_v7 = vpop.permute.xlu1 %560  ;;  %v5085_v27 = vpop.permute.xlu0 %558 }
 0x13e   : > { %1159 = vrot.lane.b32.xlu1 %v1140_v42, %s4346_s28  ;;  %1157 = vrot.lane.b32.xlu0 %v1139_v16, %s4346_s28 }
 0x140   : > { %v5091_v25 = vpop.permute.xlu1 %564  ;;  %v5093_v28 = vpop.permute.xlu0 %562 }
 0x142   : > { %1163 = vrot.lane.b32.xlu1 %v1142_v20, %s4346_s28  ;;  %1161 = vrot.lane.b32.xlu0 %v1141_v19, %s4346_s28  ;;  %v294_v19 = vadd.f32 %v4729_v49, %v4786_v3  ;;  %v295_v20 = vadd.f32 %v4737_v51, %v4789_v4 }
 0x144   : > { %v5099_v24 = vpop.permute.xlu1 %568  ;;  %v5101_v42 = vpop.permute.xlu0 %566 }
 0x146   : > { %1167 = vrot.lane.b32.xlu1 %v1144_v23, %s4346_s28  ;;  %1165 = vrot.lane.b32.xlu0 %v1143_v13, %s4346_s28  ;;  %v343_v23 = vadd.f32 %v4759_v56, %v295_v20  ;;  %v342_v13 = vadd.f32 %v4761_v57, %v294_v19  ;;  %v7928_v19 = vld [vmem:[#allocation56_spill] sm:$0xff] }
 0x148   : > { %v5105_v16 = vpop.permute.xlu1 %572  ;;  %v5107_v30 = vpop.permute.xlu0 %570  ;;  %v391_v49 = vadd.f32 %v4806_v14, %v343_v23  ;;  %v390_v51 = vadd.f32 %v4808_v15, %v342_v13  ;;  %v301_v14 = vadd.f32 %v4751_v54, %v4836_v8  ;;  %v7929_v23 = vld [vmem:[#allocation23_spill] sm:$0xff] }
 0x14a   : > { %1187 = vrot.lane.b32.xlu1 %v1090_v44, %s4347_s30  ;;  %1185 = vrot.lane.b32.xlu0 %v1089_v43, %s4347_s30  ;;  %v296_v44 = vadd.f32 %v4727_v48, %v4801_v1  ;;  %v297_v43 = vadd.f32 %v4735_v50, %v4804_v11  ;;  %v299_v48 = vadd.f32 %v4743_v52, %v4816_v17 }
 0x14b   : > { %v298_v50 = vadd.f32 %v4745_v53, %v4819_v0  ;;  %v300_v52 = vadd.f32 %v4753_v55, %v4839_v9  ;;  %v349_v54 = vadd.f32 %v4791_v6, %v301_v14  ;;  %v7938_v14 = vld [vmem:[#allocation59_spill] sm:$0xff] }
 0x14c   : > { %v593_v36 = vpop.permute.xlu1 %592  ;;  %v591_v35 = vpop.permute.xlu0 %590  ;;  %v345_v56 = vadd.f32 %v4768_v59, %v297_v43  ;;  %v344_v57 = vadd.f32 %v4770_v60, %v296_v44  ;;  %v347_v53 = vadd.f32 %v4776_v61, %v299_v48  ;;  %v7930_v44 = vld [vmem:[#allocation45_spill] sm:$0xff] }
 0x14d   : > { %v346_v15 = vadd.f32 %v4778_v62, %v298_v50  ;;  %v7935_v48 = vld [vmem:[#allocation65_spill] sm:$0xff] }
 0x14e   : > { %1191 = vrot.lane.b32.xlu1 %v1092_v45, %s4347_s30  ;;  %1189 = vrot.lane.b32.xlu0 %v1091_v46, %s4347_s30  ;;  %v439_v45 = vadd.f32 %v4881_v31, %v391_v49  ;;  %v438_v46 = vadd.f32 %v4883_v32, %v390_v51  ;;  %v393_v1 = vadd.f32 %v4821_v2, %v345_v56  ;;  %v7922_v32 = vld [vmem:[#allocation63_spill] sm:$0xff]  ;;  %v7931_v49 = vld [vmem:[#allocation46_spill] sm:$0xff] }
 0x14f   : > { %v392_v59 = vadd.f32 %v4823_v18, %v344_v57  ;;  %v395_v55 = vadd.f32 %v4841_v21, %v347_v53  ;;  %v394_v61 = vadd.f32 %v4843_v22, %v346_v15  ;;  %v7932_v56 = vld [vmem:[#allocation47_spill] sm:$0xff]  ;;  %v7933_v57 = vld [vmem:[#allocation48_spill] sm:$0xff] }
 0x150   : > { %v5125_v3 = vpop.permute.xlu1 %596  ;;  %v5127_v4 = vpop.permute.xlu0 %594  ;;  %v487_v60 = vadd.f32 %v4943_v63, %v439_v45  ;;  %v486_v11 = vadd.f32 %v4945_v10, %v438_v46  ;;  %v441_v2 = vadd.f32 %v4901_v37, %v393_v1  ;;  %v7923_v37 = vld [vmem:[#allocation15_spill] sm:$0xff]  ;;  %v7934_v45 = vld [vmem:[#allocation64_spill] sm:$0xff] }
 0x151   : > { %v440_v18 = vadd.f32 %v4903_v38, %v392_v59  ;;  %v348_v6 = vadd.f32 %v7923_v37, %v300_v52  ;;  %v7924_v38 = vld [vmem:[#allocation22_spill] sm:$0xff]  ;;  %v7939_v53 = vld [vmem:[#allocation60_spill] sm:$0xff]  ;;  %v7945_v37 = vld [vmem:[#allocation67_spill] sm:$0xff] }
 0x152   : > { %1195 = vrot.lane.b32.xlu1 %v1094_v33, %s4347_s30  ;;  %1193 = vrot.lane.b32.xlu0 %v1093_v12, %s4347_s30  ;;  %v519_v12 = vadd.f32 %v4999_v58, %v487_v60  ;;  %v518_v31 = vadd.f32 %v5001_v47, %v486_v11  ;;  %v489_v62 = vadd.f32 %v4957_v40, %v441_v2  ;;  %v7925_v47 = vld [vmem:[#allocation33_spill] sm:$0xff]  ;;  %v7926_v58 = vld [vmem:[#allocation34_spill] sm:$0xff] }
 0x153   : > { %v488_v8 = vadd.f32 %v4959_v39, %v440_v18  ;;  %v397_v21 = vadd.f32 %v7924_v38, %v349_v54  ;;  %v443_v22 = vadd.f32 %v7925_v47, %v395_v55  ;;  %v442_v63 = vadd.f32 %v7926_v58, %v394_v61  ;;  %v7937_v60 = vld [vmem:[#allocation38_spill] sm:$0xff]  ;;  %v7940_v61 = vld [vmem:[#allocation49_spill] sm:$0xff] }
 0x154   : > { %v5149_v17 = vpop.permute.xlu1 %600  ;;  %v5151_v0 = vpop.permute.xlu0 %598  ;;  %v551_v9 = vadd.f32 %v5045_v34, %v519_v12  ;;  %v550_v33 = vadd.f32 %v7922_v32, %v518_v31  ;;  %v396_v13 = vadd.f32 %v7929_v23, %v348_v6  ;;  %v7944_v32 = vld [vmem:[#allocation66_spill] sm:$0xff]  ;;  %v7946_v38 = vld [vmem:[#allocation61_spill] sm:$0xff] }
 0x155   : > { %v520_v39 = vadd.f32 %v7928_v19, %v488_v8  ;;  %v491_v43 = vadd.f32 %v7930_v44, %v443_v22  ;;  %v490_v51 = vadd.f32 %v7931_v49, %v442_v63  ;;  %v7942_v8 = vld [vmem:[#allocation51_spill] sm:$0xff]  ;;  %v7947_v47 = vld [vmem:[#allocation62_spill] sm:$0xff]  ;;  %v7948_v19 = vld [vmem:[#allocation53_spill] sm:$0xff] }
 0x156   : > { %1199 = vrot.lane.b32.xlu1 %v5060_v26, %s4347_s30  ;;  %1197 = vrot.lane.b32.xlu0 %v5063_v5, %s4347_s30  ;;  %v7927_v5 = vld [vmem:[#allocation55_spill] sm:$0xff]  ;;  %v583_v34 = vadd.f32 %v5083_v7, %v551_v9  ;;  %v582_v20 = vadd.f32 %v5085_v27, %v550_v33  ;;  %v7936_v27 = vld [vmem:[#allocation37_spill] sm:$0xff]  ;;  %v444_v11 = vadd.f32 %v7937_v60, %v396_v13  ;;  %v7943_v9 = vld [vmem:[#allocation52_spill] sm:$0xff] }
 0x157   : > { %v521_v40 = vadd.f32 %v7927_v5, %v489_v62  ;;  %v552_v50 = vadd.f32 %v7935_v48, %v520_v39  ;;  %v445_v59 = vadd.f32 %v7936_v27, %v397_v21  ;;  %v523_v52 = vadd.f32 %v7938_v14, %v491_v43  ;;  %v7949_v39 = vld [vmem:[#allocation54_spill] sm:$0xff]  ;;  %v7953_v48 = vld [vmem:[#allocation35_spill] sm:$0xff]  ;;  %v7957_v60 = vld [vmem:[#allocation41_spill] sm:$0xff] }
 0x158   : > { %v5172_v26 = vpop.permute.xlu1 %604  ;;  %v5174_v10 = vpop.permute.xlu0 %602  ;;  %v615_v7 = vadd.f32 %v593_v36, %v583_v34  ;;  %v614_v1 = vadd.f32 %v591_v35, %v582_v20  ;;  %v522_v15 = vadd.f32 %v7939_v53, %v490_v51  ;;  %v7941_v36 = vld [vmem:[#allocation50_spill] sm:$0xff]  ;;  %v7950_v20 = vld [vmem:[#allocation68_spill] sm:$0xff]  ;;  %v7959_v53 = vld [vmem:[#allocation43_spill] sm:$0xff] }
 0x159   : > { %v553_v46 = vadd.f32 %v7934_v45, %v521_v40  ;;  %v584_v31 = vadd.f32 %v5093_v28, %v552_v50  ;;  %v493_v62 = vadd.f32 %v7940_v61, %v445_v59  ;;  %v492_v35 = vadd.f32 %v7941_v36, %v444_v11  ;;  %v7954_v50 = vld [vmem:[#allocation36_spill] sm:$0xff]  ;;  %v7958_v11 = vld [vmem:[#allocation42_spill] sm:$0xff]  ;;  %v1355_v36 = vld [vmem:[#allocation3 + $0x48] sm:$0x3] }
 0x15a   : > { %1219 = vrot.lane.b32.xlu1 %v7932_v56, %s4348_s3  ;;  %1217 = vrot.lane.b32.xlu0 %v7933_v57, %s4348_s3  ;;  %v555_v33 = vadd.f32 %v7944_v32, %v523_v52  ;;  %v554_v6 = vadd.f32 %v7945_v37, %v522_v15  ;;  %v7960_v15 = vld [vmem:[#allocation44_spill] sm:$0xff] }
 0x15b   : > { %v585_v12 = vadd.f32 %v5091_v25, %v553_v46  ;;  %v616_v28 = vadd.f32 %v5127_v4, %v584_v31  ;;  %v525_v21 = vadd.f32 %v7946_v38, %v493_v62  ;;  %v524_v22 = vadd.f32 %v7947_v47, %v492_v35  ;;  %v7962_v31 = vld [vmem:[#allocation19_spill] sm:$0xff]  ;;  %v7965_v35 = vld [vmem:[#allocation24_spill] sm:$0xff] }
 0x15c   : > { %v633_v2 = vpop.permute.xlu1 %632  ;;  %v631_v18 = vpop.permute.xlu0 %630  ;;  %v587_v5 = vadd.f32 %v5099_v24, %v555_v33 }
 0x15d   : > { %v655_v54 = vadd.f32 %v633_v2, %v615_v7  ;;  %v654_v55 = vadd.f32 %v631_v18, %v614_v1  ;;  %v617_v25 = vadd.f32 %v5125_v3, %v585_v12  ;;  %v586_v3 = vadd.f32 %v5101_v42, %v554_v6  ;;  %v7955_v7 = vld [vmem:[#allocation39_spill] sm:$0xff]  ;;  %v7956_v1 = vld [vmem:[#allocation40_spill] sm:$0xff]  ;;  %v7961_v12 = vld [vmem:[#allocation18_spill] sm:$0xff] }
 0x15e   : > { %1223 = vrot.lane.b32.xlu1 %v7942_v8, %s4348_s3  ;;  %1221 = vrot.lane.b32.xlu0 %v7943_v9, %s4348_s3  ;;  %v557_v34 = vadd.f32 %v5075_v41, %v525_v21  ;;  %v556_v23 = vadd.f32 %v7950_v20, %v524_v22  ;;  %v619_v13 = vadd.f32 %v5149_v17, %v587_v5  ;;  %v7951_v17 = vld [vmem:[#allocation57_spill] sm:$0xff]  ;;  %v1357_v6 = vld [vmem:[#allocation3 + $0x58] sm:$0x3]  ;;  %v7974_v5 = vld [vmem:[#allocation32_spill] sm:$0xff] }
 0x15f   : > { %681 = vst.msk [vmem:[#allocation4 + $0x18] sm:$0xff] %vm670_vm0, %v655_v54  ;;  %690 = vst.msk [vmem:[#allocation3 + $0x2] sm:$0xff] %vm670_vm0, %v655_v54  ;;  %v618_v44 = vadd.f32 %v5151_v0, %v586_v3  ;;  %v7952_v0 = vld [vmem:[#allocation58_spill] sm:$0xff]  ;;  %v7966_v8 = vld [vmem:[#allocation25_spill] sm:$0xff] }
 0x160   : > { %680 = vst.msk [vmem:[#allocation4 + $0x10] sm:$0xff] %vm670_vm0, %v654_v55  ;;  %v637_v58 = vpop.permute.xlu1 %636  ;;  %v635_v63 = vpop.permute.xlu0 %634  ;;  %v589_v43 = vadd.f32 %v5105_v16, %v557_v34  ;;  %v588_v41 = vadd.f32 %v5107_v30, %v556_v23 }
 0x161   : > { %689 = vst.msk [vmem:[#allocation3 - $0x6] sm:$0xc0] %vm688_vm2, %v654_v55  ;;  %v657_v40 = vadd.f32 %v637_v58, %v617_v25  ;;  %v656_v4 = vadd.f32 %v635_v63, %v616_v28  ;;  %v7969_v25 = vld [vmem:[#allocation27_spill] sm:$0xff]  ;;  %v7970_v28 = vld [vmem:[#allocation28_spill] sm:$0xff]  ;;  %v1359_v58 = vld [vmem:[#allocation3 + $0x68] sm:$0x3] }
 0x162   : > { %1227 = vrot.lane.b32.xlu1 %v7948_v19, %s4348_s3  ;;  %1225 = vrot.lane.b32.xlu0 %v7949_v39, %s4348_s3  ;;  %v621_v56 = vadd.f32 %v5172_v26, %v589_v43  ;;  %v620_v57 = vadd.f32 %v5174_v10, %v588_v41  ;;  %v7973_v63 = vld [vmem:[#allocation31_spill] sm:$0xff]  ;;  %v7977_v19 = vld [vmem:[#allocation17_spill] sm:$0xff] }
 0x163   : > { %683 = vst.msk [vmem:[#allocation4 + $0x38] sm:$0xff] %vm670_vm0, %v657_v40  ;;  %692 = vst.msk [vmem:[#allocation3 + $0x12] sm:$0xff] %vm670_vm0, %v657_v40  ;;  %v7976_v40 = vld [vmem:[#allocation16_spill] sm:$0xff]  ;;  %v5322_v39 = vmul.f32 0.0010283801, %v7977_v19 }
 0x164   : > { %682 = vst.msk [vmem:[#allocation4 + $0x30] sm:$0xff] %vm670_vm0, %v656_v4  ;;  %v641_v24 = vpop.permute.xlu1 %640  ;;  %v639_v42 = vpop.permute.xlu0 %638 }
 0x165   : > { %691 = vst.msk [vmem:[#allocation3 + $0xa] sm:$0xc0] %vm688_vm2, %v656_v4  ;;  %v659_v49 = vadd.f32 %v641_v24, %v619_v13  ;;  %v658_v51 = vadd.f32 %v639_v42, %v618_v44  ;;  %v5319_v4 = vmul.f32 0.0010283801, %v7976_v40  ;;  %v1361_v13 = vld [vmem:[#allocation3 + $0x78] sm:$0x3] }
 0x166   : > { %1231 = vrot.lane.b32.xlu1 %v7951_v17, %s4348_s3  ;;  %1229 = vrot.lane.b32.xlu0 %v7952_v0, %s4348_s3  ;;  %v7980_v44 = vld [vmem:[#allocation20_spill] sm:$0xff]  ;;  %v7981_v42 = vld [vmem:[#allocation21_spill] sm:$0xff]  ;;  %v7982_v17 = vld [vmem:[#allocation26_spill] sm:$0xff] }
 0x167   : > { %685 = vst.msk [vmem:[#allocation4 + $0x58] sm:$0xff] %vm670_vm0, %v659_v49  ;;  %694 = vst.msk [vmem:[#allocation3 + $0x22] sm:$0xff] %vm670_vm0, %v659_v49  ;;  %v5277_v54 = vld [vmem:[#allocation4 + $0xe] sm:$0xff]  ;;  %v5336_v24 = vmul.f32 0.0010283801, %v7980_v44 }
 0x168   : > { %684 = vst.msk [vmem:[#allocation4 + $0x50] sm:$0xff] %vm670_vm0, %v658_v51  ;;  %v645_v30 = vpop.permute.xlu1 %644  ;;  %v643_v16 = vpop.permute.xlu0 %642  ;;  %7963 = vst [vmem:[#allocation63_spill] sm:$0xff] %v5277_v54  ;;  %v5283_v62 = vld [vmem:[#allocation4 + $0xf] sm:$0xff]  ;;  %v5339_v43 = vmul.f32 0.0010283801, %v7981_v42  ;;  %v4172_v42 = vld [vmem:[%s4542_s5 + $0x38] sm:$0xff] }
 0x169   : > { %693 = vst.msk [vmem:[#allocation3 + $0x1a] sm:$0xc0] %vm688_vm2, %v658_v51  ;;  %v661_v45 = vadd.f32 %v645_v30, %v621_v56  ;;  %v660_v46 = vadd.f32 %v643_v16, %v620_v57  ;;  %7964 = vst [vmem:[#allocation15_spill] sm:$0xff] %v5283_v62  ;;  %v5350_v51 = vmul.f32 0.0010283801, %v4876_v29  ;;  %v7983_v30 = vld [vmem:[#allocation14_spill] sm:$0xff] }
 0x16a   : > { %1251 = vrot.lane.b32.xlu1 %v7953_v48, %s4349_s15  ;;  %1249 = vrot.lane.b32.xlu0 %v7954_v50, %s4349_s15  ;;  %1363 = vst.msk [vmem:[#allocation4 + $0xe] sm:$0x3] %vm672_vm1, %v1355_v36  ;;  %v5353_v0 = vmul.f32 0.0010283801, %v7982_v17  ;;  %v5365_v16 = vmul.f32 %v7983_v30, %v7983_v30  ;;  %v4167_v29 = vld [vmem:[%s4542_s5] sm:$0xff]  ;;  %v7987_v50 = vld [vmem:[#allocation30_spill] sm:$0xff]  ;;  %v5431_v17 = vmul.f32 %v4172_v42, %v4172_v42 }
 0x16b   : > { %687 = vst.msk [vmem:[#allocation4 + $0x78] sm:$0xff] %vm670_vm0, %v661_v45  ;;  %696 = vst.msk [vmem:[#allocation3 + $0x32] sm:$0xff] %vm670_vm0, %v661_v45  ;;  %v5290_v9 = vld [vmem:[#allocation4 + $0x2e] sm:$0xff]  ;;  %v5368_v45 = vmul.f32 %v4167_v29, %v4167_v29 }
 0x16c   : > { %686 = vst.msk [vmem:[#allocation4 + $0x70] sm:$0xff] %vm670_vm0, %v660_v46  ;;  %v5245_v26 = vpop.permute.xlu1 %963  ;;  %v5247_v10 = vpop.permute.xlu0 %961  ;;  %7967 = vst [vmem:[#allocation22_spill] sm:$0xff] %v5290_v9  ;;  %v5296_v37 = vld [vmem:[#allocation4 + $0x2f] sm:$0xff]  ;;  %v5459_v42 = vmul.f32 0.036000773, %v5365_v16 }
 0x16d   : > { %695 = vst.msk [vmem:[#allocation3 + $0x2a] sm:$0xc0] %vm688_vm2, %v660_v46  ;;  %7968 = vst [vmem:[#allocation33_spill] sm:$0xff] %v5296_v37  ;;  %v7986_v46 = vld [vmem:[#allocation29_spill] sm:$0xff]  ;;  %v4173_v30 = vld [vmem:[%s4542_s5 + $0x30] sm:$0xff] }
 0x16e   : > { %1255 = vrot.lane.b32.xlu1 %v7955_v7, %s4349_s15  ;;  %1253 = vrot.lane.b32.xlu0 %v7956_v1, %s4349_s15  ;;  %1365 = vst.msk [vmem:[#allocation4 + $0x2e] sm:$0x3] %vm672_vm1, %v1357_v6  ;;  %7984 = vst [vmem:[#allocation46_spill] sm:$0xff] %v5365_v16  ;;  %v5371_v48 = vmul.f32 0.0010283801, %v7986_v46  ;;  %v5434_v29 = vmul.f32 %v4173_v30, %v4173_v30 }
 0x16f   : > { %v5303_v38 = vld [vmem:[#allocation4 + $0x4e] sm:$0xff]  ;;  %7985 = vst [vmem:[#allocation47_spill] sm:$0xff] %v5368_v45  ;;  %v5374_v7 = vmul.f32 0.0010283801, %v7987_v50  ;;  %7999 = vst [vmem:[#allocation66_spill] sm:$0xff] %v5431_v17 }
 0x170   : > { %v5253_v27 = vpop.permute.xlu1 %967  ;;  %v5255_v59 = vpop.permute.xlu0 %965  ;;  %7971 = vst [vmem:[#allocation34_spill] sm:$0xff] %v5303_v38  ;;  %v5309_v22 = vld [vmem:[#allocation4 + $0x4f] sm:$0xff]  ;;  %8000 = vst [vmem:[#allocation67_spill] sm:$0xff] %v5434_v29  ;;  %v5462_v30 = vmul.f32 0.036000773, %v5368_v45 }
 0x171   : > { %7972 = vst [vmem:[#allocation55_spill] sm:$0xff] %v5309_v22  ;;  %1367 = vst.msk [vmem:[#allocation4 + $0x4e] sm:$0x3] %vm672_vm1, %v1359_v58 }
 0x172   : > { %1259 = vrot.lane.b32.xlu1 %v7957_v60, %s4349_s15  ;;  %1257 = vrot.lane.b32.xlu0 %v7958_v11, %s4349_s15  ;;  %v5385_v11 = vmul.f32 0.007598758, %v5365_v16  ;;  %8005 = vst [vmem:[#allocation68_spill] sm:$0xff] %v5459_v42  ;;  %8006 = vst [vmem:[#allocation57_spill] sm:$0xff] %v5462_v30 }
 0x173   : > { %v5316_v3 = vld [vmem:[#allocation4 + $0x6e] sm:$0xff] }
 0x174   : > { %v5261_v14 = vpop.permute.xlu1 %971  ;;  %v5263_v52 = vpop.permute.xlu0 %969  ;;  %7975 = vst [vmem:[#allocation56_spill] sm:$0xff] %v5316_v3  ;;  %v5328_v23 = vld [vmem:[#allocation4 + $0x6f] sm:$0xff]  ;;  %7988 = vst [vmem:[#allocation48_spill] sm:$0xff] %v5385_v11 }
 0x175   : > { %7979 = vst [vmem:[#allocation45_spill] sm:$0xff] %v5328_v23  ;;  %1369 = vst.msk [vmem:[#allocation4 + $0x6e] sm:$0x3] %vm672_vm1, %v1361_v13 }
 0x176   : > { %1263 = vrot.lane.b32.xlu1 %v7959_v53, %s4349_s15  ;;  %1261 = vrot.lane.b32.xlu0 %v7960_v15, %s4349_s15  ;;  %v5388_v53 = vmul.f32 0.007598758, %v5368_v45  ;;  %v4168_v15 = vld [vmem:[%s4542_s5 + $0x18] sm:$0xff] }
 0x178   : > { %v5269_v2 = vpop.permute.xlu1 %975  ;;  %v5271_v18 = vpop.permute.xlu0 %973  ;;  %7989 = vst [vmem:[#allocation64_spill] sm:$0xff] %v5388_v53 }
 0x17a   : > { %1283 = vrot.lane.b32.xlu1 %v7961_v12, %s4350_s26  ;;  %1281 = vrot.lane.b32.xlu0 %v7962_v31, %s4350_s26  ;;  %v5391_v12 = vmul.f32 %v4168_v15, %v4168_v15  ;;  %v4169_v31 = vld [vmem:[%s4542_s5 + $0x10] sm:$0xff]  ;;  %v5445_v15 = vmul.f32 0.007598758, %v5431_v17 }
 0x17b   : > { %v5394_v36 = vmul.f32 %v4169_v31, %v4169_v31  ;;  %v5448_v31 = vmul.f32 0.007598758, %v5434_v29 }
 0x17c   : > { %v5279_v55 = vpop.permute.xlu1 %1011  ;;  %v5281_v61 = vpop.permute.xlu0 %1009  ;;  %7990 = vst [vmem:[#allocation65_spill] sm:$0xff] %v5391_v12  ;;  %v5405_v6 = vmul.f32 0.007598758, %v5391_v12  ;;  %8001 = vst [vmem:[#allocation61_spill] sm:$0xff] %v5445_v15  ;;  %v5473_v22 = vmul.f32 0.036000773, %v5391_v12 }
 0x17d   : > { %7991 = vst [vmem:[#allocation37_spill] sm:$0xff] %v5394_v36  ;;  %8002 = vst [vmem:[#allocation62_spill] sm:$0xff] %v5448_v31  ;;  %v5476_v38 = vmul.f32 0.036000773, %v5394_v36 }
 0x17e   : > { %1287 = vrot.lane.b32.xlu1 %v7965_v35, %s4350_s26  ;;  %1285 = vrot.lane.b32.xlu0 %v7966_v8, %s4350_s26  ;;  %7994 = vst [vmem:[#allocation60_spill] sm:$0xff] %v5405_v6  ;;  %8009 = vst [vmem:[#allocation36_spill] sm:$0xff] %v5473_v22 }
 0x17f   : > { %8010 = vst [vmem:[#allocation39_spill] sm:$0xff] %v5476_v38 }
 0x180   : > { %v5292_v32 = vpop.permute.xlu1 %1015  ;;  %v5294_v33 = vpop.permute.xlu0 %1013 }
 0x182   : > { %1291 = vrot.lane.b32.xlu1 %v7969_v25, %s4350_s26  ;;  %1289 = vrot.lane.b32.xlu0 %v7970_v28, %s4350_s26  ;;  %v5408_v25 = vmul.f32 0.007598758, %v5394_v36  ;;  %v4170_v28 = vld [vmem:[%s4542_s5 + $0x28] sm:$0xff] }
 0x183   : > { %v5411_v58 = vmul.f32 %v4170_v28, %v4170_v28 }
 0x184   : > { %v5305_v21 = vpop.permute.xlu1 %1019  ;;  %v5307_v47 = vpop.permute.xlu0 %1017  ;;  %7995 = vst [vmem:[#allocation49_spill] sm:$0xff] %v5408_v25 }
 0x185   : > { %v5425_v13 = vmul.f32 0.007598758, %v5411_v58  ;;  %v5487_v62 = vmul.f32 0.036000773, %v5411_v58 }
 0x186   : > { %1295 = vrot.lane.b32.xlu1 %v7973_v63, %s4350_s26  ;;  %1293 = vrot.lane.b32.xlu0 %v7974_v5, %s4350_s26  ;;  %v4171_v63 = vld [vmem:[%s4542_s5 + $0x20] sm:$0xff] }
 0x187   : > { %v5414_v5 = vmul.f32 %v4171_v63, %v4171_v63  ;;  %7997 = vst [vmem:[#allocation51_spill] sm:$0xff] %v5425_v13  ;;  %8011 = vst [vmem:[#allocation40_spill] sm:$0xff] %v5487_v62 }
 0x188   : > { %v5324_v34 = vpop.permute.xlu1 %1023  ;;  %v5326_v20 = vpop.permute.xlu0 %1021 }
 0x189   : > { %7978 = vst [vmem:[#allocation23_spill] sm:$0xff] %v5326_v20  ;;  %7996 = vst [vmem:[#allocation50_spill] sm:$0xff] %v5414_v5  ;;  %v5428_v44 = vmul.f32 0.007598758, %v5414_v5  ;;  %v5490_v54 = vmul.f32 0.036000773, %v5414_v5 }
 0x18a   : > { %1323 = vrot.lane.b32.xlu1 %v5319_v4, %s4351_s16  ;;  %1321 = vrot.lane.b32.xlu0 %v5322_v39, %s4351_s16 }
 0x18b   : > { %7998 = vst [vmem:[#allocation52_spill] sm:$0xff] %v5428_v44  ;;  %8012 = vst [vmem:[#allocation41_spill] sm:$0xff] %v5490_v54 }
 0x18c   : > { %v5341_v41 = vpop.permute.xlu1 %1059  ;;  %v5343_v49 = vpop.permute.xlu0 %1057 }
 0x18e   : > { %1327 = vrot.lane.b32.xlu1 %v5336_v24, %s4351_s16  ;;  %1325 = vrot.lane.b32.xlu0 %v5339_v43, %s4351_s16 }
 0x190   : > { %v5355_v56 = vpop.permute.xlu1 %1063  ;;  %v5357_v57 = vpop.permute.xlu0 %1061 }
 0x192   : > { %1331 = vrot.lane.b32.xlu1 %v5350_v51, %s4351_s16  ;;  %1329 = vrot.lane.b32.xlu0 %v5353_v0, %s4351_s16 }
 0x194   : > { %v5376_v1 = vpop.permute.xlu1 %1067  ;;  %v5378_v60 = vpop.permute.xlu0 %1065 }
 0x196   : > { %1335 = vrot.lane.b32.xlu1 %v5371_v48, %s4351_s16  ;;  %1333 = vrot.lane.b32.xlu0 %v5374_v7, %s4351_s16 }
 0x198   : > { %v5396_v35 = vpop.permute.xlu1 %1071  ;;  %v5398_v8 = vpop.permute.xlu0 %1069 }
 0x199   : > { %7992 = vst [vmem:[#allocation38_spill] sm:$0xff] %v5396_v35  ;;  %7993 = vst [vmem:[#allocation59_spill] sm:$0xff] %v5398_v8  ;;  %v5595_v8 = vmul.f32 0.21300554, %v5431_v17 }
 0x19a   : > { %1684 = vrot.lane.b32.xlu1 %v5385_v11, %s4342_s21  ;;  %1682 = vrot.lane.b32.xlu0 %v5388_v53, %s4342_s21  ;;  %v5515_v53 = vmul.f32 0.10936069, %v5365_v16  ;;  %v5518_v11 = vmul.f32 0.10936069, %v5368_v45 }
 0x19c   : > { %v5416_v40 = vpop.permute.xlu1 %1107  ;;  %v5418_v19 = vpop.permute.xlu0 %1105  ;;  %8017 = vst [vmem:[#allocation19_spill] sm:$0xff] %v5515_v53  ;;  %8018 = vst [vmem:[#allocation24_spill] sm:$0xff] %v5518_v11 }
 0x19e   : > { %1688 = vrot.lane.b32.xlu1 %v5405_v6, %s4342_s21  ;;  %1686 = vrot.lane.b32.xlu0 %v5408_v25, %s4342_s21 }
 0x1a0   : > { %v5436_v46 = vpop.permute.xlu1 %1111  ;;  %v5438_v50 = vpop.permute.xlu0 %1109 }
 0x1a2   : > { %1692 = vrot.lane.b32.xlu1 %v5425_v13, %s4342_s21  ;;  %1690 = vrot.lane.b32.xlu0 %v5428_v44, %s4342_s21  ;;  %v5501_v44 = vmul.f32 0.036000773, %v5431_v17  ;;  %v5504_v13 = vmul.f32 0.036000773, %v5434_v29 }
 0x1a4   : > { %v5450_v28 = vpop.permute.xlu1 %1115  ;;  %v5452_v63 = vpop.permute.xlu0 %1113  ;;  %8013 = vst [vmem:[#allocation42_spill] sm:$0xff] %v5501_v44  ;;  %8014 = vst [vmem:[#allocation43_spill] sm:$0xff] %v5504_v13 }
 0x1a5   : > { %8003 = vst [vmem:[#allocation53_spill] sm:$0xff] %v5450_v28  ;;  %8004 = vst [vmem:[#allocation54_spill] sm:$0xff] %v5452_v63 }
 0x1a6   : > { %1696 = vrot.lane.b32.xlu1 %v5445_v15, %s4342_s21  ;;  %1694 = vrot.lane.b32.xlu0 %v5448_v31, %s4342_s21 }
 0x1a8   : > { %v5464_v23 = vpop.permute.xlu1 %1119  ;;  %v5466_v3 = vpop.permute.xlu0 %1117 }
 0x1a9   : > { %8007 = vst [vmem:[#allocation58_spill] sm:$0xff] %v5464_v23  ;;  %8008 = vst [vmem:[#allocation35_spill] sm:$0xff] %v5466_v3 }
 0x1aa   : > { %1732 = vrot.lane.b32.xlu1 %v5459_v42, %s4343_s8  ;;  %1730 = vrot.lane.b32.xlu0 %v5462_v30, %s4343_s8  ;;  %v5543_v30 = vmul.f32 0.10936069, %v5411_v58  ;;  %v5546_v42 = vmul.f32 0.10936069, %v5414_v5 }
 0x1ac   : > { %v5478_v37 = vpop.permute.xlu1 %1155  ;;  %v5480_v9 = vpop.permute.xlu0 %1153  ;;  %8023 = vst [vmem:[#allocation32_spill] sm:$0xff] %v5543_v30  ;;  %8024 = vst [vmem:[#allocation16_spill] sm:$0xff] %v5546_v42 }
 0x1ae   : > { %1736 = vrot.lane.b32.xlu1 %v5473_v22, %s4343_s8  ;;  %1734 = vrot.lane.b32.xlu0 %v5476_v38, %s4343_s8 }
 0x1b0   : > { %v5492_v31 = vpop.permute.xlu1 %1159  ;;  %v5494_v15 = vpop.permute.xlu0 %1157 }
 0x1b2   : > { %1740 = vrot.lane.b32.xlu1 %v5487_v62, %s4343_s8  ;;  %1738 = vrot.lane.b32.xlu0 %v5490_v54, %s4343_s8 }
 0x1b4   : > { %v5506_v25 = vpop.permute.xlu1 %1163  ;;  %v5508_v6 = vpop.permute.xlu0 %1161 }
 0x1b5   : > { %8015 = vst [vmem:[#allocation44_spill] sm:$0xff] %v5506_v25  ;;  %8016 = vst [vmem:[#allocation18_spill] sm:$0xff] %v5508_v6 }
 0x1b6   : > { %1744 = vrot.lane.b32.xlu1 %v5501_v44, %s4343_s8  ;;  %1742 = vrot.lane.b32.xlu0 %v5504_v13, %s4343_s8  ;;  %v5529_v44 = vmul.f32 0.10936069, %v5391_v12  ;;  %v5532_v13 = vmul.f32 0.10936069, %v5394_v36 }
 0x1b8   : > { %v5520_v54 = vpop.permute.xlu1 %1167  ;;  %v5522_v62 = vpop.permute.xlu0 %1165  ;;  %8021 = vst [vmem:[#allocation28_spill] sm:$0xff] %v5529_v44  ;;  %8022 = vst [vmem:[#allocation31_spill] sm:$0xff] %v5532_v13 }
 0x1b9   : > { %8019 = vst [vmem:[#allocation25_spill] sm:$0xff] %v5520_v54  ;;  %8020 = vst [vmem:[#allocation27_spill] sm:$0xff] %v5522_v62 }
 0x1ba   : > { %1780 = vrot.lane.b32.xlu1 %v5515_v53, %s4344_s18  ;;  %1778 = vrot.lane.b32.xlu0 %v5518_v11, %s4344_s18 }
 0x1bc   : > { %v5534_v38 = vpop.permute.xlu1 %1187  ;;  %v5536_v22 = vpop.permute.xlu0 %1185 }
 0x1be   : > { %1784 = vrot.lane.b32.xlu1 %v5529_v44, %s4344_s18  ;;  %1782 = vrot.lane.b32.xlu0 %v5532_v13, %s4344_s18  ;;  %v5557_v44 = vmul.f32 0.10936069, %v5431_v17  ;;  %v5560_v13 = vmul.f32 0.10936069, %v5434_v29 }
 0x1c0   : > { %v5548_v62 = vpop.permute.xlu1 %1191  ;;  %v5550_v54 = vpop.permute.xlu0 %1189  ;;  %8027 = vst [vmem:[#allocation21_spill] sm:$0xff] %v5557_v44  ;;  %8028 = vst [vmem:[#allocation26_spill] sm:$0xff] %v5560_v13 }
 0x1c1   : > { %8025 = vst [vmem:[#allocation17_spill] sm:$0xff] %v5548_v62  ;;  %8026 = vst [vmem:[#allocation20_spill] sm:$0xff] %v5550_v54  ;;  %v5598_v54 = vmul.f32 0.21300554, %v5434_v29 }
 0x1c2   : > { %1788 = vrot.lane.b32.xlu1 %v5543_v30, %s4344_s18  ;;  %1786 = vrot.lane.b32.xlu0 %v5546_v42, %s4344_s18  ;;  %v1811_v30 = vmul.f32 0.21300554, %v5365_v16  ;;  %v1810_v42 = vmul.f32 0.21300554, %v5368_v45 }
 0x1c4   : > { %v5562_v3 = vpop.permute.xlu1 %1195  ;;  %v5564_v23 = vpop.permute.xlu0 %1193 }
 0x1c5   : > { %8029 = vst [vmem:[#allocation14_spill] sm:$0xff] %v5562_v3  ;;  %8030 = vst [vmem:[#allocation29_spill] sm:$0xff] %v5564_v23  ;;  %v1813_v23 = vmul.f32 0.21300554, %v5391_v12  ;;  %v1812_v3 = vmul.f32 0.21300554, %v5394_v36 }
 0x1c6   : > { %1792 = vrot.lane.b32.xlu1 %v5557_v44, %s4344_s18  ;;  %1790 = vrot.lane.b32.xlu0 %v5560_v13, %s4344_s18  ;;  %v1815_v13 = vmul.f32 0.21300554, %v5411_v58 }
 0x1c8   : > { %v5572_v11 = vpop.permute.xlu1 %1199  ;;  %v5574_v53 = vpop.permute.xlu0 %1197 }
 0x1c9   : > { %8031 = vst [vmem:[#allocation30_spill] sm:$0xff] %v5572_v11  ;;  %8032 = vst [vmem:[#allocation69_spill] sm:$0xff] %v5574_v53  ;;  %v1814_v53 = vmul.f32 0.21300554, %v5414_v5 }
 0x1ca   : > { %1828 = vrot.lane.b32.xlu1 %v1811_v30, %s4345_s19  ;;  %1826 = vrot.lane.b32.xlu0 %v1810_v42, %s4345_s19 }
 0x1cc   : > { %v5580_v44 = vpop.permute.xlu1 %1219  ;;  %v5582_v6 = vpop.permute.xlu0 %1217 }
 0x1cd   : > { %8033 = vst [vmem:[#allocation70_spill] sm:$0xff] %v5582_v6 }
 0x1ce   : > { %1832 = vrot.lane.b32.xlu1 %v1813_v23, %s4345_s19  ;;  %1830 = vrot.lane.b32.xlu0 %v1812_v3, %s4345_s19 }
 0x1d0   : > { %v5588_v11 = vpop.permute.xlu1 %1223  ;;  %v5590_v25 = vpop.permute.xlu0 %1221 }
 0x1d1   : > { %8034 = vst [vmem:[#allocation71_spill] sm:$0xff] %v5588_v11  ;;  %8035 = vst [vmem:[#allocation72_spill] sm:$0xff] %v5590_v25  ;;  %v1859_v25 = vmul.f32 0.26601171, %v5365_v16  ;;  %v1858_v11 = vmul.f32 0.26601171, %v5368_v45 }
 0x1d2   : > { %1836 = vrot.lane.b32.xlu1 %v1815_v13, %s4345_s19  ;;  %1834 = vrot.lane.b32.xlu0 %v1814_v53, %s4345_s19  ;;  %v1863_v45 = vmul.f32 0.26601171, %v5411_v58  ;;  %v1862_v16 = vmul.f32 0.26601171, %v5414_v5 }
 0x1d4   : > { %v5600_v62 = vpop.permute.xlu1 %1227  ;;  %v5602_v63 = vpop.permute.xlu0 %1225 }
 0x1d5   : > { %8036 = vst [vmem:[#allocation73_spill] sm:$0xff] %v5600_v62  ;;  %8037 = vst [vmem:[#allocation74_spill] sm:$0xff] %v5602_v63  ;;  %v1861_v63 = vmul.f32 0.26601171, %v5391_v12  ;;  %v1860_v62 = vmul.f32 0.26601171, %v5394_v36 }
 0x1d6   : > { %1840 = vrot.lane.b32.xlu1 %v5595_v8, %s4345_s19  ;;  %1838 = vrot.lane.b32.xlu0 %v5598_v54, %s4345_s19  ;;  %v1864_v36 = vmul.f32 0.26601171, %v5434_v29 }
 0x1d8   : > { %v5610_v28 = vpop.permute.xlu1 %1231  ;;  %v5612_v35 = vpop.permute.xlu0 %1229 }
 0x1d9   : > { %8038 = vst [vmem:[#allocation75_spill] sm:$0xff] %v5612_v35 }
 0x1da   : > { %1876 = vrot.lane.b32.xlu1 %v1859_v25, %s4346_s28  ;;  %1874 = vrot.lane.b32.xlu0 %v1858_v11, %s4346_s28  ;;  %v1865_v11 = vmul.f32 0.26601171, %v5431_v17 }
 0x1dc   : > { %v5618_v20 = vpop.permute.xlu1 %1251  ;;  %v5620_v6 = vpop.permute.xlu0 %1249 }
 0x1de   : > { %1880 = vrot.lane.b32.xlu1 %v1861_v63, %s4346_s28  ;;  %1878 = vrot.lane.b32.xlu0 %v1860_v62, %s4346_s28 }
 0x1e0   : > { %v5626_v35 = vpop.permute.xlu1 %1255  ;;  %v5628_v25 = vpop.permute.xlu0 %1253 }
 0x1e2   : > { %1884 = vrot.lane.b32.xlu1 %v1863_v45, %s4346_s28  ;;  %1882 = vrot.lane.b32.xlu0 %v1862_v16, %s4346_s28  ;;  %v986_v16 = vadd.f32 %v5245_v26, %v5319_v4  ;;  %v985_v45 = vadd.f32 %v5247_v10, %v5322_v39 }
 0x1e4   : > { %v5634_v12 = vpop.permute.xlu1 %1259  ;;  %v5636_v63 = vpop.permute.xlu0 %1257 }
 0x1e6   : > { %1888 = vrot.lane.b32.xlu1 %v1865_v11, %s4346_s28  ;;  %1886 = vrot.lane.b32.xlu0 %v1864_v36, %s4346_s28  ;;  %v1034_v11 = vadd.f32 %v5279_v55, %v986_v16  ;;  %v1033_v36 = vadd.f32 %v5281_v61, %v985_v45  ;;  %v8045_v16 = vld [vmem:[#allocation20_spill] sm:$0xff] }
 0x1e8   : > { %v5640_v62 = vpop.permute.xlu1 %1263  ;;  %v5642_v5 = vpop.permute.xlu0 %1261  ;;  %v1082_v26 = vadd.f32 %v5341_v41, %v1034_v11  ;;  %v1081_v10 = vadd.f32 %v5343_v49, %v1033_v36  ;;  %v992_v41 = vadd.f32 %v5269_v2, %v5371_v48  ;;  %v8046_v11 = vld [vmem:[#allocation59_spill] sm:$0xff] }
 0x1ea   : > { %1908 = vrot.lane.b32.xlu1 %v1811_v30, %s4347_s30  ;;  %1906 = vrot.lane.b32.xlu0 %v1810_v42, %s4347_s30  ;;  %v988_v30 = vadd.f32 %v5253_v27, %v5336_v24  ;;  %v987_v42 = vadd.f32 %v5255_v59, %v5339_v43  ;;  %v990_v27 = vadd.f32 %v5261_v14, %v5350_v51 }
 0x1eb   : > { %v989_v59 = vadd.f32 %v5263_v52, %v5353_v0  ;;  %v991_v14 = vadd.f32 %v5271_v18, %v5374_v7  ;;  %v1040_v2 = vadd.f32 %v5324_v34, %v992_v41  ;;  %v8039_v7 = vld [vmem:[#allocation70_spill] sm:$0xff] }
 0x1ec   : > { %v1284_v29 = vpop.permute.xlu1 %1283  ;;  %v1282_v17 = vpop.permute.xlu0 %1281  ;;  %v1036_v55 = vadd.f32 %v5292_v32, %v988_v30  ;;  %v1035_v61 = vadd.f32 %v5294_v33, %v987_v42  ;;  %v1038_v52 = vadd.f32 %v5305_v21, %v990_v27  ;;  %v8047_v30 = vld [vmem:[#allocation44_spill] sm:$0xff] }
 0x1ed   : > { %v1037_v49 = vadd.f32 %v5307_v47, %v989_v59  ;;  %v8052_v27 = vld [vmem:[#allocation72_spill] sm:$0xff] }
 0x1ee   : > { %1912 = vrot.lane.b32.xlu1 %v1813_v23, %s4347_s30  ;;  %1910 = vrot.lane.b32.xlu0 %v1812_v3, %s4347_s30  ;;  %v1130_v3 = vadd.f32 %v5416_v40, %v1082_v26  ;;  %v1129_v23 = vadd.f32 %v5418_v19, %v1081_v10  ;;  %v1084_v24 = vadd.f32 %v5355_v56, %v1036_v55  ;;  %v8041_v40 = vld [vmem:[#allocation38_spill] sm:$0xff]  ;;  %v8042_v19 = vld [vmem:[#allocation53_spill] sm:$0xff]  ;;  %v8049_v55 = vld [vmem:[#allocation19_spill] sm:$0xff] }
 0x1ef   : > { %v1083_v32 = vadd.f32 %v5357_v57, %v1035_v61  ;;  %v1086_v18 = vadd.f32 %v5376_v1, %v1038_v52  ;;  %v1085_v21 = vadd.f32 %v5378_v60, %v1037_v49  ;;  %v1088_v1 = vadd.f32 %v8041_v40, %v1040_v2  ;;  %v8048_v26 = vld [vmem:[#allocation18_spill] sm:$0xff]  ;;  %v8050_v61 = vld [vmem:[#allocation24_spill] sm:$0xff] }
 0x1f0   : > { %v5660_v4 = vpop.permute.xlu1 %1287  ;;  %v5662_v39 = vpop.permute.xlu0 %1285  ;;  %v1178_v33 = vadd.f32 %v5478_v37, %v1130_v3  ;;  %v1177_v43 = vadd.f32 %v5480_v9, %v1129_v23  ;;  %v1132_v56 = vadd.f32 %v5436_v46, %v1084_v24  ;;  %v8051_v3 = vld [vmem:[#allocation71_spill] sm:$0xff]  ;;  %v8058_v49 = vld [vmem:[#allocation14_spill] sm:$0xff] }
 0x1f1   : > { %v1131_v37 = vadd.f32 %v5438_v50, %v1083_v32  ;;  %v1134_v60 = vadd.f32 %v8042_v19, %v1086_v18  ;;  %v5724_v32 = vld [vmem:[#allocation4 + $0x11] sm:$0xff] }
 0x1f2   : > { %1916 = vrot.lane.b32.xlu1 %v1815_v13, %s4347_s30  ;;  %1914 = vrot.lane.b32.xlu0 %v1814_v53, %s4347_s30  ;;  %v1210_v9 = vadd.f32 %v5534_v38, %v1178_v33  ;;  %v1209_v57 = vadd.f32 %v5536_v22, %v1177_v43  ;;  %v1180_v47 = vadd.f32 %v5492_v31, %v1132_v56  ;;  %v8040_v53 = vld [vmem:[#allocation23_spill] sm:$0xff]  ;;  %v8043_v13 = vld [vmem:[#allocation54_spill] sm:$0xff] }
 0x1f3   : > { %v1179_v48 = vadd.f32 %v5494_v15, %v1131_v37  ;;  %v1039_v34 = vadd.f32 %v8040_v53, %v991_v14  ;;  %v1133_v46 = vadd.f32 %v8043_v13, %v1085_v21  ;;  %v1182_v42 = vadd.f32 %v8047_v30, %v1134_v60  ;;  %8053 = vst [vmem:[#allocation70_spill] sm:$0xff] %v5724_v32  ;;  %v5728_v33 = vld [vmem:[#allocation4 + $0x13] sm:$0xff]  ;;  %v8059_v37 = vld [vmem:[#allocation29_spill] sm:$0xff] }
 0x1f4   : > { %v5684_v51 = vpop.permute.xlu1 %1291  ;;  %v5686_v0 = vpop.permute.xlu0 %1289  ;;  %v1242_v38 = vadd.f32 %v5580_v44, %v1210_v9  ;;  %v1241_v22 = vadd.f32 %v8039_v7, %v1209_v57  ;;  %8055 = vst [vmem:[#allocation38_spill] sm:$0xff] %v5728_v33  ;;  %v8056_v43 = vld [vmem:[#allocation58_spill] sm:$0xff]  ;;  %v8057_v14 = vld [vmem:[#allocation35_spill] sm:$0xff]  ;;  %v8076_v30 = vld [vmem:[#allocation69_spill] sm:$0xff] }
 0x1f5   : > { %v1211_v15 = vadd.f32 %v8045_v16, %v1179_v48  ;;  %v1087_v36 = vadd.f32 %v8046_v11, %v1039_v34  ;;  %v1181_v10 = vadd.f32 %v8048_v26, %v1133_v46  ;;  %v1136_v41 = vadd.f32 %v8056_v43, %v1088_v1  ;;  %v5734_v18 = vld [vmem:[#allocation4 + $0x14] sm:$0xff]  ;;  %v8066_v1 = vld [vmem:[#allocation28_spill] sm:$0xff] }
 0x1f6   : > { %1920 = vrot.lane.b32.xlu1 %v5595_v8, %s4347_s30  ;;  %1918 = vrot.lane.b32.xlu0 %v5598_v54, %s4347_s30  ;;  %v8044_v54 = vld [vmem:[#allocation17_spill] sm:$0xff]  ;;  %v1274_v44 = vadd.f32 %v5618_v20, %v1242_v38  ;;  %v1273_v45 = vadd.f32 %v5620_v6, %v1241_v22  ;;  %v5726_v6 = vld [vmem:[#allocation4 + $0x12] sm:$0xff]  ;;  %v1214_v56 = vadd.f32 %v8058_v49, %v1182_v42 }
 0x1f7   : > { %v1212_v31 = vadd.f32 %v8044_v54, %v1180_v47  ;;  %v1243_v59 = vadd.f32 %v8052_v27, %v1211_v15  ;;  %8054 = vst [vmem:[#allocation23_spill] sm:$0xff] %v5726_v6  ;;  %v1135_v52 = vadd.f32 %v8057_v14, %v1087_v36  ;;  %v1213_v9 = vadd.f32 %v8059_v37, %v1181_v10  ;;  %v5742_v7 = vld [vmem:[#allocation4 + $0x17] sm:$0xff]  ;;  %v8064_v22 = vld [vmem:[#allocation25_spill] sm:$0xff] }
 0x1f8   : > { %v5707_v8 = vpop.permute.xlu1 %1295  ;;  %v5709_v50 = vpop.permute.xlu0 %1293  ;;  %v1306_v24 = vadd.f32 %v1284_v29, %v1274_v44  ;;  %v1305_v20 = vadd.f32 %v1282_v17, %v1273_v45  ;;  %8060 = vst [vmem:[#allocation53_spill] sm:$0xff] %v5734_v18  ;;  %v5736_v29 = vld [vmem:[#allocation4 + $0x15] sm:$0xff]  ;;  %8063 = vst [vmem:[#allocation20_spill] sm:$0xff] %v5742_v7  ;;  %v1184_v53 = vadd.f32 %v8064_v22, %v1136_v41 }
 0x1f9   : > { %v1244_v23 = vadd.f32 %v8051_v3, %v1212_v31  ;;  %8061 = vst [vmem:[#allocation54_spill] sm:$0xff] %v5736_v29  ;;  %v5738_v17 = vld [vmem:[#allocation4 + $0x16] sm:$0xff]  ;;  %v1275_v47 = vadd.f32 %v5628_v25, %v1243_v59 }
 0x1fa   : > { %1940 = vrot.lane.b32.xlu1 %v8049_v55, %s4348_s3  ;;  %1938 = vrot.lane.b32.xlu0 %v8050_v61, %s4348_s3  ;;  %8062 = vst [vmem:[#allocation17_spill] sm:$0xff] %v5738_v17  ;;  %v8065_v34 = vld [vmem:[#allocation27_spill] sm:$0xff]  ;;  %v5750_v60 = vld [vmem:[#allocation4 + $0x10] sm:$0xff] }
 0x1fb   : > { %v1276_v21 = vadd.f32 %v5626_v35, %v1244_v23  ;;  %v1183_v40 = vadd.f32 %v8065_v34, %v1135_v52  ;;  %v8067_v19 = vld [vmem:[#allocation31_spill] sm:$0xff]  ;;  %8068 = vst [vmem:[#allocation59_spill] sm:$0xff] %v5750_v60  ;;  %v8070_v35 = vld [vmem:[#allocation73_spill] sm:$0xff]  ;;  %v8071_v46 = vld [vmem:[#allocation74_spill] sm:$0xff]  ;;  %v1307_v16 = vadd.f32 %v5662_v39, %v1275_v47 }
 0x1fc   : > { %v1324_v57 = vpop.permute.xlu1 %1323  ;;  %v1322_v2 = vpop.permute.xlu0 %1321  ;;  %v5752_v13 = vld [vmem:[#allocation4 + $0x18] sm:$0xff]  ;;  %v1246_v25 = vadd.f32 %v8070_v35, %v1214_v56  ;;  %v1245_v54 = vadd.f32 %v8071_v46, %v1213_v9  ;;  %v8075_v11 = vld [vmem:[#allocation30_spill] sm:$0xff] }
 0x1fd   : > { %v1346_v48 = vadd.f32 %v1324_v57, %v1306_v24  ;;  %v1345_v38 = vadd.f32 %v1322_v2, %v1305_v20  ;;  %8069 = vst [vmem:[#allocation44_spill] sm:$0xff] %v5752_v13  ;;  %v1308_v31 = vadd.f32 %v5660_v4, %v1276_v21  ;;  %v5762_v15 = vld [vmem:[#allocation4 + $0x31] sm:$0xff]  ;;  %v1216_v36 = vadd.f32 %v8075_v11, %v1184_v53  ;;  %v8081_v24 = vld [vmem:[#allocation32_spill] sm:$0xff]  ;;  %v8093_v53 = vld [vmem:[#allocation21_spill] sm:$0xff] }
 0x1fe   : > { %1944 = vrot.lane.b32.xlu1 %v8066_v1, %s4348_s3  ;;  %1942 = vrot.lane.b32.xlu0 %v8067_v19, %s4348_s3  ;;  %8072 = vst [vmem:[#allocation18_spill] sm:$0xff] %v5762_v15  ;;  %v5764_v44 = vld [vmem:[#allocation4 + $0x32] sm:$0xff]  ;;  %v1215_v4 = vadd.f32 %v8076_v30, %v1183_v40  ;;  %v1278_v61 = vadd.f32 %v5634_v12, %v1246_v25  ;;  %v8082_v20 = vld [vmem:[#allocation16_spill] sm:$0xff] }
 0x1ff   : > { %1379 = vst.msk [vmem:[#allocation3 + $0x42] sm:$0xff] %vm670_vm0, %v1346_v48  ;;  %1370 = vst.msk [vmem:[#allocation4 + $0x10] sm:$0xff] %vm670_vm0, %v1345_v38  ;;  %v5766_v45 = vld [vmem:[#allocation4 + $0x33] sm:$0xff]  ;;  %v1277_v3 = vadd.f32 %v5636_v63, %v1245_v54  ;;  %v1248_v14 = vadd.f32 %v5610_v28, %v1216_v36  ;;  %v8104_v30 = vld [vmem:[#allocation68_spill] sm:$0xff] }
 0x200   : > { %1378 = vst.msk [vmem:[#allocation3 + $0x3a] sm:$0xc0] %vm688_vm2, %v1345_v38  ;;  %8073 = vst [vmem:[#allocation19_spill] sm:$0xff] %v5764_v44  ;;  %v1328_v42 = vpop.permute.xlu1 %1327  ;;  %v1326_v39 = vpop.permute.xlu0 %1325  ;;  %v5770_v26 = vld [vmem:[#allocation4 + $0x34] sm:$0xff]  ;;  %v1310_v63 = vadd.f32 %v5684_v51, %v1278_v61 }
 0x201   : > { %1371 = vst.msk [vmem:[#allocation4 + $0x18] sm:$0xff] %vm670_vm0, %v1346_v48  ;;  %8074 = vst [vmem:[#allocation24_spill] sm:$0xff] %v5766_v45  ;;  %v5772_v10 = vld [vmem:[#allocation4 + $0x35] sm:$0xff]  ;;  %v1348_v23 = vadd.f32 %v1328_v42, %v1308_v31  ;;  %v1347_v27 = vadd.f32 %v1326_v39, %v1307_v16  ;;  %v1309_v49 = vadd.f32 %v5686_v0, %v1277_v3 }
 0x202   : > { %8077 = vst [vmem:[#allocation71_spill] sm:$0xff] %v5770_v26  ;;  %8078 = vst [vmem:[#allocation72_spill] sm:$0xff] %v5772_v10  ;;  %v5774_v55 = vld [vmem:[#allocation4 + $0x36] sm:$0xff]  ;;  %1948 = vrot.lane.b32.xlu1 %v8081_v24, %s4348_s3  ;;  %1946 = vrot.lane.b32.xlu0 %v8082_v20, %s4348_s3  ;;  %v1280_v21 = vadd.f32 %v5640_v62, %v1248_v14  ;;  %v8110_v14 = vld [vmem:[#allocation40_spill] sm:$0xff] }
 0x203   : > { %8079 = vst [vmem:[#allocation58_spill] sm:$0xff] %v5774_v55  ;;  %v5778_v59 = vld [vmem:[#allocation4 + $0x37] sm:$0xff]  ;;  %1381 = vst.msk [vmem:[#allocation3 + $0x52] sm:$0xff] %vm670_vm0, %v1348_v23 }
 0x204   : > { %8080 = vst [vmem:[#allocation35_spill] sm:$0xff] %v5778_v59  ;;  %v5784_v43 = vld [vmem:[#allocation4 + $0x30] sm:$0xff]  ;;  %v5786_v41 = vld [vmem:[#allocation4 + $0x38] sm:$0xff]  ;;  %1380 = vst.msk [vmem:[#allocation3 + $0x4a] sm:$0xc0] %vm688_vm2, %v1347_v27  ;;  %v1332_v28 = vpop.permute.xlu1 %1331  ;;  %v1330_v57 = vpop.permute.xlu0 %1329  ;;  %v1312_v19 = vadd.f32 %v5707_v8, %v1280_v21 }
 0x205   : > { %8083 = vst [vmem:[#allocation14_spill] sm:$0xff] %v5784_v43  ;;  %8084 = vst [vmem:[#allocation29_spill] sm:$0xff] %v5786_v41  ;;  %v8085_v52 = vld [vmem:[#allocation75_spill] sm:$0xff]  ;;  %v1350_v48 = vadd.f32 %v1332_v28, %v1310_v63  ;;  %v1349_v38 = vadd.f32 %v1330_v57, %v1309_v49  ;;  %v8094_v34 = vld [vmem:[#allocation26_spill] sm:$0xff]  ;;  %v5957_v59 = vmul.f32 0.0010283801, %v5411_v58 }
 0x206   : > { %v1247_v12 = vadd.f32 %v8085_v52, %v1215_v4  ;;  %1372 = vst.msk [vmem:[#allocation4 + $0x30] sm:$0xff] %vm670_vm0, %v1347_v27  ;;  %1373 = vst.msk [vmem:[#allocation4 + $0x38] sm:$0xff] %vm670_vm0, %v1348_v23  ;;  %v5796_v56 = vld [vmem:[#allocation4 + $0x51] sm:$0xff]  ;;  %1952 = vrot.lane.b32.xlu1 %v8093_v53, %s4348_s3  ;;  %1950 = vrot.lane.b32.xlu0 %v8094_v34, %s4348_s3  ;;  %v8105_v4 = vld [vmem:[#allocation57_spill] sm:$0xff] }
 0x207   : > { %8086 = vst [vmem:[#allocation25_spill] sm:$0xff] %v5796_v56  ;;  %v5798_v37 = vld [vmem:[#allocation4 + $0x52] sm:$0xff]  ;;  %1383 = vst.msk [vmem:[#allocation3 + $0x62] sm:$0xff] %vm670_vm0, %v1350_v48  ;;  %v8108_v23 = vld [vmem:[#allocation36_spill] sm:$0xff] }
 0x208   : > { %8087 = vst [vmem:[#allocation27_spill] sm:$0xff] %v5798_v37  ;;  %v5800_v9 = vld [vmem:[#allocation4 + $0x53] sm:$0xff]  ;;  %v1279_v47 = vadd.f32 %v5642_v5, %v1247_v12  ;;  %1382 = vst.msk [vmem:[#allocation3 + $0x5a] sm:$0xc0] %vm688_vm2, %v1349_v38  ;;  %v1336_v46 = vpop.permute.xlu1 %1335  ;;  %v1334_v54 = vpop.permute.xlu0 %1333  ;;  %v8111_v52 = vld [vmem:[#allocation41_spill] sm:$0xff] }
 0x209   : > { %8088 = vst [vmem:[#allocation28_spill] sm:$0xff] %v5800_v9  ;;  %v5802_v2 = vld [vmem:[#allocation4 + $0x54] sm:$0xff]  ;;  %v1352_v16 = vadd.f32 %v1336_v46, %v1312_v19  ;;  %v2076_v19 = vld [vmem:[#allocation3 + $0x88] sm:$0x3]  ;;  %v8118_v46 = vld [vmem:[#allocation60_spill] sm:$0xff] }
 0x20a   : > { %8089 = vst [vmem:[#allocation31_spill] sm:$0xff] %v5802_v2  ;;  %v5804_v51 = vld [vmem:[#allocation4 + $0x55] sm:$0xff]  ;;  %v1311_v62 = vadd.f32 %v5709_v50, %v1279_v47  ;;  %1972 = vrot.lane.b32.xlu1 %v8104_v30, %s4349_s15  ;;  %1970 = vrot.lane.b32.xlu0 %v8105_v4, %s4349_s15  ;;  %v8114_v47 = vld [vmem:[#allocation48_spill] sm:$0xff] }
 0x20b   : > { %8090 = vst [vmem:[#allocation73_spill] sm:$0xff] %v5804_v51  ;;  %v5806_v0 = vld [vmem:[#allocation4 + $0x56] sm:$0xff]  ;;  %1385 = vst.msk [vmem:[#allocation3 + $0x72] sm:$0xff] %vm670_vm0, %v1352_v16  ;;  %v5888_v34 = vld [vmem:[#allocation4 + $0xe] sm:$0xff] }
 0x20c   : > { %8091 = vst [vmem:[#allocation74_spill] sm:$0xff] %v5806_v0  ;;  %v5810_v22 = vld [vmem:[#allocation4 + $0x57] sm:$0xff]  ;;  %v1351_v11 = vadd.f32 %v1334_v54, %v1311_v62  ;;  %v5852_v61 = vpop.permute.xlu1 %1684  ;;  %v5854_v3 = vpop.permute.xlu0 %1682  ;;  %8116 = vst [vmem:[#allocation36_spill] sm:$0xff] %v5888_v34  ;;  %v5890_v62 = vld [vmem:[#allocation4 + $0xf] sm:$0xff] }
 0x20d   : > { %8092 = vst [vmem:[#allocation30_spill] sm:$0xff] %v5810_v22  ;;  %v5816_v40 = vld [vmem:[#allocation4 + $0x50] sm:$0xff]  ;;  %v5818_v1 = vld [vmem:[#allocation4 + $0x58] sm:$0xff]  ;;  %v8119_v54 = vld [vmem:[#allocation49_spill] sm:$0xff] }
 0x20e   : > { %8095 = vst [vmem:[#allocation69_spill] sm:$0xff] %v5816_v40  ;;  %8096 = vst [vmem:[#allocation32_spill] sm:$0xff] %v5818_v1  ;;  %v5826_v5 = vld [vmem:[#allocation4 + $0x71] sm:$0xff]  ;;  %1976 = vrot.lane.b32.xlu1 %v8108_v23, %s4349_s15 }
 0x20f   : > { %1374 = vst.msk [vmem:[#allocation4 + $0x50] sm:$0xff] %vm670_vm0, %v1349_v38  ;;  %1375 = vst.msk [vmem:[#allocation4 + $0x58] sm:$0xff] %vm670_vm0, %v1350_v48  ;;  %v5828_v35 = vld [vmem:[#allocation4 + $0x72] sm:$0xff]  ;;  %v8115_v48 = vld [vmem:[#allocation64_spill] sm:$0xff] }
 0x210   : > { %8097 = vst [vmem:[#allocation16_spill] sm:$0xff] %v5826_v5  ;;  %8098 = vst [vmem:[#allocation75_spill] sm:$0xff] %v5828_v35  ;;  %v5830_v25 = vld [vmem:[#allocation4 + $0x73] sm:$0xff]  ;;  %v5860_v24 = vpop.permute.xlu1 %1688  ;;  %v5862_v20 = vpop.permute.xlu0 %1686  ;;  %v6033_v35 = vld [vmem:[%s4549_s7 + $0x28] sm:$0xff] }
 0x211   : > { %8099 = vst [vmem:[#allocation21_spill] sm:$0xff] %v5830_v25  ;;  %v5832_v31 = vld [vmem:[#allocation4 + $0x74] sm:$0xff]  ;;  %1384 = vst.msk [vmem:[#allocation3 + $0x6a] sm:$0xc0] %vm688_vm2, %v1351_v11  ;;  %v6037_v37 = vmul.f32 %v6033_v35, %v6033_v35  ;;  %v6040_v5 = vld [vmem:[%s4549_s7 + $0x20] sm:$0xff] }
 0x212   : > { %8100 = vst [vmem:[#allocation26_spill] sm:$0xff] %v5832_v31  ;;  %v5834_v8 = vld [vmem:[#allocation4 + $0x75] sm:$0xff]  ;;  %1980 = vrot.lane.b32.xlu1 %v8110_v14, %s4349_s15  ;;  %2084 = vst.msk [vmem:[#allocation4 + $0xe] sm:$0x3] %vm672_vm1, %v2076_v19  ;;  %v8123_v14 = vld [vmem:[#allocation52_spill] sm:$0xff] }
 0x213   : > { %8101 = vst [vmem:[#allocation76_spill] sm:$0xff] %v5834_v8  ;;  %v5836_v50 = vld [vmem:[#allocation4 + $0x76] sm:$0xff]  ;;  %v5901_v30 = vld [vmem:[#allocation4 + $0x2e] sm:$0xff]  ;;  %8152 = vst [vmem:[#allocation81_spill] sm:$0xff] %v6033_v35 }
 0x214   : > { %8102 = vst [vmem:[#allocation77_spill] sm:$0xff] %v5836_v50  ;;  %v5838_v36 = vld [vmem:[#allocation4 + $0x77] sm:$0xff]  ;;  %v5868_v12 = vpop.permute.xlu1 %1692  ;;  %v5870_v63 = vpop.permute.xlu0 %1690  ;;  %8120 = vst [vmem:[#allocation40_spill] sm:$0xff] %v5901_v30  ;;  %v5903_v23 = vld [vmem:[#allocation4 + $0x2f] sm:$0xff] }
 0x215   : > { %8103 = vst [vmem:[#allocation78_spill] sm:$0xff] %v5838_v36  ;;  %v5844_v42 = vld [vmem:[#allocation4 + $0x70] sm:$0xff]  ;;  %v5846_v39 = vld [vmem:[#allocation4 + $0x78] sm:$0xff]  ;;  %8121 = vst [vmem:[#allocation41_spill] sm:$0xff] %v5903_v23 }
 0x216   : > { %8106 = vst [vmem:[#allocation68_spill] sm:$0xff] %v5844_v42  ;;  %8107 = vst [vmem:[#allocation57_spill] sm:$0xff] %v5846_v39  ;;  %v8109_v27 = vld [vmem:[#allocation39_spill] sm:$0xff]  ;;  %v8112_v49 = vld [vmem:[#allocation42_spill] sm:$0xff]  ;;  %v6055_v42 = vmul.f32 0.007598758, %v6037_v37 }
 0x217   : > { %1376 = vst.msk [vmem:[#allocation4 + $0x70] sm:$0xff] %vm670_vm0, %v1351_v11  ;;  %1377 = vst.msk [vmem:[#allocation4 + $0x78] sm:$0xff] %vm670_vm0, %v1352_v16  ;;  %1974 = vrot.lane.b32.xlu0 %v8109_v27, %s4349_s15  ;;  %1984 = vrot.lane.b32.xlu1 %v8112_v49, %s4349_s15  ;;  %v8113_v28 = vld [vmem:[#allocation43_spill] sm:$0xff]  ;;  %v8126_v19 = vld [vmem:[#allocation61_spill] sm:$0xff] }
 0x218   : > { %v5876_v57 = vpop.permute.xlu1 %1696  ;;  %v5878_v21 = vpop.permute.xlu0 %1694  ;;  %8117 = vst [vmem:[#allocation39_spill] sm:$0xff] %v5890_v62  ;;  %v2078_v4 = vld [vmem:[#allocation3 + $0x98] sm:$0x3]  ;;  %v5971_v50 = vld [vmem:[%s4549_s7 + $0x8] sm:$0xff]  ;;  %v8140_v55 = vld [vmem:[#allocation66_spill] sm:$0xff] }
 0x219   : > { %v8122_v27 = vld [vmem:[#allocation51_spill] sm:$0xff]  ;;  %2086 = vst.msk [vmem:[#allocation4 + $0x2e] sm:$0x3] %vm672_vm1, %v2078_v4  ;;  %8136 = vst [vmem:[#allocation49_spill] sm:$0xff] %v5971_v50  ;;  %v5975_v58 = vmul.f32 %v5971_v50, %v5971_v50  ;;  %v5985_v17 = vmul.f32 0.0010283801, %v8140_v55 }
 0x21a   : > { %v8129_v4 = vld [vmem:[#allocation47_spill] sm:$0xff]  ;;  %v6012_v26 = vld [vmem:[%s4549_s7 + $0x10] sm:$0xff]  ;;  %8153 = vst [vmem:[#allocation82_spill] sm:$0xff] %v6040_v5  ;;  %8155 = vst [vmem:[#allocation84_spill] sm:$0xff] %v6055_v42 }
 0x21b   : > { %1978 = vrot.lane.b32.xlu0 %v8111_v52, %s4349_s15  ;;  %2004 = vrot.lane.b32.xlu1 %v8114_v47, %s4350_s26  ;;  %v2080_v47 = vld [vmem:[#allocation3 + $0xa8] sm:$0x3]  ;;  %v2082_v13 = vld [vmem:[#allocation3 + $0xb8] sm:$0x3]  ;;  %8137 = vst [vmem:[#allocation51_spill] sm:$0xff] %v5975_v58  ;;  %v6016_v18 = vmul.f32 %v6012_v26, %v6012_v26 }
 0x21c   : > { %v5884_v38 = vpop.permute.xlu1 %1732  ;;  %v5886_v53 = vpop.permute.xlu0 %1730  ;;  %v8141_v8 = vld [vmem:[#allocation67_spill] sm:$0xff]  ;;  %v5999_v31 = vmul.f32 0.007598758, %v5975_v58  ;;  %v6097_v62 = vmul.f32 0.036000773, %v5975_v58 }
 0x21d   : > { %v5988_v51 = vmul.f32 0.0010283801, %v8141_v8  ;;  %v6005_v8 = vld [vmem:[%s4549_s7 + $0x18] sm:$0xff]  ;;  %v6030_v33 = vmul.f32 0.007598758, %v6016_v18 }
 0x21e   : > { %v5933_v41 = vld [vmem:[#allocation4 + $0x6e] sm:$0xff]  ;;  %8144 = vst [vmem:[#allocation47_spill] sm:$0xff] %v6005_v8  ;;  %v6009_v2 = vmul.f32 %v6005_v8, %v6005_v8  ;;  %v6061_v44 = vld [vmem:[%s4549_s7 + $0x38] sm:$0xff]  ;;  %8164 = vst [vmem:[#allocation93_spill] sm:$0xff] %v6097_v62 }
 0x21f   : > { %1982 = vrot.lane.b32.xlu0 %v8113_v28, %s4349_s15  ;;  %2008 = vrot.lane.b32.xlu1 %v8118_v46, %s4350_s26  ;;  %v5914_v28 = vld [vmem:[#allocation4 + $0x4e] sm:$0xff]  ;;  %8131 = vst [vmem:[#allocation64_spill] sm:$0xff] %v5933_v41  ;;  %8151 = vst [vmem:[#allocation80_spill] sm:$0xff] %v6030_v33  ;;  %v6065_v15 = vmul.f32 %v6061_v44, %v6061_v44 }
 0x220   : > { %v5897_v16 = vpop.permute.xlu1 %1736  ;;  %v5899_v11 = vpop.permute.xlu0 %1734  ;;  %8124 = vst [vmem:[#allocation42_spill] sm:$0xff] %v5914_v28  ;;  %v8127_v46 = vld [vmem:[#allocation62_spill] sm:$0xff]  ;;  %v6027_v45 = vmul.f32 0.007598758, %v6009_v2  ;;  %8157 = vst [vmem:[#allocation86_spill] sm:$0xff] %v6061_v44 }
 0x221   : > { %v5935_v36 = vld [vmem:[#allocation4 + $0x6f] sm:$0xff]  ;;  %8142 = vst [vmem:[#allocation62_spill] sm:$0xff] %v5999_v31  ;;  %v6083_v23 = vmul.f32 0.007598758, %v6065_v15 }
 0x222   : > { %8132 = vst [vmem:[#allocation60_spill] sm:$0xff] %v5935_v36  ;;  %2090 = vst.msk [vmem:[#allocation4 + $0x6e] sm:$0x3] %vm672_vm1, %v2082_v13  ;;  %v8135_v13 = vld [vmem:[#allocation50_spill] sm:$0xff]  ;;  %v6044_v36 = vmul.f32 %v6040_v5, %v6040_v5  ;;  %v6139_v5 = vmul.f32 0.036000773, %v6065_v15 }
 0x223   : > { %2002 = vrot.lane.b32.xlu0 %v8115_v48, %s4350_s26  ;;  %2012 = vrot.lane.b32.xlu1 %v8122_v27, %s4350_s26  ;;  %v5916_v48 = vld [vmem:[#allocation4 + $0x4f] sm:$0xff]  ;;  %v5960_v7 = vmul.f32 0.0010283801, %v8135_v13  ;;  %v5978_v13 = vld [vmem:[%s4549_s7] sm:$0xff]  ;;  %8147 = vst [vmem:[#allocation50_spill] sm:$0xff] %v6016_v18  ;;  %8150 = vst [vmem:[#allocation79_spill] sm:$0xff] %v6027_v45 }
 0x224   : > { %v5910_v52 = vpop.permute.xlu1 %1740  ;;  %v5912_v49 = vpop.permute.xlu0 %1738  ;;  %8125 = vst [vmem:[#allocation43_spill] sm:$0xff] %v5916_v48  ;;  %2088 = vst.msk [vmem:[#allocation4 + $0x4e] sm:$0x3] %vm672_vm1, %v2080_v47  ;;  %v8133_v47 = vld [vmem:[#allocation65_spill] sm:$0xff]  ;;  %v5982_v0 = vmul.f32 %v5978_v13, %v5978_v13  ;;  %v6058_v40 = vmul.f32 0.007598758, %v6044_v36 }
 0x225   : > { %8138 = vst [vmem:[#allocation52_spill] sm:$0xff] %v5978_v13  ;;  %8145 = vst [vmem:[#allocation65_spill] sm:$0xff] %v6009_v2  ;;  %v6068_v48 = vld [vmem:[%s4549_s7 + $0x30] sm:$0xff]  ;;  %s7678_s7 = scalar_lea.hbm %s7727_s2, %s4072_s29 }
 0x226   : > { %8139 = vst [vmem:[#allocation61_spill] sm:$0xff] %v5982_v0  ;;  %v6002_v55 = vmul.f32 0.007598758, %v5982_v0  ;;  %8154 = vst [vmem:[#allocation83_spill] sm:$0xff] %v6044_v36  ;;  %v6072_v28 = vmul.f32 %v6068_v48, %v6068_v48  ;;  %v6100_v34 = vmul.f32 0.036000773, %v5982_v0 }
 0x227   : > { %2006 = vrot.lane.b32.xlu0 %v8119_v54, %s4350_s26  ;;  %2016 = vrot.lane.b32.xlu1 %v8126_v19, %s4350_s26  ;;  %v8128_v54 = vld [vmem:[#allocation46_spill] sm:$0xff]  ;;  %v5943_v19 = vmul.f32 0.0010283801, %v8133_v47  ;;  %8156 = vst [vmem:[#allocation85_spill] sm:$0xff] %v6058_v40  ;;  %8158 = vst [vmem:[#allocation87_spill] sm:$0xff] %v6068_v48 }
 0x228   : > { %v5924_v27 = vmul.f32 0.0010283801, %v8128_v54  ;;  %v5929_v39 = vpop.permute.xlu1 %1744  ;;  %v5931_v1 = vpop.permute.xlu0 %1742  ;;  %8143 = vst [vmem:[#allocation46_spill] sm:$0xff] %v6002_v55  ;;  %8159 = vst [vmem:[#allocation88_spill] sm:$0xff] %v6072_v28  ;;  %v6086_v30 = vmul.f32 0.007598758, %v6072_v28 }
 0x229   : > { %8130 = vst [vmem:[#allocation48_spill] sm:$0xff] %v5931_v1  ;;  %8160 = vst [vmem:[#allocation89_spill] sm:$0xff] %v6083_v23 }
 0x22a   : > { %8161 = vst [vmem:[#allocation90_spill] sm:$0xff] %v6086_v30  ;;  %8165 = vst [vmem:[#allocation94_spill] sm:$0xff] %v6100_v34 }
 0x22b   : > { %2010 = vrot.lane.b32.xlu0 %v8123_v14, %s4350_s26  ;;  %v5927_v14 = vmul.f32 0.0010283801, %v8129_v4  ;;  %2044 = vrot.lane.b32.xlu1 %v5924_v27, %s4351_s16  ;;  %8172 = vst [vmem:[#allocation101_spill] sm:$0xff] %v6139_v5 }
 0x22c   : > { %v5948_v4 = vpop.permute.xlu1 %1780  ;;  %v5950_v22 = vpop.permute.xlu0 %1778 }
 0x22f   : > { %2014 = vrot.lane.b32.xlu0 %v8127_v46, %s4350_s26  ;;  %v8134_v46 = vld [vmem:[#allocation37_spill] sm:$0xff]  ;;  %2048 = vrot.lane.b32.xlu1 %v5943_v19, %s4351_s16 }
 0x230   : > { %v5946_v54 = vmul.f32 0.0010283801, %v8134_v46  ;;  %v5962_v47 = vpop.permute.xlu1 %1784  ;;  %v5964_v46 = vpop.permute.xlu0 %1782  ;;  %8146 = vst [vmem:[#allocation37_spill] sm:$0xff] %v6012_v26 }
 0x233   : > { %2042 = vrot.lane.b32.xlu0 %v5927_v14, %s4351_s16  ;;  %2052 = vrot.lane.b32.xlu1 %v5957_v59, %s4351_s16 }
 0x234   : > { %v5990_v10 = vpop.permute.xlu1 %1788  ;;  %v5992_v29 = vpop.permute.xlu0 %1786 }
 0x237   : > { %2046 = vrot.lane.b32.xlu0 %v5946_v54, %s4351_s16  ;;  %2056 = vrot.lane.b32.xlu1 %v5985_v17, %s4351_s16 }
 0x238   : > { %v6018_v25 = vpop.permute.xlu1 %1792  ;;  %v6020_v9 = vpop.permute.xlu0 %1790 }
 0x239   : > { %8148 = vst [vmem:[#allocation66_spill] sm:$0xff] %v6018_v25  ;;  %8149 = vst [vmem:[#allocation67_spill] sm:$0xff] %v6020_v9 }
 0x23b   : > { %2050 = vrot.lane.b32.xlu0 %v5960_v7, %s4351_s16  ;;  %2389 = vrot.lane.b32.xlu1 %v5999_v31, %s4342_s21 }
 0x23c   : > { %v6046_v41 = vpop.permute.xlu1 %1828  ;;  %v6048_v56 = vpop.permute.xlu0 %1826 }
 0x23f   : > { %2054 = vrot.lane.b32.xlu0 %v5988_v51, %s4351_s16  ;;  %2393 = vrot.lane.b32.xlu1 %v6027_v45, %s4342_s21  ;;  %v6125_v45 = vmul.f32 0.036000773, %v6037_v37 }
 0x240   : > { %v6074_v6 = vpop.permute.xlu1 %1832  ;;  %v6076_v32 = vpop.permute.xlu0 %1830 }
 0x241   : > { %8170 = vst [vmem:[#allocation99_spill] sm:$0xff] %v6125_v45 }
 0x243   : > { %2387 = vrot.lane.b32.xlu0 %v6002_v55, %s4342_s21  ;;  %2397 = vrot.lane.b32.xlu1 %v6055_v42, %s4342_s21  ;;  %v6114_v42 = vmul.f32 0.036000773, %v6016_v18  ;;  %v6156_v55 = vmul.f32 0.10936069, %v5982_v0 }
 0x244   : > { %v6088_v43 = vpop.permute.xlu1 %1836  ;;  %v6090_v60 = vpop.permute.xlu0 %1834 }
 0x245   : > { %8162 = vst [vmem:[#allocation91_spill] sm:$0xff] %v6088_v43  ;;  %8163 = vst [vmem:[#allocation92_spill] sm:$0xff] %v6090_v60  ;;  %v2565_v60 = vmul.f32 0.26601171, %v6016_v18  ;;  %v2563_v43 = vmul.f32 0.26601171, %v5982_v0 }
 0x246   : > { %8169 = vst [vmem:[#allocation98_spill] sm:$0xff] %v6114_v42 }
 0x247   : > { %2391 = vrot.lane.b32.xlu0 %v6030_v33, %s4342_s21  ;;  %2401 = vrot.lane.b32.xlu1 %v6083_v23, %s4342_s21  ;;  %v6111_v23 = vmul.f32 0.036000773, %v6009_v2 }
 0x248   : > { %v6102_v44 = vpop.permute.xlu1 %1840  ;;  %v6104_v35 = vpop.permute.xlu0 %1838 }
 0x249   : > { %8166 = vst [vmem:[#allocation95_spill] sm:$0xff] %v6102_v44  ;;  %8167 = vst [vmem:[#allocation96_spill] sm:$0xff] %v6104_v35  ;;  %v6198_v44 = vmul.f32 0.10936069, %v6072_v28 }
 0x24a   : > { %8168 = vst [vmem:[#allocation97_spill] sm:$0xff] %v6111_v23 }
 0x24b   : > { %2395 = vrot.lane.b32.xlu0 %v6058_v40, %s4342_s21  ;;  %2437 = vrot.lane.b32.xlu1 %v6097_v62, %s4343_s8  ;;  %v6142_v40 = vmul.f32 0.036000773, %v6072_v28  ;;  %8184 = vst [vmem:[#allocation113_spill] sm:$0xff] %v6198_v44 }
 0x24c   : > { %v6116_v8 = vpop.permute.xlu1 %1876  ;;  %v6118_v48 = vpop.permute.xlu0 %1874 }
 0x24d   : > { %8173 = vst [vmem:[#allocation102_spill] sm:$0xff] %v6142_v40 }
 0x24f   : > { %2399 = vrot.lane.b32.xlu0 %v6086_v30, %s4342_s21  ;;  %2441 = vrot.lane.b32.xlu1 %v6111_v23, %s4343_s8  ;;  %v6128_v30 = vmul.f32 0.036000773, %v6044_v36 }
 0x250   : > { %v6130_v50 = vpop.permute.xlu1 %1880  ;;  %v6132_v31 = vpop.permute.xlu0 %1878 }
 0x251   : > { %8171 = vst [vmem:[#allocation100_spill] sm:$0xff] %v6128_v30 }
 0x253   : > { %2435 = vrot.lane.b32.xlu0 %v6100_v34, %s4343_s8  ;;  %2445 = vrot.lane.b32.xlu1 %v6125_v45, %s4343_s8  ;;  %v6153_v45 = vmul.f32 0.10936069, %v5975_v58 }
 0x254   : > { %v6144_v62 = vpop.permute.xlu1 %1884  ;;  %v6146_v23 = vpop.permute.xlu0 %1882 }
 0x255   : > { %8174 = vst [vmem:[#allocation103_spill] sm:$0xff] %v6144_v62  ;;  %8175 = vst [vmem:[#allocation104_spill] sm:$0xff] %v6146_v23  ;;  %v2515_v23 = vmul.f32 0.21300554, %v5982_v0 }
 0x256   : > { %8176 = vst [vmem:[#allocation105_spill] sm:$0xff] %v6153_v45 }
 0x257   : > { %2439 = vrot.lane.b32.xlu0 %v6114_v42, %s4343_s8  ;;  %2449 = vrot.lane.b32.xlu1 %v6139_v5, %s4343_s8  ;;  %v6167_v5 = vmul.f32 0.10936069, %v6009_v2 }
 0x258   : > { %v6158_v33 = vpop.permute.xlu1 %1888  ;;  %v6160_v13 = vpop.permute.xlu0 %1886 }
 0x259   : > { %8177 = vst [vmem:[#allocation106_spill] sm:$0xff] %v6158_v33  ;;  %8178 = vst [vmem:[#allocation107_spill] sm:$0xff] %v6160_v13  ;;  %v6184_v13 = vmul.f32 0.10936069, %v6044_v36 }
 0x25a   : > { %8179 = vst [vmem:[#allocation108_spill] sm:$0xff] %v6167_v5 }
 0x25b   : > { %2443 = vrot.lane.b32.xlu0 %v6128_v30, %s4343_s8  ;;  %2485 = vrot.lane.b32.xlu1 %v6153_v45, %s4344_s18  ;;  %v6181_v45 = vmul.f32 0.10936069, %v6037_v37 }
 0x25c   : > { %v6172_v26 = vpop.permute.xlu1 %1908  ;;  %v6174_v30 = vpop.permute.xlu0 %1906 }
 0x25d   : > { %8180 = vst [vmem:[#allocation109_spill] sm:$0xff] %v6181_v45 }
 0x25f   : > { %2447 = vrot.lane.b32.xlu0 %v6142_v40, %s4343_s8  ;;  %v6170_v40 = vmul.f32 0.10936069, %v6016_v18  ;;  %2489 = vrot.lane.b32.xlu1 %v6167_v5, %s4344_s18  ;;  %v6195_v5 = vmul.f32 0.10936069, %v6065_v15 }
 0x260   : > { %v6186_v33 = vpop.permute.xlu1 %1912  ;;  %v6188_v35 = vpop.permute.xlu0 %1910 }
 0x261   : > { %8181 = vst [vmem:[#allocation110_spill] sm:$0xff] %v6186_v33  ;;  %8182 = vst [vmem:[#allocation111_spill] sm:$0xff] %v6188_v35 }
 0x262   : > { %8183 = vst [vmem:[#allocation112_spill] sm:$0xff] %v6195_v5 }
 0x263   : > { %2483 = vrot.lane.b32.xlu0 %v6156_v55, %s4344_s18  ;;  %2493 = vrot.lane.b32.xlu1 %v6181_v45, %s4344_s18  ;;  %v6209_v45 = vmul.f32 0.21300554, %v5975_v58 }
 0x264   : > { %v6200_v34 = vpop.permute.xlu1 %1916  ;;  %v6202_v42 = vpop.permute.xlu0 %1914 }
 0x265   : > { %8185 = vst [vmem:[#allocation114_spill] sm:$0xff] %v6200_v34  ;;  %8186 = vst [vmem:[#allocation115_spill] sm:$0xff] %v6202_v42  ;;  %v6220_v42 = vmul.f32 0.21300554, %v6009_v2 }
 0x267   : > { %2487 = vrot.lane.b32.xlu0 %v6170_v40, %s4344_s18  ;;  %2497 = vrot.lane.b32.xlu1 %v6195_v5, %s4344_s18  ;;  %v2517_v5 = vmul.f32 0.21300554, %v6016_v18 }
 0x268   : > { %v6212_v62 = vpop.permute.xlu1 %1920  ;;  %v6214_v9 = vpop.permute.xlu0 %1918 }
 0x269   : > { %8187 = vst [vmem:[#allocation116_spill] sm:$0xff] %v6212_v62  ;;  %8188 = vst [vmem:[#allocation117_spill] sm:$0xff] %v6214_v9  ;;  %v6231_v9 = vmul.f32 0.21300554, %v6037_v37  ;;  %v2519_v62 = vmul.f32 0.21300554, %v6044_v36 }
 0x26b   : > { %2491 = vrot.lane.b32.xlu0 %v6184_v13, %s4344_s18  ;;  %2533 = vrot.lane.b32.xlu1 %v6209_v45, %s4345_s19  ;;  %8190 = vst [vmem:[#allocation119_spill] sm:$0xff] %v6231_v9 }
 0x26c   : > { %v6225_v34 = vpop.permute.xlu0 %1938 }
 0x26d   : > { %8189 = vst [vmem:[#allocation118_spill] sm:$0xff] %v6225_v34 }
 0x26f   : > { %2495 = vrot.lane.b32.xlu0 %v6198_v44, %s4344_s18  ;;  %v6223_v44 = vpop.permute.xlu1 %1940  ;;  %2537 = vrot.lane.b32.xlu1 %v6220_v42, %s4345_s19 }
 0x270   : > { %v6236_v33 = vpop.permute.xlu0 %1942 }
 0x271   : > { %8192 = vst [vmem:[#allocation121_spill] sm:$0xff] %v6236_v33  ;;  %v6251_v33 = vmul.f32 0.21300554, %v6072_v28 }
 0x273   : > { %2531 = vrot.lane.b32.xlu0 %v2515_v23, %s4345_s19  ;;  %v6234_v35 = vpop.permute.xlu1 %1944  ;;  %2541 = vrot.lane.b32.xlu1 %v6231_v9, %s4345_s19 }
 0x274   : > { %8191 = vst [vmem:[#allocation120_spill] sm:$0xff] %v6234_v35  ;;  %v6245_v1 = vpop.permute.xlu0 %1946  ;;  %v2567_v35 = vmul.f32 0.26601171, %v6044_v36 }
 0x275   : > { %8193 = vst [vmem:[#allocation122_spill] sm:$0xff] %v6245_v1 }
 0x277   : > { %2535 = vrot.lane.b32.xlu0 %v2517_v5, %s4345_s19  ;;  %v6243_v25 = vpop.permute.xlu1 %1948  ;;  %2583 = vrot.lane.b32.xlu1 %v2565_v60, %s4346_s28  ;;  %v2566_v60 = vmul.f32 0.26601171, %v6009_v2 }
 0x278   : > { %v6255_v34 = vpop.permute.xlu0 %1950 }
 0x279   : > { %8195 = vst [vmem:[#allocation124_spill] sm:$0xff] %v6255_v34 }
 0x27b   : > { %2539 = vrot.lane.b32.xlu0 %v2519_v62, %s4345_s19  ;;  %v6253_v9 = vpop.permute.xlu1 %1952  ;;  %2587 = vrot.lane.b32.xlu1 %v2567_v35, %s4346_s28  ;;  %v2569_v35 = vmul.f32 0.26601171, %v6072_v28 }
 0x27c   : > { %8194 = vst [vmem:[#allocation123_spill] sm:$0xff] %v6253_v9  ;;  %v6262_v0 = vpop.permute.xlu0 %1970 }
 0x27f   : > { %2579 = vrot.lane.b32.xlu0 %v2563_v43, %s4346_s28  ;;  %v6260_v18 = vpop.permute.xlu1 %1972  ;;  %2615 = vrot.lane.b32.xlu1 %v2517_v5, %s4347_s30  ;;  %v2564_v43 = vmul.f32 0.26601171, %v5975_v58 }
 0x283   : > { %2543 = vrot.lane.b32.xlu0 %v6251_v33, %s4345_s19  ;;  %v6268_v36 = vpop.permute.xlu1 %1976  ;;  %2585 = vrot.lane.b32.xlu1 %v2566_v60, %s4346_s28  ;;  %v2568_v60 = vmul.f32 0.26601171, %v6037_v37 }
 0x287   : > { %2611 = vrot.lane.b32.xlu0 %v2515_v23, %s4347_s30  ;;  %v6275_v9 = vpop.permute.xlu1 %1980  ;;  %2619 = vrot.lane.b32.xlu1 %v2519_v62, %s4347_s30  ;;  %v1707_v62 = vadd.f32 %v5852_v61, %v5924_v27  ;;  %v1708_v61 = vadd.f32 %v5862_v20, %v5946_v54  ;;  %v1710_v20 = vadd.f32 %v5870_v63, %v5960_v7 }
 0x288   : > { %v1712_v7 = vadd.f32 %v5878_v21, %v5988_v51  ;;  %v8196_v21 = vld [vmem:[#allocation118_spill] sm:$0xff] }
 0x289   : > { %v6270_v34 = vpop.permute.xlu0 %1974  ;;  %v1755_v58 = vadd.f32 %v5884_v38, %v1707_v62 }
 0x28b   : > { %2581 = vrot.lane.b32.xlu0 %v2564_v43, %s4346_s28  ;;  %v6281_v5 = vpop.permute.xlu1 %1984  ;;  %2647 = vrot.lane.b32.xlu1 %v6170_v40, %s4348_s3  ;;  %v6291_v43 = vmul.f32 0.21300554, %v6065_v15  ;;  %v1803_v27 = vadd.f32 %v5948_v4, %v1755_v58  ;;  %v8199_v4 = vld [vmem:[#allocation91_spill] sm:$0xff] }
 0x28d   : > { %v6277_v1 = vpop.permute.xlu0 %1978  ;;  %v1851_v62 = vadd.f32 %v6046_v41, %v1803_v27  ;;  %v8204_v27 = vld [vmem:[#allocation103_spill] sm:$0xff] }
 0x28f   : > { %2591 = vrot.lane.b32.xlu0 %v2569_v35, %s4346_s28  ;;  %v1706_v35 = vadd.f32 %v5854_v3, %v5927_v14  ;;  %v2005_v28 = vpop.permute.xlu1 %2004  ;;  %2589 = vrot.lane.b32.xlu1 %v2568_v60, %s4346_s28  ;;  %v1756_v60 = vadd.f32 %v5899_v11, %v1708_v61  ;;  %v1899_v41 = vadd.f32 %v6116_v8, %v1851_v62  ;;  %v8202_v8 = vld [vmem:[#allocation111_spill] sm:$0xff]  ;;  %v8206_v62 = vld [vmem:[#allocation98_spill] sm:$0xff] }
 0x291   : > { %v6283_v23 = vpop.permute.xlu0 %1982  ;;  %v1754_v40 = vadd.f32 %v5886_v53, %v1706_v35 }
 0x293   : > { %2643 = vrot.lane.b32.xlu0 %v6156_v55, %s4348_s3  ;;  %v1709_v55 = vadd.f32 %v5860_v24, %v5943_v19  ;;  %v1802_v3 = vadd.f32 %v5950_v22, %v1754_v40  ;;  %v6308_v14 = vpop.permute.xlu1 %2008  ;;  %v1711_v24 = vadd.f32 %v5868_v12, %v5957_v59  ;;  %2617 = vrot.lane.b32.xlu1 %v6220_v42, %s4347_s30 }
 0x294   : > { %v1713_v59 = vadd.f32 %v5876_v57, %v5985_v17  ;;  %v1758_v42 = vadd.f32 %v5912_v49, %v1710_v20  ;;  %v8198_v49 = vld [vmem:[#allocation66_spill] sm:$0xff]  ;;  %v8208_v20 = vld [vmem:[#allocation120_spill] sm:$0xff] }
 0x295   : > { %v2003_v2 = vpop.permute.xlu0 %2002  ;;  %v1757_v53 = vadd.f32 %v5897_v16, %v1709_v55  ;;  %v1850_v35 = vadd.f32 %v6048_v56, %v1802_v3  ;;  %v1804_v16 = vadd.f32 %v5964_v46, %v1756_v60  ;;  %v1759_v12 = vadd.f32 %v5910_v52, %v1711_v24  ;;  %v8197_v52 = vld [vmem:[#allocation48_spill] sm:$0xff]  ;;  %v8203_v55 = vld [vmem:[#allocation67_spill] sm:$0xff] }
 0x296   : > { %v1761_v17 = vadd.f32 %v5929_v39, %v1713_v59  ;;  %v1806_v57 = vadd.f32 %v5992_v29, %v1758_v42  ;;  %v1760_v39 = vadd.f32 %v8197_v52, %v1712_v7  ;;  %v2570_v24 = vmul.f32 0.26601171, %v6065_v15  ;;  %v8211_v7 = vld [vmem:[#allocation96_spill] sm:$0xff]  ;;  %v8212_v42 = vld [vmem:[#allocation114_spill] sm:$0xff] }
 0x297   : > { %2545 = vrot.lane.b32.xlu0 %v6291_v43, %s4345_s19  ;;  %v1805_v22 = vadd.f32 %v5962_v47, %v1757_v53  ;;  %v1898_v56 = vadd.f32 %v6118_v48, %v1850_v35  ;;  %v6334_v63 = vpop.permute.xlu1 %2012  ;;  %v1852_v19 = vadd.f32 %v6076_v32, %v1804_v16  ;;  %v1931_v48 = vadd.f32 %v6172_v26, %v1899_v41  ;;  %v8200_v47 = vld [vmem:[#allocation92_spill] sm:$0xff]  ;;  %v8207_v35 = vld [vmem:[#allocation94_spill] sm:$0xff]  ;;  %v8209_v16 = vld [vmem:[#allocation121_spill] sm:$0xff] }
 0x298   : > { %v1807_v51 = vadd.f32 %v5990_v10, %v1759_v12  ;;  %2651 = vrot.lane.b32.xlu1 %v6184_v13, %s4348_s3  ;;  %v1809_v10 = vadd.f32 %v8198_v49, %v1761_v17  ;;  %v1854_v46 = vadd.f32 %v8200_v47, %v1806_v57  ;;  %v1808_v61 = vadd.f32 %v8203_v55, %v1760_v39  ;;  %v8205_v53 = vld [vmem:[#allocation104_spill] sm:$0xff]  ;;  %v6381_v57 = vld [vmem:[#allocation4 + $0x11] sm:$0xff]  ;;  %v8228_v55 = vld [vmem:[#allocation117_spill] sm:$0xff] }
 0x299   : > { %v6310_v38 = vpop.permute.xlu0 %2006  ;;  %v1853_v11 = vadd.f32 %v6074_v6, %v1805_v22  ;;  %v1930_v54 = vadd.f32 %v6174_v30, %v1898_v56  ;;  %v1900_v32 = vadd.f32 %v6132_v31, %v1852_v19  ;;  %v1963_v26 = vadd.f32 %v6223_v44, %v1931_v48  ;;  %v8210_v56 = vld [vmem:[#allocation95_spill] sm:$0xff]  ;;  %8215 = vst [vmem:[#allocation48_spill] sm:$0xff] %v6381_v57  ;;  %v8220_v39 = vld [vmem:[#allocation106_spill] sm:$0xff] }
 0x29a   : > { %v1855_v29 = vadd.f32 %v8199_v4, %v1807_v51  ;;  %v1902_v60 = vadd.f32 %v8205_v53, %v1854_v46  ;;  %v1857_v59 = vadd.f32 %v8210_v56, %v1809_v10  ;;  %v1856_v12 = vadd.f32 %v8211_v7, %v1808_v61  ;;  %v8213_v19 = vld [vmem:[#allocation115_spill] sm:$0xff]  ;;  %v6379_v51 = vld [vmem:[#allocation4 + $0x10] sm:$0xff] }
 0x29b   : > { %2613 = vrot.lane.b32.xlu0 %v6209_v45, %s4347_s30  ;;  %v1901_v6 = vadd.f32 %v6130_v50, %v1853_v11  ;;  %v1962_v30 = vadd.f32 %v8196_v21, %v1930_v54  ;;  %v6357_v58 = vpop.permute.xlu1 %2016  ;;  %v1932_v31 = vadd.f32 %v8202_v8, %v1900_v32  ;;  %v1995_v44 = vadd.f32 %v6260_v18, %v1963_v26  ;;  %v6387_v21 = vld [vmem:[#allocation4 + $0x13] sm:$0xff] }
 0x29c   : > { %v1903_v3 = vadd.f32 %v8204_v27, %v1855_v29  ;;  %2679 = vrot.lane.b32.xlu1 %v8206_v62, %s4349_s15  ;;  %v1934_v48 = vadd.f32 %v8213_v19, %v1902_v60  ;;  %8214 = vst [vmem:[#allocation118_spill] sm:$0xff] %v6379_v51  ;;  %8217 = vst [vmem:[#allocation91_spill] sm:$0xff] %v6387_v21  ;;  %v6391_v52 = vld [vmem:[#allocation4 + $0x15] sm:$0xff]  ;;  %v1905_v49 = vadd.f32 %v8220_v39, %v1857_v59  ;;  %v8241_v59 = vld [vmem:[#allocation124_spill] sm:$0xff] }
 0x29d   : > { %v6336_v45 = vpop.permute.xlu0 %2010  ;;  %v1994_v40 = vadd.f32 %v6262_v0, %v1962_v30  ;;  %v1964_v18 = vadd.f32 %v8209_v16, %v1932_v31  ;;  %v2027_v41 = vadd.f32 %v2005_v28, %v1995_v44  ;;  %v6389_v30 = vld [vmem:[#allocation4 + $0x14] sm:$0xff]  ;;  %v8227_v44 = vld [vmem:[#allocation116_spill] sm:$0xff] }
 0x29e   : > { %v1935_v11 = vadd.f32 %v8212_v42, %v1903_v3  ;;  %8218 = vst [vmem:[#allocation92_spill] sm:$0xff] %v6389_v30  ;;  %v8221_v10 = vld [vmem:[#allocation107_spill] sm:$0xff]  ;;  %v6414_v3 = vld [vmem:[#allocation4 + $0x30] sm:$0xff]  ;;  %v8235_v16 = vld [vmem:[#allocation108_spill] sm:$0xff] }
 0x29f   : > { %2623 = vrot.lane.b32.xlu0 %v6251_v33, %s4347_s30  ;;  %v8201_v33 = vld [vmem:[#allocation110_spill] sm:$0xff]  ;;  %v2026_v0 = vadd.f32 %v2003_v2, %v1994_v40  ;;  %v2045_v54 = vpop.permute.xlu1 %2044  ;;  %v1996_v2 = vadd.f32 %v6270_v34, %v1964_v18  ;;  %v1904_v4 = vadd.f32 %v8221_v10, %v1856_v12  ;;  %v8222_v29 = vld [vmem:[#allocation119_spill] sm:$0xff]  ;;  %v1937_v40 = vadd.f32 %v8227_v44, %v1905_v49  ;;  %v8236_v18 = vld [vmem:[#allocation105_spill] sm:$0xff] }
 0x2a0   : > { %v1933_v50 = vadd.f32 %v8201_v33, %v1901_v6  ;;  %v6383_v6 = vld [vmem:[#allocation4 + $0x12] sm:$0xff]  ;;  %v2067_v28 = vadd.f32 %v2045_v54, %v2027_v41  ;;  %8219 = vst [vmem:[#allocation110_spill] sm:$0xff] %v6391_v52  ;;  %2621 = vrot.lane.b32.xlu1 %v8222_v29, %s4347_s30  ;;  %v1967_v46 = vadd.f32 %v6243_v25, %v1935_v11  ;;  %8229 = vst [vmem:[#allocation104_spill] sm:$0xff] %v6414_v3  ;;  %v8248_v49 = vld [vmem:[#allocation100_spill] sm:$0xff] }
 0x2a1   : > { %v6359_v13 = vpop.permute.xlu0 %2014  ;;  %8216 = vst [vmem:[#allocation66_spill] sm:$0xff] %v6383_v6  ;;  %v6400_v34 = vld [vmem:[#allocation4 + $0x17] sm:$0xff]  ;;  %v2028_v31 = vadd.f32 %v6310_v38, %v1996_v2  ;;  %v1936_v61 = vadd.f32 %v8228_v55, %v1904_v4  ;;  %v8249_v10 = vld [vmem:[#allocation113_spill] sm:$0xff]  ;;  %v8317_v6 = vld [vmem:[#allocation88_spill] sm:$0xff] }
 0x2a2   : > { %v1965_v22 = vadd.f32 %v8208_v20, %v1933_v50  ;;  %8224 = vst [vmem:[#allocation67_spill] sm:$0xff] %v6400_v34  ;;  %v6402_v47 = vld [vmem:[#allocation4 + $0x18] sm:$0xff]  ;;  %v8226_v33 = vld [vmem:[#allocation122_spill] sm:$0xff]  ;;  %2100 = vst.msk [vmem:[#allocation3 + $0x82] sm:$0xff] %vm670_vm0, %v2067_v28  ;;  %v1999_v38 = vadd.f32 %v6275_v9, %v1967_v46 }
 0x2a3   : > { %2675 = vrot.lane.b32.xlu0 %v8207_v35, %s4349_s15  ;;  %8225 = vst [vmem:[#allocation103_spill] sm:$0xff] %v6402_v47  ;;  %v1966_v50 = vadd.f32 %v8226_v33, %v1934_v48  ;;  %v2049_v27 = vpop.permute.xlu1 %2048  ;;  %v6416_v53 = vld [vmem:[#allocation4 + $0x31] sm:$0xff]  ;;  %v1968_v7 = vadd.f32 %v8241_v59, %v1936_v61  ;;  %v8250_v29 = vld [vmem:[#allocation37_spill] sm:$0xff] }
 0x2a4   : > { %v1997_v32 = vadd.f32 %v6268_v36, %v1965_v22  ;;  %v6398_v36 = vld [vmem:[#allocation4 + $0x16] sm:$0xff]  ;;  %8230 = vst [vmem:[#allocation98_spill] sm:$0xff] %v6416_v53  ;;  %2649 = vrot.lane.b32.xlu1 %v8235_v16, %s4348_s3  ;;  %v2031_v12 = vadd.f32 %v6334_v63, %v1999_v38  ;;  %v8293_v47 = vld [vmem:[#allocation49_spill] sm:$0xff] }
 0x2a5   : > { %v2043_v17 = vpop.permute.xlu0 %2042  ;;  %8223 = vst [vmem:[#allocation111_spill] sm:$0xff] %v6398_v36  ;;  %2092 = vst.msk [vmem:[#allocation4 + $0x18] sm:$0xff] %vm670_vm0, %v2067_v28  ;;  %v1998_v60 = vadd.f32 %v6277_v1, %v1966_v50  ;;  %v6424_v20 = vld [vmem:[#allocation4 + $0x34] sm:$0xff] }
 0x2a6   : > { %v2066_v26 = vadd.f32 %v2043_v17, %v2026_v0  ;;  %v2029_v8 = vadd.f32 %v6308_v14, %v1997_v32  ;;  %v6418_v14 = vld [vmem:[#allocation4 + $0x32] sm:$0xff]  ;;  %8233 = vst [vmem:[#allocation121_spill] sm:$0xff] %v6424_v20 }
 0x2a7   : > { %2593 = vrot.lane.b32.xlu0 %v2570_v24, %s4346_s28  ;;  %8231 = vst [vmem:[#allocation94_spill] sm:$0xff] %v6418_v14  ;;  %v6422_v24 = vld [vmem:[#allocation4 + $0x33] sm:$0xff]  ;;  %v2030_v42 = vadd.f32 %v6336_v45, %v1998_v60  ;;  %v2053_v11 = vpop.permute.xlu1 %2052  ;;  %v2000_v45 = vadd.f32 %v6283_v23, %v1968_v7  ;;  %v8251_v23 = vld [vmem:[#allocation52_spill] sm:$0xff] }
 0x2a8   : > { %2099 = vst.msk [vmem:[#allocation3 + $0x7a] sm:$0xc0] %vm688_vm2, %v2066_v26  ;;  %v2069_v62 = vadd.f32 %v2049_v27, %v2029_v8  ;;  %8232 = vst [vmem:[#allocation120_spill] sm:$0xff] %v6422_v24  ;;  %v6426_v22 = vld [vmem:[#allocation4 + $0x35] sm:$0xff]  ;;  %v2071_v32 = vadd.f32 %v2053_v11, %v2031_v12  ;;  %2683 = vrot.lane.b32.xlu1 %v8248_v49, %s4349_s15  ;;  %v8311_v24 = vld [vmem:[#allocation101_spill] sm:$0xff] }
 0x2a9   : > { %2091 = vst.msk [vmem:[#allocation4 + $0x10] sm:$0xff] %vm670_vm0, %v2066_v26  ;;  %v2047_v25 = vpop.permute.xlu0 %2046  ;;  %8234 = vst [vmem:[#allocation95_spill] sm:$0xff] %v6426_v22  ;;  %v6432_v41 = vld [vmem:[#allocation4 + $0x36] sm:$0xff] }
 0x2aa   : > { %v2068_v35 = vadd.f32 %v2047_v25, %v2028_v31  ;;  %8237 = vst [vmem:[#allocation96_spill] sm:$0xff] %v6432_v41  ;;  %v6434_v0 = vld [vmem:[#allocation4 + $0x37] sm:$0xff]  ;;  %2102 = vst.msk [vmem:[#allocation3 + $0x92] sm:$0xff] %vm670_vm0, %v2069_v62 }
 0x2ab   : > { %2645 = vrot.lane.b32.xlu0 %v8236_v18, %s4348_s3  ;;  %8238 = vst [vmem:[#allocation114_spill] sm:$0xff] %v6434_v0  ;;  %v6436_v9 = vld [vmem:[#allocation4 + $0x38] sm:$0xff]  ;;  %v6446_v48 = vld [vmem:[#allocation4 + $0x50] sm:$0xff]  ;;  %2104 = vst.msk [vmem:[#allocation3 + $0xa2] sm:$0xff] %vm670_vm0, %v2071_v32  ;;  %v2057_v55 = vpop.permute.xlu1 %2056 }
 0x2ac   : > { %8239 = vst [vmem:[#allocation115_spill] sm:$0xff] %v6436_v9  ;;  %v8240_v1 = vld [vmem:[#allocation123_spill] sm:$0xff]  ;;  %2101 = vst.msk [vmem:[#allocation3 + $0x8a] sm:$0xc0] %vm688_vm2, %v2068_v35  ;;  %v4182_v4 = vld [vmem:[%s4542_s5 + $0x10] sm:$0xff] }
 0x2ad   : > { %v1969_v56 = vadd.f32 %v8240_v1, %v1937_v40  ;;  %2093 = vst.msk [vmem:[#allocation4 + $0x30] sm:$0xff] %vm670_vm0, %v2068_v35  ;;  %2094 = vst.msk [vmem:[#allocation4 + $0x38] sm:$0xff] %vm670_vm0, %v2069_v62  ;;  %v2051_v19 = vpop.permute.xlu0 %2050  ;;  %v6448_v54 = vld [vmem:[#allocation4 + $0x51] sm:$0xff]  ;;  %v6466_v46 = vmul.f32 %v4182_v4, %v8250_v29  ;;  %v2032_v40 = vadd.f32 %v6359_v13, %v2000_v45  ;;  %v8262_v18 = vld [vmem:[#allocation80_spill] sm:$0xff] }
 0x2ae   : > { %8242 = vst [vmem:[#allocation106_spill] sm:$0xff] %v6446_v48  ;;  %8243 = vst [vmem:[#allocation107_spill] sm:$0xff] %v6448_v54  ;;  %v6450_v17 = vld [vmem:[#allocation4 + $0x52] sm:$0xff]  ;;  %v2070_v2 = vadd.f32 %v2051_v19, %v2030_v42  ;;  %2711 = vrot.lane.b32.xlu1 %v8262_v18, %s4350_s26  ;;  %v8268_v45 = vld [vmem:[#allocation109_spill] sm:$0xff] }
 0x2af   : > { %8244 = vst [vmem:[#allocation119_spill] sm:$0xff] %v6450_v17  ;;  %v2001_v63 = vadd.f32 %v6281_v5, %v1969_v56  ;;  %v6454_v28 = vld [vmem:[#allocation4 + $0x53] sm:$0xff]  ;;  %2655 = vrot.lane.b32.xlu0 %v8249_v10, %s4348_s3  ;;  %v4183_v5 = vld [vmem:[%s4542_s5] sm:$0xff]  ;;  %v6503_v56 = vmul.f32 0.007598758, %v6466_v46  ;;  %v6516_v42 = vpop.permute.xlu1 %2389 }
 0x2b0   : > { %8245 = vst [vmem:[#allocation122_spill] sm:$0xff] %v6454_v28  ;;  %v6456_v26 = vld [vmem:[#allocation4 + $0x54] sm:$0xff]  ;;  %v6470_v33 = vmul.f32 %v4183_v5, %v8251_v23  ;;  %2103 = vst.msk [vmem:[#allocation3 + $0x9a] sm:$0xc0] %vm688_vm2, %v2070_v2  ;;  %v2781_v29 = vld [vmem:[#allocation3 + $0xc8] sm:$0x3] }
 0x2b1   : > { %8246 = vst [vmem:[#allocation116_spill] sm:$0xff] %v6456_v26  ;;  %v6458_v39 = vld [vmem:[#allocation4 + $0x55] sm:$0xff]  ;;  %v2033_v44 = vadd.f32 %v6357_v58, %v2001_v63  ;;  %v2055_v61 = vpop.permute.xlu0 %2054  ;;  %8264 = vst [vmem:[#allocation80_spill] sm:$0xff] %v6503_v56  ;;  %v2785_v9 = vld [vmem:[#allocation3 + $0xe8] sm:$0x3] }
 0x2b2   : > { %8247 = vst [vmem:[#allocation117_spill] sm:$0xff] %v6458_v39  ;;  %v6472_v50 = vld [vmem:[#allocation4 + $0x56] sm:$0xff]  ;;  %v2072_v13 = vadd.f32 %v2055_v61, %v2032_v40  ;;  %v6506_v59 = vmul.f32 0.007598758, %v6470_v33  ;;  %3096 = vrot.lane.b32.xlu1 %v6503_v56, %s4342_s21  ;;  %v8278_v61 = vld [vmem:[#allocation85_spill] sm:$0xff] }
 0x2b3   : > { %8252 = vst [vmem:[#allocation108_spill] sm:$0xff] %v6472_v50  ;;  %v6474_v8 = vld [vmem:[#allocation4 + $0x57] sm:$0xff]  ;;  %v2073_v58 = vadd.f32 %v2057_v55, %v2033_v44  ;;  %v6524_v19 = vpop.permute.xlu1 %2393  ;;  %v6536_v49 = vld [vmem:[#allocation4 + $0xf] sm:$0xff]  ;;  %v6677_v26 = vmul.f32 0.10936069, %v6466_v46 }
 0x2b4   : > { %8253 = vst [vmem:[#allocation105_spill] sm:$0xff] %v6474_v8  ;;  %v6476_v31 = vld [vmem:[#allocation4 + $0x58] sm:$0xff]  ;;  %2095 = vst.msk [vmem:[#allocation4 + $0x50] sm:$0xff] %vm670_vm0, %v2070_v2  ;;  %v6484_v27 = vld [vmem:[#allocation4 + $0x70] sm:$0xff] }
 0x2b5   : > { %8254 = vst [vmem:[#allocation123_spill] sm:$0xff] %v6476_v31  ;;  %2096 = vst.msk [vmem:[#allocation4 + $0x58] sm:$0xff] %vm670_vm0, %v2071_v32  ;;  %v6486_v25 = vld [vmem:[#allocation4 + $0x71] sm:$0xff]  ;;  %v6518_v11 = vpop.permute.xlu0 %2387  ;;  %v8275_v44 = vld [vmem:[#allocation93_spill] sm:$0xff] }
 0x2b6   : > { %8255 = vst [vmem:[#allocation124_spill] sm:$0xff] %v6484_v27  ;;  %8256 = vst [vmem:[#allocation100_spill] sm:$0xff] %v6486_v25  ;;  %v6488_v38 = vld [vmem:[#allocation4 + $0x72] sm:$0xff]  ;;  %2653 = vrot.lane.b32.xlu1 %v8268_v45, %s4348_s3  ;;  %v8281_v45 = vld [vmem:[#allocation61_spill] sm:$0xff] }
 0x2b7   : > { %8257 = vst [vmem:[#allocation113_spill] sm:$0xff] %v6488_v38  ;;  %v6490_v60 = vld [vmem:[#allocation4 + $0x73] sm:$0xff]  ;;  %2106 = vst.msk [vmem:[#allocation3 + $0xb2] sm:$0xff] %vm670_vm0, %v2073_v58  ;;  %v6538_v10 = vpop.permute.xlu1 %2397  ;;  %v8286_v31 = vld [vmem:[#allocation112_spill] sm:$0xff] }
 0x2b8   : > { %8258 = vst [vmem:[#allocation37_spill] sm:$0xff] %v6490_v60  ;;  %v6492_v62 = vld [vmem:[#allocation4 + $0x74] sm:$0xff]  ;;  %2105 = vst.msk [vmem:[#allocation3 + $0xaa] sm:$0xc0] %vm688_vm2, %v2072_v13  ;;  %v4185_v8 = vld [vmem:[%s4542_s5 + $0x8] sm:$0xff] }
 0x2b9   : > { %8259 = vst [vmem:[#allocation52_spill] sm:$0xff] %v6492_v62  ;;  %v6494_v35 = vld [vmem:[#allocation4 + $0x75] sm:$0xff]  ;;  %v6526_v63 = vpop.permute.xlu0 %2391  ;;  %8271 = vst [vmem:[#allocation130_spill] sm:$0xff] %v6536_v49  ;;  %v6616_v0 = vmul.f32 %v4185_v8, %v8293_v47 }
 0x2ba   : > { %8260 = vst [vmem:[#allocation125_spill] sm:$0xff] %v6494_v35  ;;  %v6496_v16 = vld [vmem:[#allocation4 + $0x76] sm:$0xff]  ;;  %v6532_v32 = vld [vmem:[#allocation4 + $0xe] sm:$0xff]  ;;  %8272 = vst [vmem:[#allocation131_spill] sm:$0xff] %v6538_v10 }
 0x2bb   : > { %8261 = vst [vmem:[#allocation126_spill] sm:$0xff] %v6496_v16  ;;  %v8263_v1 = vld [vmem:[#allocation46_spill] sm:$0xff]  ;;  %v6510_v12 = vld [vmem:[#allocation4 + $0x78] sm:$0xff]  ;;  %8269 = vst [vmem:[#allocation109_spill] sm:$0xff] %v6532_v32  ;;  %v6550_v40 = vpop.permute.xlu1 %2401 }
 0x2bc   : > { %2707 = vrot.lane.b32.xlu0 %v8263_v1, %s4350_s26  ;;  %8265 = vst [vmem:[#allocation46_spill] sm:$0xff] %v6506_v59  ;;  %v6508_v7 = vld [vmem:[#allocation4 + $0x77] sm:$0xff]  ;;  %8267 = vst [vmem:[#allocation128_spill] sm:$0xff] %v6510_v12  ;;  %v6534_v2 = vld [vmem:[#allocation4 + $0x2e] sm:$0xff] }
 0x2bd   : > { %8266 = vst [vmem:[#allocation127_spill] sm:$0xff] %v6508_v7  ;;  %2097 = vst.msk [vmem:[#allocation4 + $0x70] sm:$0xff] %vm670_vm0, %v2072_v13  ;;  %v6540_v4 = vpop.permute.xlu0 %2395  ;;  %v2783_v5 = vld [vmem:[#allocation3 + $0xd8] sm:$0x3]  ;;  %v6542_v23 = vld [vmem:[#allocation4 + $0x2f] sm:$0xff] }
 0x2be   : > { %2098 = vst.msk [vmem:[#allocation4 + $0x78] sm:$0xff] %vm670_vm0, %v2073_v58  ;;  %8270 = vst [vmem:[#allocation129_spill] sm:$0xff] %v6534_v2  ;;  %v8279_v58 = vld [vmem:[#allocation102_spill] sm:$0xff]  ;;  %v4184_v13 = vld [vmem:[%s4542_s5 + $0x20] sm:$0xff] }
 0x2bf   : > { %8273 = vst [vmem:[#allocation132_spill] sm:$0xff] %v6542_v23  ;;  %2789 = vst.msk [vmem:[#allocation4 + $0xe] sm:$0x3] %vm672_vm1, %v2781_v29  ;;  %v8280_v18 = vld [vmem:[#allocation82_spill] sm:$0xff]  ;;  %v6563_v29 = vmul.f32 0.0010283801, %v8281_v45 }
 0x2c0   : > { %3092 = vrot.lane.b32.xlu0 %v6506_v59, %s4342_s21  ;;  %2791 = vst.msk [vmem:[#allocation4 + $0x2e] sm:$0x3] %vm672_vm1, %v2783_v5  ;;  %v6560_v1 = vmul.f32 %v4184_v13, %v8280_v18  ;;  %v8282_v5 = vld [vmem:[#allocation50_spill] sm:$0xff]  ;;  %v6591_v45 = vmul.f32 0.036000773, %v6466_v46  ;;  %v8298_v34 = vld [vmem:[#allocation87_spill] sm:$0xff] }
 0x2c1   : > { %v6552_v55 = vpop.permute.xlu0 %2399  ;;  %v6605_v49 = vld [vmem:[#allocation4 + $0x4e] sm:$0xff]  ;;  %v4187_v41 = vld [vmem:[%s4542_s5 + $0x18] sm:$0xff] }
 0x2c2   : > { %8277 = vst [vmem:[#allocation93_spill] sm:$0xff] %v6552_v55  ;;  %8289 = vst [vmem:[#allocation112_spill] sm:$0xff] %v6605_v49  ;;  %v6607_v32 = vld [vmem:[#allocation4 + $0x4f] sm:$0xff]  ;;  %v8299_v47 = vld [vmem:[#allocation47_spill] sm:$0xff] }
 0x2c3   : > { %8290 = vst [vmem:[#allocation133_spill] sm:$0xff] %v6607_v32  ;;  %2793 = vst.msk [vmem:[#allocation4 + $0x4e] sm:$0x3] %vm672_vm1, %v2785_v9  ;;  %v8291_v16 = vld [vmem:[#allocation62_spill] sm:$0xff]  ;;  %v8296_v32 = vld [vmem:[#allocation79_spill] sm:$0xff]  ;;  %v6635_v8 = vmul.f32 %v4187_v41, %v8299_v47 }
 0x2c4   : > { %2625 = vrot.lane.b32.xlu0 %v6291_v43, %s4347_s30  ;;  %v8274_v43 = vld [vmem:[#allocation97_spill] sm:$0xff]  ;;  %v8295_v49 = vld [vmem:[#allocation90_spill] sm:$0xff]  ;;  %v6627_v9 = vmul.f32 0.007598758, %v6616_v0  ;;  %v8300_v62 = vld [vmem:[#allocation83_spill] sm:$0xff] }
 0x2c5   : > { %2681 = vrot.lane.b32.xlu1 %v8274_v43, %s4349_s15  ;;  %8276 = vst [vmem:[#allocation97_spill] sm:$0xff] %v6550_v40  ;;  %v6566_v43 = vmul.f32 0.0010283801, %v8282_v5  ;;  %v6570_v12 = vpop.permute.xlu0 %2435  ;;  %v6638_v39 = vmul.f32 0.0010283801, %v8300_v62  ;;  %v6683_v28 = vld [vmem:[#allocation4 + $0x6e] sm:$0xff] }
 0x2c6   : > { %v6666_v47 = vmul.f32 0.036000773, %v6560_v1  ;;  %v2787_v38 = vld [vmem:[#allocation3 + $0xf8] sm:$0x3]  ;;  %8309 = vst [vmem:[#allocation136_spill] sm:$0xff] %v6683_v28  ;;  %v6685_v30 = vld [vmem:[#allocation4 + $0x6f] sm:$0xff] }
 0x2c7   : > { %8310 = vst [vmem:[#allocation137_spill] sm:$0xff] %v6685_v30  ;;  %2795 = vst.msk [vmem:[#allocation4 + $0x6e] sm:$0x3] %vm672_vm1, %v2787_v38  ;;  %v8312_v25 = vld [vmem:[#allocation51_spill] sm:$0xff]  ;;  %v8314_v30 = vld [vmem:[#allocation84_spill] sm:$0xff] }
 0x2c8   : > { %2677 = vrot.lane.b32.xlu0 %v8275_v44, %s4349_s15  ;;  %v6568_v44 = vpop.permute.xlu1 %2437  ;;  %8305 = vst [vmem:[#allocation47_spill] sm:$0xff] %v6666_v47  ;;  %v6693_v17 = vmul.f32 0.0010283801, %v8312_v25  ;;  %v4188_v38 = vld [vmem:[%s4542_s5 + $0x28] sm:$0xff]  ;;  %v6711_v25 = vmul.f32 0.0010283801, %v8317_v6 }
 0x2c9   : > { %2715 = vrot.lane.b32.xlu1 %v8278_v61, %s4350_s26  ;;  %v6577_v61 = vmul.f32 0.036000773, %v6470_v33  ;;  %v6584_v18 = vpop.permute.xlu0 %2439  ;;  %v8315_v28 = vld [vmem:[#allocation81_spill] sm:$0xff]  ;;  %v6739_v57 = vmul.f32 0.036000773, %v6635_v8 }
 0x2ca   : > { %v6705_v27 = vmul.f32 %v4188_v38, %v8315_v28  ;;  %8318 = vst [vmem:[#allocation51_spill] sm:$0xff] %v6711_v25  ;;  %v8328_v10 = vld [vmem:[#allocation89_spill] sm:$0xff] }
 0x2cb   : > { %8323 = vst [vmem:[#allocation138_spill] sm:$0xff] %v6739_v57 }
 0x2cc   : > { %2687 = vrot.lane.b32.xlu0 %v8279_v58, %s4349_s15  ;;  %v6580_v58 = vmul.f32 0.007598758, %v6560_v1  ;;  %v6582_v13 = vpop.permute.xlu1 %2441  ;;  %v6725_v28 = vmul.f32 0.007598758, %v6705_v27 }
 0x2cd   : > { %2751 = vrot.lane.b32.xlu1 %v6566_v43, %s4351_s16  ;;  %8284 = vst [vmem:[#allocation102_spill] sm:$0xff] %v6582_v13  ;;  %v6595_v7 = vpop.permute.xlu0 %2443  ;;  %v2413_v13 = vadd.f32 %v6526_v63, %v6566_v43 }
 0x2ce   : > { %8283 = vst [vmem:[#allocation85_spill] sm:$0xff] %v6580_v58 }
 0x2d0   : > { %2747 = vrot.lane.b32.xlu0 %v6563_v29, %s4351_s16  ;;  %v6593_v5 = vpop.permute.xlu1 %2445 }
 0x2d1   : > { %3140 = vrot.lane.b32.xlu1 %v6577_v61, %s4343_s8  ;;  %8285 = vst [vmem:[#allocation82_spill] sm:$0xff] %v6593_v5  ;;  %v6603_v2 = vpop.permute.xlu0 %2447 }
 0x2d2   : > { %8288 = vst [vmem:[#allocation50_spill] sm:$0xff] %v6603_v2  ;;  %v6879_v2 = vmul.f32 0.21300554, %v6705_v27 }
 0x2d4   : > { %3100 = vrot.lane.b32.xlu0 %v6580_v58, %s4342_s21  ;;  %v6601_v23 = vpop.permute.xlu1 %2449  ;;  %v6779_v58 = vmul.f32 0.0010283801, %v6037_v37 }
 0x2d5   : > { %2657 = vrot.lane.b32.xlu1 %v8286_v31, %s4348_s3  ;;  %8287 = vst [vmem:[#allocation61_spill] sm:$0xff] %v6601_v23  ;;  %v8292_v31 = vld [vmem:[#allocation99_spill] sm:$0xff]  ;;  %v6620_v50 = vpop.permute.xlu0 %2483  ;;  %v6753_v23 = vmul.f32 0.10936069, %v6560_v1 }
 0x2d6   : > { %8297 = vst [vmem:[#allocation99_spill] sm:$0xff] %v6627_v9  ;;  %8330 = vst [vmem:[#allocation141_spill] sm:$0xff] %v6779_v58 }
 0x2d8   : > { %3144 = vrot.lane.b32.xlu0 %v6591_v45, %s4343_s8  ;;  %v6618_v35 = vpop.permute.xlu1 %2485 }
 0x2d9   : > { %2709 = vrot.lane.b32.xlu1 %v8291_v16, %s4350_s26  ;;  %8294 = vst [vmem:[#allocation62_spill] sm:$0xff] %v6618_v35  ;;  %v4186_v16 = vld [vmem:[%s4542_s5 + $0x30] sm:$0xff] }
 0x2dc   : > { %2685 = vrot.lane.b32.xlu0 %v8292_v31, %s4349_s15  ;;  %v6631_v31 = vmul.f32 %v4186_v16, %v8298_v34  ;;  %v6640_v36 = vpop.permute.xlu1 %2489  ;;  %v6663_v16 = vmul.f32 0.10936069, %v6470_v33 }
 0x2dd   : > { %2719 = vrot.lane.b32.xlu1 %v8295_v49, %s4350_s26  ;;  %8301 = vst [vmem:[#allocation49_spill] sm:$0xff] %v6640_v36  ;;  %v6642_v49 = vpop.permute.xlu0 %2487 }
 0x2de   : > { %v6649_v34 = vmul.f32 0.007598758, %v6631_v31 }
 0x2e0   : > { %2713 = vrot.lane.b32.xlu0 %v8296_v32, %s4350_s26  ;;  %8302 = vst [vmem:[#allocation90_spill] sm:$0xff] %v6649_v34  ;;  %v6652_v32 = vmul.f32 0.007598758, %v6635_v8  ;;  %v6654_v41 = vpop.permute.xlu1 %2493 }
 0x2e1   : > { %3094 = vrot.lane.b32.xlu1 %v6627_v9, %s4342_s21  ;;  %8304 = vst [vmem:[#allocation87_spill] sm:$0xff] %v6654_v41  ;;  %v6656_v62 = vpop.permute.xlu0 %2491  ;;  %v4189_v9 = vld [vmem:[%s4542_s5 + $0x38] sm:$0xff] }
 0x2e2   : > { %8303 = vst [vmem:[#allocation79_spill] sm:$0xff] %v6652_v32 }
 0x2e4   : > { %2755 = vrot.lane.b32.xlu0 %v6638_v39, %s4351_s16  ;;  %v6668_v22 = vpop.permute.xlu1 %2497 }
 0x2e5   : > { %3104 = vrot.lane.b32.xlu1 %v6649_v34, %s4342_s21  ;;  %8306 = vst [vmem:[#allocation83_spill] sm:$0xff] %v6668_v22  ;;  %v6670_v60 = vpop.permute.xlu0 %2495  ;;  %v6750_v22 = vmul.f32 0.21300554, %v6470_v33  ;;  %v3222_v34 = vmul.f32 0.21300554, %v6466_v46 }
 0x2e6   : > { %8307 = vst [vmem:[#allocation134_spill] sm:$0xff] %v6670_v60 }
 0x2e8   : > { %3098 = vrot.lane.b32.xlu0 %v6652_v32, %s4342_s21  ;;  %v6679_v52 = vpop.permute.xlu1 %2533  ;;  %v8325_v32 = vld [vmem:[#allocation86_spill] sm:$0xff] }
 0x2e9   : > { %3188 = vrot.lane.b32.xlu1 %v6663_v16, %s4344_s18  ;;  %8308 = vst [vmem:[#allocation135_spill] sm:$0xff] %v6679_v52  ;;  %v6681_v20 = vpop.permute.xlu0 %2531 }
 0x2ec   : > { %3148 = vrot.lane.b32.xlu0 %v6666_v47, %s4343_s8  ;;  %v6695_v21 = vpop.permute.xlu1 %2537 }
 0x2ed   : > { %2689 = vrot.lane.b32.xlu1 %v8311_v24, %s4349_s15  ;;  %8313 = vst [vmem:[#allocation101_spill] sm:$0xff] %v6695_v21  ;;  %v6697_v14 = vpop.permute.xlu0 %2535  ;;  %v8316_v24 = vld [vmem:[#allocation65_spill] sm:$0xff] }
 0x2ee   : > { %v6708_v54 = vmul.f32 0.0010283801, %v8316_v24  ;;  %8321 = vst [vmem:[#allocation65_spill] sm:$0xff] %v6725_v28  ;;  %v6736_v24 = vmul.f32 0.036000773, %v6631_v31 }
 0x2f0   : > { %3192 = vrot.lane.b32.xlu0 %v6677_v26, %s4344_s18  ;;  %v6713_v53 = vpop.permute.xlu1 %2541  ;;  %8322 = vst [vmem:[#allocation88_spill] sm:$0xff] %v6736_v24 }
 0x2f1   : > { %2749 = vrot.lane.b32.xlu1 %v6693_v17, %s4351_s16  ;;  %8319 = vst [vmem:[#allocation84_spill] sm:$0xff] %v6713_v53  ;;  %v6715_v48 = vpop.permute.xlu0 %2539  ;;  %v6766_v53 = vmul.f32 %v4189_v9, %v8325_v32  ;;  %v6793_v9 = vmul.f32 0.036000773, %v6705_v27 }
 0x2f3   : > { %8332 = vst [vmem:[#allocation143_spill] sm:$0xff] %v6793_v9 }
 0x2f4   : > { %2717 = vrot.lane.b32.xlu0 %v8314_v30, %s4350_s26  ;;  %v6722_v30 = vmul.f32 0.036000773, %v6616_v0  ;;  %v6727_v38 = vpop.permute.xlu1 %2583 }
 0x2f5   : > { %2759 = vrot.lane.b32.xlu1 %v6711_v25, %s4351_s16  ;;  %v6729_v6 = vpop.permute.xlu0 %2579 }
 0x2f6   : > { %8320 = vst [vmem:[#allocation81_spill] sm:$0xff] %v6722_v30 }
 0x2f8   : > { %2753 = vrot.lane.b32.xlu0 %v6708_v54, %s4351_s16  ;;  %v6741_v3 = vpop.permute.xlu1 %2587 }
 0x2f9   : > { %3142 = vrot.lane.b32.xlu1 %v6722_v30, %s4343_s8  ;;  %v6743_v51 = vpop.permute.xlu0 %2543 }
 0x2fa   : > { %8324 = vst [vmem:[#allocation139_spill] sm:$0xff] %v6743_v51  ;;  %v3268_v51 = vmul.f32 0.26601171, %v6470_v33 }
 0x2fc   : > { %3102 = vrot.lane.b32.xlu0 %v6725_v28, %s4342_s21  ;;  %v6755_v40 = vpop.permute.xlu1 %2615 }
 0x2fd   : > { %3152 = vrot.lane.b32.xlu1 %v6736_v24, %s4343_s8  ;;  %v6757_v28 = vpop.permute.xlu0 %2611  ;;  %v6776_v24 = vmul.f32 0.007598758, %v6766_v53 }
 0x2ff   : > { %8329 = vst [vmem:[#allocation89_spill] sm:$0xff] %v6776_v24 }
 0x300   : > { %3146 = vrot.lane.b32.xlu0 %v6739_v57, %s4343_s8  ;;  %v6768_v41 = vpop.permute.xlu1 %2585 }
 0x301   : > { %3236 = vrot.lane.b32.xlu1 %v6750_v22, %s4345_s19  ;;  %8326 = vst [vmem:[#allocation86_spill] sm:$0xff] %v6768_v41  ;;  %v6770_v5 = vpop.permute.xlu0 %2581 }
 0x302   : > { %8327 = vst [vmem:[#allocation140_spill] sm:$0xff] %v6770_v5 }
 0x304   : > { %3196 = vrot.lane.b32.xlu0 %v6753_v23, %s4344_s18  ;;  %v6781_v30 = vpop.permute.xlu1 %2619 }
 0x305   : > { %2721 = vrot.lane.b32.xlu1 %v8328_v10, %s4350_s26  ;;  %v6783_v57 = vpop.permute.xlu0 %2591  ;;  %v6790_v10 = vmul.f32 0.10936069, %v6616_v0 }
 0x306   : > { %8331 = vst [vmem:[#allocation142_spill] sm:$0xff] %v6783_v57 }
 0x308   : > { %3240 = vrot.lane.b32.xlu0 %v3222_v34, %s4345_s19  ;;  %v6795_v32 = vpop.permute.xlu1 %2647 }
 0x309   : > { %3106 = vrot.lane.b32.xlu1 %v6776_v24, %s4342_s21  ;;  %v6797_v37 = vpop.permute.xlu0 %2643  ;;  %v6804_v24 = vmul.f32 0.10936069, %v6631_v31  ;;  %s3937_s21 = scalar_lea.sflag [#allocation7], %s4538_s4 }
 0x30b   : > { %8333 = vst [vmem:[#allocation144_spill] sm:$0xff] %v6804_v24 }
 0x30c   : > { %2757 = vrot.lane.b32.xlu0 %v6779_v58, %s4351_s16  ;;  %v6807_v58 = vmul.f32 0.10936069, %v6635_v8  ;;  %v6809_v57 = vpop.permute.xlu1 %2589 }
 0x30d   : > { %3190 = vrot.lane.b32.xlu1 %v6790_v10, %s4344_s18  ;;  %8334 = vst [vmem:[#allocation145_spill] sm:$0xff] %v6809_v57  ;;  %v6811_v41 = vpop.permute.xlu0 %2545  ;;  %v6827_v57 = vmul.f32 0.0010283801, %v6065_v15  ;;  %v6847_v15 = vmul.f32 0.21300554, %v6635_v8 }
 0x30e   : > { %8335 = vst [vmem:[#allocation146_spill] sm:$0xff] %v6811_v41  ;;  %v3270_v41 = vmul.f32 0.26601171, %v6466_v46 }
 0x30f   : > { %8338 = vst [vmem:[#allocation149_spill] sm:$0xff] %v6827_v57 }
 0x310   : > { %3150 = vrot.lane.b32.xlu0 %v6793_v9, %s4343_s8  ;;  %v3224_v9 = vmul.f32 0.21300554, %v6560_v1  ;;  %v6819_v21 = vpop.permute.xlu1 %2617 }
 0x311   : > { %3200 = vrot.lane.b32.xlu1 %v6804_v24, %s4344_s18  ;;  %8336 = vst [vmem:[#allocation147_spill] sm:$0xff] %v6819_v21  ;;  %v6821_v5 = vpop.permute.xlu0 %2613  ;;  %v6837_v21 = vmul.f32 0.10936069, %v6705_v27  ;;  %v2461_v24 = vadd.f32 %v6584_v18, %v2413_v13 }
 0x312   : > { %8337 = vst [vmem:[#allocation148_spill] sm:$0xff] %v6821_v5 }
 0x313   : > { %8340 = vst [vmem:[#allocation151_spill] sm:$0xff] %v6837_v21 }
 0x314   : > { %3194 = vrot.lane.b32.xlu0 %v6807_v58, %s4344_s18  ;;  %v6829_v60 = vpop.permute.xlu1 %2651 }
 0x315   : > { %3284 = vrot.lane.b32.xlu1 %v3268_v51, %s4346_s28  ;;  %v6831_v59 = vpop.permute.xlu0 %2623  ;;  %v6840_v51 = vmul.f32 0.036000773, %v6766_v53 }
 0x316   : > { %8339 = vst [vmem:[#allocation150_spill] sm:$0xff] %v6831_v59 }
 0x317   : > { %8341 = vst [vmem:[#allocation152_spill] sm:$0xff] %v6840_v51 }
 0x318   : > { %3244 = vrot.lane.b32.xlu0 %v3224_v9, %s4345_s19  ;;  %v2680_v5 = vpop.permute.xlu1 %2679 }
 0x319   : > { %2761 = vrot.lane.b32.xlu1 %v6827_v57, %s4351_s16  ;;  %v2676_v56 = vpop.permute.xlu0 %2675  ;;  %v6850_v57 = vmul.f32 0.21300554, %v6616_v0 }
 0x31c   : > { %3288 = vrot.lane.b32.xlu0 %v3270_v41, %s4346_s28  ;;  %v6852_v41 = vpop.permute.xlu1 %2621 }
 0x31d   : > { %3198 = vrot.lane.b32.xlu1 %v6837_v21, %s4344_s18  ;;  %8342 = vst [vmem:[#allocation153_spill] sm:$0xff] %v6852_v41  ;;  %v6854_v59 = vpop.permute.xlu0 %2593  ;;  %v3272_v21 = vmul.f32 0.26601171, %v6560_v1 }
 0x31e   : > { %8343 = vst [vmem:[#allocation154_spill] sm:$0xff] %v6854_v59 }
 0x320   : > { %3154 = vrot.lane.b32.xlu0 %v6840_v51, %s4343_s8  ;;  %v6862_v51 = vmul.f32 0.21300554, %v6631_v31  ;;  %v6864_v36 = vpop.permute.xlu1 %2649  ;;  %s4250_s8 = scalar_lea.vmem %s7673_s6, 128 }
 0x321   : > { %3242 = vrot.lane.b32.xlu1 %v6847_v15, %s4345_s19  ;;  %8344 = vst [vmem:[#allocation155_spill] sm:$0xff] %v6864_v36  ;;  %v6866_v52 = vpop.permute.xlu0 %2645  ;;  %v6882_v36 = vmul.f32 0.10936069, %v6766_v53  ;;  %p4251_p0 = scmp.ne.s32.totalorder %s7673_s6, %s4250_s8 }
 0x322   : > { %8345 = vst [vmem:[#allocation156_spill] sm:$0xff] %v6866_v52 }
 0x323   : > { %8347 = vst [vmem:[#allocation158_spill] sm:$0xff] %v6882_v36  ;;  %p4252_p12 = pnand %p4251_p0, %p8588_p3 }
 0x324   : > { %3238 = vrot.lane.b32.xlu0 %v6850_v57, %s4345_s19  ;;  %v6871_v59 = vpop.permute.xlu1 %2683 }
 0x325   : > { %3292 = vrot.lane.b32.xlu1 %v3272_v21, %s4346_s28  ;;  %v6873_v41 = vpop.permute.xlu0 %2655  ;;  %p4253_p13 = pneg %p4252_p12 }
 0x326   : > { %8346 = vst [vmem:[#allocation157_spill] sm:$0xff] %v6873_v41  ;;  %v3271_v41 = vmul.f32 0.26601171, %v6635_v8 }
 0x328   : > { %3248 = vrot.lane.b32.xlu0 %v6862_v51, %s4345_s19  ;;  %v2712_v52 = vpop.permute.xlu1 %2711 }
 0x329   : > { %3320 = vrot.lane.b32.xlu1 %v3222_v34, %s4347_s30  ;;  %v3269_v34 = vmul.f32 0.26601171, %v6616_v0 }
 0x32c   : > { %3316 = vrot.lane.b32.xlu0 %v6750_v22, %s4347_s30  ;;  %v2411_v22 = vadd.f32 %v6518_v11, %v6563_v29  ;;  %v6894_v35 = vpop.permute.xlu1 %3096  ;;  %v2509_v11 = vadd.f32 %v6642_v49, %v2461_v24  ;;  %v6937_v24 = vmul.f32 0.0010283801, %v6470_v33  ;;  %v6955_v33 = vld [vmem:[#allocation4 + $0x15] sm:$0xff] }
 0x32d   : > { %3246 = vrot.lane.b32.xlu1 %v6879_v2, %s4345_s19  ;;  %8348 = vst [vmem:[#allocation159_spill] sm:$0xff] %v6955_v33  ;;  %v8437_v33 = vld [vmem:[#allocation43_spill] sm:$0xff] }
 0x32e   : > { %v2708_v21 = vpop.permute.xlu0 %2707  ;;  %v2459_v25 = vadd.f32 %v6570_v12, %v2411_v22  ;;  %v2557_v12 = vadd.f32 %v6697_v14, %v2509_v11  ;;  %v6925_v14 = vmul.f32 0.21300554, %v6766_v53  ;;  %v6943_v22 = vld [vmem:[#allocation4 + $0x11] sm:$0xff] }
 0x32f   : > { %v6949_v11 = vld [vmem:[#allocation4 + $0x32] sm:$0xff] }
 0x330   : > { %3202 = vrot.lane.b32.xlu0 %v6882_v36, %s4344_s18  ;;  %v3274_v36 = vmul.f32 0.26601171, %v6631_v31  ;;  %v2507_v47 = vadd.f32 %v6620_v50, %v2459_v25  ;;  %v6903_v29 = vpop.permute.xlu1 %2653  ;;  %v2605_v13 = vadd.f32 %v6727_v38, %v2557_v12  ;;  %s4354_s18 = smov [#allocation10]  }
 0x331   : > { %3290 = vrot.lane.b32.xlu1 %v3271_v41, %s4346_s28  ;;  %s4254_s12 = sshll.u32 %s4354_s18, 4  ;;  %s4255_s12 = int_to_ptr.vmem [resolvable:$false] %s4254_s12 }
 0x332   : > { %v3093_v55 = vpop.permute.xlu0 %3092  ;;  %v2555_v43 = vadd.f32 %v6681_v20, %v2507_v47  ;;  %v2637_v49 = vadd.f32 %v6755_v40, %v2605_v13  ;;  %p4257_p7 = scmp.lt.s32.totalorder %s7673_s6, %s4255_s12 }
 0x334   : > { %3286 = vrot.lane.b32.xlu0 %v3269_v34, %s4346_s28  ;;  %v2603_v18 = vadd.f32 %v6729_v6, %v2555_v43  ;;  %v2669_v20 = vadd.f32 %v6795_v32, %v2637_v49  ;;  %v6939_v34 = vld [vmem:[#allocation4 + $0x10] sm:$0xff] }
 0x335   : > { %3324 = vrot.lane.b32.xlu1 %v3224_v9, %s4347_s30  ;;  %v6951_v43 = vld [vmem:[#allocation4 + $0x13] sm:$0xff] }
 0x336   : > { %v6905_v63 = vpop.permute.xlu0 %2625  ;;  %v2635_v25 = vadd.f32 %v6757_v28, %v2603_v18  ;;  %v2701_v28 = vadd.f32 %v2680_v5, %v2669_v20  ;;  %v6945_v5 = vld [vmem:[#allocation4 + $0x31] sm:$0xff]  ;;  %v6960_v18 = vmul.f32 0.0010283801, %v6560_v1  ;;  %v2415_v1 = vadd.f32 %v6540_v4, %v6638_v39 }
 0x337   : > { %v6913_v41 = vpop.permute.xlu1 %2681  ;;  %v6962_v49 = vld [vmem:[#allocation4 + $0x33] sm:$0xff] }
 0x338   : > { %3296 = vrot.lane.b32.xlu0 %v3274_v36, %s4346_s28  ;;  %v3273_v36 = vmul.f32 0.26601171, %v6705_v27  ;;  %v2667_v47 = vadd.f32 %v6797_v37, %v2635_v25  ;;  %v6941_v37 = vld [vmem:[#allocation4 + $0x30] sm:$0xff] }
 0x339   : > { %3352 = vrot.lane.b32.xlu1 %v6677_v26, %s4348_s3  ;;  %v2733_v26 = vadd.f32 %v2712_v52, %v2701_v28  ;;  %v6953_v52 = vld [vmem:[#allocation4 + $0x14] sm:$0xff] }
 0x33a   : > { %v6915_v50 = vpop.permute.xlu0 %2677  ;;  %v2699_v6 = vadd.f32 %v2676_v56, %v2667_v47  ;;  %v6947_v56 = vld [vmem:[#allocation4 + $0x12] sm:$0xff] }
 0x33b   : > { %v6929_v38 = vpop.permute.xlu1 %2715  ;;  %v6964_v25 = vld [vmem:[#allocation4 + $0x34] sm:$0xff] }
 0x33c   : > { %3348 = vrot.lane.b32.xlu0 %v6663_v16, %s4348_s3  ;;  %v2731_v16 = vadd.f32 %v2708_v21, %v2699_v6  ;;  %v6957_v21 = vld [vmem:[#allocation4 + $0x16] sm:$0xff]  ;;  %8350 = vst [vmem:[#allocation161_spill] sm:$0xff] %v6964_v25  ;;  %v6981_v6 = vmul.f32 0.0010283801, %v6466_v46  ;;  %v8444_v25 = vld [vmem:[#allocation104_spill] sm:$0xff] }
 0x33d   : > { %3294 = vrot.lane.b32.xlu1 %v3273_v36, %s4346_s28  ;;  %8349 = vst [vmem:[#allocation160_spill] sm:$0xff] %v6957_v21  ;;  %v6966_v36 = vld [vmem:[#allocation4 + $0x35] sm:$0xff] }
 0x33e   : > { %v6931_v40 = vpop.permute.xlu0 %2687  ;;  %8351 = vst [vmem:[#allocation162_spill] sm:$0xff] %v6966_v36  ;;  %v6972_v20 = vld [vmem:[#allocation4 + $0x36] sm:$0xff]  ;;  %v3118_v4 = vadd.f32 %v6894_v35, %v6981_v6 }
 0x33f   : > { %v2752_v9 = vpop.permute.xlu1 %2751  ;;  %8352 = vst [vmem:[#allocation163_spill] sm:$0xff] %v6972_v20  ;;  %v6974_v47 = vld [vmem:[#allocation4 + $0x17] sm:$0xff] }
 0x340   : > { %3250 = vrot.lane.b32.xlu0 %v6925_v14, %s4345_s19  ;;  %v2773_v12 = vadd.f32 %v2752_v9, %v2733_v26  ;;  %8353 = vst [vmem:[#allocation164_spill] sm:$0xff] %v6974_v47  ;;  %v6976_v28 = vld [vmem:[#allocation4 + $0x37] sm:$0xff]  ;;  %v3116_v26 = vadd.f32 %v3093_v55, %v6937_v24  ;;  %s4256_s19 = scalar_lea.vmem %s4255_s12, 256 }
 0x341   : > { %3322 = vrot.lane.b32.xlu1 %v6847_v15, %s4347_s30  ;;  %8354 = vst [vmem:[#allocation165_spill] sm:$0xff] %v6976_v28  ;;  %v8373_v28 = vld [vmem:[#allocation139_spill] sm:$0xff]  ;;  %v8436_v36 = vld [vmem:[#allocation42_spill] sm:$0xff]  ;;  %p4258_p10 = scmp.lt.s32.totalorder %s4256_s19, %s4250_s8 }
 0x342   : > { %v2748_v32 = vpop.permute.xlu0 %2747  ;;  %2806 = vst.msk [vmem:[#allocation3 + $0xca] sm:$0xc0] %vm688_vm2, %v2773_v12 }
 0x343   : > { %v2771_v13 = vadd.f32 %v2748_v32, %v2731_v16  ;;  %2798 = vst.msk [vmem:[#allocation4 + $0x30] sm:$0xff] %vm670_vm0, %v2773_v12  ;;  %v2463_v16 = vadd.f32 %v6595_v7, %v2415_v1  ;;  %p4259_p9 = por %p4258_p10, %p4257_p7 }
 0x344   : > { %3318 = vrot.lane.b32.xlu0 %v6850_v57, %s4347_s30  ;;  %v3141_v57 = vpop.permute.xlu1 %3140 }
 0x345   : > { %2804 = vst.msk [vmem:[#allocation3 + $0xba] sm:$0xc0] %vm688_vm2, %v2771_v13  ;;  %v6989_v9 = vadd.f32 %v3141_v57, %v3116_v26  ;;  %3356 = vrot.lane.b32.xlu1 %v6753_v23, %s4348_s3  ;;  %v2511_v46 = vadd.f32 %v6656_v62, %v2463_v16  ;;  %v3275_v23 = vmul.f32 0.26601171, %v6766_v53  ;;  %v2412_v26 = vadd.f32 %v6516_v42, %v6693_v17  ;;  %p4260_p11 = pnand %p4259_p9, %p4253_p13 }
 0x346   : > { %2796 = vst.msk [vmem:[#allocation4 + $0x10] sm:$0xff] %vm670_vm0, %v2771_v13  ;;  %v3101_v15 = vpop.permute.xlu0 %3100  ;;  %v2414_v16 = vadd.f32 %v6524_v19, %v6708_v54  ;;  %v8364_v54 = vld [vmem:[#allocation102_spill] sm:$0xff] }
 0x347   : > { %v6992_v39 = vadd.f32 %v3101_v15, %v6960_v18  ;;  %v2559_v7 = vadd.f32 %v6715_v48, %v2511_v46  ;;  %v7037_v15 = vld [vmem:[#allocation4 + $0x50] sm:$0xff]  ;;  %v8356_v46 = vld [vmem:[#allocation47_spill] sm:$0xff] }
 0x348   : > { %3328 = vrot.lane.b32.xlu0 %v6862_v51, %s4347_s30  ;;  %v7001_v55 = vpop.permute.xlu1 %2657  ;;  %v2462_v19 = vadd.f32 %v8364_v54, %v2414_v16  ;;  %v8370_v16 = vld [vmem:[#allocation134_spill] sm:$0xff]  ;;  %v8371_v54 = vld [vmem:[#allocation140_spill] sm:$0xff] }
 0x349   : > { %3384 = vrot.lane.b32.xlu1 %v6591_v45, %s4349_s15  ;;  %v2607_v62 = vadd.f32 %v6741_v3, %v2559_v7  ;;  %v7027_v3 = vmul.f32 0.0010283801, %v6616_v0  ;;  %v7041_v0 = vld [vmem:[#allocation4 + $0x52] sm:$0xff] }
 0x34a   : > { %v3145_v32 = vpop.permute.xlu0 %3144  ;;  %v7066_v7 = vld [vmem:[#allocation4 + $0x57] sm:$0xff] }
 0x34b   : > { %v7004_v12 = vadd.f32 %v3145_v32, %v3118_v4  ;;  %v2639_v13 = vadd.f32 %v6781_v30, %v2607_v62  ;;  %v8357_v4 = vld [vmem:[#allocation144_spill] sm:$0xff]  ;;  %v7062_v32 = vld [vmem:[#allocation4 + $0x55] sm:$0xff]  ;;  %8360 = vst [vmem:[#allocation167_spill] sm:$0xff] %v7066_v7 }
 0x34c   : > { %3380 = vrot.lane.b32.xlu0 %v6577_v61, %s4349_s15  ;;  %v7012_v51 = vpop.permute.xlu1 %2709  ;;  %8358 = vst [vmem:[#allocation47_spill] sm:$0xff] %v7062_v32 }
 0x34d   : > { %3326 = vrot.lane.b32.xlu1 %v6879_v2, %s4347_s30  ;;  %v2671_v48 = vadd.f32 %v6829_v60, %v2639_v13  ;;  %v2460_v2 = vadd.f32 %v6568_v44, %v2412_v26  ;;  %v7054_v44 = vld [vmem:[#allocation4 + $0x54] sm:$0xff] }
 0x34e   : > { %v7014_v35 = vpop.permute.xlu0 %2685  ;;  %8355 = vst [vmem:[#allocation166_spill] sm:$0xff] %v7054_v44  ;;  %v8363_v13 = vld [vmem:[#allocation62_spill] sm:$0xff] }
 0x34f   : > { %v2703_v1 = vadd.f32 %v6871_v59, %v2671_v48  ;;  %v7039_v59 = vld [vmem:[#allocation4 + $0x51] sm:$0xff]  ;;  %v2508_v48 = vadd.f32 %v8363_v13, %v2460_v2 }
 0x350   : > { %3298 = vrot.lane.b32.xlu0 %v3275_v23, %s4346_s28  ;;  %v7021_v45 = vpop.permute.xlu1 %2719  ;;  %v8362_v23 = vld [vmem:[#allocation93_spill] sm:$0xff] }
 0x351   : > { %3354 = vrot.lane.b32.xlu1 %v6807_v58, %s4348_s3  ;;  %v2735_v60 = vadd.f32 %v6929_v38, %v2703_v1  ;;  %v7047_v58 = vmul.f32 0.0010283801, %v6631_v31  ;;  %v7052_v38 = vld [vmem:[#allocation4 + $0x53] sm:$0xff] }
 0x352   : > { %v7023_v61 = vpop.permute.xlu0 %2713  ;;  %v7064_v31 = vld [vmem:[#allocation4 + $0x56] sm:$0xff] }
 0x353   : > { %8359 = vst [vmem:[#allocation144_spill] sm:$0xff] %v7064_v31 }
 0x354   : > { %3350 = vrot.lane.b32.xlu0 %v6790_v10, %s4348_s3  ;;  %v3095_v30 = vpop.permute.xlu1 %3094  ;;  %v7050_v10 = vmul.f32 0.0010283801, %v6635_v8  ;;  %v8361_v8 = vld [vmem:[#allocation51_spill] sm:$0xff] }
 0x355   : > { %v7044_v17 = vadd.f32 %v3095_v30, %v7027_v3  ;;  %3388 = vrot.lane.b32.xlu1 %v8356_v46, %s4349_s15  ;;  %v2417_v62 = vadd.f32 %v8362_v23, %v8361_v8  ;;  %v8367_v8 = vld [vmem:[#allocation49_spill] sm:$0xff]  ;;  %v8368_v23 = vld [vmem:[#allocation80_spill] sm:$0xff] }
 0x356   : > { %v2756_v57 = vpop.permute.xlu0 %2755  ;;  %v2510_v2 = vadd.f32 %v8367_v8, %v2462_v19 }
 0x357   : > { %v2775_v42 = vadd.f32 %v2756_v57, %v2735_v60  ;;  %v8365_v60 = vld [vmem:[#allocation50_spill] sm:$0xff]  ;;  %v8366_v57 = vld [vmem:[#allocation135_spill] sm:$0xff] }
 0x358   : > { %3360 = vrot.lane.b32.xlu0 %v8357_v4, %s4348_s3  ;;  %v3105_v1 = vpop.permute.xlu1 %3104  ;;  %v2465_v30 = vadd.f32 %v8365_v60, %v2417_v62  ;;  %v2556_v46 = vadd.f32 %v8366_v57, %v2508_v48  ;;  %v8372_v60 = vld [vmem:[#allocation101_spill] sm:$0xff] }
 0x359   : > { %2808 = vst.msk [vmem:[#allocation3 + $0xda] sm:$0xc0] %vm688_vm2, %v2775_v42  ;;  %v7077_v4 = vadd.f32 %v3105_v1, %v7047_v58  ;;  %3416 = vrot.lane.b32.xlu1 %v8368_v23, %s4350_s26  ;;  %v2558_v48 = vadd.f32 %v8372_v60, %v2510_v2  ;;  %v8375_v23 = vld [vmem:[#allocation151_spill] sm:$0xff] }
 0x35a   : > { %2800 = vst.msk [vmem:[#allocation4 + $0x50] sm:$0xff] %vm670_vm0, %v2775_v42  ;;  %v3099_v26 = vpop.permute.xlu0 %3098  ;;  %v8369_v42 = vld [vmem:[#allocation46_spill] sm:$0xff]  ;;  %v2513_v13 = vadd.f32 %v8370_v16, %v2465_v30  ;;  %v2604_v62 = vadd.f32 %v8371_v54, %v2556_v46  ;;  %v8378_v16 = vld [vmem:[#allocation156_spill] sm:$0xff]  ;;  %v3488_v60 = vld [vmem:[#allocation3 + $0x118] sm:$0x3] }
 0x35b   : > { %v7080_v7 = vadd.f32 %v3099_v26, %v7050_v10  ;;  %v8374_v26 = vld [vmem:[#allocation148_spill] sm:$0xff]  ;;  %v7102_v30 = vld [vmem:[#allocation4 + $0xe] sm:$0xff] }
 0x35c   : > { %3412 = vrot.lane.b32.xlu0 %v8369_v42, %s4350_s26  ;;  %v3189_v57 = vpop.permute.xlu1 %3188  ;;  %v2561_v47 = vadd.f32 %v8373_v28, %v2513_v13  ;;  %v2636_v31 = vadd.f32 %v8374_v26, %v2604_v62  ;;  %v8376_v46 = vld [vmem:[#allocation86_spill] sm:$0xff] }
 0x35d   : > { %v7093_v19 = vadd.f32 %v3189_v57, %v6989_v9  ;;  %3358 = vrot.lane.b32.xlu1 %v8375_v23, %s4348_s3  ;;  %v2606_v2 = vadd.f32 %v8376_v46, %v2558_v48  ;;  %v8377_v42 = vld [vmem:[#allocation142_spill] sm:$0xff]  ;;  %v3486_v57 = vld [vmem:[#allocation3 + $0x108] sm:$0x3] }
 0x35e   : > { %v3149_v1 = vpop.permute.xlu0 %3148  ;;  %v2609_v28 = vadd.f32 %v8377_v42, %v2561_v47  ;;  %v2668_v13 = vadd.f32 %v8378_v16, %v2636_v31  ;;  %v7107_v54 = vld [vmem:[#allocation4 + $0x2e] sm:$0xff]  ;;  %v8383_v42 = vld [vmem:[#allocation155_spill] sm:$0xff] }
 0x35f   : > { %v7096_v8 = vadd.f32 %v3149_v1, %v6992_v39  ;;  %v7109_v9 = vld [vmem:[#allocation4 + $0xf] sm:$0xff] }
 0x360   : > { %3330 = vrot.lane.b32.xlu0 %v6925_v14, %s4347_s30  ;;  %v7111_v39 = vpop.permute.xlu1 %2689  ;;  %v7113_v1 = vld [vmem:[#allocation4 + $0x2f] sm:$0xff]  ;;  %v8379_v14 = vld [vmem:[#allocation147_spill] sm:$0xff]  ;;  %v2700_v48 = vadd.f32 %v6915_v50, %v2668_v13  ;;  %3494 = vst.msk [vmem:[#allocation4 + $0xe] sm:$0x3] %vm672_vm1, %v3486_v57 }
 0x361   : > { %v2638_v26 = vadd.f32 %v8379_v14, %v2606_v2  ;;  %v8380_v23 = vld [vmem:[#allocation150_spill] sm:$0xff]  ;;  %3496 = vst.msk [vmem:[#allocation4 + $0x2e] sm:$0x3] %vm672_vm1, %v3488_v60  ;;  %v8382_v46 = vld [vmem:[#allocation81_spill] sm:$0xff] }
 0x362   : > { %v3193_v62 = vpop.permute.xlu0 %3192  ;;  %v2641_v20 = vadd.f32 %v8380_v23, %v2609_v28  ;;  %v8381_v31 = vld [vmem:[#allocation138_spill] sm:$0xff]  ;;  %v8384_v2 = vld [vmem:[#allocation157_spill] sm:$0xff]  ;;  %v2732_v28 = vadd.f32 %v7012_v51, %v2700_v48  ;;  %v8386_v23 = vld [vmem:[#allocation88_spill] sm:$0xff] }
 0x363   : > { %v7119_v47 = vadd.f32 %v3193_v62, %v7004_v12  ;;  %3386 = vrot.lane.b32.xlu1 %v8381_v31, %s4349_s15  ;;  %v2670_v16 = vadd.f32 %v8383_v42, %v2638_v26  ;;  %v8385_v57 = vld [vmem:[#allocation85_spill] sm:$0xff]  ;;  %v7138_v31 = vld [vmem:[#allocation4 + $0x18] sm:$0xff] }
 0x364   : > { %3382 = vrot.lane.b32.xlu0 %v8382_v46, %s4349_s15  ;;  %v2673_v14 = vadd.f32 %v8384_v2, %v2641_v20  ;;  %v2750_v50 = vpop.permute.xlu1 %2749  ;;  %8387 = vst [vmem:[#allocation51_spill] sm:$0xff] %v7138_v31  ;;  %v7146_v48 = vld [vmem:[#allocation4 + $0x71] sm:$0xff]  ;;  %v7151_v2 = vmul.f32 0.0010283801, %v6705_v27  ;;  %v8393_v27 = vld [vmem:[#allocation141_spill] sm:$0xff] }
 0x365   : > { %v2702_v12 = vadd.f32 %v6913_v41, %v2670_v16  ;;  %v2772_v60 = vadd.f32 %v2750_v50, %v2732_v28  ;;  %v7148_v46 = vld [vmem:[#allocation4 + $0x72] sm:$0xff] }
 0x366   : > { %v7130_v13 = vpop.permute.xlu0 %2717  ;;  %v2705_v62 = vadd.f32 %v6931_v40, %v2673_v14  ;;  %v7144_v40 = vld [vmem:[#allocation4 + $0x70] sm:$0xff] }
 0x367   : > { %3420 = vrot.lane.b32.xlu1 %v8385_v57, %s4350_s26  ;;  %v2734_v51 = vadd.f32 %v7023_v61, %v2702_v12  ;;  %2805 = vst.msk [vmem:[#allocation3 + $0xc2] sm:$0xff] %vm670_vm0, %v2772_v60  ;;  %2797 = vst.msk [vmem:[#allocation4 + $0x18] sm:$0xff] %vm670_vm0, %v2772_v60  ;;  %v7155_v61 = vld [vmem:[#allocation4 + $0x74] sm:$0xff] }
 0x368   : > { %3392 = vrot.lane.b32.xlu0 %v8386_v23, %s4349_s15  ;;  %v2737_v20 = vadd.f32 %v7021_v45, %v2705_v62  ;;  %v2760_v41 = vpop.permute.xlu1 %2759  ;;  %v7153_v45 = vld [vmem:[#allocation4 + $0x73] sm:$0xff]  ;;  %8388 = vst [vmem:[#allocation93_spill] sm:$0xff] %v7155_v61 }
 0x369   : > { %v7157_v14 = vld [vmem:[#allocation4 + $0x75] sm:$0xff] }
 0x36a   : > { %v2754_v26 = vpop.permute.xlu0 %2753  ;;  %v2777_v42 = vadd.f32 %v2760_v41, %v2737_v20  ;;  %8389 = vst [vmem:[#allocation62_spill] sm:$0xff] %v7157_v14  ;;  %v7163_v28 = vld [vmem:[#allocation4 + $0x76] sm:$0xff]  ;;  %v7175_v23 = vld [vmem:[#allocation4 + $0x4e] sm:$0xff] }
 0x36b   : > { %v2774_v16 = vadd.f32 %v2754_v26, %v2734_v51  ;;  %3456 = vrot.lane.b32.xlu1 %v6981_v6, %s4351_s16  ;;  %8390 = vst [vmem:[#allocation102_spill] sm:$0xff] %v7163_v28  ;;  %v7165_v50 = vld [vmem:[#allocation4 + $0x77] sm:$0xff]  ;;  %v7177_v20 = vld [vmem:[#allocation4 + $0x4f] sm:$0xff]  ;;  %v8399_v28 = vld [vmem:[#allocation84_spill] sm:$0xff] }
 0x36c   : > { %3452 = vrot.lane.b32.xlu0 %v6937_v24, %s4351_s16  ;;  %8391 = vst [vmem:[#allocation50_spill] sm:$0xff] %v7165_v50  ;;  %v7167_v12 = vld [vmem:[#allocation4 + $0x38] sm:$0xff]  ;;  %2810 = vst.msk [vmem:[#allocation3 + $0xea] sm:$0xc0] %vm688_vm2, %v2777_v42  ;;  %v3143_v6 = vpop.permute.xlu1 %3142  ;;  %v3490_v24 = vld [vmem:[#allocation3 + $0x128] sm:$0x3] }
 0x36d   : > { %8392 = vst [vmem:[#allocation135_spill] sm:$0xff] %v7167_v12  ;;  %v8394_v62 = vld [vmem:[#allocation131_spill] sm:$0xff]  ;;  %2807 = vst.msk [vmem:[#allocation3 + $0xd2] sm:$0xff] %vm670_vm0, %v2774_v16  ;;  %v8395_v51 = vld [vmem:[#allocation82_spill] sm:$0xff]  ;;  %v3165_v26 = vadd.f32 %v3143_v6, %v7044_v17 }
 0x36e   : > { %v2416_v60 = vadd.f32 %v8394_v62, %v8393_v27  ;;  %2799 = vst.msk [vmem:[#allocation4 + $0x38] sm:$0xff] %vm670_vm0, %v2774_v16  ;;  %2802 = vst.msk [vmem:[#allocation4 + $0x70] sm:$0xff] %vm670_vm0, %v2777_v42  ;;  %v3103_v57 = vpop.permute.xlu0 %3102  ;;  %v8396_v62 = vld [vmem:[#allocation143_spill] sm:$0xff]  ;;  %v8397_v42 = vld [vmem:[#allocation158_spill] sm:$0xff] }
 0x36f   : > { %v3121_v27 = vadd.f32 %v3103_v57, %v7151_v2  ;;  %3498 = vst.msk [vmem:[#allocation4 + $0x4e] sm:$0x3] %vm672_vm1, %v3490_v24  ;;  %3390 = vrot.lane.b32.xlu1 %v8396_v62, %s4349_s15  ;;  %v8398_v16 = vld [vmem:[#allocation87_spill] sm:$0xff]  ;;  %v8402_v24 = vld [vmem:[#allocation145_spill] sm:$0xff] }
 0x370   : > { %v2464_v41 = vadd.f32 %v8395_v51, %v2416_v60  ;;  %3362 = vrot.lane.b32.xlu0 %v8397_v42, %s4348_s3  ;;  %v3153_v31 = vpop.permute.xlu1 %3152  ;;  %v8400_v6 = vld [vmem:[#allocation79_spill] sm:$0xff]  ;;  %v8403_v14 = vld [vmem:[#allocation153_spill] sm:$0xff] }
 0x371   : > { %v3170_v60 = vadd.f32 %v3153_v31, %v7077_v4  ;;  %v8401_v57 = vld [vmem:[#allocation99_spill] sm:$0xff] }
 0x372   : > { %v2512_v12 = vadd.f32 %v8398_v16, %v2464_v41  ;;  %v3147_v50 = vpop.permute.xlu0 %3146  ;;  %v3492_v31 = vld [vmem:[#allocation3 + $0x138] sm:$0x3] }
 0x373   : > { %v3167_v17 = vadd.f32 %v3147_v50, %v7080_v7  ;;  %3418 = vrot.lane.b32.xlu1 %v8400_v6, %s4350_s26  ;;  %v8404_v7 = vld [vmem:[#allocation90_spill] sm:$0xff] }
 0x374   : > { %v2560_v21 = vadd.f32 %v8399_v28, %v2512_v12  ;;  %3414 = vrot.lane.b32.xlu0 %v8401_v57, %s4350_s26  ;;  %v3237_v62 = vpop.permute.xlu1 %3236  ;;  %v8409_v57 = vld [vmem:[#allocation149_spill] sm:$0xff] }
 0x375   : > { %v3260_v16 = vadd.f32 %v3237_v62, %v7093_v19  ;;  %v7204_v50 = vld [vmem:[#allocation4 + $0x6e] sm:$0xff] }
 0x376   : > { %v2608_v51 = vadd.f32 %v8402_v24, %v2560_v21  ;;  %v3197_v42 = vpop.permute.xlu0 %3196  ;;  %8405 = vst [vmem:[#allocation49_spill] sm:$0xff] %v7204_v50  ;;  %v7206_v21 = vld [vmem:[#allocation4 + $0x6f] sm:$0xff] }
 0x377   : > { %v3216_v28 = vadd.f32 %v3197_v42, %v7096_v8  ;;  %3460 = vrot.lane.b32.xlu1 %v6960_v18, %s4351_s16  ;;  %8406 = vst [vmem:[#allocation80_spill] sm:$0xff] %v7206_v21  ;;  %3500 = vst.msk [vmem:[#allocation4 + $0x6e] sm:$0x3] %vm672_vm1, %v3492_v31  ;;  %v3075_v18 = vmul.f32 0.0010283801, %v6766_v53  ;;  %v8410_v24 = vld [vmem:[#allocation97_spill] sm:$0xff] }
 0x378   : > { %v2640_v41 = vadd.f32 %v8403_v14, %v2608_v51  ;;  %3424 = vrot.lane.b32.xlu0 %v8404_v7, %s4350_s26  ;;  %v2722_v12 = vpop.permute.xlu1 %2721  ;;  %v8407_v14 = vld [vmem:[#allocation65_spill] sm:$0xff]  ;;  %v2418_v51 = vadd.f32 %v8410_v24, %v8409_v57  ;;  %v7849_v7 = vmov 0.0   ;;  %v7226_v31 = vld [vmem:[#allocation4 + $0x58] sm:$0xff] }
 0x379   : > { %229 = vst.msk [vmem:[#allocation2] sm:$0x1] %vm228_vm3, %v7849_v7  ;;  %8412 = vst [vmem:[#allocation46_spill] sm:$0xff] %v7226_v31 }
 0x37a   : > { %v2672_v4 = vadd.f32 %v6903_v29, %v2640_v41  ;;  %v3241_v6 = vpop.permute.xlu0 %3240  ;;  %v8408_v29 = vld [vmem:[#allocation152_spill] sm:$0xff] }
 0x37b   : > { %v3262_v8 = vadd.f32 %v3241_v6, %v7119_v47  ;;  %3422 = vrot.lane.b32.xlu1 %v8407_v14, %s4350_s26 }
 0x37c   : > { %v2704_v19 = vadd.f32 %v7014_v35, %v2672_v4  ;;  %3394 = vrot.lane.b32.xlu0 %v8408_v29, %s4349_s15  ;;  %v3107_v42 = vpop.permute.xlu1 %3106  ;;  %v8411_v35 = vld [vmem:[#allocation61_spill] sm:$0xff]  ;;  %v8414_v29 = vld [vmem:[#allocation146_spill] sm:$0xff] }
 0x37d   : > { %v2466_v53 = vadd.f32 %v8411_v35, %v2418_v51  ;;  %v3123_v47 = vadd.f32 %v3107_v42, %v3075_v18 }
 0x37e   : > { %v2736_v62 = vadd.f32 %v7130_v13, %v2704_v19  ;;  %v2758_v41 = vpop.permute.xlu0 %2757  ;;  %v8413_v13 = vld [vmem:[#allocation83_spill] sm:$0xff] }
 0x37f   : > { %3458 = vrot.lane.b32.xlu1 %v7050_v10, %s4351_s16  ;;  %v2514_v6 = vadd.f32 %v8413_v13, %v2466_v53 }
 0x380   : > { %v2776_v4 = vadd.f32 %v2758_v41, %v2736_v62  ;;  %3454 = vrot.lane.b32.xlu0 %v7027_v3, %s4351_s16  ;;  %v3191_v19 = vpop.permute.xlu1 %3190  ;;  %v8415_v62 = vld [vmem:[#allocation89_spill] sm:$0xff]  ;;  %v8416_v3 = vld [vmem:[#allocation154_spill] sm:$0xff] }
 0x381   : > { %v2562_v57 = vadd.f32 %v8414_v29, %v2514_v6  ;;  %v3213_v24 = vadd.f32 %v3191_v19, %v3165_v26 }
 0x382   : > { %2809 = vst.msk [vmem:[#allocation3 + $0xe2] sm:$0xff] %vm670_vm0, %v2776_v4  ;;  %2801 = vst.msk [vmem:[#allocation4 + $0x58] sm:$0xff] %vm670_vm0, %v2776_v4  ;;  %v3151_v14 = vpop.permute.xlu0 %3150 }
 0x383   : > { %v3169_v51 = vadd.f32 %v3151_v14, %v3121_v27  ;;  %3426 = vrot.lane.b32.xlu1 %v8415_v62, %s4350_s26  ;;  %v2610_v10 = vadd.f32 %v8416_v3, %v2562_v57  ;;  %v8418_v14 = vld [vmem:[#allocation63_spill] sm:$0xff] }
 0x384   : > { %3464 = vrot.lane.b32.xlu0 %v7047_v58, %s4351_s16  ;;  %v3201_v42 = vpop.permute.xlu1 %3200  ;;  %v706_v29 = vmul.f32 0.0010283801, %v8418_v14 }
 0x385   : > { %v2642_v35 = vadd.f32 %v6905_v63, %v2610_v10  ;;  %v7238_v53 = vadd.f32 %v3201_v42, %v3170_v60  ;;  %v8419_v63 = vld [vmem:[#allocation15_spill] sm:$0xff] }
 0x386   : > { %v3195_v41 = vpop.permute.xlu0 %3194  ;;  %v722_v60 = vmul.f32 0.007598758, %v8419_v63  ;;  %v8428_v63 = vld [vmem:[#allocation59_spill] sm:$0xff] }
 0x387   : > { %v3215_v4 = vadd.f32 %v3195_v41, %v3167_v17  ;;  %3466 = vrot.lane.b32.xlu1 %v3075_v18, %s4351_s16  ;;  %v2674_v26 = vadd.f32 %v7001_v55, %v2642_v35  ;;  %v8420_v17 = vld [vmem:[#allocation22_spill] sm:$0xff]  ;;  %v8421_v18 = vld [vmem:[#allocation33_spill] sm:$0xff]  ;;  %v8423_v35 = vld [vmem:[#allocation36_spill] sm:$0xff] }
 0x388   : > { %3462 = vrot.lane.b32.xlu0 %v7151_v2, %s4351_s16  ;;  %v3285_v27 = vpop.permute.xlu1 %3284  ;;  %v708_v62 = vmul.f32 0.0010283801, %v8420_v17  ;;  %v724_v3 = vmul.f32 0.007598758, %v8421_v18  ;;  %v730_v41 = vadd.f32 %v722_v60, %v706_v29  ;;  %v746_v17 = vmul.f32 0.036000773, %v8428_v63 }
 0x389   : > { %v2706_v58 = vadd.f32 %v7111_v39, %v2674_v26  ;;  %v7245_v6 = vadd.f32 %v3285_v27, %v3260_v16  ;;  %v1395_v39 = vmul.f32 0.0010283801, %v8423_v35  ;;  %v8424_v16 = vld [vmem:[#allocation39_spill] sm:$0xff]  ;;  %v8426_v27 = vld [vmem:[#allocation34_spill] sm:$0xff]  ;;  %v8429_v29 = vld [vmem:[#allocation56_spill] sm:$0xff] }
 0x38a   : > { %v3245_v13 = vpop.permute.xlu0 %3244  ;;  %v1411_v26 = vmul.f32 0.007598758, %v8424_v16  ;;  %v732_v14 = vadd.f32 %v724_v3, %v708_v62  ;;  %v712_v60 = vmul.f32 0.0010283801, %v8429_v29  ;;  %v8430_v18 = vld [vmem:[#allocation45_spill] sm:$0xff]  ;;  %v754_v3 = vadd.f32 %v746_v17, %v730_v41  ;;  %v8434_v63 = vld [vmem:[#allocation70_spill] sm:$0xff] }
 0x38b   : > { %8417 = vst [vmem:[#allocation134_spill] sm:$0xff] %v7245_v6  ;;  %v3264_v19 = vadd.f32 %v3245_v13, %v3216_v28  ;;  %v2738_v57 = vadd.f32 %v2722_v12, %v2706_v58  ;;  %v7255_v28 = vld [vmem:[#allocation4 + $0x78] sm:$0xff]  ;;  %v710_v12 = vmul.f32 0.0010283801, %v8426_v27  ;;  %v8432_v27 = vld [vmem:[#allocation40_spill] sm:$0xff] }
 0x38c   : > { %v2762_v10 = vpop.permute.xlu1 %2761  ;;  %8425 = vst [vmem:[#allocation101_spill] sm:$0xff] %v7255_v28  ;;  %v8427_v13 = vld [vmem:[#allocation55_spill] sm:$0xff]  ;;  %v1397_v28 = vmul.f32 0.0010283801, %v8432_v27  ;;  %v770_v31 = vmul.f32 0.10936069, %v8434_v63 }
 0x38d   : > { %v2778_v42 = vadd.f32 %v2762_v10, %v2738_v57  ;;  %v726_v58 = vmul.f32 0.007598758, %v8427_v13  ;;  %v728_v10 = vmul.f32 0.007598758, %v8430_v18  ;;  %v8433_v13 = vld [vmem:[#allocation41_spill] sm:$0xff]  ;;  %v8439_v27 = vld [vmem:[#allocation19_spill] sm:$0xff] }
 0x38e   : > { %v3289_v2 = vpop.permute.xlu0 %3288  ;;  %v1413_v62 = vmul.f32 0.007598758, %v8433_v13  ;;  %v1399_v18 = vmul.f32 0.0010283801, %v8436_v36  ;;  %v796_v44 = vmul.f32 0.21300554, %v8439_v27 }
 0x38f   : > { %v7251_v55 = vadd.f32 %v3289_v2, %v3262_v8  ;;  %2811 = vst.msk [vmem:[#allocation3 + $0xf2] sm:$0xff] %vm670_vm0, %v2778_v42  ;;  %2803 = vst.msk [vmem:[#allocation4 + $0x78] sm:$0xff] %vm670_vm0, %v2778_v42  ;;  %v8431_v2 = vld [vmem:[#allocation14_spill] sm:$0xff]  ;;  %v8435_v42 = vld [vmem:[#allocation23_spill] sm:$0xff]  ;;  %v734_v32 = vadd.f32 %v726_v58, %v710_v12  ;;  %v1437_v27 = vmul.f32 0.036000773, %v8444_v25 }
 0x390   : > { %v3199_v8 = vpop.permute.xlu1 %3198  ;;  %v748_v35 = vmul.f32 0.036000773, %v8431_v2  ;;  %v794_v6 = vmul.f32 0.21300554, %v8435_v42  ;;  %v1415_v2 = vmul.f32 0.007598758, %v8437_v33  ;;  %v1421_v12 = vadd.f32 %v1413_v62, %v1397_v28 }
 0x391   : > { %8422 = vst [vmem:[#allocation140_spill] sm:$0xff] %v7251_v55  ;;  %v7265_v16 = vadd.f32 %v3199_v8, %v3169_v51  ;;  %v1419_v55 = vadd.f32 %v1411_v26, %v1395_v39  ;;  %v8440_v13 = vld [vmem:[#allocation118_spill] sm:$0xff]  ;;  %v8441_v39 = vld [vmem:[#allocation69_spill] sm:$0xff]  ;;  %v8442_v58 = vld [vmem:[#allocation68_spill] sm:$0xff] }
 0x392   : > { %v3155_v57 = vpop.permute.xlu0 %3154  ;;  %v756_v29 = vadd.f32 %v748_v35, %v732_v14  ;;  %v1435_v41 = vmul.f32 0.036000773, %v8440_v13  ;;  %v750_v26 = vmul.f32 0.036000773, %v8441_v39  ;;  %v752_v36 = vmul.f32 0.036000773, %v8442_v58 }
 0x393   : > { %v7267_v7 = vadd.f32 %v3155_v57, %v3123_v47  ;;  %v736_v47 = vadd.f32 %v728_v10, %v712_v60  ;;  %v8438_v57 = vld [vmem:[#allocation18_spill] sm:$0xff]  ;;  %v8443_v14 = vld [vmem:[#allocation25_spill] sm:$0xff]  ;;  %v778_v35 = vadd.f32 %v770_v31, %v754_v3  ;;  %v8447_v39 = vld [vmem:[#allocation48_spill] sm:$0xff] }
 0x394   : > { %v3243_v51 = vpop.permute.xlu1 %3242  ;;  %v772_v61 = vmul.f32 0.10936069, %v8438_v57  ;;  %v774_v33 = vmul.f32 0.10936069, %v8443_v14  ;;  %v1443_v42 = vadd.f32 %v1435_v41, %v1419_v55  ;;  %v758_v60 = vadd.f32 %v750_v26, %v734_v32  ;;  %v8449_v31 = vld [vmem:[#allocation106_spill] sm:$0xff]  ;;  %v8450_v55 = vld [vmem:[#allocation16_spill] sm:$0xff] }
 0x395   : > { %v7278_v17 = vadd.f32 %v3243_v51, %v3215_v4  ;;  %v1423_v57 = vadd.f32 %v1415_v2, %v1399_v18  ;;  %v760_v4 = vadd.f32 %v752_v36, %v736_v47  ;;  %v8445_v51 = vld [vmem:[#allocation64_spill] sm:$0xff]  ;;  %v1459_v28 = vmul.f32 0.10936069, %v8447_v39  ;;  %v8451_v25 = vld [vmem:[#allocation27_spill] sm:$0xff]  ;;  %v8452_v36 = vld [vmem:[#allocation98_spill] sm:$0xff] }
 0x396   : > { %v3239_v8 = vpop.permute.xlu0 %3238  ;;  %v780_v10 = vadd.f32 %v772_v61, %v756_v29  ;;  %v1439_v32 = vmul.f32 0.036000773, %v8449_v31  ;;  %v1445_v61 = vadd.f32 %v1437_v27, %v1421_v12  ;;  %v776_v3 = vmul.f32 0.10936069, %v8450_v55  ;;  %v8455_v12 = vld [vmem:[#allocation66_spill] sm:$0xff]  ;;  %v8457_v55 = vld [vmem:[#allocation24_spill] sm:$0xff] }
 0x397   : > { %v7280_v63 = vadd.f32 %v3239_v8, %v3213_v24  ;;  %v1401_v24 = vmul.f32 0.0010283801, %v8445_v51  ;;  %v8446_v8 = vld [vmem:[#allocation60_spill] sm:$0xff]  ;;  %v798_v29 = vmul.f32 0.21300554, %v8451_v25  ;;  %v802_v18 = vadd.f32 %v794_v6, %v778_v35  ;;  %v8456_v39 = vld [vmem:[#allocation38_spill] sm:$0xff] }
 0x398   : > { %v3293_v21 = vpop.permute.xlu1 %3292  ;;  %v1417_v50 = vmul.f32 0.007598758, %v8446_v8  ;;  %v1467_v2 = vadd.f32 %v1459_v28, %v1443_v42  ;;  %v782_v47 = vadd.f32 %v774_v33, %v758_v60  ;;  %v804_v41 = vadd.f32 %v796_v44, %v780_v10  ;;  %v8458_v35 = vld [vmem:[#allocation107_spill] sm:$0xff]  ;;  %v8459_v42 = vld [vmem:[#allocation28_spill] sm:$0xff]  ;;  %v8460_v10 = vld [vmem:[#allocation21_spill] sm:$0xff] }
 0x399   : > { %v7289_v62 = vadd.f32 %v3293_v21, %v3264_v19  ;;  %v1447_v26 = vadd.f32 %v1439_v32, %v1423_v57  ;;  %v1461_v14 = vmul.f32 0.10936069, %v8452_v36  ;;  %v8454_v19 = vld [vmem:[#allocation75_spill] sm:$0xff]  ;;  %v1483_v27 = vmul.f32 0.21300554, %v8455_v12  ;;  %v8461_v28 = vld [vmem:[#allocation124_spill] sm:$0xff] }
 0x39a   : > { %v3249_v13 = vpop.permute.xlu0 %3248  ;;  %v1425_v8 = vadd.f32 %v1417_v50, %v1401_v24  ;;  %v818_v31 = vmul.f32 0.26601171, %v8456_v39  ;;  %v820_v6 = vmul.f32 0.26601171, %v8457_v55  ;;  %v1463_v33 = vmul.f32 0.10936069, %v8458_v35 }
 0x39b   : > { %8448 = vst [vmem:[#allocation139_spill] sm:$0xff] %v7289_v62  ;;  %v7292_v58 = vadd.f32 %v3249_v13, %v7238_v53  ;;  %v784_v53 = vadd.f32 %v776_v3, %v760_v4  ;;  %v800_v13 = vmul.f32 0.21300554, %v8454_v19  ;;  %v1469_v44 = vadd.f32 %v1461_v14, %v1445_v61  ;;  %v8462_v50 = vld [vmem:[#allocation94_spill] sm:$0xff]  ;;  %v8463_v62 = vld [vmem:[#allocation53_spill] sm:$0xff]  ;;  %v8464_v35 = vld [vmem:[#allocation91_spill] sm:$0xff] }
 0x39c   : > { %v7298_v51 = vpop.permute.xlu1 %3320  ;;  %v822_v60 = vmul.f32 0.26601171, %v8459_v42  ;;  %v824_v57 = vmul.f32 0.26601171, %v8460_v10  ;;  %v1441_v32 = vmul.f32 0.036000773, %v8461_v28  ;;  %v1491_v25 = vadd.f32 %v1483_v27, %v1467_v2 }
 0x39d   : > { %v806_v4 = vadd.f32 %v798_v29, %v782_v47  ;;  %v826_v3 = vadd.f32 %v818_v31, %v802_v18  ;;  %v1471_v36 = vadd.f32 %v1463_v33, %v1447_v26  ;;  %v1485_v24 = vmul.f32 0.21300554, %v8462_v50  ;;  %v8467_v2 = vld [vmem:[#allocation119_spill] sm:$0xff]  ;;  %v8469_v31 = vld [vmem:[#allocation100_spill] sm:$0xff] }
 0x39e   : > { %v7300_v21 = vpop.permute.xlu0 %3316  ;;  %v808_v39 = vadd.f32 %v800_v13, %v784_v53  ;;  %v842_v55 = vmul.f32 0.21300554, %v8463_v62  ;;  %v1507_v61 = vmul.f32 0.26601171, %v8464_v35  ;;  %v1487_v29 = vmul.f32 0.21300554, %v8467_v2 }
 0x39f   : > { %8453 = vst [vmem:[#allocation148_spill] sm:$0xff] %v7300_v21  ;;  %v1449_v21 = vadd.f32 %v1441_v32, %v1425_v8  ;;  %v1493_v18 = vadd.f32 %v1485_v24, %v1469_v44  ;;  %v828_v47 = vadd.f32 %v820_v6, %v804_v41  ;;  %v8468_v26 = vld [vmem:[#allocation71_spill] sm:$0xff]  ;;  %v1465_v33 = vmul.f32 0.10936069, %v8469_v31  ;;  %v8471_v28 = vld [vmem:[#allocation120_spill] sm:$0xff] }
 0x3a0   : > { %v3247_v19 = vpop.permute.xlu1 %3246  ;;  %v844_v27 = vmul.f32 0.21300554, %v8468_v26  ;;  %v1515_v53 = vadd.f32 %v1507_v61, %v1491_v25  ;;  %v830_v13 = vadd.f32 %v822_v60, %v806_v4  ;;  %v8470_v62 = vld [vmem:[#allocation31_spill] sm:$0xff]  ;;  %v1495_v10 = vadd.f32 %v1487_v29, %v1471_v36  ;;  %v8473_v2 = vld [vmem:[#allocation92_spill] sm:$0xff]  ;;  %v8476_v25 = vld [vmem:[#allocation122_spill] sm:$0xff] }
 0x3a1   : > { %v7314_v14 = vadd.f32 %v3247_v19, %v7265_v16  ;;  %v846_v8 = vmul.f32 0.21300554, %v8470_v62  ;;  %v1509_v32 = vmul.f32 0.26601171, %v8471_v28  ;;  %v832_v19 = vadd.f32 %v824_v57, %v808_v39  ;;  %v8477_v29 = vld [vmem:[#allocation113_spill] sm:$0xff] }
 0x3a2   : > { %v3203_v12 = vpop.permute.xlu0 %3202  ;;  %v1473_v35 = vadd.f32 %v1465_v33, %v1449_v21  ;;  %v1531_v44 = vmul.f32 0.21300554, %v8473_v2  ;;  %v8475_v60 = vmov 0.0   ;;  %v1511_v4 = vmul.f32 0.26601171, %v8476_v25  ;;  %v8478_v21 = vld [vmem:[#allocation54_spill] sm:$0xff] }
 0x3a3   : > { %8465 = vst [vmem:[#allocation151_spill] sm:$0xff] %v7314_v14  ;;  %v7317_v42 = vadd.f32 %v3203_v12, %v7267_v7  ;;  %v8472_v7 = vld [vmem:[#allocation26_spill] sm:$0xff]  ;;  %v1517_v36 = vadd.f32 %v1509_v32, %v1493_v18  ;;  %v850_v24 = vadd.f32 %v842_v55, %v826_v3  ;;  %v852_v61 = vadd.f32 %v844_v27, %v828_v47  ;;  %v8479_v62 = vld [vmem:[#allocation121_spill] sm:$0xff]  ;;  %v8484_v27 = vld [vmem:[#allocation116_spill] sm:$0xff] }
 0x3a4   : > { %v3291_v16 = vpop.permute.xlu1 %3290  ;;  %v848_v12 = vmul.f32 0.21300554, %v8472_v7  ;;  %v1489_v57 = vmul.f32 0.21300554, %v8477_v29  ;;  %v1539_v39 = vadd.f32 %v1531_v44, %v1515_v53  ;;  %v854_v26 = vadd.f32 %v846_v8, %v830_v13  ;;  %v8481_v7 = vld [vmem:[#allocation73_spill] sm:$0xff]  ;;  %v8482_v18 = vld [vmem:[#allocation110_spill] sm:$0xff] }
 0x3a5   : > { %8466 = vst [vmem:[#allocation86_spill] sm:$0xff] %v7317_v42  ;;  %v7327_v41 = vadd.f32 %v3291_v16, %v7278_v17  ;;  %v866_v31 = vmul.f32 0.10936069, %v8478_v21  ;;  %v1519_v33 = vadd.f32 %v1511_v4, %v1495_v10  ;;  %v1533_v17 = vmul.f32 0.21300554, %v8479_v62  ;;  %v8480_v16 = vld [vmem:[#allocation72_spill] sm:$0xff] }
 0x3a6   : > { %v3287_v50 = vpop.permute.xlu0 %3286  ;;  %v870_v2 = vmul.f32 0.10936069, %v8481_v7  ;;  %v1555_v3 = vmul.f32 0.10936069, %v8482_v18  ;;  %v856_v47 = vadd.f32 %v848_v12, %v832_v19  ;;  %v1535_v53 = vmul.f32 0.21300554, %v8484_v27 }
 0x3a7   : > { %v7330_v6 = vadd.f32 %v3287_v50, %v7280_v63  ;;  %3908 = vadd.xlane.f32.xlu0 %v8475_v60  ;;  %v868_v50 = vmul.f32 0.10936069, %v8480_v16  ;;  %v1497_v60 = vadd.f32 %v1489_v57, %v1473_v35  ;;  %v1541_v13 = vadd.f32 %v1533_v17, %v1517_v36  ;;  %v8485_v8 = vld [vmem:[#allocation76_spill] sm:$0xff]  ;;  %v8486_v44 = vld [vmem:[#allocation37_spill] sm:$0xff]  ;;  %v8487_v16 = vld [vmem:[#allocation95_spill] sm:$0xff] }
 0x3a8   : > { %v7337_v28 = vpop.permute.xlu1 %3324  ;;  %v872_v10 = vmul.f32 0.10936069, %v8485_v8  ;;  %v874_v32 = vadd.f32 %v866_v31, %v850_v24  ;;  %v1513_v25 = vmul.f32 0.26601171, %v8486_v44  ;;  %v1563_v4 = vadd.f32 %v1555_v3, %v1539_v39  ;;  %v8489_v12 = vld [vmem:[#allocation58_spill] sm:$0xff]  ;;  %v8490_v17 = vld [vmem:[#allocation111_spill] sm:$0xff] }
 0x3a9   : > { %8474 = vst [vmem:[#allocation142_spill] sm:$0xff] %v7330_v6  ;;  %v876_v29 = vadd.f32 %v868_v50, %v852_v61  ;;  %v878_v21 = vadd.f32 %v870_v2, %v854_v26  ;;  %v1543_v62 = vadd.f32 %v1535_v53, %v1519_v33  ;;  %v1557_v35 = vmul.f32 0.10936069, %v8487_v16  ;;  %v8491_v31 = vld [vmem:[#allocation74_spill] sm:$0xff]  ;;  %v8492_v39 = vld [vmem:[#allocation117_spill] sm:$0xff]  ;;  %v8494_v3 = vld [vmem:[#allocation52_spill] sm:$0xff] }
 0x3aa   : > { %v3297_v63 = vpop.permute.xlu0 %3296  ;;  %v1521_v36 = vadd.f32 %v1513_v25, %v1497_v60  ;;  %v1575_v18 = vmul.f32 0.036000773, %v8490_v17  ;;  %v880_v24 = vadd.f32 %v872_v10, %v856_v47  ;;  %v890_v27 = vmul.f32 0.036000773, %v8491_v31  ;;  %v8493_v33 = vld [vmem:[#allocation77_spill] sm:$0xff]  ;;  %v8495_v14 = vld [vmem:[#allocation96_spill] sm:$0xff] }
 0x3ab   : > { %v7343_v55 = vadd.f32 %v3297_v63, %v7292_v58  ;;  %v8488_v58 = vld [vmem:[#allocation17_spill] sm:$0xff]  ;;  %v888_v63 = vmul.f32 0.036000773, %v8489_v12  ;;  %v1559_v61 = vmul.f32 0.10936069, %v8492_v39  ;;  %v1565_v26 = vadd.f32 %v1557_v35, %v1541_v13  ;;  %v8498_v47 = vld [vmem:[#allocation20_spill] sm:$0xff] }
 0x3ac   : > { %v7349_v57 = vpop.permute.xlu1 %3352  ;;  %v886_v19 = vmul.f32 0.036000773, %v8488_v58  ;;  %v892_v50 = vmul.f32 0.036000773, %v8493_v33  ;;  %v1537_v53 = vmul.f32 0.21300554, %v8494_v3  ;;  %v1583_v8 = vadd.f32 %v1575_v18, %v1563_v4 }
 0x3ad   : > { %8483 = vst [vmem:[#allocation156_spill] sm:$0xff] %v7343_v55  ;;  %v896_v44 = vadd.f32 %v888_v63, %v876_v29  ;;  %v898_v16 = vadd.f32 %v890_v27, %v878_v21  ;;  %v1567_v58 = vadd.f32 %v1559_v61, %v1543_v62  ;;  %v1577_v12 = vmul.f32 0.036000773, %v8495_v14  ;;  %v8499_v17 = vld [vmem:[#allocation35_spill] sm:$0xff]  ;;  %v8502_v4 = vld [vmem:[#allocation108_spill] sm:$0xff]  ;;  %v8503_v62 = vld [vmem:[#allocation78_spill] sm:$0xff] }
 0x3ae   : > { %v7351_v7 = vpop.permute.xlu0 %3348  ;;  %v894_v2 = vadd.f32 %v886_v19, %v874_v32  ;;  %v905_v10 = vmul.f32 0.007598758, %v8498_v47  ;;  %v906_v31 = vmul.f32 0.007598758, %v8499_v17  ;;  %v1545_v13 = vadd.f32 %v1537_v53, %v1521_v36  ;;  %v8500_v35 = vld [vmem:[#allocation67_spill] sm:$0xff]  ;;  %v8501_v19 = vld [vmem:[#allocation30_spill] sm:$0xff] }
 0x3af   : > { %v1594_v39 = vmul.f32 0.007598758, %v8500_v35  ;;  %v900_v32 = vadd.f32 %v892_v50, %v880_v24  ;;  %v907_v33 = vmul.f32 0.007598758, %v8501_v19  ;;  %v1579_v29 = vmul.f32 0.036000773, %v8502_v4 }
 0x3b0   : > { %v7361_v60 = vpop.permute.xlu1 %3294  ;;  %v1585_v21 = vadd.f32 %v1577_v12, %v1565_v26  ;;  %v908_v63 = vmul.f32 0.007598758, %v8503_v62  ;;  %v910_v14 = vadd.f32 %v905_v10, %v894_v2  ;;  %v8504_v18 = vld [vmem:[#allocation125_spill] sm:$0xff]  ;;  %v912_v3 = vadd.f32 %v906_v31, %v896_v44  ;;  %v8505_v55 = vld [vmem:[#allocation114_spill] sm:$0xff]  ;;  %v8507_v24 = vld [vmem:[#allocation44_spill] sm:$0xff] }
 0x3b1   : > { %8496 = vst [vmem:[#allocation147_spill] sm:$0xff] %v7361_v60  ;;  %v1561_v27 = vmul.f32 0.10936069, %v8504_v18  ;;  %v1599_v61 = vadd.f32 %v1594_v39, %v1583_v8  ;;  %v914_v60 = vadd.f32 %v907_v33, %v898_v16  ;;  %v1587_v47 = vadd.f32 %v1579_v29, %v1567_v58  ;;  %v8508_v35 = vld [vmem:[#allocation29_spill] sm:$0xff]  ;;  %v8509_v12 = vld [vmem:[#allocation103_spill] sm:$0xff]  ;;  %v8510_v10 = vld [vmem:[#allocation32_spill] sm:$0xff] }
 0x3b2   : > { %v7363_v25 = vpop.permute.xlu0 %3250  ;;  %v1595_v17 = vmul.f32 0.007598758, %v8505_v55  ;;  %v922_v50 = vmul.f32 0.0010283801, %v8507_v24  ;;  %v924_v19 = vmul.f32 0.0010283801, %v8508_v35  ;;  %v916_v2 = vadd.f32 %v908_v63, %v900_v32 }
 0x3b3   : > { %8497 = vst [vmem:[#allocation150_spill] sm:$0xff] %v7363_v25  ;;  %v1569_v26 = vadd.f32 %v1561_v27, %v1545_v13  ;;  %v1611_v4 = vmul.f32 0.0010283801, %v8509_v12  ;;  %v926_v62 = vmul.f32 0.0010283801, %v8510_v10  ;;  %v8511_v8 = vld [vmem:[#allocation105_spill] sm:$0xff] }
 0x3b4   : > { %v7373_v36 = vpop.permute.xlu1 %3322  ;;  %v1596_v44 = vmul.f32 0.007598758, %v8511_v8  ;;  %v1601_v16 = vadd.f32 %v1595_v17, %v1585_v21  ;;  %v8512_v58 = vld [vmem:[#allocation126_spill] sm:$0xff]  ;;  %v8513_v39 = vld [vmem:[#allocation109_spill] sm:$0xff]  ;;  %v8515_v24 = vld [vmem:[#allocation115_spill] sm:$0xff]  ;;  %v930_v17 = vadd.f32 %v922_v50, %v910_v14  ;;  %v7393_v8 = vadd.f32 %v924_v19, %v912_v3 }
 0x3b5   : > { %v1581_v31 = vmul.f32 0.036000773, %v8512_v58  ;;  %v1619_v55 = vadd.f32 %v1611_v4, %v1599_v61  ;;  %v2116_v33 = vmul.f32 0.0010283801, %v8513_v39  ;;  %v8514_v29 = vld [vmem:[#allocation130_spill] sm:$0xff]  ;;  %v8516_v35 = vld [vmem:[#allocation129_spill] sm:$0xff] }
 0x3b6   : > { %v7375_v53 = vpop.permute.xlu0 %3318  ;;  %v2132_v18 = vmul.f32 0.007598758, %v8514_v29  ;;  %v1603_v25 = vadd.f32 %v1596_v44, %v1587_v47  ;;  %v1613_v42 = vmul.f32 0.0010283801, %v8515_v24  ;;  %v2118_v13 = vmul.f32 0.0010283801, %v8516_v35 }
 0x3b7   : > { %8506 = vst [vmem:[#allocation138_spill] sm:$0xff] %v7375_v53  ;;  %v8517_v27 = vld [vmem:[#allocation132_spill] sm:$0xff]  ;;  %v8519_v10 = vld [vmem:[#allocation57_spill] sm:$0xff]  ;;  %8520 = vst [vmem:[#allocation155_spill] sm:$0xff] %v7393_v8  ;;  %v1589_v61 = vadd.f32 %v1581_v31, %v1569_v26  ;;  %v7400_v35 = vadd.f32 %v926_v62, %v914_v60  ;;  %v7403_v6 = vmul.f32 %v1619_v55, %v1619_v55  ;;  %v2156_v62 = vmul.f32 0.036000773, %v6939_v34 }
 0x3b8   : > { %v2134_v12 = vmul.f32 0.007598758, %v8517_v27  ;;  %v7388_v32 = vpop.permute.xlu1 %3356  ;;  %v928_v21 = vmul.f32 0.0010283801, %v8519_v10  ;;  %v8521_v4 = vld [vmem:[#allocation123_spill] sm:$0xff]  ;;  %v7396_v39 = vadd.f32 %v1613_v42, %v1601_v16  ;;  %v8523_v47 = vld [vmem:[#allocation112_spill] sm:$0xff]  ;;  %v7413_v26 = vmul.f32 %v930_v17, %v930_v17 }
 0x3b9   : > { %v1615_v58 = vmul.f32 0.0010283801, %v8521_v4  ;;  %v2120_v44 = vmul.f32 0.0010283801, %v8523_v47  ;;  %v8524_v29 = vld [vmem:[#allocation133_spill] sm:$0xff]  ;;  %8525 = vst [vmem:[#allocation85_spill] sm:$0xff] %v7400_v35  ;;  %v7417_v60 = vmul.f32 %v7393_v8, %v7393_v8 }
 0x3ba   : > { %v7390_v63 = vpop.permute.xlu0 %3328  ;;  %8522 = vst [vmem:[#allocation157_spill] sm:$0xff] %v7396_v39  ;;  %v2136_v24 = vmul.f32 0.007598758, %v8524_v29  ;;  %v8526_v27 = vld [vmem:[#allocation127_spill] sm:$0xff]  ;;  %v7405_v10 = vadd.f32 %v928_v21, %v916_v2  ;;  %v2142_v3 = vadd.f32 %v2134_v12, %v2118_v13  ;;  %v7422_v2 = vmul.f32 %v7396_v39, %v7396_v39  ;;  %v8536_v47 = vld [vmem:[#allocation137_spill] sm:$0xff] }
 0x3bb   : > { %8518 = vst [vmem:[#allocation81_spill] sm:$0xff] %v7390_v63  ;;  %v1597_v53 = vmul.f32 0.007598758, %v8526_v27  ;;  %v2140_v63 = vadd.f32 %v2132_v18, %v2116_v33  ;;  %v7407_v14 = vadd.f32 %v1615_v58, %v1603_v25  ;;  %v7424_v25 = vmul.f32 %v1619_v55, %v930_v17  ;;  %v8530_v33 = vld [vmem:[#allocation128_spill] sm:$0xff]  ;;  %v8543_v39 = vld [vmem:[#allocation161_spill] sm:$0xff] }
 0x3bc   : > { %8527 = vst [vmem:[#allocation88_spill] sm:$0xff] %v7405_v10  ;;  %v7409_v50 = vpop.permute.xlu1 %3384  ;;  %v2144_v16 = vadd.f32 %v2136_v24, %v2120_v44  ;;  %v2158_v31 = vmul.f32 0.036000773, %v6941_v37  ;;  %v1617_v18 = vmul.f32 0.0010283801, %v8530_v33  ;;  %v3806_v12 = vadd.f32 %v7403_v6, %v7413_v26 }
 0x3bd   : > { %8528 = vst [vmem:[#allocation141_spill] sm:$0xff] %v7407_v14  ;;  %v1605_v19 = vadd.f32 %v1597_v53, %v1589_v61  ;;  %8529 = vst [vmem:[#allocation131_spill] sm:$0xff] %v7424_v25  ;;  %v7430_v53 = vmul.f32 %v7400_v35, %v7400_v35  ;;  %v2164_v13 = vadd.f32 %v2156_v62, %v2140_v63  ;;  %v2160_v37 = vmul.f32 0.036000773, %v7037_v15  ;;  %v8535_v63 = vld [vmem:[#allocation136_spill] sm:$0xff] }
 0x3be   : > { %v7411_v42 = vpop.permute.xlu0 %3380  ;;  %v7436_v34 = vmul.f32 %v7405_v10, %v7405_v10  ;;  %v7440_v55 = vmul.f32 %v7407_v14, %v7407_v14  ;;  %v2166_v21 = vadd.f32 %v2158_v31, %v2142_v3  ;;  %v2122_v58 = vmul.f32 0.0010283801, %v8535_v63  ;;  %v8542_v14 = vld [vmem:[#allocation80_spill] sm:$0xff] }
 0x3bf   : > { %8531 = vst [vmem:[#allocation82_spill] sm:$0xff] %v7430_v53  ;;  %v7447_v4 = vadd.f32 %v1617_v18, %v1605_v19  ;;  %v2138_v44 = vmul.f32 0.007598758, %v8536_v47  ;;  %v2180_v29 = vmul.f32 0.10936069, %v6943_v22  ;;  %v2168_v24 = vadd.f32 %v2160_v37, %v2144_v16 }
 0x3c0   : > { %8532 = vst [vmem:[#allocation143_spill] sm:$0xff] %v7440_v55  ;;  %v7443_v17 = vpop.permute.xlu1 %3326  ;;  %v2182_v27 = vmul.f32 0.10936069, %v6945_v5  ;;  %v7454_v62 = vmul.f32 2.0, %v7424_v25  ;;  %v7458_v15 = vadd.f32 %v7422_v2, %v7417_v60  ;;  %v2204_v19 = vmul.f32 0.21300554, %v6947_v56 }
 0x3c1   : > { %8533 = vst [vmem:[#allocation158_spill] sm:$0xff] %v7443_v17  ;;  %8534 = vst [vmem:[#allocation87_spill] sm:$0xff] %v7447_v4  ;;  %v2188_v3 = vadd.f32 %v2180_v29, %v2164_v13  ;;  %v2228_v31 = vmul.f32 0.26601171, %v6951_v43  ;;  %v7462_v33 = vadd.f32 0.0001, %v3806_v12  ;;  %v2146_v47 = vadd.f32 %v2138_v44, %v2122_v58 }
 0x3c2   : > { %v7445_v61 = vpop.permute.xlu0 %3298  ;;  %8537 = vst [vmem:[#allocation84_spill] sm:$0xff] %v7454_v62  ;;  %8538 = vst [vmem:[#allocation79_spill] sm:$0xff] %v7458_v15  ;;  %v2184_v18 = vmul.f32 0.10936069, %v7039_v59  ;;  %v2190_v22 = vadd.f32 %v2182_v27, %v2166_v21  ;;  %v2206_v16 = vmul.f32 0.21300554, %v6949_v11 }
 0x3c3   : > { %8539 = vst [vmem:[#allocation99_spill] sm:$0xff] %v7462_v33  ;;  %v2208_v5 = vmul.f32 0.21300554, %v7041_v0  ;;  %v2162_v13 = vmul.f32 0.036000773, %v7144_v40  ;;  %v7479_v0 = vmul.f32 %v7447_v4, %v7447_v4  ;;  %v2853_v40 = vld [vmem:[#allocation4 + $0x10] sm:$0xff] }
 0x3c4   : > { %v7467_v37 = vpop.permute.xlu1 %3354  ;;  %v2821_v56 = vmul.f32 0.0010283801, %v7102_v30  ;;  %v2837_v43 = vmul.f32 0.007598758, %v7109_v9  ;;  %v2186_v12 = vmul.f32 0.10936069, %v7146_v48  ;;  %v2192_v29 = vadd.f32 %v2184_v18, %v2168_v24 }
 0x3c5   : > { %v2823_v59 = vmul.f32 0.0010283801, %v7107_v54  ;;  %v2839_v11 = vmul.f32 0.007598758, %v7113_v1  ;;  %v2825_v21 = vmul.f32 0.0010283801, %v7175_v23  ;;  %v7485_v30 = vadd.f32 %v7440_v55, %v7430_v53 }
 0x3c6   : > { %v7469_v63 = vpop.permute.xlu0 %3350  ;;  %v2841_v58 = vmul.f32 0.007598758, %v7177_v20  ;;  %v2210_v9 = vmul.f32 0.21300554, %v7148_v46  ;;  %v2212_v48 = vadd.f32 %v2204_v19, %v2188_v3  ;;  %v2214_v44 = vadd.f32 %v2206_v16, %v2190_v22  ;;  %v2877_v1 = vld [vmem:[#allocation4 + $0x11] sm:$0xff]  ;;  %v8541_v16 = vld [vmem:[#allocation49_spill] sm:$0xff] }
 0x3c7   : > { %8540 = vst [vmem:[#allocation145_spill] sm:$0xff] %v7485_v30  ;;  %v2230_v54 = vmul.f32 0.26601171, %v6962_v49  ;;  %v2170_v18 = vadd.f32 %v2162_v13, %v2146_v47  ;;  %v2232_v23 = vmul.f32 0.26601171, %v7052_v38  ;;  %v2845_v62 = vadd.f32 %v2837_v43, %v2821_v56  ;;  %v2855_v25 = vld [vmem:[#allocation4 + $0x30] sm:$0xff] }
 0x3c8   : > { %v7489_v24 = vpop.permute.xlu1 %3388  ;;  %v7495_v20 = vmul.f32 0.26601171, %v7153_v45  ;;  %v2879_v4 = vld [vmem:[#allocation4 + $0x31] sm:$0xff]  ;;  %v2216_v10 = vadd.f32 %v2208_v5, %v2192_v29  ;;  %v2252_v46 = vmul.f32 0.21300554, %v6953_v52  ;;  %v2847_v3 = vadd.f32 %v2839_v11, %v2823_v59  ;;  %v8545_v15 = vld [vmem:[#allocation93_spill] sm:$0xff] }
 0x3c9   : > { %v2857_v19 = vld [vmem:[#allocation4 + $0x50] sm:$0xff]  ;;  %v2861_v49 = vmul.f32 0.036000773, %v2853_v40  ;;  %v2827_v33 = vmul.f32 0.0010283801, %v8541_v16  ;;  %v2849_v47 = vadd.f32 %v2841_v58, %v2825_v21  ;;  %v2236_v38 = vadd.f32 %v2228_v31, %v2212_v48  ;;  %v8546_v17 = vld [vmem:[#allocation159_spill] sm:$0xff] }
 0x3ca   : > { %v7491_v27 = vpop.permute.xlu0 %3360  ;;  %v2881_v22 = vld [vmem:[#allocation4 + $0x51] sm:$0xff]  ;;  %v2843_v35 = vmul.f32 0.007598758, %v8542_v14  ;;  %v2885_v13 = vmul.f32 0.10936069, %v2877_v1  ;;  %v2194_v30 = vadd.f32 %v2186_v12, %v2170_v18  ;;  %v2238_v16 = vadd.f32 %v2230_v54, %v2214_v44 }
 0x3cb   : > { %v2254_v45 = vmul.f32 0.21300554, %v8543_v39  ;;  %v2863_v8 = vmul.f32 0.036000773, %v2855_v25  ;;  %v2887_v56 = vmul.f32 0.10936069, %v2879_v4  ;;  %v2869_v11 = vadd.f32 %v2861_v49, %v2845_v62 }
 0x3cc   : > { %v7501_v43 = vpop.permute.xlu1 %3416  ;;  %v8544_v52 = vld [vmem:[#allocation166_spill] sm:$0xff]  ;;  %v2865_v59 = vmul.f32 0.036000773, %v2857_v19  ;;  %v2889_v40 = vmul.f32 0.10936069, %v2881_v22  ;;  %v2240_v25 = vadd.f32 %v2232_v23, %v2216_v10  ;;  %v2851_v4 = vadd.f32 %v2843_v35, %v2827_v33  ;;  %v8548_v33 = vld [vmem:[#allocation47_spill] sm:$0xff] }
 0x3cd   : > { %v2256_v29 = vmul.f32 0.21300554, %v8544_v52  ;;  %v7507_v14 = vmul.f32 0.21300554, %v8545_v15  ;;  %v2859_v21 = vld [vmem:[#allocation4 + $0x70] sm:$0xff]  ;;  %v2871_v31 = vadd.f32 %v2863_v8, %v2847_v3  ;;  %v2893_v1 = vadd.f32 %v2885_v13, %v2869_v11 }
 0x3ce   : > { %v7503_v5 = vpop.permute.xlu0 %3412  ;;  %v2883_v58 = vld [vmem:[#allocation4 + $0x71] sm:$0xff]  ;;  %v2873_v48 = vadd.f32 %v2865_v59, %v2849_v47  ;;  %v2260_v55 = vadd.f32 %v2252_v46, %v2236_v38  ;;  %v2276_v52 = vmul.f32 0.10936069, %v8546_v17  ;;  %v2867_v54 = vmul.f32 0.036000773, %v2859_v21 }
 0x3cf   : > { %v2901_v39 = vld [vmem:[#allocation4 + $0x12] sm:$0xff]  ;;  %v2895_v49 = vadd.f32 %v2887_v56, %v2871_v31  ;;  %v2891_v8 = vmul.f32 0.10936069, %v2883_v58  ;;  %v2218_v10 = vadd.f32 %v2210_v9, %v2194_v30  ;;  %v2262_v35 = vadd.f32 %v2254_v45, %v2238_v16 }
 0x3d0   : > { %v2903_v53 = vld [vmem:[#allocation4 + $0x32] sm:$0xff]  ;;  %v7511_v44 = vpop.permute.xlu1 %3358  ;;  %v2897_v18 = vadd.f32 %v2889_v40, %v2873_v48  ;;  %v2909_v3 = vmul.f32 0.21300554, %v2901_v39  ;;  %v2280_v23 = vmul.f32 0.10936069, %v8548_v33  ;;  %v2875_v13 = vadd.f32 %v2867_v54, %v2851_v4  ;;  %v8552_v4 = vld [vmem:[#allocation140_spill] sm:$0xff] }
 0x3d1   : > { %v8547_v19 = vld [vmem:[#allocation162_spill] sm:$0xff]  ;;  %v2911_v22 = vmul.f32 0.21300554, %v2903_v53  ;;  %v2264_v11 = vadd.f32 %v2256_v29, %v2240_v25  ;;  %v2284_v31 = vadd.f32 %v2276_v52, %v2260_v55  ;;  %v8551_v53 = vld [vmem:[#allocation163_spill] sm:$0xff]  ;;  %v8554_v29 = vld [vmem:[#allocation148_spill] sm:$0xff]  ;;  %v2242_v25 = vadd.f32 %v7495_v20, %v2218_v10 }
 0x3d2   : > { %v2278_v62 = vmul.f32 0.10936069, %v8547_v19  ;;  %v2905_v12 = vld [vmem:[#allocation4 + $0x52] sm:$0xff]  ;;  %v7513_v15 = vpop.permute.xlu0 %3330  ;;  %v2917_v56 = vadd.f32 %v2909_v3, %v2893_v1  ;;  %v8550_v19 = vld [vmem:[#allocation160_spill] sm:$0xff]  ;;  %v2298_v45 = vmul.f32 0.036000773, %v8551_v53  ;;  %v2899_v16 = vadd.f32 %v2891_v8, %v2875_v13 }
 0x3d3   : > { %v2925_v46 = vld [vmem:[#allocation4 + $0x13] sm:$0xff]  ;;  %v2913_v38 = vmul.f32 0.21300554, %v2905_v12  ;;  %v2296_v21 = vmul.f32 0.036000773, %v8550_v19  ;;  %v2919_v40 = vadd.f32 %v2911_v22, %v2895_v49  ;;  %v3342_v1 = vadd.f32 %v7298_v51, %v8552_v4  ;;  %v8555_v20 = vld [vmem:[#allocation144_spill] sm:$0xff] }
 0x3d4   : > { %v8549_v47 = vld [vmem:[#allocation62_spill] sm:$0xff]  ;;  %v2933_v33 = vmul.f32 0.26601171, %v2925_v46  ;;  %v2286_v54 = vadd.f32 %v2278_v62, %v2262_v35  ;;  %v2300_v10 = vmul.f32 0.036000773, %v8555_v20 }
 0x3d5   : > { %v7517_v17 = vmul.f32 0.10936069, %v8549_v47  ;;  %v2927_v59 = vld [vmem:[#allocation4 + $0x33] sm:$0xff]  ;;  %v7520_v30 = vpop.permute.xlu1 %3386  ;;  %v2921_v48 = vadd.f32 %v2913_v38, %v2897_v18  ;;  %v3374_v53 = vadd.f32 %v7349_v57, %v3342_v1  ;;  %v2288_v18 = vadd.f32 %v2280_v23, %v2264_v11 }
 0x3d6   : > { %v2907_v58 = vld [vmem:[#allocation4 + $0x72] sm:$0xff]  ;;  %v7522_v9 = vpop.permute.xlu0 %3382  ;;  %v2935_v52 = vmul.f32 0.26601171, %v2927_v59  ;;  %v2941_v47 = vadd.f32 %v2933_v33, %v2917_v56  ;;  %v2266_v11 = vadd.f32 %v7507_v14, %v2242_v25  ;;  %v8557_v25 = vld [vmem:[#allocation164_spill] sm:$0xff] }
 0x3d7   : > { %v2929_v39 = vld [vmem:[#allocation4 + $0x53] sm:$0xff]  ;;  %v2915_v3 = vmul.f32 0.21300554, %v2907_v58  ;;  %v3406_v56 = vadd.f32 %v7409_v50, %v3374_v53 }
 0x3d8   : > { %v8553_v12 = vld [vmem:[#allocation134_spill] sm:$0xff]  ;;  %v2937_v22 = vmul.f32 0.26601171, %v2929_v39  ;;  %v2943_v13 = vadd.f32 %v2935_v52, %v2919_v40 }
 0x3d9   : > { %v3340_v55 = vadd.f32 %v8554_v29, %v8553_v12  ;;  %v2949_v49 = vld [vmem:[#allocation4 + $0x14] sm:$0xff]  ;;  %v7532_v38 = vpop.permute.xlu1 %3420  ;;  %v2923_v59 = vadd.f32 %v2915_v3, %v2899_v16  ;;  %v3438_v29 = vadd.f32 %v7501_v43, %v3406_v56  ;;  %v2306_v3 = vadd.f32 %v2298_v45, %v2286_v54  ;;  %v8558_v54 = vld [vmem:[#allocation165_spill] sm:$0xff] }
 0x3da   : > { %v2951_v19 = vld [vmem:[#allocation4 + $0x34] sm:$0xff]  ;;  %v7534_v4 = vpop.permute.xlu0 %3392  ;;  %v2945_v62 = vadd.f32 %v2937_v22, %v2921_v48  ;;  %v2957_v35 = vmul.f32 0.21300554, %v2949_v49  ;;  %v2304_v48 = vadd.f32 %v2296_v21, %v2284_v31  ;;  %v2308_v43 = vadd.f32 %v2300_v10, %v2288_v18 }
 0x3db   : > { %v3372_v8 = vadd.f32 %v7351_v7, %v3340_v55  ;;  %v2931_v46 = vld [vmem:[#allocation4 + $0x73] sm:$0xff]  ;;  %v2959_v7 = vmul.f32 0.21300554, %v2951_v19  ;;  %v2290_v45 = vadd.f32 %v7517_v17, %v2266_v11 }
 0x3dc   : > { %v2953_v51 = vld [vmem:[#allocation4 + $0x54] sm:$0xff]  ;;  %v2939_v40 = vmul.f32 0.26601171, %v2931_v46  ;;  %v2965_v1 = vadd.f32 %v2957_v35, %v2941_v47  ;;  %v2315_v46 = vmul.f32 0.007598758, %v8557_v25 }
 0x3dd   : > { %v3404_v58 = vadd.f32 %v7411_v42, %v3372_v8  ;;  %v8556_v57 = vld [vmem:[#allocation102_spill] sm:$0xff]  ;;  %v2961_v33 = vmul.f32 0.21300554, %v2953_v51  ;;  %v2967_v52 = vadd.f32 %v2959_v7, %v2943_v13  ;;  %v3457_v49 = vpop.permute.xlu1 %3456  ;;  %v8561_v11 = vld [vmem:[#allocation139_spill] sm:$0xff] }
 0x3de   : > { %v2302_v39 = vmul.f32 0.036000773, %v8556_v57  ;;  %v2973_v23 = vld [vmem:[#allocation4 + $0x15] sm:$0xff]  ;;  %v3453_v42 = vpop.permute.xlu0 %3452  ;;  %v2947_v22 = vadd.f32 %v2939_v40, %v2923_v59  ;;  %v3478_v8 = vadd.f32 %v3457_v49, %v3438_v29  ;;  %v2316_v59 = vmul.f32 0.007598758, %v8558_v54 }
 0x3df   : > { %v2975_v12 = vld [vmem:[#allocation4 + $0x35] sm:$0xff]  ;;  %v3436_v16 = vadd.f32 %v7503_v5, %v3404_v58  ;;  %v2969_v19 = vadd.f32 %v2961_v33, %v2945_v62  ;;  %v2981_v53 = vmul.f32 0.10936069, %v2973_v23  ;;  %v2320_v29 = vadd.f32 %v2315_v46, %v2304_v48 }
 0x3e0   : > { %v2955_v55 = vld [vmem:[#allocation4 + $0x74] sm:$0xff]  ;;  %v2983_v47 = vmul.f32 0.10936069, %v2975_v12  ;;  %3511 = vst.msk [vmem:[#allocation3 + $0x10a] sm:$0xc0] %vm688_vm2, %v3478_v8  ;;  %v3344_v12 = vadd.f32 %v7337_v28, %v8561_v11 }
 0x3e1   : > { %v2977_v50 = vld [vmem:[#allocation4 + $0x55] sm:$0xff]  ;;  %v3476_v14 = vadd.f32 %v3453_v42, %v3436_v16  ;;  %v2963_v35 = vmul.f32 0.21300554, %v2955_v55  ;;  %v2989_v31 = vadd.f32 %v2981_v53, %v2965_v1  ;;  %v7551_v18 = vpop.permute.xlu1 %3390  ;;  %v2322_v16 = vadd.f32 %v2316_v59, %v2306_v3  ;;  %v8565_v59 = vld [vmem:[#allocation101_spill] sm:$0xff] }
 0x3e2   : > { %v2996_v51 = vld [vmem:[#allocation4 + $0x16] sm:$0xff]  ;;  %v2985_v5 = vmul.f32 0.10936069, %v2977_v50  ;;  %v2991_v57 = vadd.f32 %v2983_v47, %v2967_v52  ;;  %v7553_v10 = vpop.permute.xlu0 %3362 }
 0x3e3   : > { %v3016_v20 = vld [vmem:[#allocation4 + $0x17] sm:$0xff]  ;;  %3509 = vst.msk [vmem:[#allocation3 + $0xfa] sm:$0xc0] %vm688_vm2, %v3476_v14  ;;  %v2971_v33 = vadd.f32 %v2963_v35, %v2947_v22  ;;  %v3001_v17 = vmul.f32 0.036000773, %v2996_v51 }
 0x3e4   : > { %v2997_v21 = vld [vmem:[#allocation4 + $0x36] sm:$0xff]  ;;  %3501 = vst.msk [vmem:[#allocation4 + $0x10] sm:$0xff] %vm670_vm0, %v3476_v14  ;;  %v2993_v1 = vadd.f32 %v2985_v5, %v2969_v19  ;;  %v2310_v14 = vadd.f32 %v2302_v39, %v2290_v45  ;;  %v3020_v46 = vmul.f32 0.007598758, %v3016_v20 }
 0x3e5   : > { %v3017_v13 = vld [vmem:[#allocation4 + $0x37] sm:$0xff]  ;;  %v3003_v55 = vmul.f32 0.036000773, %v2997_v21  ;;  %v3009_v53 = vadd.f32 %v3001_v17, %v2989_v31  ;;  %v3419_v51 = vpop.permute.xlu1 %3418 }
 0x3e6   : > { %v8559_v62 = vld [vmem:[#allocation167_spill] sm:$0xff]  ;;  %3503 = vst.msk [vmem:[#allocation4 + $0x30] sm:$0xff] %vm670_vm0, %v3478_v8  ;;  %v8560_v23 = vld [vmem:[#allocation50_spill] sm:$0xff]  ;;  %v3376_v8 = vadd.f32 %v7388_v32, %v3344_v12  ;;  %v3415_v35 = vpop.permute.xlu0 %3414  ;;  %v3021_v31 = vmul.f32 0.007598758, %v3017_v13  ;;  %v7566_v32 = vadd.f32 %v7479_v0, %v7436_v34 }
 0x3e7   : > { %v2317_v56 = vmul.f32 0.007598758, %v8559_v62  ;;  %v2979_v58 = vld [vmem:[#allocation4 + $0x75] sm:$0xff]  ;;  %v2318_v40 = vmul.f32 0.007598758, %v8560_v23  ;;  %v3011_v22 = vadd.f32 %v3003_v55, %v2991_v57 }
 0x3e8   : > { %v2998_v7 = vld [vmem:[#allocation4 + $0x56] sm:$0xff]  ;;  %v2987_v49 = vmul.f32 0.10936069, %v2979_v58  ;;  %v3408_v21 = vadd.f32 %v7489_v24, %v3376_v8  ;;  %v2338_v62 = vmul.f32 0.0010283801, %v8565_v59  ;;  %v8571_v59 = vld [vmem:[#allocation81_spill] sm:$0xff] }
 0x3e9   : > { %v8562_v52 = vld [vmem:[#allocation51_spill] sm:$0xff]  ;;  %v3005_v42 = vmul.f32 0.036000773, %v2998_v7  ;;  %v8564_v5 = vld [vmem:[#allocation46_spill] sm:$0xff]  ;;  %v2324_v39 = vadd.f32 %v2317_v56, %v2308_v43  ;;  %v3025_v7 = vadd.f32 %v3020_v46, %v3009_v53  ;;  %v3027_v11 = vadd.f32 %v3021_v31, %v3011_v22  ;;  %v3461_v12 = vpop.permute.xlu1 %3460 }
 0x3ea   : > { %v2332_v50 = vmul.f32 0.0010283801, %v8562_v52  ;;  %v8563_v25 = vld [vmem:[#allocation135_spill] sm:$0xff]  ;;  %v2336_v28 = vmul.f32 0.0010283801, %v8564_v5  ;;  %v2995_v48 = vadd.f32 %v2987_v49, %v2971_v33  ;;  %v3440_v17 = vadd.f32 %v7532_v38, %v3408_v21  ;;  %v3425_v55 = vpop.permute.xlu0 %3424  ;;  %v8566_v56 = vld [vmem:[#allocation142_spill] sm:$0xff] }
 0x3eb   : > { %v2334_v47 = vmul.f32 0.0010283801, %v8563_v25  ;;  %v2999_v54 = vld [vmem:[#allocation4 + $0x76] sm:$0xff]  ;;  %v3013_v3 = vadd.f32 %v3005_v42, %v2993_v1  ;;  %v2326_v33 = vadd.f32 %v2318_v40, %v2310_v14  ;;  %v3343_v43 = vadd.f32 %v7373_v36, %v7327_v41 }
 0x3ec   : > { %v3018_v19 = vld [vmem:[#allocation4 + $0x57] sm:$0xff]  ;;  %v3007_v45 = vmul.f32 0.036000773, %v2999_v54  ;;  %v2340_v1 = vadd.f32 %v2332_v50, %v2320_v29  ;;  %v3480_v25 = vadd.f32 %v3461_v12, %v3440_v17  ;;  %v2344_v40 = vadd.f32 %v2336_v28, %v2324_v39 }
 0x3ed   : > { %v3032_v58 = vld [vmem:[#allocation4 + $0x18] sm:$0xff]  ;;  %v3022_v57 = vmul.f32 0.007598758, %v3018_v19  ;;  %v7569_v13 = vadd.f32 %v2334_v47, %v2322_v16  ;;  %v8567_v53 = vld [vmem:[#allocation138_spill] sm:$0xff]  ;;  %v3375_v54 = vadd.f32 %v7467_v37, %v3343_v43  ;;  %v8570_v37 = vld [vmem:[#allocation156_spill] sm:$0xff] }
 0x3ee   : > { %v3033_v23 = vld [vmem:[#allocation4 + $0x38] sm:$0xff]  ;;  %v3015_v52 = vadd.f32 %v3007_v45, %v2995_v48  ;;  %v3037_v42 = vmul.f32 0.0010283801, %v3032_v58  ;;  %v3341_v8 = vadd.f32 %v8567_v53, %v8566_v56  ;;  %3513 = vst.msk [vmem:[#allocation3 + $0x11a] sm:$0xc0] %vm688_vm2, %v3480_v25  ;;  %v2348_v47 = vsub.f32 %v2340_v1, %v7413_v26  ;;  %v8568_v41 = vld [vmem:[#allocation86_spill] sm:$0xff]  ;;  %v3423_v48 = vpop.permute.xlu1 %3422  ;;  %v3395_v28 = vpop.permute.xlu0 %3394 }
 0x3ef   : > { %v3019_v20 = vld [vmem:[#allocation4 + $0x77] sm:$0xff]  ;;  %v3029_v49 = vadd.f32 %v3022_v57, %v3013_v3  ;;  %v3039_v38 = vmul.f32 0.0010283801, %v3033_v23  ;;  %3505 = vst.msk [vmem:[#allocation4 + $0x50] sm:$0xff] %vm670_vm0, %v3480_v25  ;;  %v7582_v3 = vadd.f32 %v2338_v62, %v2326_v33  ;;  %v3407_v31 = vadd.f32 %v7520_v30, %v3375_v54  ;;  %v3518_v30 = vld [vmem:[#allocation4 + $0xe] sm:$0xff] }
 0x3f0   : > { %v3034_v24 = vld [vmem:[#allocation4 + $0x58] sm:$0xff]  ;;  %v3023_v29 = vmul.f32 0.007598758, %v3019_v20  ;;  %v3045_v14 = vadd.f32 %v3037_v42, %v3025_v7  ;;  %v3373_v16 = vadd.f32 %v7469_v63, %v3341_v8  ;;  %v8569_v36 = vld [vmem:[#allocation150_spill] sm:$0xff]  ;;  %v3346_v63 = vadd.f32 %v8571_v59, %v8570_v37 }
 0x3f1   : > { %v3041_v50 = vmul.f32 0.0010283801, %v3034_v24  ;;  %v3035_v22 = vld [vmem:[#allocation4 + $0x78] sm:$0xff]  ;;  %v3047_v19 = vadd.f32 %v3039_v38, %v3027_v11  ;;  %v3267_v5 = vadd.f32 %v8569_v36, %v8568_v41  ;;  %v2350_v58 = vsub.f32 %v7569_v13, %v7417_v60  ;;  %v8574_v11 = vld [vmem:[#allocation158_spill] sm:$0xff]  ;;  %v8578_v41 = vld [vmem:[#allocation145_spill] sm:$0xff] }
 0x3f2   : > { %v3031_v46 = vadd.f32 %v3023_v29, %v3015_v52  ;;  %v3405_v26 = vadd.f32 %v7522_v9, %v3373_v16  ;;  %v8572_v39 = vld [vmem:[#allocation151_spill] sm:$0xff]  ;;  %v3043_v23 = vmul.f32 0.0010283801, %v3035_v22  ;;  %v3053_v62 = vsub.f32 %v3045_v14, %v7403_v6  ;;  %v3459_v60 = vpop.permute.xlu1 %3458  ;;  %v3455_v12 = vpop.permute.xlu0 %3454  ;;  %v3534_v42 = vld [vmem:[#allocation4 + $0xf] sm:$0xff] }
 0x3f3   : > { %v3049_v21 = vadd.f32 %v3041_v50, %v3029_v49  ;;  %v8573_v45 = vld [vmem:[#allocation147_spill] sm:$0xff]  ;;  %v3315_v7 = vadd.f32 %v7445_v61, %v3267_v5  ;;  %v3378_v17 = vadd.f32 %v7491_v27, %v3346_v63  ;;  %v3439_v33 = vadd.f32 %v3419_v51, %v3407_v31  ;;  %v3520_v61 = vld [vmem:[#allocation4 + $0x2e] sm:$0xff] }
 0x3f4   : > { %v3313_v57 = vadd.f32 %v8573_v45, %v8572_v39  ;;  %v3437_v1 = vadd.f32 %v3415_v35, %v3405_v26  ;;  %v3055_v20 = vsub.f32 %v3047_v19, %v7422_v2  ;;  %v3051_v13 = vadd.f32 %v3043_v23, %v3031_v46  ;;  %v8575_v52 = vld [vmem:[#allocation143_spill] sm:$0xff]  ;;  %v3536_v43 = vld [vmem:[#allocation4 + $0x2f] sm:$0xff] }
 0x3f5   : > { %v3347_v24 = vadd.f32 %v7513_v15, %v3315_v7  ;;  %v3057_v49 = vsub.f32 %v3049_v21, %v8575_v52  ;;  %v3410_v6 = vadd.f32 %v7534_v4, %v3378_v17  ;;  %v3479_v27 = vadd.f32 %v3459_v60, %v3439_v33  ;;  %v8576_v35 = vld [vmem:[#allocation82_spill] sm:$0xff]  ;;  %v8577_v14 = vld [vmem:[#allocation79_spill] sm:$0xff]  ;;  %v8580_v46 = vld [vmem:[#allocation157_spill] sm:$0xff] }
 0x3f6   : > { %v3345_v9 = vadd.f32 %v8574_v11, %v3313_v57  ;;  %v3477_v51 = vadd.f32 %v3455_v12, %v3437_v1  ;;  %v2352_v56 = vsub.f32 %v2344_v40, %v8576_v35  ;;  %v3526_v8 = vmul.f32 0.0010283801, %v3518_v30  ;;  %v3427_v50 = vpop.permute.xlu1 %3426  ;;  %v3465_v40 = vpop.permute.xlu0 %3464  ;;  %v3558_v19 = vld [vmem:[#allocation4 + $0x10] sm:$0xff]  ;;  %v8579_v5 = vld [vmem:[#allocation155_spill] sm:$0xff] }
 0x3f7   : > { %v3379_v53 = vadd.f32 %v7553_v10, %v3347_v24  ;;  %v3822_v15 = vadd.f32 %v3053_v62, %v2348_v47  ;;  %v3442_v25 = vadd.f32 %v3425_v55, %v3410_v6  ;;  %3512 = vst.msk [vmem:[#allocation3 + $0x112] sm:$0xff] %vm670_vm0, %v3479_v27  ;;  %3504 = vst.msk [vmem:[#allocation4 + $0x38] sm:$0xff] %vm670_vm0, %v3479_v27  ;;  %v3528_v4 = vmul.f32 0.0010283801, %v3520_v61  ;;  %v3560_v59 = vld [vmem:[#allocation4 + $0x30] sm:$0xff] }
 0x3f8   : > { %v3377_v2 = vadd.f32 %v7511_v44, %v3345_v9  ;;  %3510 = vst.msk [vmem:[#allocation3 + $0x102] sm:$0xff] %vm670_vm0, %v3477_v51  ;;  %3502 = vst.msk [vmem:[#allocation4 + $0x18] sm:$0xff] %vm670_vm0, %v3477_v51  ;;  %v3542_v38 = vmul.f32 0.007598758, %v3534_v42  ;;  %v3544_v29 = vmul.f32 0.007598758, %v3536_v43  ;;  %v3059_v44 = vsub.f32 %v3051_v13, %v7479_v0 }
 0x3f9   : > { %v3816_v10 = vadd.f32 0.0001, %v8577_v14  ;;  %v3824_v54 = vadd.f32 %v3055_v20, %v2350_v58  ;;  %v3826_v16 = vadd.f32 %v3057_v49, %v2352_v56  ;;  %v3411_v47 = vadd.f32 %v3395_v28, %v3379_v53  ;;  %v3522_v0 = vld [vmem:[#allocation4 + $0x4e] sm:$0xff]  ;;  %v8583_v13 = vld [vmem:[#allocation99_spill] sm:$0xff] }
 0x3fa   : > { %v3409_v55 = vadd.f32 %v7551_v18, %v3377_v2  ;;  %v3482_v22 = vadd.f32 %v3465_v40, %v3442_v25  ;;  %v7611_v36 = vadd.f32 0.0001, %v8578_v41  ;;  %v7615_v21 = vmul.f32 %v8580_v46, %v8579_v5  ;;  %v3538_v26 = vld [vmem:[#allocation4 + $0x4f] sm:$0xff]  ;;  %v3467_v45 = vpop.permute.xlu1 %3466  ;;  %v3463_v57 = vpop.permute.xlu0 %3462 }
 0x3fb   : > { %v2354_v37 = vsub.f32 %v7582_v3, %v7436_v34  ;;  %v7620_v63 = vadd.f32 0.0001, %v7566_v32  ;;  %v3830_v31 = vadd.f32 0.0009, %v3822_v15  ;;  %v3443_v28 = vadd.f32 %v3427_v50, %v3411_v47  ;;  %v3562_v33 = vld [vmem:[#allocation4 + $0x50] sm:$0xff]  ;;  %v8582_v20 = vld [vmem:[#allocation141_spill] sm:$0xff] }
 0x3fc   : > { %v3441_v18 = vadd.f32 %v3423_v48, %v3409_v55  ;;  %3515 = vst.msk [vmem:[#allocation3 + $0x12a] sm:$0xc0] %vm688_vm2, %v3482_v22  ;;  %v3550_v58 = vadd.f32 %v3542_v38, %v3526_v8  ;;  %v3552_v39 = vadd.f32 %v3544_v29, %v3528_v4  ;;  %v3566_v7 = vmul.f32 0.036000773, %v3558_v19  ;;  %v8581_v48 = vld [vmem:[#allocation85_spill] sm:$0xff] }
 0x3fd   : > { %3507 = vst.msk [vmem:[#allocation4 + $0x70] sm:$0xff] %vm670_vm0, %v3482_v22  ;;  %v3828_v23 = vadd.f32 %v3059_v44, %v2354_v37  ;;  %v3832_v34 = vadd.f32 0.0009, %v3824_v54  ;;  %v3834_v3 = vadd.f32 0.0009, %v3826_v16  ;;  %v3483_v62 = vadd.f32 %v3467_v45, %v3443_v28 }
 0x3fe   : > { %v3481_v17 = vadd.f32 %v3463_v57, %v3441_v18  ;;  %v3530_v32 = vmul.f32 0.0010283801, %v3522_v0  ;;  %v3568_v1 = vmul.f32 0.036000773, %v3560_v59  ;;  %v7626_v30 = vmul.f32 %v8582_v20, %v8581_v48  ;;  %v3584_v24 = vld [vmem:[#allocation4 + $0x31] sm:$0xff] }
 0x3ff   : > { %v3546_v11 = vmul.f32 0.007598758, %v3538_v26  ;;  %v3582_v9 = vld [vmem:[#allocation4 + $0x11] sm:$0xff]  ;;  %v7629_v12 = vmul.f32 2.0, %v7615_v21  ;;  %v7632_v52 = vmul.f32 %v3830_v31, %v8583_v13  ;;  %3516 = vst.msk [vmem:[#allocation3 + $0x132] sm:$0xff] %vm670_vm0, %v3483_v62  ;;  %3508 = vst.msk [vmem:[#allocation4 + $0x78] sm:$0xff] %vm670_vm0, %v3483_v62  ;;  %v3574_v49 = vadd.f32 %v3566_v7, %v3550_v58 }
 0x400   : > { %v3606_v60 = vld [vmem:[#allocation4 + $0x12] sm:$0xff]  ;;  %3514 = vst.msk [vmem:[#allocation3 + $0x122] sm:$0xff] %vm670_vm0, %v3481_v17  ;;  %3506 = vst.msk [vmem:[#allocation4 + $0x58] sm:$0xff] %vm670_vm0, %v3481_v17  ;;  %v3576_v61 = vadd.f32 %v3568_v1, %v3552_v39  ;;  %v3590_v42 = vmul.f32 0.10936069, %v3582_v9  ;;  %v7638_v38 = vmul.f32 %v3832_v34, %v3816_v10  ;;  %v7641_v54 = vmul.f32 2.0, %v7626_v30 }
 0x401   : > { %v3592_v43 = vmul.f32 0.10936069, %v3584_v24  ;;  %v3608_v6 = vld [vmem:[#allocation4 + $0x32] sm:$0xff]  ;;  %v3570_v51 = vmul.f32 0.036000773, %v3562_v33  ;;  %v3554_v40 = vadd.f32 %v3546_v11, %v3530_v32  ;;  %4159 = vrcp.f32 %v7632_v52 }
 0x402   : > { %v3630_v27 = vld [vmem:[#allocation4 + $0x13] sm:$0xff]  ;;  %v3614_v35 = vmul.f32 0.21300554, %v3606_v60  ;;  %v3836_v56 = vadd.f32 0.0009, %v3828_v23  ;;  %v3598_v2 = vadd.f32 %v3590_v42, %v3574_v49  ;;  %v7645_v19 = vmul.f32 %v3834_v3, %v7611_v36 }
 0x403   : > { %v3600_v53 = vadd.f32 %v3592_v43, %v3576_v61  ;;  %v3616_v8 = vmul.f32 0.21300554, %v3608_v6  ;;  %v3632_v15 = vld [vmem:[#allocation4 + $0x33] sm:$0xff]  ;;  %v3638_v14 = vmul.f32 0.26601171, %v3630_v27  ;;  %4161 = vrcp.f32 %v7638_v38 }
 0x404   : > { %v3654_v25 = vld [vmem:[#allocation4 + $0x14] sm:$0xff]  ;;  %v3622_v47 = vadd.f32 %v3614_v35, %v3598_v2  ;;  %v3640_v5 = vmul.f32 0.26601171, %v3632_v15  ;;  %v3578_v26 = vadd.f32 %v3570_v51, %v3554_v40  ;;  %v7649_v36 = vmul.f32 %v3836_v56, %v7620_v63 }
 0x405   : > { %v3656_v4 = vld [vmem:[#allocation4 + $0x34] sm:$0xff]  ;;  %v3624_v10 = vadd.f32 %v3616_v8, %v3600_v53  ;;  %v3662_v46 = vmul.f32 0.21300554, %v3654_v25  ;;  %4163 = vrcp.f32 %v7645_v19 }
 0x406   : > { %v3524_v29 = vld [vmem:[#allocation4 + $0x6e] sm:$0xff]  ;;  %v3646_v0 = vadd.f32 %v3638_v14, %v3622_v47  ;;  %v3664_v59 = vmul.f32 0.21300554, %v3656_v4  ;;  %v3701_v18 = vld [vmem:[#allocation4 + $0x16] sm:$0xff]  ;;  %4165 = vrcp.f32 %v7649_v36 }
 0x407   : > { %v3540_v50 = vld [vmem:[#allocation4 + $0x6f] sm:$0xff]  ;;  %v3532_v16 = vmul.f32 0.0010283801, %v3524_v29  ;;  %v3648_v57 = vadd.f32 %v3640_v5, %v3624_v10  ;;  %v3706_v20 = vmul.f32 0.036000773, %v3701_v18  ;;  %v3721_v6 = vld [vmem:[#allocation4 + $0x17] sm:$0xff] }
 0x408   : > { %v3564_v44 = vld [vmem:[#allocation4 + $0x70] sm:$0xff]  ;;  %v3548_v55 = vmul.f32 0.007598758, %v3540_v50  ;;  %v3670_v32 = vadd.f32 %v3662_v46, %v3646_v0  ;;  %v8585_v18 = vld [vmem:[#allocation87_spill] sm:$0xff] }
 0x409   : > { %v3678_v22 = vld [vmem:[#allocation4 + $0x15] sm:$0xff]  ;;  %v3572_v41 = vmul.f32 0.036000773, %v3564_v44  ;;  %v3672_v1 = vadd.f32 %v3664_v59, %v3648_v57  ;;  %v3725_v44 = vmul.f32 0.007598758, %v3721_v6 }
 0x40a   : > { %v3556_v37 = vadd.f32 %v3548_v55, %v3532_v16  ;;  %v3680_v31 = vld [vmem:[#allocation4 + $0x35] sm:$0xff]  ;;  %v3686_v7 = vmul.f32 0.10936069, %v3678_v22 }
 0x40b   : > { %v3702_v28 = vld [vmem:[#allocation4 + $0x36] sm:$0xff]  ;;  %v3688_v48 = vmul.f32 0.10936069, %v3680_v31  ;;  %v7653_v8 = vpop.eup %4159  ;;  %v8584_v31 = vld [vmem:[#allocation88_spill] sm:$0xff] }
 0x40c   : > { %v3586_v58 = vld [vmem:[#allocation4 + $0x51] sm:$0xff]  ;;  %v3580_v23 = vadd.f32 %v3572_v41, %v3556_v37  ;;  %v3694_v61 = vadd.f32 %v3686_v7, %v3670_v32  ;;  %v3708_v43 = vmul.f32 0.036000773, %v3702_v28  ;;  %v1649_v28 = vmul.f32 %v8585_v18, %v8584_v31 }
 0x40d   : > { %v3588_v39 = vld [vmem:[#allocation4 + $0x71] sm:$0xff]  ;;  %v3594_v34 = vmul.f32 0.10936069, %v3586_v58  ;;  %v3696_v42 = vadd.f32 %v3688_v48, %v3672_v1  ;;  %v4162_v5 = vpop.eup %4161  ;;  %v3854_v1 = vmul.f32 %v7653_v8, %v7632_v52  ;;  %v3776_v52 = vadd.f32 0.0001, %v7629_v12 }
 0x40e   : > { %v3610_v45 = vld [vmem:[#allocation4 + $0x52] sm:$0xff]  ;;  %v3596_v3 = vmul.f32 0.10936069, %v3588_v39  ;;  %v3714_v4 = vadd.f32 %v3706_v20, %v3694_v61  ;;  %v3856_v48 = vmul.f32 %v4162_v5, %v7638_v38  ;;  %v8587_v61 = vld [vmem:[#allocation84_spill] sm:$0xff] }
 0x40f   : > { %v3612_v62 = vld [vmem:[#allocation4 + $0x72] sm:$0xff]  ;;  %v3602_v11 = vadd.f32 %v3594_v34, %v3578_v26  ;;  %v3618_v24 = vmul.f32 0.21300554, %v3610_v45  ;;  %v3716_v29 = vadd.f32 %v3708_v43, %v3696_v42  ;;  %v3774_v42 = vadd.f32 0.0001, %v8587_v61 }
 0x410   : > { %v3634_v17 = vld [vmem:[#allocation4 + $0x53] sm:$0xff]  ;;  %v3604_v9 = vadd.f32 %v3596_v3, %v3580_v23  ;;  %v3620_v60 = vmul.f32 0.21300554, %v3612_v62  ;;  %v3730_v0 = vadd.f32 %v3725_v44, %v3714_v4  ;;  %v4164_v3 = vpop.eup %4163  ;;  %v3864_v4 = vsub.f32 2.0, %v3856_v48 }
 0x411   : > { %v3636_v33 = vld [vmem:[#allocation4 + $0x73] sm:$0xff]  ;;  %v3642_v63 = vmul.f32 0.26601171, %v3634_v17  ;;  %v3626_v27 = vadd.f32 %v3618_v24, %v3602_v11  ;;  %v4166_v43 = vpop.eup %4165 }
 0x412   : > { %v3658_v13 = vld [vmem:[#allocation4 + $0x54] sm:$0xff]  ;;  %v3628_v51 = vadd.f32 %v3620_v60, %v3604_v9  ;;  %v3644_v35 = vmul.f32 0.26601171, %v3636_v33 }
 0x413   : > { %v3660_v49 = vld [vmem:[#allocation4 + $0x74] sm:$0xff]  ;;  %v3666_v15 = vmul.f32 0.21300554, %v3658_v13  ;;  %v3650_v50 = vadd.f32 %v3642_v63, %v3626_v27  ;;  %v3772_v63 = vmul.f32 2.0, %v1649_v28 }
 0x414   : > { %v3682_v56 = vld [vmem:[#allocation4 + $0x55] sm:$0xff]  ;;  %v3668_v25 = vmul.f32 0.21300554, %v3660_v49  ;;  %v3652_v40 = vadd.f32 %v3644_v35, %v3628_v51 }
 0x415   : > { %v3684_v2 = vld [vmem:[#allocation4 + $0x75] sm:$0xff]  ;;  %v3690_v47 = vmul.f32 0.10936069, %v3682_v56  ;;  %v3674_v46 = vadd.f32 %v3666_v15, %v3650_v50  ;;  %v3860_v50 = vmul.f32 %v4166_v43, %v7649_v36 }
 0x416   : > { %v3722_v53 = vld [vmem:[#allocation4 + $0x37] sm:$0xff]  ;;  %v3692_v22 = vmul.f32 0.10936069, %v3684_v2  ;;  %v3676_v37 = vadd.f32 %v3668_v25, %v3652_v40  ;;  %v3862_v2 = vsub.f32 2.0, %v3854_v1  ;;  %v3858_v25 = vmul.f32 %v4164_v3, %v7645_v19 }
 0x417   : > { %v3726_v14 = vmul.f32 0.007598758, %v3722_v53  ;;  %v3737_v16 = vld [vmem:[#allocation4 + $0x18] sm:$0xff]  ;;  %v3698_v57 = vadd.f32 %v3690_v47, %v3674_v46  ;;  %v3894_v40 = vlaneseq  ;;  %v3778_v46 = vadd.f32 0.0001, %v7641_v54 }
 0x418   : > { %v3738_v55 = vld [vmem:[#allocation4 + $0x38] sm:$0xff]  ;;  %v3742_v39 = vmul.f32 0.0010283801, %v3737_v16  ;;  %v3700_v7 = vadd.f32 %v3692_v22, %v3676_v37  ;;  %v3870_v12 = vmul.f32 %v7653_v8, %v3862_v2  ;;  %v3780_v19 = vadd.f32 0.0001, %v3772_v63 }
 0x419   : > { %v3703_v41 = vld [vmem:[#allocation4 + $0x56] sm:$0xff]  ;;  %v3732_v59 = vadd.f32 %v3726_v14, %v3716_v29  ;;  %v3744_v45 = vmul.f32 0.0010283801, %v3738_v55  ;;  %v3868_v37 = vsub.f32 2.0, %v3860_v50 }
 0x41a   : > { %v3704_v10 = vld [vmem:[#allocation4 + $0x76] sm:$0xff]  ;;  %v3710_v23 = vmul.f32 0.036000773, %v3703_v41  ;;  %v3750_v32 = vadd.f32 %v3742_v39, %v3730_v0  ;;  %v3866_v41 = vsub.f32 2.0, %v3858_v25  ;;  %v3895_v0 = vshrl.u32 %v3894_v40, 7 }
 0x41b   : > { %v3723_v26 = vld [vmem:[#allocation4 + $0x57] sm:$0xff]  ;;  %v3712_v34 = vmul.f32 0.036000773, %v3704_v10  ;;  %v3752_v33 = vadd.f32 %v3744_v45, %v3732_v59  ;;  %v3872_v10 = vmul.f32 %v4162_v5, %v3864_v4  ;;  %v3876_v39 = vmul.f32 %v4166_v43, %v3868_v37 }
 0x41c   : > { %v3724_v58 = vld [vmem:[#allocation4 + $0x77] sm:$0xff]  ;;  %v3718_v20 = vadd.f32 %v3710_v23, %v3698_v57  ;;  %v3727_v9 = vmul.f32 0.007598758, %v3723_v26 }
 0x41d   : > { %v3739_v62 = vld [vmem:[#allocation4 + $0x58] sm:$0xff]  ;;  %v3720_v11 = vadd.f32 %v3712_v34, %v3700_v7  ;;  %v3728_v24 = vmul.f32 0.007598758, %v3724_v58  ;;  %v3760_v49 = vsub.f32 %v3752_v33, %v7615_v21  ;;  %v3896_v58 = vadd.s32 8, %v3895_v0 }
 0x41e   : > { %v3740_v17 = vld [vmem:[#allocation4 + $0x78] sm:$0xff]  ;;  %v3734_v6 = vadd.f32 %v3727_v9, %v3718_v20  ;;  %v3746_v51 = vmul.f32 0.0010283801, %v3739_v62  ;;  %v4353_v34 = vmov 0  }
 0x41f   : > { %v8586_v60 = vld [vmem:[#allocation131_spill] sm:$0xff]  ;;  %v3736_v27 = vadd.f32 %v3728_v24, %v3720_v11  ;;  %v3748_v35 = vmul.f32 0.0010283801, %v3740_v17  ;;  %v3784_v38 = vmul.f32 2.0, %v3760_v49  ;;  %vm3899_vm4 = vcmp.ge.s32.totalorder %v3896_v58, 10  ;;  %4158 = vset.pattern.permute.xlu0 %v4353_v34 }
 0x420   : > { %v3758_v13 = vsub.f32 %v3750_v32, %v8586_v60  ;;  %v3754_v53 = vadd.f32 %v3746_v51, %v3734_v6  ;;  %v3920_v11 = vld [vmem:[#allocation2] sm:$0x1]  ;;  %v3929_v60 = vsub.s32 0, %v3895_v0 }
 0x421   : > { %v3756_v15 = vadd.f32 %v3748_v35, %v3736_v27  ;;  %v3792_v21 = vadd.f32 0.0009, %v3784_v38 }
 0x422   : > { %v3782_v56 = vmul.f32 2.0, %v3758_v13  ;;  %v3762_v44 = vsub.f32 %v3754_v53, %v7626_v30 }
 0x423   : > { %v3764_v14 = vsub.f32 %v3756_v15, %v1649_v28  ;;  %v3800_v55 = vmul.f32 %v3792_v21, %v3776_v52  ;;  %v3874_v28 = vmul.f32 %v4164_v3, %v3866_v41 }
 0x424   : > { %v3790_v29 = vadd.f32 0.0009, %v3782_v56  ;;  %v3786_v47 = vmul.f32 2.0, %v3762_v44 }
 0x425   : > { %v3788_v22 = vmul.f32 2.0, %v3764_v14  ;;  %v3880_v18 = vmul.f32 %v3872_v10, %v3800_v55 }
 0x426   : > { %v3798_v16 = vmul.f32 %v3790_v29, %v3774_v42  ;;  %v3794_v59 = vadd.f32 0.0009, %v3786_v47 }
 0x427   : > { %v3796_v31 = vadd.f32 0.0009, %v3788_v22 }
 0x428   : > { %v3878_v36 = vmul.f32 %v3870_v12, %v3798_v16  ;;  %v3802_v26 = vmul.f32 %v3794_v59, %v3778_v46 }
 0x429   : > { %v3804_v30 = vmul.f32 %v3796_v31, %v3780_v19 }
 0x42a   : > { %v3882_v45 = vmul.f32 %v3874_v28, %v3802_v26  ;;  %v3886_v8 = vadd.f32 %v3880_v18, %v3878_v36 }
 0x42b   : > { %v3884_v57 = vmul.f32 %v3876_v39, %v3804_v30 }
 0x42c   : > { %v3888_v7 = vadd.f32 %v3886_v8, %v3882_v45 }
 0x42e   : > { %v3890_v5 = vadd.f32 %v3888_v7, %v3884_v57 }
 0x430   : > { %v3906_v23 = vsel %vm3899_vm4, %v3890_v5, 0.0 }
 0x431   : > { %v3910_v54 = vsel %vm670_vm0, %v3906_v23, 0.0 }
 0x432   : > { %3911 = vadd.xlane.f32.xlu1 %v3910_v54 }
 0x434   : > { %v3909_v62 = vpop.xlane.xlu0 %3908 }
 0x4bf   : > { %v3912_v17 = vpop.xlane.xlu1 %3911 }
 0x4c0   : > { %v3913_v32 = vadd.f32 %v3912_v17, %v3909_v62 }
 0x4c2   : > { %v3914_v33 = vrot.slane %v3913_v32, 4 }
 0x4c4   : > { %v3915_v3 = vadd.f32 %v3914_v33, %v3913_v32 }
 0x4c6   : > { %v3916_v1 = vrot.slane %v3915_v3, 2 }
 0x4c8   : > { %v3917_v48 = vadd.f32 %v3916_v1, %v3915_v3 }
 0x4ca   : > { %v3918_v20 = vrot.slane %v3917_v48, 1 }
 0x4cc   : > { %v3919_v9 = vadd.f32 %v3918_v20, %v3917_v48 }
 0x4ce   : > { %v3921_v24 = vadd.f32 %v3920_v11, %v3919_v9 }
 0x4d0   : > { %3923 = vst.msk [vmem:[#allocation2] sm:$0x1] %vm228_vm3, %v3921_v24 }
 0x4d7   : > { %v3924_v13 = vld [vmem:[#allocation2] sm:$0x1] }
 0x4d8   : > { %v3925_v49 = vmul.f32 0.0069444445, %v3924_v13 }
 0x4da   : > { %v3930_v63 = vrot.slane %v3925_v49, %v3929_v60 }
 0x4dc   : > { %3932 = vperm.xlu0 %4158, %v3930_v63  }
 0x55b   : > { %v3933_v61 = vpop.permute.xlu0 %3932 }
 0x55c   : > { %3935 = vst [vmem:[%s221_s27] sm:$0xff] %v3933_v61 }
 0x55d   : > { %4263 = shalt.err (!%p4260_p11)
}
 0x55e   : > { %s4264_s4 = scalar_lea.hbm %s7678_s7, 128  ;;  %s4268_s3 = scalar_lea.hbm %s7727_s2, 256 }
 0x55f   : > { %p4265_p1 = scmp.ne.s32.totalorder %s7678_s7, %s4264_s4  ;;  %p4269_p5 = scmp.lt.u32.totalorder %s7678_s7, %s7727_s2 }
 0x560   : > { %p4270_p4 = scmp.lt.u32.totalorder %s4268_s3, %s4264_s4  ;;  %p4272_p0 = scmp.lt.u32.totalorder %s4264_s4, %s7678_s7 }
 0x561   : > { %p4266_p6 = pnand %p4265_p1, %p8588_p3 }
 0x562   : > { %p4271_p8 = por %p4270_p4, %p4269_p5 }
 0x563   : > { %p4267_p2 = pneg %p4266_p6 }
 0x564   : > { %p4273_p12 = por %p4272_p0, %p4271_p8 }
 0x566   : > { %p4274_p13 = pnand %p4273_p12, %p4267_p2 }
 0x568   : > { %4277 = shalt.err (!%p4274_p13)
}
 0x569   : > { %4081 = dma.vmem_to_hbm [thread:$0]  (%p8588_p3), %s7673_s6, 128, %s7678_s7, %s3937_s21  }
 0x56a PF: > { %s3962_s16 = sand.u32 1, %s4316_s9   ;;  %p8589_p7 = scmp.ne.s32.totalorder %s7862_s24, 0 }
 0x56b   : > { %p8590_p10 = scmp.ge.s32.totalorder %s4336_s14, 2  ;;  %s3963_s20 = scalar_lea.sflag [#allocation7], %s3962_s16 }
 0x56d   : > { %p4091_p9 = pnand %p8590_p10, %p8589_p7 }
 0x56f   : > { %4311 = dma.done.wait (!%p4091_p9), %s3963_s20, 128  }
 0x570   : > { %4313 = vsyncadd (!%p4091_p9), %s3963_s20, 4294967168  ;;  %s21_s14 = sadd.s32 1, %s4336_s14   ;;  %s8591_s9 = smov %s4320_s10 }
 0x571   : > { %p18_p11 = scmp.ge.s32.totalorder %s21_s14, 4   ;;  %s8592_s10 = smov %s4324_s11 }
 0x572   : > { %s8593_s11 = smov %s4426_s23  ;;  %s8594_s12 = smov %s4332_s13 }
 0x573   : > { %s8595_s13 = smov %s8597_s17  ;;  %20 = sbr.rel (!%p18_p11) target bundleno = 8 (0x8), region = 94 }
 0x57a   :  { %3968 = vsyncpa [#allocation6], 1 }
 0x57b   :  { %3970 = vsyncpa [#allocation6 + $0x1], 1 }
 0x57c   :  { %3971 = vsyncpa [#allocation9], 1 }
 0x57d   :  { %3973 = vsyncpa [#allocation9 + $0x1], 1 }
 0x57e   :  { %3974 = vsyncpa [#allocation7], 1 }
 0x57f   :  { %3976 = vsyncpa [#allocation7 + $0x1], 1 }

</bundles_post_ra>
